<compile_context>
chip_gen: v7x
topology: tpu7x:2x2x1
jax: 0.10.0
libtpu: 0.0.40
codegen_flags: <defaults>
</compile_context>

<pallas_src>
import functools
import numpy as np

import jax
import jax.numpy as jnp
from jax.experimental import pallas as pl
from jax.experimental.pallas import tpu as pltpu


def _device_kind():
    try:
        return jax.devices()[0].device_kind.lower()
    except Exception:
        return ""


_IS_V7 = "v7" in _device_kind()
# v5e/v6e: 128 MiB physical VMEM -> 64 MiB scoped limit + wider N tiles are safe.
# v7x:     64 MiB physical VMEM  -> stay at 32 MiB scoped + 256-wide tiles.
VMEM_LIMIT = (32 if _IS_V7 else 64) * 1024 * 1024
TN_CAP = 256 if _IS_V7 else 512


def _round_up(x, m):
    return (x + m - 1) // m * m


def _tile_m(M, cap=256):
    """Full-M block (zero padding) when small; else least-padding 256/128 tile."""
    if M <= cap:
        return M
    return min((256, 128), key=lambda t: ((-M) % t, -t))


def _tile_n(N, cap):
    if N <= cap:
        return N                                   # full-dim block, no padding
    for t in (512, 384, 256, 128):
        if t <= cap and N % t == 0:
            return t
    return min(cap, 256)                           # rare fallback (pads N)


def _tile_k(K):
    if K <= 1024:
        return K                                   # whole K, no padded MACs
    for t in (512, 384, 256, 128):
        if K % t == 0:
            return t
    return 512                                     # rare fallback (pads K)


# ----------------------------------------------------------------------------
# sin-cos positional embeddings (numpy, parameter setup only)
# ----------------------------------------------------------------------------
def get_1d_sincos_pos_embed_from_grid(embed_dim, pos):
    assert embed_dim % 2 == 0
    omega = np.arange(embed_dim // 2, dtype=np.float32)
    omega /= embed_dim / 2.0
    omega = 1.0 / 10000 ** omega
    pos = pos.reshape(-1)
    out = np.einsum('m,d->md', pos, omega)
    return np.concatenate([np.sin(out), np.cos(out)], axis=1)


def get_3d_sincos_pos_embed(embed_dim, grid_size, cls_token=False):
    assert embed_dim % 16 == 0
    t_size, h_size, w_size = grid_size
    w_dim = embed_dim // 16 * 6
    h_dim = embed_dim // 16 * 6
    t_dim = embed_dim // 16 * 4
    w_pe = get_1d_sincos_pos_embed_from_grid(w_dim, np.arange(w_size))
    h_pe = get_1d_sincos_pos_embed_from_grid(h_dim, np.arange(h_size))
    t_pe = get_1d_sincos_pos_embed_from_grid(t_dim, np.arange(t_size))
    w_pe = np.tile(w_pe, (t_size * h_size, 1))
    h_pe = np.tile(np.repeat(h_pe, w_size, axis=0), (t_size, 1))
    t_pe = np.repeat(t_pe, h_size * w_size, axis=0)
    pe = np.concatenate((w_pe, h_pe, t_pe), axis=1)
    if cls_token:
        pe = np.concatenate([np.zeros([1, embed_dim]), pe], axis=0)
    return pe.astype(np.float32)


# ----------------------------------------------------------------------------
# In-kernel math helpers
# ----------------------------------------------------------------------------
def _erf_approx(x):
    """erf via Abramowitz&Stegun 7.1.26 (exp + reciprocal on the EUP, rest VPU)."""
    a1, a2, a3, a4, a5 = 0.254829592, -0.284496736, 1.421413741, -1.453152027, 1.061405429
    pp = 0.3275911
    ax = jnp.abs(x)
    t = pl.reciprocal(1.0 + pp * ax, approx=True)
    poly = ((((a5 * t + a4) * t + a3) * t + a2) * t + a1) * t
    y = 1.0 - poly * jnp.exp(-ax * ax)
    return jnp.where(x >= 0, y, -y)


# ----------------------------------------------------------------------------
# Pallas kernels
# ----------------------------------------------------------------------------
def _matmul_kernel(x_ref, w_ref, b_ref, *rest, fuse_residual):
    """Tiled matmul: grid (Mt, Nt, Kt), f32 VMEM accumulator, bf16 MXU operands.
    Epilogue at k==last: +bias (and +residual if fused), all epilogue math in f32."""
    if fuse_residual:
        r_ref, o_ref, acc_ref = rest
    else:
        o_ref, acc_ref = rest

    @pl.when(pl.program_id(2) == 0)
    def _():
        acc_ref[...] = jnp.zeros_like(acc_ref)

    acc_ref[...] += jnp.dot(x_ref[...], w_ref[...],
                            preferred_element_type=jnp.float32)

    @pl.when(pl.program_id(2) == pl.num_programs(2) - 1)
    def _():
        y = acc_ref[...] + b_ref[...]
        if fuse_residual:
            y = y + r_ref[...].astype(jnp.float32)
        o_ref[...] = y.astype(o_ref.dtype)


def _ln_matmul_kernel(x_ref, g_ref, bln_ref, w_ref, b_ref, o_ref, xn_ref, *, gelu):
    """Fused LayerNorm prologue (computed once per row-block, cached in bf16 VMEM
    scratch) + matmul + bias (+GELU).  Grid (Mt, Nt) with j innermost/'arbitrary'."""
    @pl.when(pl.program_id(1) == 0)
    def _():
        x = x_ref[...].astype(jnp.float32)                    # (tm, K)
        mean = jnp.mean(x, axis=-1, keepdims=True)
        var = jnp.mean((x - mean) * (x - mean), axis=-1, keepdims=True)
        xn = (x - mean) * jax.lax.rsqrt(var + 1e-5)           # nn.LayerNorm eps
        xn = xn * g_ref[...] + bln_ref[...]
        xn_ref[...] = xn.astype(jnp.bfloat16)

    y = jnp.dot(xn_ref[...], w_ref[...], preferred_element_type=jnp.float32)
    y = y + b_ref[...]
    if gelu:
        y = 0.5 * y * (1.0 + _erf_approx(y * 0.7071067811865476))
    o_ref[...] = y.astype(o_ref.dtype)


def _attention_kernel(qkv_ref, o_ref, *, num_heads, scale):
    """All heads of one batch element per grid step, reading the fused (S, 3D)
    bf16 qkv slab.  Scale folded into q (S x hd multiplies, not S^2); each head's
    output stored directly into its lane range of o_ref (no concat, nothing held).
    TODO(synk): for production sequence lengths on v7x convert to a KV-tiled
    online-softmax (flash) form to bound the S x S score / slab VMEM footprint."""
    qkv = qkv_ref[0]                                          # (S, 3D) bf16
    D3 = qkv.shape[-1]
    D = D3 // 3
    hd = D // num_heads
    for h in range(num_heads):                                # unrolled (H small)
        q = (qkv[:, h * hd:(h + 1) * hd].astype(jnp.float32) * scale
             ).astype(jnp.bfloat16)
        k = qkv[:, D + h * hd:D + (h + 1) * hd]
        v = qkv[:, 2 * D + h * hd:2 * D + (h + 1) * hd]
        # q @ k^T as an NT dot_general (no explicit transpose), f32 accumulate.
        s = jax.lax.dot_general(q, k, (((1,), (1,)), ((), ())),
                                preferred_element_type=jnp.float32)
        s = s - jnp.max(s, axis=-1, keepdims=True)
        p = jnp.exp(s)
        p = p * pl.reciprocal(jnp.sum(p, axis=-1, keepdims=True), approx=True)
        out_h = jnp.dot(p.astype(jnp.bfloat16), v, preferred_element_type=jnp.float32)
        o_ref[0, :, h * hd:(h + 1) * hd] = out_h.astype(o_ref.dtype)


def _masked_mse_kernel(p_ref, t_ref, m_ref, num_ref, den_ref):
    """Masked MSE accumulated into a single resident (1,1) output pair
    (grid axis 'arbitrary', pl.when init) — no per-tile lane-1 writebacks."""
    @pl.when(pl.program_id(0) == 0)
    def _():
        num_ref[...] = jnp.zeros_like(num_ref)
        den_ref[...] = jnp.zeros_like(den_ref)

    d = p_ref[...] - t_ref[...]
    per_row = jnp.mean(d * d, axis=-1, keepdims=True)         # (tm, 1)
    m = m_ref[...]                                            # (tm, 1)
    num_ref[...] += jnp.sum(per_row * m, keepdims=True)
    den_ref[...] += jnp.sum(m, keepdims=True)


# ----------------------------------------------------------------------------
# Pallas wrappers
# ----------------------------------------------------------------------------
def linear(x, w, b, residual=None, out_dtype=jnp.bfloat16):
    """y = x @ w + b (+ residual).  Tiled over (M, N, K), f32 accumulator,
    bf16 activations/weights, bf16 (or f32) output."""
    orig_shape = x.shape
    K = orig_shape[-1]
    N = w.shape[1]
    x2 = x.reshape(-1, K)
    if x2.dtype != jnp.bfloat16:
        x2 = x2.astype(jnp.bfloat16)
    M = x2.shape[0]

    tm, tn, tk = _tile_m(M), _tile_n(N, TN_CAP), _tile_k(K)
    M_pad, N_pad, K_pad = _round_up(M, tm), _round_up(N, tn), _round_up(K, tk)

    xp = jnp.pad(x2, ((0, M_pad - M), (0, K_pad - K))) if (M_pad != M or K_pad != K) else x2
    wp = w if w.dtype == jnp.bfloat16 else w.astype(jnp.bfloat16)  # pre-cast at init
    if K_pad != K or N_pad != N:
        wp = jnp.pad(wp, ((0, K_pad - K), (0, N_pad - N)))
    bp = (jnp.pad(b, (0, N_pad - N)) if N_pad != N else b).reshape(1, N_pad)

    in_specs = [
        pl.BlockSpec((tm, tk), lambda i, j, k: (i, k)),
        pl.BlockSpec((tk, tn), lambda i, j, k: (k, j)),
        pl.BlockSpec((1, tn), lambda i, j, k: (0, j)),
    ]
    args = [xp, wp, bp]
    if residual is not None:
        r2 = residual.reshape(-1, N)
        if r2.dtype != jnp.bfloat16:
            r2 = r2.astype(jnp.bfloat16)
        if M_pad != M or N_pad != N:
            r2 = jnp.pad(r2, ((0, M_pad - M), (0, N_pad - N)))
        in_specs.append(pl.BlockSpec((tm, tn), lambda i, j, k: (i, j)))
        args.append(r2)

    out_bytes = 2 if out_dtype == jnp.bfloat16 else 4
    out = pl.pallas_call(
        functools.partial(_matmul_kernel, fuse_residual=residual is not None),
        out_shape=jax.ShapeDtypeStruct((M_pad, N_pad), out_dtype),
        grid=(M_pad // tm, N_pad // tn, K_pad // tk),
        in_specs=in_specs,
        out_specs=pl.BlockSpec((tm, tn), lambda i, j, k: (i, j)),
        scratch_shapes=[pltpu.VMEM((tm, tn), jnp.float32)],
        compiler_params=pltpu.CompilerParams(
            dimension_semantics=("parallel", "parallel", "arbitrary"),
            vmem_limit_bytes=VMEM_LIMIT),
        cost_estimate=pl.CostEstimate(
            flops=2 * M_pad * N_pad * K_pad,
            transcendentals=0,
            bytes_accessed=M_pad * K_pad * 2 + K_pad * N_pad * 2
                           + M_pad * N_pad * out_bytes),
    )(*args)
    if M_pad != M or N_pad != N:
        out = out[:M, :N]
    return out.reshape(orig_shape[:-1] + (N,))


def ln_linear(x, g, bln, w, b, gelu=False, out_dtype=jnp.bfloat16):
    """y = (LayerNorm(x) * g + bln) @ w + b  [+ GELU].  K kept whole (LN is
    row-local); LN computed once per row block and cached in a bf16 VMEM scratch."""
    orig_shape = x.shape
    K = orig_shape[-1]
    N = w.shape[1]
    x2 = x.reshape(-1, K)
    if x2.dtype != jnp.bfloat16:
        x2 = x2.astype(jnp.bfloat16)
    M = x2.shape[0]

    tm, tn = _tile_m(M), _tile_n(N, TN_CAP)
    M_pad, N_pad = _round_up(M, tm), _round_up(N, tn)

    xp = jnp.pad(x2, ((0, M_pad - M), (0, 0))) if M_pad != M else x2
    wp = w if w.dtype == jnp.bfloat16 else w.astype(jnp.bfloat16)
    if N_pad != N:
        wp = jnp.pad(wp, ((0, 0), (0, N_pad - N)))
    bp = (jnp.pad(b, (0, N_pad - N)) if N_pad != N else b).reshape(1, N_pad)

    out_bytes = 2 if out_dtype == jnp.bfloat16 else 4
    out = pl.pallas_call(
        functools.partial(_ln_matmul_kernel, gelu=gelu),
        out_shape=jax.ShapeDtypeStruct((M_pad, N_pad), out_dtype),
        grid=(M_pad // tm, N_pad // tn),
        in_specs=[
            pl.BlockSpec((tm, K), lambda i, j: (i, 0)),
            pl.BlockSpec((1, K), lambda i, j: (0, 0)),
            pl.BlockSpec((1, K), lambda i, j: (0, 0)),
            pl.BlockSpec((K, tn), lambda i, j: (0, j)),
            pl.BlockSpec((1, tn), lambda i, j: (0, j)),
        ],
        out_specs=pl.BlockSpec((tm, tn), lambda i, j: (i, j)),
        scratch_shapes=[pltpu.VMEM((tm, K), jnp.bfloat16)],
        compiler_params=pltpu.CompilerParams(
            dimension_semantics=("parallel", "arbitrary"),
            vmem_limit_bytes=VMEM_LIMIT),
        cost_estimate=pl.CostEstimate(
            flops=2 * M_pad * N_pad * K + 8 * M_pad * K,
            transcendentals=M_pad * N_pad if gelu else 0,
            bytes_accessed=M_pad * K * 2 + K * N_pad * 2 + M_pad * N_pad * out_bytes),
    )(xp, g.reshape(1, K), bln.reshape(1, K), wp, bp)
    if M_pad != M or N_pad != N:
        out = out[:M, :N]
    return out.reshape(orig_shape[:-1] + (N,))


def apply_attention(qkv, num_heads, scale):
    """qkv: (B, S, 3D) fused bf16 slab -> (B, S, D) bf16 attention output."""
    B, S, D3 = qkv.shape
    D = D3 // 3
    hd = D // num_heads
    return pl.pallas_call(
        functools.partial(_attention_kernel, num_heads=num_heads, scale=scale),
        out_shape=jax.ShapeDtypeStruct((B, S, D), jnp.bfloat16),
        grid=(B,),
        in_specs=[pl.BlockSpec((1, S, D3), lambda bb: (bb, 0, 0))],
        out_specs=pl.BlockSpec((1, S, D), lambda bb: (bb, 0, 0)),
        compiler_params=pltpu.CompilerParams(
            dimension_semantics=("parallel",),
            vmem_limit_bytes=VMEM_LIMIT),
        cost_estimate=pl.CostEstimate(
            flops=4 * B * num_heads * S * S * hd,
            transcendentals=B * num_heads * S * S,
            bytes_accessed=B * S * (D3 + D) * 2),
    )(qkv)


def masked_mse(pred, target, mask):
    """sum(mask * mean((pred-target)^2, -1)) / sum(mask), accumulated in-kernel."""
    B, L, Dp = pred.shape
    M = B * L
    p2 = pred.reshape(M, Dp).astype(jnp.float32)
    t2 = target.reshape(M, Dp).astype(jnp.float32)
    m2 = mask.reshape(M, 1).astype(jnp.float32)

    tm = _tile_m(M, cap=512)
    M_pad = _round_up(M, tm)
    if M_pad != M:
        p2 = jnp.pad(p2, ((0, M_pad - M), (0, 0)))
        t2 = jnp.pad(t2, ((0, M_pad - M), (0, 0)))
        m2 = jnp.pad(m2, ((0, M_pad - M), (0, 0)))
    nt = M_pad // tm

    num, den = pl.pallas_call(
        _masked_mse_kernel,
        out_shape=(jax.ShapeDtypeStruct((1, 1), jnp.float32),
                   jax.ShapeDtypeStruct((1, 1), jnp.float32)),
        grid=(nt,),
        in_specs=[pl.BlockSpec((tm, Dp), lambda i: (i, 0)),
                  pl.BlockSpec((tm, Dp), lambda i: (i, 0)),
                  pl.BlockSpec((tm, 1), lambda i: (i, 0))],
        out_specs=[pl.BlockSpec((1, 1), lambda i: (0, 0)),
                   pl.BlockSpec((1, 1), lambda i: (0, 0))],
        compiler_params=pltpu.CompilerParams(
            dimension_semantics=("arbitrary",),
            vmem_limit_bytes=VMEM_LIMIT),
    )(p2, t2, m2)
    # TODO(synk): sum(mask)==0 (mask_ratio=0) reproduces the reference 0/0 -> NaN.
    return (num / den)[0, 0]


# ----------------------------------------------------------------------------
# Model pieces (glue in JAX, heavy compute in Pallas)
# ----------------------------------------------------------------------------
def patch_embed(imgs, w2d, b, patch, tub):
    """Conv3d with kernel == stride  <=>  per-patch linear projection."""
    B, C, T, H, W = imgs.shape
    Tp, Hp, Wp = T // tub, H // patch, W // patch
    x = imgs.reshape(B, C, Tp, tub, Hp, patch, Wp, patch)
    x = x.transpose(0, 2, 4, 6, 1, 3, 5, 7)               # (B, Tp, Hp, Wp, C, tub, p, p)
    x = x.reshape(B * Tp * Hp * Wp, C * tub * patch * patch)
    y = linear(x, w2d, b)                                  # Pallas tiled matmul (bf16 out)
    return y.reshape(B, Tp * Hp * Wp, w2d.shape[1])


def patchify(imgs, patch):
    """Matches the torch as_strided patchify: only frame t=0 is patchified.
    TODO(synk): for tubelet_size>1 / multi-frame configs pred and target token
    counts diverge, exactly as in the reference patchify."""
    B, C, T, H, W = imgs.shape
    im0 = imgs[:, :, 0].transpose(0, 2, 3, 1)              # (B, H, W, C)
    hp, wp = H // patch, W // patch
    x = im0.reshape(B, hp, patch, wp, patch, C)
    x = x.transpose(0, 1, 3, 2, 4, 5)
    return x.reshape(B, hp * wp, patch * patch * C)


def random_masking(x, mask_ratio):
    # TODO(synk): torch uses Generator(seed=50) rand stream; not bit-reproducible in JAX,
    # we use jax.random.PRNGKey(50) instead (same algorithm: argsort noise twice + gather).
    N, L, D = x.shape
    len_keep = int(L * (1 - mask_ratio))
    noise = jax.random.uniform(jax.random.PRNGKey(50), (N, L), jnp.float32)
    ids_shuffle = jnp.argsort(noise, axis=1)
    ids_restore = jnp.argsort(ids_shuffle, axis=1)
    ids_keep = ids_shuffle[:, :len_keep]
    x_masked = jnp.take_along_axis(
        x, jnp.broadcast_to(ids_keep[:, :, None], (N, len_keep, D)), axis=1)
    mask = jnp.ones((N, L), jnp.float32)
    mask = mask.at[:, :len_keep].set(0.0)
    mask = jnp.take_along_axis(mask, ids_restore, axis=1)
    return x_masked, mask, ids_restore


def block_forward(x, p, num_heads):
    """timm ViT Block: x + Attn(LN1(x)); x + MLP(LN2(x)) — LN/bias/GELU/residual fused."""
    B, S, D = x.shape
    hd = D // num_heads
    # fused LN1 -> qkv projection; attention reads the (B, S, 3D) bf16 slab directly.
    qkv = ln_linear(x, p['norm1_g'], p['norm1_b'], p['qkv_w'], p['qkv_b'])
    o = apply_attention(qkv, num_heads, scale=hd ** -0.5)          # (B, S, D) bf16
    x = linear(o, p['proj_w'], p['proj_b'], residual=x)            # proj + residual fused
    # fused LN2 -> fc1 -> GELU; then fc2 + residual fused.
    h = ln_linear(x, p['norm2_g'], p['norm2_b'], p['fc1_w'], p['fc1_b'], gelu=True)
    x = linear(h, p['fc2_w'], p['fc2_b'], residual=x)
    return x


# ----------------------------------------------------------------------------
# Full forward (single-stream MAE path: x_s=imgs, x_t=None)
# ----------------------------------------------------------------------------
# TODO(synk): the reference forward() calls forward_encoder(imgs, mask_ratio) against a
# (x_s, x_t, ...) signature and an undefined forward_decoder; we implement the intended
# standard MAE single-stream path (encoder -> mask-token restore -> decoder -> pred -> loss).
def forward(params, imgs, cfg, mask_ratio=0.75):
    patch = cfg['patch_size']
    tub = cfg['tubelet_size']
    E = cfg['embed_dim']
    Dd = cfg['decoder_embed_dim']
    B = imgs.shape[0]

    # ----- encoder -----
    x = patch_embed(imgs, params['patch_w'], params['patch_b'], patch, tub)  # (B, L, E) bf16
    L = x.shape[1]
    x = x + params['pos_embed'][None, 1:, :]
    x, mask, ids_restore = random_masking(x, mask_ratio)
    cls = params['cls_token'] + params['pos_embed'][None, :1, :]
    x = jnp.concatenate([jnp.broadcast_to(cls, (B, 1, E)), x], axis=1)
    for blk in params['enc_blocks']:
        x = block_forward(x, blk, cfg['num_heads'])

    # ----- decoder (final encoder norm fused into decoder_embed projection) -----
    x = ln_linear(x, params['norm_g'], params['norm_b'],
                  params['dec_embed_w'], params['dec_embed_b'])              # (B, Sk, Dd)
    Sk = x.shape[1]
    mask_tokens = jnp.broadcast_to(params['mask_token'], (B, L + 1 - Sk, Dd))
    x_ = jnp.concatenate([x[:, 1:, :], mask_tokens], axis=1)                 # (B, L, Dd)
    idx = jnp.broadcast_to(ids_restore[:, :, None], (B, L, Dd))
    x_ = jnp.take_along_axis(x_, idx, axis=1)
    x = jnp.concatenate([x[:, :1, :], x_], axis=1)                           # (B, L+1, Dd)
    x = x + params['dec_pos_embed'][None]
    for blk in params['dec_blocks']:
        x = block_forward(x, blk, cfg['decoder_num_heads'])
    # decoder norm fused into the prediction head; pred kept in f32 for the loss.
    pred = ln_linear(x, params['dec_norm_g'], params['dec_norm_b'],
                     params['dec_pred_w'], params['dec_pred_b'],
                     out_dtype=jnp.float32)
    pred = pred[:, 1:, :]                                                    # drop cls

    # ----- loss -----
    target = patchify(imgs, patch)                                           # norm_pix_loss=False
    loss = masked_mse(pred, target, mask)
    return loss, pred, mask


# ----------------------------------------------------------------------------
# Deterministic parameter initialization (weights pre-cast to bf16 once)
# ----------------------------------------------------------------------------
def init_params(key, cfg):
    p = cfg['patch_size']
    tub = cfg['tubelet_size']
    C = cfg['in_chans']
    E = cfg['embed_dim']
    Dd = cfg['decoder_embed_dim']
    patch_dim = C * tub * p * p
    grid = (cfg['num_frames'] // tub, cfg['img_size'] // p, cfg['img_size'] // p)

    keys = list(jax.random.split(key, 128))
    kit = iter(keys)

    def xavier(fan_in, fan_out):
        bound = float(np.sqrt(6.0 / (fan_in + fan_out)))
        w = jax.random.uniform(next(kit), (fan_in, fan_out), jnp.float32, -bound, bound)
        return w.astype(jnp.bfloat16)                 # pre-cast once (MXU operand dtype)

    def make_block(D):
        Hm = int(D * cfg['mlp_ratio'])
        return dict(
            norm1_g=jnp.ones((D,), jnp.float32), norm1_b=jnp.zeros((D,), jnp.float32),
            qkv_w=xavier(D, 3 * D), qkv_b=jnp.zeros((3 * D,), jnp.float32),
            proj_w=xavier(D, D), proj_b=jnp.zeros((D,), jnp.float32),
            norm2_g=jnp.ones((D,), jnp.float32), norm2_b=jnp.zeros((D,), jnp.float32),
            fc1_w=xavier(D, Hm), fc1_b=jnp.zeros((Hm,), jnp.float32),
            fc2_w=xavier(Hm, D), fc2_b=jnp.zeros((D,), jnp.float32),
        )

    params = {}
    # Conv3d proj weight, xavier over the (E, C*tub*p*p) view, stored transposed.
    params['patch_w'] = xavier(patch_dim, E)
    cb = 1.0 / float(np.sqrt(patch_dim))
    params['patch_b'] = jax.random.uniform(next(kit), (E,), jnp.float32, -cb, cb)
    params['cls_token'] = (0.02 * jax.random.normal(next(kit), (1, 1, E), jnp.float32)
                           ).astype(jnp.bfloat16)
    params['mask_token'] = (0.02 * jax.random.normal(next(kit), (1, 1, Dd), jnp.float32)
                            ).astype(jnp.bfloat16)
    params['pos_embed'] = jnp.asarray(
        get_3d_sincos_pos_embed(E, grid, cls_token=True)).astype(jnp.bfloat16)
    params['dec_pos_embed'] = jnp.asarray(
        get_3d_sincos_pos_embed(Dd, grid, cls_token=True)).astype(jnp.bfloat16)
    params['enc_blocks'] = [make_block(E) for _ in range(cfg['depth'])]
    params['norm_g'] = jnp.ones((E,), jnp.float32)
    params['norm_b'] = jnp.zeros((E,), jnp.float32)
    params['dec_embed_w'] = xavier(E, Dd)
    params['dec_embed_b'] = jnp.zeros((Dd,), jnp.float32)
    params['dec_blocks'] = [make_block(Dd) for _ in range(cfg['decoder_depth'])]
    params['dec_norm_g'] = jnp.ones((Dd,), jnp.float32)
    params['dec_norm_b'] = jnp.zeros((Dd,), jnp.float32)
    params['dec_pred_w'] = xavier(Dd, patch_dim)
    params['dec_pred_b'] = jnp.zeros((patch_dim,), jnp.float32)
    return params


# ----------------------------------------------------------------------------
if __name__ == "__main__":
    cfg = dict(
        T_img_size=32, img_size=32, patch_size=8, num_frames=1, tubelet_size=1,
        in_chans=4, embed_dim=64, depth=2, num_heads=4,
        decoder_embed_dim=32, decoder_depth=1, decoder_num_heads=4, mlp_ratio=4.0,
    )
    key = jax.random.PRNGKey(0)
    pkey, xkey = jax.random.split(key)
    params = init_params(pkey, cfg)
    imgs = jax.random.normal(
        xkey,
        (2, cfg['in_chans'], cfg['num_frames'], cfg['img_size'], cfg['img_size']),
        jnp.float32,
    )

    fwd = jax.jit(functools.partial(forward, cfg=cfg, mask_ratio=0.75))
    loss, pred, mask = fwd(params, imgs)
    jax.block_until_ready((loss, pred, mask))

    assert pred.shape == (2, 16, cfg['patch_size'] ** 2 * cfg['in_chans'])
    assert mask.shape == (2, 16)
    assert loss.shape == ()
    assert bool(jnp.isfinite(loss))
    print("KERNEL_OK")
</pallas_src>

<mosaic_0001>
module attributes {stable_mosaic.version = 11 : i64} {
  func.func @_matmul_kernel(%arg0: i32, %arg1: i32, %arg2: i32, %arg3: memref<32x256xbf16, #tpu.memory_space<vmem>>, %arg4: memref<256x64xbf16, #tpu.memory_space<vmem>>, %arg5: memref<1x64xf32, #tpu.memory_space<vmem>>, %arg6: memref<32x64xbf16, #tpu.memory_space<vmem>>, %arg7: memref<32x64xf32, #tpu.memory_space<vmem>>) attributes {dimension_semantics = [#tpu.dimension_semantics<parallel>, #tpu.dimension_semantics<parallel>, #tpu.dimension_semantics<arbitrary>], iteration_bounds = array<i64: 1, 1, 1>, scalar_prefetch = 0 : i64, scratch_operands = 1 : i64, tpu.core_type = #tpu.core_type<tc>, window_params = [{transform_indices = @transform_0, window_bounds = array<i64: 32, 256>}, {transform_indices = @transform_1, window_bounds = array<i64: 256, 64>}, {transform_indices = @transform_2, window_bounds = array<i64: 1, 64>}, {transform_indices = @transform_3, window_bounds = array<i64: 32, 64>}]} {
    %c0_i32 = arith.constant 0 : i32
    %0 = arith.cmpi eq, %arg2, %c0_i32 : i32
    %1 = arith.extui %0 : i1 to i32
    %c0_i32_0 = arith.constant 0 : i32
    %2 = arith.cmpi ne, %1, %c0_i32_0 : i32
    scf.if %2 {
      %cst_10 = arith.constant 0.000000e+00 : f32
      %12 = vector.broadcast %cst_10 : f32 to vector<32x64xf32>
      %c0_11 = arith.constant 0 : index
      %c0_12 = arith.constant 0 : index
      %13 = vector.load %arg7[%c0_11, %c0_12] : memref<32x64xf32, #tpu.memory_space<vmem>>, vector<32x64xf32>
      tpu.vector_store %arg7[%c0_11, %c0_12], %12 {strides = array<i32>} : memref<32x64xf32, #tpu.memory_space<vmem>>, vector<32x64xf32>,
    } else {
    }
    %c0 = arith.constant 0 : index
    %c0_1 = arith.constant 0 : index
    %3 = vector.load %arg7[%c0, %c0_1] : memref<32x64xf32, #tpu.memory_space<vmem>>, vector<32x64xf32>
    %c0_2 = arith.constant 0 : index
    %c0_3 = arith.constant 0 : index
    %4 = vector.load %arg3[%c0_2, %c0_3] : memref<32x256xbf16, #tpu.memory_space<vmem>>, vector<32x256xbf16>
    %c0_4 = arith.constant 0 : index
    %c0_5 = arith.constant 0 : index
    %5 = vector.load %arg4[%c0_4, %c0_5] : memref<256x64xbf16, #tpu.memory_space<vmem>>, vector<256x64xbf16>
    %cst = arith.constant dense<0.000000e+00> : vector<32x64xf32>
    %6 = tpu.matmul %4, %5, %cst {dimension_numbers = #tpu.dot_dimension_numbers<[1], [0], [0], [1], [0, 0, 1, 1], [], []>} : vector<32x256xbf16>, vector<256x64xbf16>, vector<32x64xf32> -> vector<32x64xf32>
    %7 = arith.addf %3, %6 : vector<32x64xf32>
    %c0_6 = arith.constant 0 : index
    %c0_7 = arith.constant 0 : index
    %8 = vector.load %arg7[%c0_6, %c0_7] : memref<32x64xf32, #tpu.memory_space<vmem>>, vector<32x64xf32>
    tpu.vector_store %arg7[%c0_6, %c0_7], %7 {strides = array<i32>} : memref<32x64xf32, #tpu.memory_space<vmem>>, vector<32x64xf32>,
    %c0_i32_8 = arith.constant 0 : i32
    %9 = arith.cmpi eq, %arg2, %c0_i32_8 : i32
    %10 = arith.extui %9 : i1 to i32
    %c0_i32_9 = arith.constant 0 : i32
    %11 = arith.cmpi ne, %10, %c0_i32_9 : i32
    scf.if %11 {
      %c0_10 = arith.constant 0 : index
      %c0_11 = arith.constant 0 : index
      %12 = vector.load %arg7[%c0_10, %c0_11] : memref<32x64xf32, #tpu.memory_space<vmem>>, vector<32x64xf32>
      %c0_12 = arith.constant 0 : index
      %c0_13 = arith.constant 0 : index
      %13 = vector.load %arg5[%c0_12, %c0_13] : memref<1x64xf32, #tpu.memory_space<vmem>>, vector<1x64xf32>
      %14 = vector.broadcast %13 : vector<1x64xf32> to vector<32x64xf32>
      %15 = arith.addf %12, %14 : vector<32x64xf32>
      %16 = arith.truncf %15 : vector<32x64xf32> to vector<32x64xbf16>
      %c0_14 = arith.constant 0 : index
      %c0_15 = arith.constant 0 : index
      %17 = vector.load %arg6[%c0_14, %c0_15] : memref<32x64xbf16, #tpu.memory_space<vmem>>, vector<32x64xbf16>
      tpu.vector_store %arg6[%c0_14, %c0_15], %16 {strides = array<i32>} : memref<32x64xbf16, #tpu.memory_space<vmem>>, vector<32x64xbf16>,
    } else {
    }
    return
  }
  func.func @transform_0(%arg0: i32, %arg1: i32, %arg2: i32) -> (i32, i32) {
    %c0_i32 = arith.constant 0 : i32
    return %arg0, %arg2 : i32, i32
  }
  func.func @transform_1(%arg0: i32, %arg1: i32, %arg2: i32) -> (i32, i32) {
    %c0_i32 = arith.constant 0 : i32
    return %arg2, %arg1 : i32, i32
  }
  func.func @transform_2(%arg0: i32, %arg1: i32, %arg2: i32) -> (i32, i32) {
    %c0_i32 = arith.constant 0 : i32
    %c0_i32_0 = arith.constant 0 : i32
    return %c0_i32, %arg1 : i32, i32
  }
  func.func @transform_3(%arg0: i32, %arg1: i32, %arg2: i32) -> (i32, i32) {
    %c0_i32 = arith.constant 0 : i32
    return %arg0, %arg1 : i32, i32
  }
}

module attributes {stable_mosaic.version = 11 : i64} {
  func.func @_ln_matmul_kernel(%arg0: i32, %arg1: i32, %arg2: memref<10x64xbf16, #tpu.memory_space<vmem>>, %arg3: memref<1x64xf32, #tpu.memory_space<vmem>>, %arg4: memref<1x64xf32, #tpu.memory_space<vmem>>, %arg5: memref<64x192xbf16, #tpu.memory_space<vmem>>, %arg6: memref<1x192xf32, #tpu.memory_space<vmem>>, %arg7: memref<10x192xbf16, #tpu.memory_space<vmem>>, %arg8: memref<10x64xbf16, #tpu.memory_space<vmem>>) attributes {dimension_semantics = [#tpu.dimension_semantics<parallel>, #tpu.dimension_semantics<arbitrary>], iteration_bounds = array<i64: 1, 1>, scalar_prefetch = 0 : i64, scratch_operands = 1 : i64, tpu.core_type = #tpu.core_type<tc>, window_params = [{transform_indices = @transform_0, window_bounds = array<i64: 10, 64>}, {pipeline_mode = #tpu.pipeline_mode<synchronous>, transform_indices = @transform_1, window_bounds = array<i64: 1, 64>}, {pipeline_mode = #tpu.pipeline_mode<synchronous>, transform_indices = @transform_2, window_bounds = array<i64: 1, 64>}, {transform_indices = @transform_3, window_bounds = array<i64: 64, 192>}, {transform_indices = @transform_4, window_bounds = array<i64: 1, 192>}, {transform_indices = @transform_5, window_bounds = array<i64: 10, 192>}]} {
    %c0_i32 = arith.constant 0 : i32
    %0 = arith.cmpi eq, %arg1, %c0_i32 : i32
    %1 = arith.extui %0 : i1 to i32
    %c0_i32_0 = arith.constant 0 : i32
    %2 = arith.cmpi ne, %1, %c0_i32_0 : i32
    scf.if %2 {
      %c0_8 = arith.constant 0 : index
      %c0_9 = arith.constant 0 : index
      %11 = vector.load %arg2[%c0_8, %c0_9] : memref<10x64xbf16, #tpu.memory_space<vmem>>, vector<10x64xbf16>
      %12 = arith.extf %11 : vector<10x64xbf16> to vector<10x64xf32>
      %cst_10 = arith.constant dense<0.000000e+00> : vector<10xf32>
      %13 = vector.multi_reduction <add>, %12, %cst_10 [1] : vector<10x64xf32> to vector<10xf32>
      %14 = vector.shape_cast %13 : vector<10xf32> to vector<10x1xf32>
      %cst_11 = arith.constant 6.400000e+01 : f32
      %15 = vector.broadcast %cst_11 : f32 to vector<10x1xf32>
      %16 = arith.divf %14, %15 : vector<10x1xf32>
      %17 = vector.broadcast %16 : vector<10x1xf32> to vector<10x64xf32>
      %18 = arith.subf %12, %17 : vector<10x64xf32>
      %19 = vector.broadcast %16 : vector<10x1xf32> to vector<10x64xf32>
      %20 = arith.subf %12, %19 : vector<10x64xf32>
      %21 = arith.mulf %18, %20 : vector<10x64xf32>
      %cst_12 = arith.constant dense<0.000000e+00> : vector<10xf32>
      %22 = vector.multi_reduction <add>, %21, %cst_12 [1] : vector<10x64xf32> to vector<10xf32>
      %23 = vector.shape_cast %22 : vector<10xf32> to vector<10x1xf32>
      %cst_13 = arith.constant 6.400000e+01 : f32
      %24 = vector.broadcast %cst_13 : f32 to vector<10x1xf32>
      %25 = arith.divf %23, %24 : vector<10x1xf32>
      %26 = vector.broadcast %16 : vector<10x1xf32> to vector<10x64xf32>
      %27 = arith.subf %12, %26 : vector<10x64xf32>
      %cst_14 = arith.constant 9.99999974E-6 : f32
      %28 = vector.broadcast %cst_14 : f32 to vector<10x1xf32>
      %29 = arith.addf %25, %28 : vector<10x1xf32>
      %30 = math.rsqrt %29 : vector<10x1xf32>
      %31 = vector.broadcast %30 : vector<10x1xf32> to vector<10x64xf32>
      %32 = arith.mulf %27, %31 : vector<10x64xf32>
      %c0_15 = arith.constant 0 : index
      %c0_16 = arith.constant 0 : index
      %33 = vector.load %arg3[%c0_15, %c0_16] : memref<1x64xf32, #tpu.memory_space<vmem>>, vector<1x64xf32>
      %34 = vector.broadcast %33 : vector<1x64xf32> to vector<10x64xf32>
      %35 = arith.mulf %32, %34 : vector<10x64xf32>
      %c0_17 = arith.constant 0 : index
      %c0_18 = arith.constant 0 : index
      %36 = vector.load %arg4[%c0_17, %c0_18] : memref<1x64xf32, #tpu.memory_space<vmem>>, vector<1x64xf32>
      %37 = vector.broadcast %36 : vector<1x64xf32> to vector<10x64xf32>
      %38 = arith.addf %35, %37 : vector<10x64xf32>
      %39 = arith.truncf %38 : vector<10x64xf32> to vector<10x64xbf16>
      %c0_19 = arith.constant 0 : index
      %c0_20 = arith.constant 0 : index
      %40 = vector.load %arg8[%c0_19, %c0_20] : memref<10x64xbf16, #tpu.memory_space<vmem>>, vector<10x64xbf16>
      tpu.vector_store %arg8[%c0_19, %c0_20], %39 {strides = array<i32>} : memref<10x64xbf16, #tpu.memory_space<vmem>>, vector<10x64xbf16>,
    } else {
    }
    %c0 = arith.constant 0 : index
    %c0_1 = arith.constant 0 : index
    %3 = vector.load %arg8[%c0, %c0_1] : memref<10x64xbf16, #tpu.memory_space<vmem>>, vector<10x64xbf16>
    %c0_2 = arith.constant 0 : index
    %c0_3 = arith.constant 0 : index
    %4 = vector.load %arg5[%c0_2, %c0_3] : memref<64x192xbf16, #tpu.memory_space<vmem>>, vector<64x192xbf16>
    %cst = arith.constant dense<0.000000e+00> : vector<10x192xf32>
    %5 = tpu.matmul %3, %4, %cst {dimension_numbers = #tpu.dot_dimension_numbers<[1], [0], [0], [1], [0, 0, 1, 1], [], []>} : vector<10x64xbf16>, vector<64x192xbf16>, vector<10x192xf32> -> vector<10x192xf32>
    %c0_4 = arith.constant 0 : index
    %c0_5 = arith.constant 0 : index
    %6 = vector.load %arg6[%c0_4, %c0_5] : memref<1x192xf32, #tpu.memory_space<vmem>>, vector<1x192xf32>
    %7 = vector.broadcast %6 : vector<1x192xf32> to vector<10x192xf32>
    %8 = arith.addf %5, %7 : vector<10x192xf32>
    %9 = arith.truncf %8 : vector<10x192xf32> to vector<10x192xbf16>
    %c0_6 = arith.constant 0 : index
    %c0_7 = arith.constant 0 : index
    %10 = vector.load %arg7[%c0_6, %c0_7] : memref<10x192xbf16, #tpu.memory_space<vmem>>, vector<10x192xbf16>
    tpu.vector_store %arg7[%c0_6, %c0_7], %9 {strides = array<i32>} : memref<10x192xbf16, #tpu.memory_space<vmem>>, vector<10x192xbf16>,
    return
  }
  func.func @transform_0(%arg0: i32, %arg1: i32) -> (i32, i32) {
    %c0_i32 = arith.constant 0 : i32
    %c0_i32_0 = arith.constant 0 : i32
    return %arg0, %c0_i32 : i32, i32
  }
  func.func @transform_1(%arg0: i32, %arg1: i32) -> (i32, i32) {
    %c0_i32 = arith.constant 0 : i32
    %c0_i32_0 = arith.constant 0 : i32
    %c0_i32_1 = arith.constant 0 : i32
    return %c0_i32, %c0_i32_0 : i32, i32
  }
  func.func @transform_2(%arg0: i32, %arg1: i32) -> (i32, i32) {
    %c0_i32 = arith.constant 0 : i32
    %c0_i32_0 = arith.constant 0 : i32
    %c0_i32_1 = arith.constant 0 : i32
    return %c0_i32, %c0_i32_0 : i32, i32
  }
  func.func @transform_3(%arg0: i32, %arg1: i32) -> (i32, i32) {
    %c0_i32 = arith.constant 0 : i32
    %c0_i32_0 = arith.constant 0 : i32
    return %c0_i32, %arg1 : i32, i32
  }
  func.func @transform_4(%arg0: i32, %arg1: i32) -> (i32, i32) {
    %c0_i32 = arith.constant 0 : i32
    %c0_i32_0 = arith.constant 0 : i32
    return %c0_i32, %arg1 : i32, i32
  }
  func.func @transform_5(%arg0: i32, %arg1: i32) -> (i32, i32) {
    %c0_i32 = arith.constant 0 : i32
    return %arg0, %arg1 : i32, i32
  }
}

module attributes {stable_mosaic.version = 11 : i64} {
  func.func @_attention_kernel(%arg0: i32, %arg1: memref<1x5x192xbf16, #tpu.memory_space<vmem>>, %arg2: memref<1x5x64xbf16, #tpu.memory_space<vmem>>) attributes {dimension_semantics = [#tpu.dimension_semantics<parallel>], iteration_bounds = array<i64: 2>, scalar_prefetch = 0 : i64, scratch_operands = 0 : i64, tpu.core_type = #tpu.core_type<tc>, window_params = [{transform_indices = @transform_0, window_bounds = array<i64: 1, 5, 192>}, {transform_indices = @transform_1, window_bounds = array<i64: 1, 5, 64>}]} {
    %c0 = arith.constant 0 : index
    %c0_0 = arith.constant 0 : index
    %c0_1 = arith.constant 0 : index
    %0 = vector.load %arg1[%c0, %c0_0, %c0_1] : memref<1x5x192xbf16, #tpu.memory_space<vmem>>, vector<1x5x192xbf16>
    %1 = vector.shape_cast %0 : vector<1x5x192xbf16> to vector<5x192xbf16>
    %2 = vector.extract_strided_slice %1 {offsets = [0, 0], sizes = [5, 16], strides = [1, 1]} : vector<5x192xbf16> to vector<5x16xbf16>
    %3 = arith.extf %2 : vector<5x16xbf16> to vector<5x16xf32>
    %cst = arith.constant 2.500000e-01 : f32
    %4 = vector.broadcast %cst : f32 to vector<5x16xf32>
    %5 = arith.mulf %3, %4 : vector<5x16xf32>
    %6 = arith.truncf %5 : vector<5x16xf32> to vector<5x16xbf16>
    %7 = vector.extract_strided_slice %1 {offsets = [0, 64], sizes = [5, 16], strides = [1, 1]} : vector<5x192xbf16> to vector<5x16xbf16>
    %8 = vector.extract_strided_slice %1 {offsets = [0, 128], sizes = [5, 16], strides = [1, 1]} : vector<5x192xbf16> to vector<5x16xbf16>
    %cst_2 = arith.constant dense<0.000000e+00> : vector<5x5xf32>
    %9 = tpu.matmul %6, %7, %cst_2 {dimension_numbers = #tpu.dot_dimension_numbers<[1], [1], [0], [0], [0, 0, 1, 0], [], []>} : vector<5x16xbf16>, vector<5x16xbf16>, vector<5x5xf32> -> vector<5x5xf32>
    %cst_3 = arith.constant dense<0xFF800000> : vector<5xf32>
    %10 = vector.multi_reduction <maximumf>, %9, %cst_3 [1] : vector<5x5xf32> to vector<5xf32>
    %11 = vector.shape_cast %10 : vector<5xf32> to vector<5x1xf32>
    %12 = vector.broadcast %11 : vector<5x1xf32> to vector<5x5xf32>
    %13 = arith.subf %9, %12 : vector<5x5xf32>
    %14 = math.exp %13 : vector<5x5xf32>
    %cst_4 = arith.constant dense<0.000000e+00> : vector<5xf32>
    %15 = vector.multi_reduction <add>, %14, %cst_4 [1] : vector<5x5xf32> to vector<5xf32>
    %16 = vector.shape_cast %15 : vector<5xf32> to vector<5x1xf32>
    %17 = tpu.reciprocal %16 {approx = true} : vector<5x1xf32> -> vector<5x1xf32>
    %18 = vector.broadcast %17 : vector<5x1xf32> to vector<5x5xf32>
    %19 = arith.mulf %14, %18 : vector<5x5xf32>
    %20 = arith.truncf %19 : vector<5x5xf32> to vector<5x5xbf16>
    %cst_5 = arith.constant dense<0.000000e+00> : vector<5x16xf32>
    %21 = tpu.matmul %20, %8, %cst_5 {dimension_numbers = #tpu.dot_dimension_numbers<[1], [0], [0], [1], [0, 0, 1, 1], [], []>} : vector<5x5xbf16>, vector<5x16xbf16>, vector<5x16xf32> -> vector<5x16xf32>
    %22 = arith.truncf %21 : vector<5x16xf32> to vector<5x16xbf16>
    %c0_6 = arith.constant 0 : index
    %c0_7 = arith.constant 0 : index
    %c0_8 = arith.constant 0 : index
    %23 = vector.load %arg2[%c0_6, %c0_7, %c0_8] : memref<1x5x64xbf16, #tpu.memory_space<vmem>>, vector<1x5x16xbf16>
    %24 = vector.shape_cast %23 : vector<1x5x16xbf16> to vector<5x16xbf16>
    %25 = vector.shape_cast %22 : vector<5x16xbf16> to vector<1x5x16xbf16>
    tpu.vector_store %arg2[%c0_6, %c0_7, %c0_8], %25 {strides = array<i32>} : memref<1x5x64xbf16, #tpu.memory_space<vmem>>, vector<1x5x16xbf16>,
    %26 = vector.extract_strided_slice %1 {offsets = [0, 16], sizes = [5, 16], strides = [1, 1]} : vector<5x192xbf16> to vector<5x16xbf16>
    %27 = arith.extf %26 : vector<5x16xbf16> to vector<5x16xf32>
    %cst_9 = arith.constant 2.500000e-01 : f32
    %28 = vector.broadcast %cst_9 : f32 to vector<5x16xf32>
    %29 = arith.mulf %27, %28 : vector<5x16xf32>
    %30 = arith.truncf %29 : vector<5x16xf32> to vector<5x16xbf16>
    %31 = vector.extract_strided_slice %1 {offsets = [0, 80], sizes = [5, 16], strides = [1, 1]} : vector<5x192xbf16> to vector<5x16xbf16>
    %32 = vector.extract_strided_slice %1 {offsets = [0, 144], sizes = [5, 16], strides = [1, 1]} : vector<5x192xbf16> to vector<5x16xbf16>
    %cst_10 = arith.constant dense<0.000000e+00> : vector<5x5xf32>
    %33 = tpu.matmul %30, %31, %cst_10 {dimension_numbers = #tpu.dot_dimension_numbers<[1], [1], [0], [0], [0, 0, 1, 0], [], []>} : vector<5x16xbf16>, vector<5x16xbf16>, vector<5x5xf32> -> vector<5x5xf32>
    %cst_11 = arith.constant dense<0xFF800000> : vector<5xf32>
    %34 = vector.multi_reduction <maximumf>, %33, %cst_11 [1] : vector<5x5xf32> to vector<5xf32>
    %35 = vector.shape_cast %34 : vector<5xf32> to vector<5x1xf32>
    %36 = vector.broadcast %35 : vector<5x1xf32> to vector<5x5xf32>
    %37 = arith.subf %33, %36 : vector<5x5xf32>
    %38 = math.exp %37 : vector<5x5xf32>
    %cst_12 = arith.constant dense<0.000000e+00> : vector<5xf32>
    %39 = vector.multi_reduction <add>, %38, %cst_12 [1] : vector<5x5xf32> to vector<5xf32>
    %40 = vector.shape_cast %39 : vector<5xf32> to vector<5x1xf32>
    %41 = tpu.reciprocal %40 {approx = true} : vector<5x1xf32> -> vector<5x1xf32>
    %42 = vector.broadcast %41 : vector<5x1xf32> to vector<5x5xf32>
    %43 = arith.mulf %38, %42 : vector<5x5xf32>
    %44 = arith.truncf %43 : vector<5x5xf32> to vector<5x5xbf16>
    %cst_13 = arith.constant dense<0.000000e+00> : vector<5x16xf32>
    %45 = tpu.matmul %44, %32, %cst_13 {dimension_numbers = #tpu.dot_dimension_numbers<[1], [0], [0], [1], [0, 0, 1, 1], [], []>} : vector<5x5xbf16>, vector<5x16xbf16>, vector<5x16xf32> -> vector<5x16xf32>
    %46 = arith.truncf %45 : vector<5x16xf32> to vector<5x16xbf16>
    %c0_14 = arith.constant 0 : index
    %c0_15 = arith.constant 0 : index
    %c16 = arith.constant 16 : index
    %47 = vector.load %arg2[%c0_14, %c0_15, %c16] : memref<1x5x64xbf16, #tpu.memory_space<vmem>>, vector<1x5x16xbf16>
    %48 = vector.shape_cast %47 : vector<1x5x16xbf16> to vector<5x16xbf16>
    %49 = vector.shape_cast %46 : vector<5x16xbf16> to vector<1x5x16xbf16>
    tpu.vector_store %arg2[%c0_14, %c0_15, %c16], %49 {strides = array<i32>} : memref<1x5x64xbf16, #tpu.memory_space<vmem>>, vector<1x5x16xbf16>,
    %50 = vector.extract_strided_slice %1 {offsets = [0, 32], sizes = [5, 16], strides = [1, 1]} : vector<5x192xbf16> to vector<5x16xbf16>
    %51 = arith.extf %50 : vector<5x16xbf16> to vector<5x16xf32>
    %cst_16 = arith.constant 2.500000e-01 : f32
    %52 = vector.broadcast %cst_16 : f32 to vector<5x16xf32>
    %53 = arith.mulf %51, %52 : vector<5x16xf32>
    %54 = arith.truncf %53 : vector<5x16xf32> to vector<5x16xbf16>
    %55 = vector.extract_strided_slice %1 {offsets = [0, 96], sizes = [5, 16], strides = [1, 1]} : vector<5x192xbf16> to vector<5x16xbf16>
    %56 = vector.extract_strided_slice %1 {offsets = [0, 160], sizes = [5, 16], strides = [1, 1]} : vector<5x192xbf16> to vector<5x16xbf16>
    %cst_17 = arith.constant dense<0.000000e+00> : vector<5x5xf32>
    %57 = tpu.matmul %54, %55, %cst_17 {dimension_numbers = #tpu.dot_dimension_numbers<[1], [1], [0], [0], [0, 0, 1, 0], [], []>} : vector<5x16xbf16>, vector<5x16xbf16>, vector<5x5xf32> -> vector<5x5xf32>
    %cst_18 = arith.constant dense<0xFF800000> : vector<5xf32>
    %58 = vector.multi_reduction <maximumf>, %57, %cst_18 [1] : vector<5x5xf32> to vector<5xf32>
    %59 = vector.shape_cast %58 : vector<5xf32> to vector<5x1xf32>
    %60 = vector.broadcast %59 : vector<5x1xf32> to vector<5x5xf32>
    %61 = arith.subf %57, %60 : vector<5x5xf32>
    %62 = math.exp %61 : vector<5x5xf32>
    %cst_19 = arith.constant dense<0.000000e+00> : vector<5xf32>
    %63 = vector.multi_reduction <add>, %62, %cst_19 [1] : vector<5x5xf32> to vector<5xf32>
    %64 = vector.shape_cast %63 : vector<5xf32> to vector<5x1xf32>
    %65 = tpu.reciprocal %64 {approx = true} : vector<5x1xf32> -> vector<5x1xf32>
    %66 = vector.broadcast %65 : vector<5x1xf32> to vector<5x5xf32>
    %67 = arith.mulf %62, %66 : vector<5x5xf32>
    %68 = arith.truncf %67 : vector<5x5xf32> to vector<5x5xbf16>
    %cst_20 = arith.constant dense<0.000000e+00> : vector<5x16xf32>
    %69 = tpu.matmul %68, %56, %cst_20 {dimension_numbers = #tpu.dot_dimension_numbers<[1], [0], [0], [1], [0, 0, 1, 1], [], []>} : vector<5x5xbf16>, vector<5x16xbf16>, vector<5x16xf32> -> vector<5x16xf32>
    %70 = arith.truncf %69 : vector<5x16xf32> to vector<5x16xbf16>
    %c0_21 = arith.constant 0 : index
    %c0_22 = arith.constant 0 : index
    %c32 = arith.constant 32 : index
    %71 = vector.load %arg2[%c0_21, %c0_22, %c32] : memref<1x5x64xbf16, #tpu.memory_space<vmem>>, vector<1x5x16xbf16>
    %72 = vector.shape_cast %71 : vector<1x5x16xbf16> to vector<5x16xbf16>
    %73 = vector.shape_cast %70 : vector<5x16xbf16> to vector<1x5x16xbf16>
    tpu.vector_store %arg2[%c0_21, %c0_22, %c32], %73 {strides = array<i32>} : memref<1x5x64xbf16, #tpu.memory_space<vmem>>, vector<1x5x16xbf16>,
    %74 = vector.extract_strided_slice %1 {offsets = [0, 48], sizes = [5, 16], strides = [1, 1]} : vector<5x192xbf16> to vector<5x16xbf16>
    %75 = arith.extf %74 : vector<5x16xbf16> to vector<5x16xf32>
    %cst_23 = arith.constant 2.500000e-01 : f32
    %76 = vector.broadcast %cst_23 : f32 to vector<5x16xf32>
    %77 = arith.mulf %75, %76 : vector<5x16xf32>
    %78 = arith.truncf %77 : vector<5x16xf32> to vector<5x16xbf16>
    %79 = vector.extract_strided_slice %1 {offsets = [0, 112], sizes = [5, 16], strides = [1, 1]} : vector<5x192xbf16> to vector<5x16xbf16>
    %80 = vector.extract_strided_slice %1 {offsets = [0, 176], sizes = [5, 16], strides = [1, 1]} : vector<5x192xbf16> to vector<5x16xbf16>
    %cst_24 = arith.constant dense<0.000000e+00> : vector<5x5xf32>
    %81 = tpu.matmul %78, %79, %cst_24 {dimension_numbers = #tpu.dot_dimension_numbers<[1], [1], [0], [0], [0, 0, 1, 0], [], []>} : vector<5x16xbf16>, vector<5x16xbf16>, vector<5x5xf32> -> vector<5x5xf32>
    %cst_25 = arith.constant dense<0xFF800000> : vector<5xf32>
    %82 = vector.multi_reduction <maximumf>, %81, %cst_25 [1] : vector<5x5xf32> to vector<5xf32>
    %83 = vector.shape_cast %82 : vector<5xf32> to vector<5x1xf32>
    %84 = vector.broadcast %83 : vector<5x1xf32> to vector<5x5xf32>
    %85 = arith.subf %81, %84 : vector<5x5xf32>
    %86 = math.exp %85 : vector<5x5xf32>
    %cst_26 = arith.constant dense<0.000000e+00> : vector<5xf32>
    %87 = vector.multi_reduction <add>, %86, %cst_26 [1] : vector<5x5xf32> to vector<5xf32>
    %88 = vector.shape_cast %87 : vector<5xf32> to vector<5x1xf32>
    %89 = tpu.reciprocal %88 {approx = true} : vector<5x1xf32> -> vector<5x1xf32>
    %90 = vector.broadcast %89 : vector<5x1xf32> to vector<5x5xf32>
    %91 = arith.mulf %86, %90 : vector<5x5xf32>
    %92 = arith.truncf %91 : vector<5x5xf32> to vector<5x5xbf16>
    %cst_27 = arith.constant dense<0.000000e+00> : vector<5x16xf32>
    %93 = tpu.matmul %92, %80, %cst_27 {dimension_numbers = #tpu.dot_dimension_numbers<[1], [0], [0], [1], [0, 0, 1, 1], [], []>} : vector<5x5xbf16>, vector<5x16xbf16>, vector<5x16xf32> -> vector<5x16xf32>
    %94 = arith.truncf %93 : vector<5x16xf32> to vector<5x16xbf16>
    %c0_28 = arith.constant 0 : index
    %c0_29 = arith.constant 0 : index
    %c48 = arith.constant 48 : index
    %95 = vector.load %arg2[%c0_28, %c0_29, %c48] : memref<1x5x64xbf16, #tpu.memory_space<vmem>>, vector<1x5x16xbf16>
    %96 = vector.shape_cast %95 : vector<1x5x16xbf16> to vector<5x16xbf16>
    %97 = vector.shape_cast %94 : vector<5x16xbf16> to vector<1x5x16xbf16>
    tpu.vector_store %arg2[%c0_28, %c0_29, %c48], %97 {strides = array<i32>} : memref<1x5x64xbf16, #tpu.memory_space<vmem>>, vector<1x5x16xbf16>,
    return
  }
  func.func @transform_0(%arg0: i32) -> (i32, i32, i32) {
    %c0_i32 = arith.constant 0 : i32
    %c0_i32_0 = arith.constant 0 : i32
    %c0_i32_1 = arith.constant 0 : i32
    return %arg0, %c0_i32, %c0_i32_0 : i32, i32, i32
  }
  func.func @transform_1(%arg0: i32) -> (i32, i32, i32) {
    %c0_i32 = arith.constant 0 : i32
    %c0_i32_0 = arith.constant 0 : i32
    %c0_i32_1 = arith.constant 0 : i32
    return %arg0, %c0_i32, %c0_i32_0 : i32, i32, i32
  }
}

module attributes {stable_mosaic.version = 11 : i64} {
  func.func @_matmul_kernel(%arg0: i32, %arg1: i32, %arg2: i32, %arg3: memref<10x64xbf16, #tpu.memory_space<vmem>>, %arg4: memref<64x64xbf16, #tpu.memory_space<vmem>>, %arg5: memref<1x64xf32, #tpu.memory_space<vmem>>, %arg6: memref<10x64xbf16, #tpu.memory_space<vmem>>, %arg7: memref<10x64xbf16, #tpu.memory_space<vmem>>, %arg8: memref<10x64xf32, #tpu.memory_space<vmem>>) attributes {dimension_semantics = [#tpu.dimension_semantics<parallel>, #tpu.dimension_semantics<parallel>, #tpu.dimension_semantics<arbitrary>], iteration_bounds = array<i64: 1, 1, 1>, scalar_prefetch = 0 : i64, scratch_operands = 1 : i64, tpu.core_type = #tpu.core_type<tc>, window_params = [{transform_indices = @transform_0, window_bounds = array<i64: 10, 64>}, {transform_indices = @transform_1, window_bounds = array<i64: 64, 64>}, {transform_indices = @transform_2, window_bounds = array<i64: 1, 64>}, {transform_indices = @transform_3, window_bounds = array<i64: 10, 64>}, {transform_indices = @transform_4, window_bounds = array<i64: 10, 64>}]} {
    %c0_i32 = arith.constant 0 : i32
    %0 = arith.cmpi eq, %arg2, %c0_i32 : i32
    %1 = arith.extui %0 : i1 to i32
    %c0_i32_0 = arith.constant 0 : i32
    %2 = arith.cmpi ne, %1, %c0_i32_0 : i32
    scf.if %2 {
      %cst_10 = arith.constant 0.000000e+00 : f32
      %12 = vector.broadcast %cst_10 : f32 to vector<10x64xf32>
      %c0_11 = arith.constant 0 : index
      %c0_12 = arith.constant 0 : index
      %13 = vector.load %arg8[%c0_11, %c0_12] : memref<10x64xf32, #tpu.memory_space<vmem>>, vector<10x64xf32>
      tpu.vector_store %arg8[%c0_11, %c0_12], %12 {strides = array<i32>} : memref<10x64xf32, #tpu.memory_space<vmem>>, vector<10x64xf32>,
    } else {
    }
    %c0 = arith.constant 0 : index
    %c0_1 = arith.constant 0 : index
    %3 = vector.load %arg8[%c0, %c0_1] : memref<10x64xf32, #tpu.memory_space<vmem>>, vector<10x64xf32>
    %c0_2 = arith.constant 0 : index
    %c0_3 = arith.constant 0 : index
    %4 = vector.load %arg3[%c0_2, %c0_3] : memref<10x64xbf16, #tpu.memory_space<vmem>>, vector<10x64xbf16>
    %c0_4 = arith.constant 0 : index
    %c0_5 = arith.constant 0 : index
    %5 = vector.load %arg4[%c0_4, %c0_5] : memref<64x64xbf16, #tpu.memory_space<vmem>>, vector<64x64xbf16>
    %cst = arith.constant dense<0.000000e+00> : vector<10x64xf32>
    %6 = tpu.matmul %4, %5, %cst {dimension_numbers = #tpu.dot_dimension_numbers<[1], [0], [0], [1], [0, 0, 1, 1], [], []>} : vector<10x64xbf16>, vector<64x64xbf16>, vector<10x64xf32> -> vector<10x64xf32>
    %7 = arith.addf %3, %6 : vector<10x64xf32>
    %c0_6 = arith.constant 0 : index
    %c0_7 = arith.constant 0 : index
    %8 = vector.load %arg8[%c0_6, %c0_7] : memref<10x64xf32, #tpu.memory_space<vmem>>, vector<10x64xf32>
    tpu.vector_store %arg8[%c0_6, %c0_7], %7 {strides = array<i32>} : memref<10x64xf32, #tpu.memory_space<vmem>>, vector<10x64xf32>,
    %c0_i32_8 = arith.constant 0 : i32
    %9 = arith.cmpi eq, %arg2, %c0_i32_8 : i32
    %10 = arith.extui %9 : i1 to i32
    %c0_i32_9 = arith.constant 0 : i32
    %11 = arith.cmpi ne, %10, %c0_i32_9 : i32
    scf.if %11 {
      %c0_10 = arith.constant 0 : index
      %c0_11 = arith.constant 0 : index
      %12 = vector.load %arg8[%c0_10, %c0_11] : memref<10x64xf32, #tpu.memory_space<vmem>>, vector<10x64xf32>
      %c0_12 = arith.constant 0 : index
      %c0_13 = arith.constant 0 : index
      %13 = vector.load %arg5[%c0_12, %c0_13] : memref<1x64xf32, #tpu.memory_space<vmem>>, vector<1x64xf32>
      %14 = vector.broadcast %13 : vector<1x64xf32> to vector<10x64xf32>
      %15 = arith.addf %12, %14 : vector<10x64xf32>
      %c0_14 = arith.constant 0 : index
      %c0_15 = arith.constant 0 : index
      %16 = vector.load %arg6[%c0_14, %c0_15] : memref<10x64xbf16, #tpu.memory_space<vmem>>, vector<10x64xbf16>
      %17 = arith.extf %16 : vector<10x64xbf16> to vector<10x64xf32>
      %18 = arith.addf %15, %17 : vector<10x64xf32>
      %19 = arith.truncf %18 : vector<10x64xf32> to vector<10x64xbf16>
      %c0_16 = arith.constant 0 : index
      %c0_17 = arith.constant 0 : index
      %20 = vector.load %arg7[%c0_16, %c0_17] : memref<10x64xbf16, #tpu.memory_space<vmem>>, vector<10x64xbf16>
      tpu.vector_store %arg7[%c0_16, %c0_17], %19 {strides = array<i32>} : memref<10x64xbf16, #tpu.memory_space<vmem>>, vector<10x64xbf16>,
    } else {
    }
    return
  }
  func.func @transform_0(%arg0: i32, %arg1: i32, %arg2: i32) -> (i32, i32) {
    %c0_i32 = arith.constant 0 : i32
    return %arg0, %arg2 : i32, i32
  }
  func.func @transform_1(%arg0: i32, %arg1: i32, %arg2: i32) -> (i32, i32) {
    %c0_i32 = arith.constant 0 : i32
    return %arg2, %arg1 : i32, i32
  }
  func.func @transform_2(%arg0: i32, %arg1: i32, %arg2: i32) -> (i32, i32) {
    %c0_i32 = arith.constant 0 : i32
    %c0_i32_0 = arith.constant 0 : i32
    return %c0_i32, %arg1 : i32, i32
  }
  func.func @transform_3(%arg0: i32, %arg1: i32, %arg2: i32) -> (i32, i32) {
    %c0_i32 = arith.constant 0 : i32
    return %arg0, %arg1 : i32, i32
  }
  func.func @transform_4(%arg0: i32, %arg1: i32, %arg2: i32) -> (i32, i32) {
    %c0_i32 = arith.constant 0 : i32
    return %arg0, %arg1 : i32, i32
  }
}

module attributes {stable_mosaic.version = 11 : i64} {
  func.func @_ln_matmul_kernel(%arg0: i32, %arg1: i32, %arg2: memref<10x64xbf16, #tpu.memory_space<vmem>>, %arg3: memref<1x64xf32, #tpu.memory_space<vmem>>, %arg4: memref<1x64xf32, #tpu.memory_space<vmem>>, %arg5: memref<64x256xbf16, #tpu.memory_space<vmem>>, %arg6: memref<1x256xf32, #tpu.memory_space<vmem>>, %arg7: memref<10x256xbf16, #tpu.memory_space<vmem>>, %arg8: memref<10x64xbf16, #tpu.memory_space<vmem>>) attributes {dimension_semantics = [#tpu.dimension_semantics<parallel>, #tpu.dimension_semantics<arbitrary>], iteration_bounds = array<i64: 1, 1>, scalar_prefetch = 0 : i64, scratch_operands = 1 : i64, tpu.core_type = #tpu.core_type<tc>, window_params = [{transform_indices = @transform_0, window_bounds = array<i64: 10, 64>}, {pipeline_mode = #tpu.pipeline_mode<synchronous>, transform_indices = @transform_1, window_bounds = array<i64: 1, 64>}, {pipeline_mode = #tpu.pipeline_mode<synchronous>, transform_indices = @transform_2, window_bounds = array<i64: 1, 64>}, {transform_indices = @transform_3, window_bounds = array<i64: 64, 256>}, {transform_indices = @transform_4, window_bounds = array<i64: 1, 256>}, {transform_indices = @transform_5, window_bounds = array<i64: 10, 256>}]} {
    %c0_i32 = arith.constant 0 : i32
    %0 = arith.cmpi eq, %arg1, %c0_i32 : i32
    %1 = arith.extui %0 : i1 to i32
    %c0_i32_0 = arith.constant 0 : i32
    %2 = arith.cmpi ne, %1, %c0_i32_0 : i32
    scf.if %2 {
      %c0_22 = arith.constant 0 : index
      %c0_23 = arith.constant 0 : index
      %50 = vector.load %arg2[%c0_22, %c0_23] : memref<10x64xbf16, #tpu.memory_space<vmem>>, vector<10x64xbf16>
      %51 = arith.extf %50 : vector<10x64xbf16> to vector<10x64xf32>
      %cst_24 = arith.constant dense<0.000000e+00> : vector<10xf32>
      %52 = vector.multi_reduction <add>, %51, %cst_24 [1] : vector<10x64xf32> to vector<10xf32>
      %53 = vector.shape_cast %52 : vector<10xf32> to vector<10x1xf32>
      %cst_25 = arith.constant 6.400000e+01 : f32
      %54 = vector.broadcast %cst_25 : f32 to vector<10x1xf32>
      %55 = arith.divf %53, %54 : vector<10x1xf32>
      %56 = vector.broadcast %55 : vector<10x1xf32> to vector<10x64xf32>
      %57 = arith.subf %51, %56 : vector<10x64xf32>
      %58 = vector.broadcast %55 : vector<10x1xf32> to vector<10x64xf32>
      %59 = arith.subf %51, %58 : vector<10x64xf32>
      %60 = arith.mulf %57, %59 : vector<10x64xf32>
      %cst_26 = arith.constant dense<0.000000e+00> : vector<10xf32>
      %61 = vector.multi_reduction <add>, %60, %cst_26 [1] : vector<10x64xf32> to vector<10xf32>
      %62 = vector.shape_cast %61 : vector<10xf32> to vector<10x1xf32>
      %cst_27 = arith.constant 6.400000e+01 : f32
      %63 = vector.broadcast %cst_27 : f32 to vector<10x1xf32>
      %64 = arith.divf %62, %63 : vector<10x1xf32>
      %65 = vector.broadcast %55 : vector<10x1xf32> to vector<10x64xf32>
      %66 = arith.subf %51, %65 : vector<10x64xf32>
      %cst_28 = arith.constant 9.99999974E-6 : f32
      %67 = vector.broadcast %cst_28 : f32 to vector<10x1xf32>
      %68 = arith.addf %64, %67 : vector<10x1xf32>
      %69 = math.rsqrt %68 : vector<10x1xf32>
      %70 = vector.broadcast %69 : vector<10x1xf32> to vector<10x64xf32>
      %71 = arith.mulf %66, %70 : vector<10x64xf32>
      %c0_29 = arith.constant 0 : index
      %c0_30 = arith.constant 0 : index
      %72 = vector.load %arg3[%c0_29, %c0_30] : memref<1x64xf32, #tpu.memory_space<vmem>>, vector<1x64xf32>
      %73 = vector.broadcast %72 : vector<1x64xf32> to vector<10x64xf32>
      %74 = arith.mulf %71, %73 : vector<10x64xf32>
      %c0_31 = arith.constant 0 : index
      %c0_32 = arith.constant 0 : index
      %75 = vector.load %arg4[%c0_31, %c0_32] : memref<1x64xf32, #tpu.memory_space<vmem>>, vector<1x64xf32>
      %76 = vector.broadcast %75 : vector<1x64xf32> to vector<10x64xf32>
      %77 = arith.addf %74, %76 : vector<10x64xf32>
      %78 = arith.truncf %77 : vector<10x64xf32> to vector<10x64xbf16>
      %c0_33 = arith.constant 0 : index
      %c0_34 = arith.constant 0 : index
      %79 = vector.load %arg8[%c0_33, %c0_34] : memref<10x64xbf16, #tpu.memory_space<vmem>>, vector<10x64xbf16>
      tpu.vector_store %arg8[%c0_33, %c0_34], %78 {strides = array<i32>} : memref<10x64xbf16, #tpu.memory_space<vmem>>, vector<10x64xbf16>,
    } else {
    }
    %c0 = arith.constant 0 : index
    %c0_1 = arith.constant 0 : index
    %3 = vector.load %arg8[%c0, %c0_1] : memref<10x64xbf16, #tpu.memory_space<vmem>>, vector<10x64xbf16>
    %c0_2 = arith.constant 0 : index
    %c0_3 = arith.constant 0 : index
    %4 = vector.load %arg5[%c0_2, %c0_3] : memref<64x256xbf16, #tpu.memory_space<vmem>>, vector<64x256xbf16>
    %cst = arith.constant dense<0.000000e+00> : vector<10x256xf32>
    %5 = tpu.matmul %3, %4, %cst {dimension_numbers = #tpu.dot_dimension_numbers<[1], [0], [0], [1], [0, 0, 1, 1], [], []>} : vector<10x64xbf16>, vector<64x256xbf16>, vector<10x256xf32> -> vector<10x256xf32>
    %c0_4 = arith.constant 0 : index
    %c0_5 = arith.constant 0 : index
    %6 = vector.load %arg6[%c0_4, %c0_5] : memref<1x256xf32, #tpu.memory_space<vmem>>, vector<1x256xf32>
    %7 = vector.broadcast %6 : vector<1x256xf32> to vector<10x256xf32>
    %8 = arith.addf %5, %7 : vector<10x256xf32>
    %cst_6 = arith.constant 5.000000e-01 : f32
    %9 = vector.broadcast %cst_6 : f32 to vector<10x256xf32>
    %10 = arith.mulf %9, %8 : vector<10x256xf32>
    %cst_7 = arith.constant 0.707106769 : f32
    %11 = vector.broadcast %cst_7 : f32 to vector<10x256xf32>
    %12 = arith.mulf %8, %11 : vector<10x256xf32>
    %13 = math.absf %12 : vector<10x256xf32>
    %cst_8 = arith.constant 0.327591091 : f32
    %14 = vector.broadcast %cst_8 : f32 to vector<10x256xf32>
    %15 = arith.mulf %14, %13 : vector<10x256xf32>
    %cst_9 = arith.constant 1.000000e+00 : f32
    %16 = vector.broadcast %cst_9 : f32 to vector<10x256xf32>
    %17 = arith.addf %16, %15 : vector<10x256xf32>
    %18 = tpu.reciprocal %17 {approx = true} : vector<10x256xf32> -> vector<10x256xf32>
    %cst_10 = arith.constant 1.06140542 : f32
    %19 = vector.broadcast %cst_10 : f32 to vector<10x256xf32>
    %20 = arith.mulf %19, %18 : vector<10x256xf32>
    %cst_11 = arith.constant -1.45315206 : f32
    %21 = vector.broadcast %cst_11 : f32 to vector<10x256xf32>
    %22 = arith.addf %20, %21 : vector<10x256xf32>
    %23 = arith.mulf %22, %18 : vector<10x256xf32>
    %cst_12 = arith.constant 1.42141378 : f32
    %24 = vector.broadcast %cst_12 : f32 to vector<10x256xf32>
    %25 = arith.addf %23, %24 : vector<10x256xf32>
    %26 = arith.mulf %25, %18 : vector<10x256xf32>
    %cst_13 = arith.constant -0.284496725 : f32
    %27 = vector.broadcast %cst_13 : f32 to vector<10x256xf32>
    %28 = arith.addf %26, %27 : vector<10x256xf32>
    %29 = arith.mulf %28, %18 : vector<10x256xf32>
    %cst_14 = arith.constant 0.254829586 : f32
    %30 = vector.broadcast %cst_14 : f32 to vector<10x256xf32>
    %31 = arith.addf %29, %30 : vector<10x256xf32>
    %32 = arith.mulf %31, %18 : vector<10x256xf32>
    %cst_15 = arith.constant 0.000000e+00 : f32
    %33 = vector.broadcast %cst_15 : f32 to vector<10x256xf32>
    %34 = arith.subf %33, %13 : vector<10x256xf32>
    %35 = arith.mulf %34, %13 : vector<10x256xf32>
    %36 = math.exp %35 : vector<10x256xf32>
    %37 = arith.mulf %32, %36 : vector<10x256xf32>
    %cst_16 = arith.constant 1.000000e+00 : f32
    %38 = vector.broadcast %cst_16 : f32 to vector<10x256xf32>
    %39 = arith.subf %38, %37 : vector<10x256xf32>
    %cst_17 = arith.constant 0.000000e+00 : f32
    %40 = vector.broadcast %cst_17 : f32 to vector<10x256xf32>
    %41 = arith.cmpf oge, %12, %40 : vector<10x256xf32>
    %cst_18 = arith.constant 0.000000e+00 : f32
    %42 = vector.broadcast %cst_18 : f32 to vector<10x256xf32>
    %43 = arith.subf %42, %39 : vector<10x256xf32>
    %44 = arith.select %41, %39, %43 : vector<10x256xi1>, vector<10x256xf32>
    %cst_19 = arith.constant 1.000000e+00 : f32
    %45 = vector.broadcast %cst_19 : f32 to vector<10x256xf32>
    %46 = arith.addf %45, %44 : vector<10x256xf32>
    %47 = arith.mulf %10, %46 : vector<10x256xf32>
    %48 = arith.truncf %47 : vector<10x256xf32> to vector<10x256xbf16>
    %c0_20 = arith.constant 0 : index
    %c0_21 = arith.constant 0 : index
    %49 = vector.load %arg7[%c0_20, %c0_21] : memref<10x256xbf16, #tpu.memory_space<vmem>>, vector<10x256xbf16>
    tpu.vector_store %arg7[%c0_20, %c0_21], %48 {strides = array<i32>} : memref<10x256xbf16, #tpu.memory_space<vmem>>, vector<10x256xbf16>,
    return
  }
  func.func @transform_0(%arg0: i32, %arg1: i32) -> (i32, i32) {
    %c0_i32 = arith.constant 0 : i32
    %c0_i32_0 = arith.constant 0 : i32
    return %arg0, %c0_i32 : i32, i32
  }
  func.func @transform_1(%arg0: i32, %arg1: i32) -> (i32, i32) {
    %c0_i32 = arith.constant 0 : i32
    %c0_i32_0 = arith.constant 0 : i32
    %c0_i32_1 = arith.constant 0 : i32
    return %c0_i32, %c0_i32_0 : i32, i32
  }
  func.func @transform_2(%arg0: i32, %arg1: i32) -> (i32, i32) {
    %c0_i32 = arith.constant 0 : i32
    %c0_i32_0 = arith.constant 0 : i32
    %c0_i32_1 = arith.constant 0 : i32
    return %c0_i32, %c0_i32_0 : i32, i32
  }
  func.func @transform_3(%arg0: i32, %arg1: i32) -> (i32, i32) {
    %c0_i32 = arith.constant 0 : i32
    %c0_i32_0 = arith.constant 0 : i32
    return %c0_i32, %arg1 : i32, i32
  }
  func.func @transform_4(%arg0: i32, %arg1: i32) -> (i32, i32) {
    %c0_i32 = arith.constant 0 : i32
    %c0_i32_0 = arith.constant 0 : i32
    return %c0_i32, %arg1 : i32, i32
  }
  func.func @transform_5(%arg0: i32, %arg1: i32) -> (i32, i32) {
    %c0_i32 = arith.constant 0 : i32
    return %arg0, %arg1 : i32, i32
  }
}

module attributes {stable_mosaic.version = 11 : i64} {
  func.func @_matmul_kernel(%arg0: i32, %arg1: i32, %arg2: i32, %arg3: memref<10x256xbf16, #tpu.memory_space<vmem>>, %arg4: memref<256x64xbf16, #tpu.memory_space<vmem>>, %arg5: memref<1x64xf32, #tpu.memory_space<vmem>>, %arg6: memref<10x64xbf16, #tpu.memory_space<vmem>>, %arg7: memref<10x64xbf16, #tpu.memory_space<vmem>>, %arg8: memref<10x64xf32, #tpu.memory_space<vmem>>) attributes {dimension_semantics = [#tpu.dimension_semantics<parallel>, #tpu.dimension_semantics<parallel>, #tpu.dimension_semantics<arbitrary>], iteration_bounds = array<i64: 1, 1, 1>, scalar_prefetch = 0 : i64, scratch_operands = 1 : i64, tpu.core_type = #tpu.core_type<tc>, window_params = [{transform_indices = @transform_0, window_bounds = array<i64: 10, 256>}, {transform_indices = @transform_1, window_bounds = array<i64: 256, 64>}, {transform_indices = @transform_2, window_bounds = array<i64: 1, 64>}, {transform_indices = @transform_3, window_bounds = array<i64: 10, 64>}, {transform_indices = @transform_4, window_bounds = array<i64: 10, 64>}]} {
    %c0_i32 = arith.constant 0 : i32
    %0 = arith.cmpi eq, %arg2, %c0_i32 : i32
    %1 = arith.extui %0 : i1 to i32
    %c0_i32_0 = arith.constant 0 : i32
    %2 = arith.cmpi ne, %1, %c0_i32_0 : i32
    scf.if %2 {
      %cst_10 = arith.constant 0.000000e+00 : f32
      %12 = vector.broadcast %cst_10 : f32 to vector<10x64xf32>
      %c0_11 = arith.constant 0 : index
      %c0_12 = arith.constant 0 : index
      %13 = vector.load %arg8[%c0_11, %c0_12] : memref<10x64xf32, #tpu.memory_space<vmem>>, vector<10x64xf32>
      tpu.vector_store %arg8[%c0_11, %c0_12], %12 {strides = array<i32>} : memref<10x64xf32, #tpu.memory_space<vmem>>, vector<10x64xf32>,
    } else {
    }
    %c0 = arith.constant 0 : index
    %c0_1 = arith.constant 0 : index
    %3 = vector.load %arg8[%c0, %c0_1] : memref<10x64xf32, #tpu.memory_space<vmem>>, vector<10x64xf32>
    %c0_2 = arith.constant 0 : index
    %c0_3 = arith.constant 0 : index
    %4 = vector.load %arg3[%c0_2, %c0_3] : memref<10x256xbf16, #tpu.memory_space<vmem>>, vector<10x256xbf16>
    %c0_4 = arith.constant 0 : index
    %c0_5 = arith.constant 0 : index
    %5 = vector.load %arg4[%c0_4, %c0_5] : memref<256x64xbf16, #tpu.memory_space<vmem>>, vector<256x64xbf16>
    %cst = arith.constant dense<0.000000e+00> : vector<10x64xf32>
    %6 = tpu.matmul %4, %5, %cst {dimension_numbers = #tpu.dot_dimension_numbers<[1], [0], [0], [1], [0, 0, 1, 1], [], []>} : vector<10x256xbf16>, vector<256x64xbf16>, vector<10x64xf32> -> vector<10x64xf32>
    %7 = arith.addf %3, %6 : vector<10x64xf32>
    %c0_6 = arith.constant 0 : index
    %c0_7 = arith.constant 0 : index
    %8 = vector.load %arg8[%c0_6, %c0_7] : memref<10x64xf32, #tpu.memory_space<vmem>>, vector<10x64xf32>
    tpu.vector_store %arg8[%c0_6, %c0_7], %7 {strides = array<i32>} : memref<10x64xf32, #tpu.memory_space<vmem>>, vector<10x64xf32>,
    %c0_i32_8 = arith.constant 0 : i32
    %9 = arith.cmpi eq, %arg2, %c0_i32_8 : i32
    %10 = arith.extui %9 : i1 to i32
    %c0_i32_9 = arith.constant 0 : i32
    %11 = arith.cmpi ne, %10, %c0_i32_9 : i32
    scf.if %11 {
      %c0_10 = arith.constant 0 : index
      %c0_11 = arith.constant 0 : index
      %12 = vector.load %arg8[%c0_10, %c0_11] : memref<10x64xf32, #tpu.memory_space<vmem>>, vector<10x64xf32>
      %c0_12 = arith.constant 0 : index
      %c0_13 = arith.constant 0 : index
      %13 = vector.load %arg5[%c0_12, %c0_13] : memref<1x64xf32, #tpu.memory_space<vmem>>, vector<1x64xf32>
      %14 = vector.broadcast %13 : vector<1x64xf32> to vector<10x64xf32>
      %15 = arith.addf %12, %14 : vector<10x64xf32>
      %c0_14 = arith.constant 0 : index
      %c0_15 = arith.constant 0 : index
      %16 = vector.load %arg6[%c0_14, %c0_15] : memref<10x64xbf16, #tpu.memory_space<vmem>>, vector<10x64xbf16>
      %17 = arith.extf %16 : vector<10x64xbf16> to vector<10x64xf32>
      %18 = arith.addf %15, %17 : vector<10x64xf32>
      %19 = arith.truncf %18 : vector<10x64xf32> to vector<10x64xbf16>
      %c0_16 = arith.constant 0 : index
      %c0_17 = arith.constant 0 : index
      %20 = vector.load %arg7[%c0_16, %c0_17] : memref<10x64xbf16, #tpu.memory_space<vmem>>, vector<10x64xbf16>
      tpu.vector_store %arg7[%c0_16, %c0_17], %19 {strides = array<i32>} : memref<10x64xbf16, #tpu.memory_space<vmem>>, vector<10x64xbf16>,
    } else {
    }
    return
  }
  func.func @transform_0(%arg0: i32, %arg1: i32, %arg2: i32) -> (i32, i32) {
    %c0_i32 = arith.constant 0 : i32
    return %arg0, %arg2 : i32, i32
  }
  func.func @transform_1(%arg0: i32, %arg1: i32, %arg2: i32) -> (i32, i32) {
    %c0_i32 = arith.constant 0 : i32
    return %arg2, %arg1 : i32, i32
  }
  func.func @transform_2(%arg0: i32, %arg1: i32, %arg2: i32) -> (i32, i32) {
    %c0_i32 = arith.constant 0 : i32
    %c0_i32_0 = arith.constant 0 : i32
    return %c0_i32, %arg1 : i32, i32
  }
  func.func @transform_3(%arg0: i32, %arg1: i32, %arg2: i32) -> (i32, i32) {
    %c0_i32 = arith.constant 0 : i32
    return %arg0, %arg1 : i32, i32
  }
  func.func @transform_4(%arg0: i32, %arg1: i32, %arg2: i32) -> (i32, i32) {
    %c0_i32 = arith.constant 0 : i32
    return %arg0, %arg1 : i32, i32
  }
}

module attributes {stable_mosaic.version = 11 : i64} {
  func.func @_ln_matmul_kernel(%arg0: i32, %arg1: i32, %arg2: memref<10x64xbf16, #tpu.memory_space<vmem>>, %arg3: memref<1x64xf32, #tpu.memory_space<vmem>>, %arg4: memref<1x64xf32, #tpu.memory_space<vmem>>, %arg5: memref<64x32xbf16, #tpu.memory_space<vmem>>, %arg6: memref<1x32xf32, #tpu.memory_space<vmem>>, %arg7: memref<10x32xbf16, #tpu.memory_space<vmem>>, %arg8: memref<10x64xbf16, #tpu.memory_space<vmem>>) attributes {dimension_semantics = [#tpu.dimension_semantics<parallel>, #tpu.dimension_semantics<arbitrary>], iteration_bounds = array<i64: 1, 1>, scalar_prefetch = 0 : i64, scratch_operands = 1 : i64, tpu.core_type = #tpu.core_type<tc>, window_params = [{transform_indices = @transform_0, window_bounds = array<i64: 10, 64>}, {pipeline_mode = #tpu.pipeline_mode<synchronous>, transform_indices = @transform_1, window_bounds = array<i64: 1, 64>}, {pipeline_mode = #tpu.pipeline_mode<synchronous>, transform_indices = @transform_2, window_bounds = array<i64: 1, 64>}, {transform_indices = @transform_3, window_bounds = array<i64: 64, 32>}, {transform_indices = @transform_4, window_bounds = array<i64: 1, 32>}, {transform_indices = @transform_5, window_bounds = array<i64: 10, 32>}]} {
    %c0_i32 = arith.constant 0 : i32
    %0 = arith.cmpi eq, %arg1, %c0_i32 : i32
    %1 = arith.extui %0 : i1 to i32
    %c0_i32_0 = arith.constant 0 : i32
    %2 = arith.cmpi ne, %1, %c0_i32_0 : i32
    scf.if %2 {
      %c0_8 = arith.constant 0 : index
      %c0_9 = arith.constant 0 : index
      %11 = vector.load %arg2[%c0_8, %c0_9] : memref<10x64xbf16, #tpu.memory_space<vmem>>, vector<10x64xbf16>
      %12 = arith.extf %11 : vector<10x64xbf16> to vector<10x64xf32>
      %cst_10 = arith.constant dense<0.000000e+00> : vector<10xf32>
      %13 = vector.multi_reduction <add>, %12, %cst_10 [1] : vector<10x64xf32> to vector<10xf32>
      %14 = vector.shape_cast %13 : vector<10xf32> to vector<10x1xf32>
      %cst_11 = arith.constant 6.400000e+01 : f32
      %15 = vector.broadcast %cst_11 : f32 to vector<10x1xf32>
      %16 = arith.divf %14, %15 : vector<10x1xf32>
      %17 = vector.broadcast %16 : vector<10x1xf32> to vector<10x64xf32>
      %18 = arith.subf %12, %17 : vector<10x64xf32>
      %19 = vector.broadcast %16 : vector<10x1xf32> to vector<10x64xf32>
      %20 = arith.subf %12, %19 : vector<10x64xf32>
      %21 = arith.mulf %18, %20 : vector<10x64xf32>
      %cst_12 = arith.constant dense<0.000000e+00> : vector<10xf32>
      %22 = vector.multi_reduction <add>, %21, %cst_12 [1] : vector<10x64xf32> to vector<10xf32>
      %23 = vector.shape_cast %22 : vector<10xf32> to vector<10x1xf32>
      %cst_13 = arith.constant 6.400000e+01 : f32
      %24 = vector.broadcast %cst_13 : f32 to vector<10x1xf32>
      %25 = arith.divf %23, %24 : vector<10x1xf32>
      %26 = vector.broadcast %16 : vector<10x1xf32> to vector<10x64xf32>
      %27 = arith.subf %12, %26 : vector<10x64xf32>
      %cst_14 = arith.constant 9.99999974E-6 : f32
      %28 = vector.broadcast %cst_14 : f32 to vector<10x1xf32>
      %29 = arith.addf %25, %28 : vector<10x1xf32>
      %30 = math.rsqrt %29 : vector<10x1xf32>
      %31 = vector.broadcast %30 : vector<10x1xf32> to vector<10x64xf32>
      %32 = arith.mulf %27, %31 : vector<10x64xf32>
      %c0_15 = arith.constant 0 : index
      %c0_16 = arith.constant 0 : index
      %33 = vector.load %arg3[%c0_15, %c0_16] : memref<1x64xf32, #tpu.memory_space<vmem>>, vector<1x64xf32>
      %34 = vector.broadcast %33 : vector<1x64xf32> to vector<10x64xf32>
      %35 = arith.mulf %32, %34 : vector<10x64xf32>
      %c0_17 = arith.constant 0 : index
      %c0_18 = arith.constant 0 : index
      %36 = vector.load %arg4[%c0_17, %c0_18] : memref<1x64xf32, #tpu.memory_space<vmem>>, vector<1x64xf32>
      %37 = vector.broadcast %36 : vector<1x64xf32> to vector<10x64xf32>
      %38 = arith.addf %35, %37 : vector<10x64xf32>
      %39 = arith.truncf %38 : vector<10x64xf32> to vector<10x64xbf16>
      %c0_19 = arith.constant 0 : index
      %c0_20 = arith.constant 0 : index
      %40 = vector.load %arg8[%c0_19, %c0_20] : memref<10x64xbf16, #tpu.memory_space<vmem>>, vector<10x64xbf16>
      tpu.vector_store %arg8[%c0_19, %c0_20], %39 {strides = array<i32>} : memref<10x64xbf16, #tpu.memory_space<vmem>>, vector<10x64xbf16>,
    } else {
    }
    %c0 = arith.constant 0 : index
    %c0_1 = arith.constant 0 : index
    %3 = vector.load %arg8[%c0, %c0_1] : memref<10x64xbf16, #tpu.memory_space<vmem>>, vector<10x64xbf16>
    %c0_2 = arith.constant 0 : index
    %c0_3 = arith.constant 0 : index
    %4 = vector.load %arg5[%c0_2, %c0_3] : memref<64x32xbf16, #tpu.memory_space<vmem>>, vector<64x32xbf16>
    %cst = arith.constant dense<0.000000e+00> : vector<10x32xf32>
    %5 = tpu.matmul %3, %4, %cst {dimension_numbers = #tpu.dot_dimension_numbers<[1], [0], [0], [1], [0, 0, 1, 1], [], []>} : vector<10x64xbf16>, vector<64x32xbf16>, vector<10x32xf32> -> vector<10x32xf32>
    %c0_4 = arith.constant 0 : index
    %c0_5 = arith.constant 0 : index
    %6 = vector.load %arg6[%c0_4, %c0_5] : memref<1x32xf32, #tpu.memory_space<vmem>>, vector<1x32xf32>
    %7 = vector.broadcast %6 : vector<1x32xf32> to vector<10x32xf32>
    %8 = arith.addf %5, %7 : vector<10x32xf32>
    %9 = arith.truncf %8 : vector<10x32xf32> to vector<10x32xbf16>
    %c0_6 = arith.constant 0 : index
    %c0_7 = arith.constant 0 : index
    %10 = vector.load %arg7[%c0_6, %c0_7] : memref<10x32xbf16, #tpu.memory_space<vmem>>, vector<10x32xbf16>
    tpu.vector_store %arg7[%c0_6, %c0_7], %9 {strides = array<i32>} : memref<10x32xbf16, #tpu.memory_space<vmem>>, vector<10x32xbf16>,
    return
  }
  func.func @transform_0(%arg0: i32, %arg1: i32) -> (i32, i32) {
    %c0_i32 = arith.constant 0 : i32
    %c0_i32_0 = arith.constant 0 : i32
    return %arg0, %c0_i32 : i32, i32
  }
  func.func @transform_1(%arg0: i32, %arg1: i32) -> (i32, i32) {
    %c0_i32 = arith.constant 0 : i32
    %c0_i32_0 = arith.constant 0 : i32
    %c0_i32_1 = arith.constant 0 : i32
    return %c0_i32, %c0_i32_0 : i32, i32
  }
  func.func @transform_2(%arg0: i32, %arg1: i32) -> (i32, i32) {
    %c0_i32 = arith.constant 0 : i32
    %c0_i32_0 = arith.constant 0 : i32
    %c0_i32_1 = arith.constant 0 : i32
    return %c0_i32, %c0_i32_0 : i32, i32
  }
  func.func @transform_3(%arg0: i32, %arg1: i32) -> (i32, i32) {
    %c0_i32 = arith.constant 0 : i32
    %c0_i32_0 = arith.constant 0 : i32
    return %c0_i32, %arg1 : i32, i32
  }
  func.func @transform_4(%arg0: i32, %arg1: i32) -> (i32, i32) {
    %c0_i32 = arith.constant 0 : i32
    %c0_i32_0 = arith.constant 0 : i32
    return %c0_i32, %arg1 : i32, i32
  }
  func.func @transform_5(%arg0: i32, %arg1: i32) -> (i32, i32) {
    %c0_i32 = arith.constant 0 : i32
    return %arg0, %arg1 : i32, i32
  }
}

module attributes {stable_mosaic.version = 11 : i64} {
  func.func @_ln_matmul_kernel(%arg0: i32, %arg1: i32, %arg2: memref<34x32xbf16, #tpu.memory_space<vmem>>, %arg3: memref<1x32xf32, #tpu.memory_space<vmem>>, %arg4: memref<1x32xf32, #tpu.memory_space<vmem>>, %arg5: memref<32x96xbf16, #tpu.memory_space<vmem>>, %arg6: memref<1x96xf32, #tpu.memory_space<vmem>>, %arg7: memref<34x96xbf16, #tpu.memory_space<vmem>>, %arg8: memref<34x32xbf16, #tpu.memory_space<vmem>>) attributes {dimension_semantics = [#tpu.dimension_semantics<parallel>, #tpu.dimension_semantics<arbitrary>], iteration_bounds = array<i64: 1, 1>, scalar_prefetch = 0 : i64, scratch_operands = 1 : i64, tpu.core_type = #tpu.core_type<tc>, window_params = [{transform_indices = @transform_0, window_bounds = array<i64: 34, 32>}, {pipeline_mode = #tpu.pipeline_mode<synchronous>, transform_indices = @transform_1, window_bounds = array<i64: 1, 32>}, {pipeline_mode = #tpu.pipeline_mode<synchronous>, transform_indices = @transform_2, window_bounds = array<i64: 1, 32>}, {transform_indices = @transform_3, window_bounds = array<i64: 32, 96>}, {transform_indices = @transform_4, window_bounds = array<i64: 1, 96>}, {transform_indices = @transform_5, window_bounds = array<i64: 34, 96>}]} {
    %c0_i32 = arith.constant 0 : i32
    %0 = arith.cmpi eq, %arg1, %c0_i32 : i32
    %1 = arith.extui %0 : i1 to i32
    %c0_i32_0 = arith.constant 0 : i32
    %2 = arith.cmpi ne, %1, %c0_i32_0 : i32
    scf.if %2 {
      %c0_8 = arith.constant 0 : index
      %c0_9 = arith.constant 0 : index
      %11 = vector.load %arg2[%c0_8, %c0_9] : memref<34x32xbf16, #tpu.memory_space<vmem>>, vector<34x32xbf16>
      %12 = arith.extf %11 : vector<34x32xbf16> to vector<34x32xf32>
      %cst_10 = arith.constant dense<0.000000e+00> : vector<34xf32>
      %13 = vector.multi_reduction <add>, %12, %cst_10 [1] : vector<34x32xf32> to vector<34xf32>
      %14 = vector.shape_cast %13 : vector<34xf32> to vector<34x1xf32>
      %cst_11 = arith.constant 3.200000e+01 : f32
      %15 = vector.broadcast %cst_11 : f32 to vector<34x1xf32>
      %16 = arith.divf %14, %15 : vector<34x1xf32>
      %17 = vector.broadcast %16 : vector<34x1xf32> to vector<34x32xf32>
      %18 = arith.subf %12, %17 : vector<34x32xf32>
      %19 = vector.broadcast %16 : vector<34x1xf32> to vector<34x32xf32>
      %20 = arith.subf %12, %19 : vector<34x32xf32>
      %21 = arith.mulf %18, %20 : vector<34x32xf32>
      %cst_12 = arith.constant dense<0.000000e+00> : vector<34xf32>
      %22 = vector.multi_reduction <add>, %21, %cst_12 [1] : vector<34x32xf32> to vector<34xf32>
      %23 = vector.shape_cast %22 : vector<34xf32> to vector<34x1xf32>
      %cst_13 = arith.constant 3.200000e+01 : f32
      %24 = vector.broadcast %cst_13 : f32 to vector<34x1xf32>
      %25 = arith.divf %23, %24 : vector<34x1xf32>
      %26 = vector.broadcast %16 : vector<34x1xf32> to vector<34x32xf32>
      %27 = arith.subf %12, %26 : vector<34x32xf32>
      %cst_14 = arith.constant 9.99999974E-6 : f32
      %28 = vector.broadcast %cst_14 : f32 to vector<34x1xf32>
      %29 = arith.addf %25, %28 : vector<34x1xf32>
      %30 = math.rsqrt %29 : vector<34x1xf32>
      %31 = vector.broadcast %30 : vector<34x1xf32> to vector<34x32xf32>
      %32 = arith.mulf %27, %31 : vector<34x32xf32>
      %c0_15 = arith.constant 0 : index
      %c0_16 = arith.constant 0 : index
      %33 = vector.load %arg3[%c0_15, %c0_16] : memref<1x32xf32, #tpu.memory_space<vmem>>, vector<1x32xf32>
      %34 = vector.broadcast %33 : vector<1x32xf32> to vector<34x32xf32>
      %35 = arith.mulf %32, %34 : vector<34x32xf32>
      %c0_17 = arith.constant 0 : index
      %c0_18 = arith.constant 0 : index
      %36 = vector.load %arg4[%c0_17, %c0_18] : memref<1x32xf32, #tpu.memory_space<vmem>>, vector<1x32xf32>
      %37 = vector.broadcast %36 : vector<1x32xf32> to vector<34x32xf32>
      %38 = arith.addf %35, %37 : vector<34x32xf32>
      %39 = arith.truncf %38 : vector<34x32xf32> to vector<34x32xbf16>
      %c0_19 = arith.constant 0 : index
      %c0_20 = arith.constant 0 : index
      %40 = vector.load %arg8[%c0_19, %c0_20] : memref<34x32xbf16, #tpu.memory_space<vmem>>, vector<34x32xbf16>
      tpu.vector_store %arg8[%c0_19, %c0_20], %39 {strides = array<i32>} : memref<34x32xbf16, #tpu.memory_space<vmem>>, vector<34x32xbf16>,
    } else {
    }
    %c0 = arith.constant 0 : index
    %c0_1 = arith.constant 0 : index
    %3 = vector.load %arg8[%c0, %c0_1] : memref<34x32xbf16, #tpu.memory_space<vmem>>, vector<34x32xbf16>
    %c0_2 = arith.constant 0 : index
    %c0_3 = arith.constant 0 : index
    %4 = vector.load %arg5[%c0_2, %c0_3] : memref<32x96xbf16, #tpu.memory_space<vmem>>, vector<32x96xbf16>
    %cst = arith.constant dense<0.000000e+00> : vector<34x96xf32>
    %5 = tpu.matmul %3, %4, %cst {dimension_numbers = #tpu.dot_dimension_numbers<[1], [0], [0], [1], [0, 0, 1, 1], [], []>} : vector<34x32xbf16>, vector<32x96xbf16>, vector<34x96xf32> -> vector<34x96xf32>
    %c0_4 = arith.constant 0 : index
    %c0_5 = arith.constant 0 : index
    %6 = vector.load %arg6[%c0_4, %c0_5] : memref<1x96xf32, #tpu.memory_space<vmem>>, vector<1x96xf32>
    %7 = vector.broadcast %6 : vector<1x96xf32> to vector<34x96xf32>
    %8 = arith.addf %5, %7 : vector<34x96xf32>
    %9 = arith.truncf %8 : vector<34x96xf32> to vector<34x96xbf16>
    %c0_6 = arith.constant 0 : index
    %c0_7 = arith.constant 0 : index
    %10 = vector.load %arg7[%c0_6, %c0_7] : memref<34x96xbf16, #tpu.memory_space<vmem>>, vector<34x96xbf16>
    tpu.vector_store %arg7[%c0_6, %c0_7], %9 {strides = array<i32>} : memref<34x96xbf16, #tpu.memory_space<vmem>>, vector<34x96xbf16>,
    return
  }
  func.func @transform_0(%arg0: i32, %arg1: i32) -> (i32, i32) {
    %c0_i32 = arith.constant 0 : i32
    %c0_i32_0 = arith.constant 0 : i32
    return %arg0, %c0_i32 : i32, i32
  }
  func.func @transform_1(%arg0: i32, %arg1: i32) -> (i32, i32) {
    %c0_i32 = arith.constant 0 : i32
    %c0_i32_0 = arith.constant 0 : i32
    %c0_i32_1 = arith.constant 0 : i32
    return %c0_i32, %c0_i32_0 : i32, i32
  }
  func.func @transform_2(%arg0: i32, %arg1: i32) -> (i32, i32) {
    %c0_i32 = arith.constant 0 : i32
    %c0_i32_0 = arith.constant 0 : i32
    %c0_i32_1 = arith.constant 0 : i32
    return %c0_i32, %c0_i32_0 : i32, i32
  }
  func.func @transform_3(%arg0: i32, %arg1: i32) -> (i32, i32) {
    %c0_i32 = arith.constant 0 : i32
    %c0_i32_0 = arith.constant 0 : i32
    return %c0_i32, %arg1 : i32, i32
  }
  func.func @transform_4(%arg0: i32, %arg1: i32) -> (i32, i32) {
    %c0_i32 = arith.constant 0 : i32
    %c0_i32_0 = arith.constant 0 : i32
    return %c0_i32, %arg1 : i32, i32
  }
  func.func @transform_5(%arg0: i32, %arg1: i32) -> (i32, i32) {
    %c0_i32 = arith.constant 0 : i32
    return %arg0, %arg1 : i32, i32
  }
}

module attributes {stable_mosaic.version = 11 : i64} {
  func.func @_matmul_kernel(%arg0: i32, %arg1: i32, %arg2: i32, %arg3: memref<34x32xbf16, #tpu.memory_space<vmem>>, %arg4: memref<32x32xbf16, #tpu.memory_space<vmem>>, %arg5: memref<1x32xf32, #tpu.memory_space<vmem>>, %arg6: memref<34x32xbf16, #tpu.memory_space<vmem>>, %arg7: memref<34x32xbf16, #tpu.memory_space<vmem>>, %arg8: memref<34x32xf32, #tpu.memory_space<vmem>>) attributes {dimension_semantics = [#tpu.dimension_semantics<parallel>, #tpu.dimension_semantics<parallel>, #tpu.dimension_semantics<arbitrary>], iteration_bounds = array<i64: 1, 1, 1>, scalar_prefetch = 0 : i64, scratch_operands = 1 : i64, tpu.core_type = #tpu.core_type<tc>, window_params = [{transform_indices = @transform_0, window_bounds = array<i64: 34, 32>}, {transform_indices = @transform_1, window_bounds = array<i64: 32, 32>}, {transform_indices = @transform_2, window_bounds = array<i64: 1, 32>}, {transform_indices = @transform_3, window_bounds = array<i64: 34, 32>}, {transform_indices = @transform_4, window_bounds = array<i64: 34, 32>}]} {
    %c0_i32 = arith.constant 0 : i32
    %0 = arith.cmpi eq, %arg2, %c0_i32 : i32
    %1 = arith.extui %0 : i1 to i32
    %c0_i32_0 = arith.constant 0 : i32
    %2 = arith.cmpi ne, %1, %c0_i32_0 : i32
    scf.if %2 {
      %cst_10 = arith.constant 0.000000e+00 : f32
      %12 = vector.broadcast %cst_10 : f32 to vector<34x32xf32>
      %c0_11 = arith.constant 0 : index
      %c0_12 = arith.constant 0 : index
      %13 = vector.load %arg8[%c0_11, %c0_12] : memref<34x32xf32, #tpu.memory_space<vmem>>, vector<34x32xf32>
      tpu.vector_store %arg8[%c0_11, %c0_12], %12 {strides = array<i32>} : memref<34x32xf32, #tpu.memory_space<vmem>>, vector<34x32xf32>,
    } else {
    }
    %c0 = arith.constant 0 : index
    %c0_1 = arith.constant 0 : index
    %3 = vector.load %arg8[%c0, %c0_1] : memref<34x32xf32, #tpu.memory_space<vmem>>, vector<34x32xf32>
    %c0_2 = arith.constant 0 : index
    %c0_3 = arith.constant 0 : index
    %4 = vector.load %arg3[%c0_2, %c0_3] : memref<34x32xbf16, #tpu.memory_space<vmem>>, vector<34x32xbf16>
    %c0_4 = arith.constant 0 : index
    %c0_5 = arith.constant 0 : index
    %5 = vector.load %arg4[%c0_4, %c0_5] : memref<32x32xbf16, #tpu.memory_space<vmem>>, vector<32x32xbf16>
    %cst = arith.constant dense<0.000000e+00> : vector<34x32xf32>
    %6 = tpu.matmul %4, %5, %cst {dimension_numbers = #tpu.dot_dimension_numbers<[1], [0], [0], [1], [0, 0, 1, 1], [], []>} : vector<34x32xbf16>, vector<32x32xbf16>, vector<34x32xf32> -> vector<34x32xf32>
    %7 = arith.addf %3, %6 : vector<34x32xf32>
    %c0_6 = arith.constant 0 : index
    %c0_7 = arith.constant 0 : index
    %8 = vector.load %arg8[%c0_6, %c0_7] : memref<34x32xf32, #tpu.memory_space<vmem>>, vector<34x32xf32>
    tpu.vector_store %arg8[%c0_6, %c0_7], %7 {strides = array<i32>} : memref<34x32xf32, #tpu.memory_space<vmem>>, vector<34x32xf32>,
    %c0_i32_8 = arith.constant 0 : i32
    %9 = arith.cmpi eq, %arg2, %c0_i32_8 : i32
    %10 = arith.extui %9 : i1 to i32
    %c0_i32_9 = arith.constant 0 : i32
    %11 = arith.cmpi ne, %10, %c0_i32_9 : i32
    scf.if %11 {
      %c0_10 = arith.constant 0 : index
      %c0_11 = arith.constant 0 : index
      %12 = vector.load %arg8[%c0_10, %c0_11] : memref<34x32xf32, #tpu.memory_space<vmem>>, vector<34x32xf32>
      %c0_12 = arith.constant 0 : index
      %c0_13 = arith.constant 0 : index
      %13 = vector.load %arg5[%c0_12, %c0_13] : memref<1x32xf32, #tpu.memory_space<vmem>>, vector<1x32xf32>
      %14 = vector.broadcast %13 : vector<1x32xf32> to vector<34x32xf32>
      %15 = arith.addf %12, %14 : vector<34x32xf32>
      %c0_14 = arith.constant 0 : index
      %c0_15 = arith.constant 0 : index
      %16 = vector.load %arg6[%c0_14, %c0_15] : memref<34x32xbf16, #tpu.memory_space<vmem>>, vector<34x32xbf16>
      %17 = arith.extf %16 : vector<34x32xbf16> to vector<34x32xf32>
      %18 = arith.addf %15, %17 : vector<34x32xf32>
      %19 = arith.truncf %18 : vector<34x32xf32> to vector<34x32xbf16>
      %c0_16 = arith.constant 0 : index
      %c0_17 = arith.constant 0 : index
      %20 = vector.load %arg7[%c0_16, %c0_17] : memref<34x32xbf16, #tpu.memory_space<vmem>>, vector<34x32xbf16>
      tpu.vector_store %arg7[%c0_16, %c0_17], %19 {strides = array<i32>} : memref<34x32xbf16, #tpu.memory_space<vmem>>, vector<34x32xbf16>,
    } else {
    }
    return
  }
  func.func @transform_0(%arg0: i32, %arg1: i32, %arg2: i32) -> (i32, i32) {
    %c0_i32 = arith.constant 0 : i32
    return %arg0, %arg2 : i32, i32
  }
  func.func @transform_1(%arg0: i32, %arg1: i32, %arg2: i32) -> (i32, i32) {
    %c0_i32 = arith.constant 0 : i32
    return %arg2, %arg1 : i32, i32
  }
  func.func @transform_2(%arg0: i32, %arg1: i32, %arg2: i32) -> (i32, i32) {
    %c0_i32 = arith.constant 0 : i32
    %c0_i32_0 = arith.constant 0 : i32
    return %c0_i32, %arg1 : i32, i32
  }
  func.func @transform_3(%arg0: i32, %arg1: i32, %arg2: i32) -> (i32, i32) {
    %c0_i32 = arith.constant 0 : i32
    return %arg0, %arg1 : i32, i32
  }
  func.func @transform_4(%arg0: i32, %arg1: i32, %arg2: i32) -> (i32, i32) {
    %c0_i32 = arith.constant 0 : i32
    return %arg0, %arg1 : i32, i32
  }
}

module attributes {stable_mosaic.version = 11 : i64} {
  func.func @_attention_kernel(%arg0: i32, %arg1: memref<1x17x96xbf16, #tpu.memory_space<vmem>>, %arg2: memref<1x17x32xbf16, #tpu.memory_space<vmem>>) attributes {dimension_semantics = [#tpu.dimension_semantics<parallel>], iteration_bounds = array<i64: 2>, scalar_prefetch = 0 : i64, scratch_operands = 0 : i64, tpu.core_type = #tpu.core_type<tc>, window_params = [{transform_indices = @transform_0, window_bounds = array<i64: 1, 17, 96>}, {transform_indices = @transform_1, window_bounds = array<i64: 1, 17, 32>}]} {
    %c0 = arith.constant 0 : index
    %c0_0 = arith.constant 0 : index
    %c0_1 = arith.constant 0 : index
    %0 = vector.load %arg1[%c0, %c0_0, %c0_1] : memref<1x17x96xbf16, #tpu.memory_space<vmem>>, vector<1x17x96xbf16>
    %1 = vector.shape_cast %0 : vector<1x17x96xbf16> to vector<17x96xbf16>
    %2 = vector.extract_strided_slice %1 {offsets = [0, 0], sizes = [17, 8], strides = [1, 1]} : vector<17x96xbf16> to vector<17x8xbf16>
    %3 = arith.extf %2 : vector<17x8xbf16> to vector<17x8xf32>
    %cst = arith.constant 0.353553385 : f32
    %4 = vector.broadcast %cst : f32 to vector<17x8xf32>
    %5 = arith.mulf %3, %4 : vector<17x8xf32>
    %6 = arith.truncf %5 : vector<17x8xf32> to vector<17x8xbf16>
    %7 = vector.extract_strided_slice %1 {offsets = [0, 32], sizes = [17, 8], strides = [1, 1]} : vector<17x96xbf16> to vector<17x8xbf16>
    %8 = vector.extract_strided_slice %1 {offsets = [0, 64], sizes = [17, 8], strides = [1, 1]} : vector<17x96xbf16> to vector<17x8xbf16>
    %cst_2 = arith.constant dense<0.000000e+00> : vector<17x17xf32>
    %9 = tpu.matmul %6, %7, %cst_2 {dimension_numbers = #tpu.dot_dimension_numbers<[1], [1], [0], [0], [0, 0, 1, 0], [], []>} : vector<17x8xbf16>, vector<17x8xbf16>, vector<17x17xf32> -> vector<17x17xf32>
    %cst_3 = arith.constant dense<0xFF800000> : vector<17xf32>
    %10 = vector.multi_reduction <maximumf>, %9, %cst_3 [1] : vector<17x17xf32> to vector<17xf32>
    %11 = vector.shape_cast %10 : vector<17xf32> to vector<17x1xf32>
    %12 = vector.broadcast %11 : vector<17x1xf32> to vector<17x17xf32>
    %13 = arith.subf %9, %12 : vector<17x17xf32>
    %14 = math.exp %13 : vector<17x17xf32>
    %cst_4 = arith.constant dense<0.000000e+00> : vector<17xf32>
    %15 = vector.multi_reduction <add>, %14, %cst_4 [1] : vector<17x17xf32> to vector<17xf32>
    %16 = vector.shape_cast %15 : vector<17xf32> to vector<17x1xf32>
    %17 = tpu.reciprocal %16 {approx = true} : vector<17x1xf32> -> vector<17x1xf32>
    %18 = vector.broadcast %17 : vector<17x1xf32> to vector<17x17xf32>
    %19 = arith.mulf %14, %18 : vector<17x17xf32>
    %20 = arith.truncf %19 : vector<17x17xf32> to vector<17x17xbf16>
    %cst_5 = arith.constant dense<0.000000e+00> : vector<17x8xf32>
    %21 = tpu.matmul %20, %8, %cst_5 {dimension_numbers = #tpu.dot_dimension_numbers<[1], [0], [0], [1], [0, 0, 1, 1], [], []>} : vector<17x17xbf16>, vector<17x8xbf16>, vector<17x8xf32> -> vector<17x8xf32>
    %22 = arith.truncf %21 : vector<17x8xf32> to vector<17x8xbf16>
    %c0_6 = arith.constant 0 : index
    %c0_7 = arith.constant 0 : index
    %c0_8 = arith.constant 0 : index
    %23 = vector.load %arg2[%c0_6, %c0_7, %c0_8] : memref<1x17x32xbf16, #tpu.memory_space<vmem>>, vector<1x17x8xbf16>
    %24 = vector.shape_cast %23 : vector<1x17x8xbf16> to vector<17x8xbf16>
    %25 = vector.shape_cast %22 : vector<17x8xbf16> to vector<1x17x8xbf16>
    tpu.vector_store %arg2[%c0_6, %c0_7, %c0_8], %25 {strides = array<i32>} : memref<1x17x32xbf16, #tpu.memory_space<vmem>>, vector<1x17x8xbf16>,
    %26 = vector.extract_strided_slice %1 {offsets = [0, 8], sizes = [17, 8], strides = [1, 1]} : vector<17x96xbf16> to vector<17x8xbf16>
    %27 = arith.extf %26 : vector<17x8xbf16> to vector<17x8xf32>
    %cst_9 = arith.constant 0.353553385 : f32
    %28 = vector.broadcast %cst_9 : f32 to vector<17x8xf32>
    %29 = arith.mulf %27, %28 : vector<17x8xf32>
    %30 = arith.truncf %29 : vector<17x8xf32> to vector<17x8xbf16>
    %31 = vector.extract_strided_slice %1 {offsets = [0, 40], sizes = [17, 8], strides = [1, 1]} : vector<17x96xbf16> to vector<17x8xbf16>
    %32 = vector.extract_strided_slice %1 {offsets = [0, 72], sizes = [17, 8], strides = [1, 1]} : vector<17x96xbf16> to vector<17x8xbf16>
    %cst_10 = arith.constant dense<0.000000e+00> : vector<17x17xf32>
    %33 = tpu.matmul %30, %31, %cst_10 {dimension_numbers = #tpu.dot_dimension_numbers<[1], [1], [0], [0], [0, 0, 1, 0], [], []>} : vector<17x8xbf16>, vector<17x8xbf16>, vector<17x17xf32> -> vector<17x17xf32>
    %cst_11 = arith.constant dense<0xFF800000> : vector<17xf32>
    %34 = vector.multi_reduction <maximumf>, %33, %cst_11 [1] : vector<17x17xf32> to vector<17xf32>
    %35 = vector.shape_cast %34 : vector<17xf32> to vector<17x1xf32>
    %36 = vector.broadcast %35 : vector<17x1xf32> to vector<17x17xf32>
    %37 = arith.subf %33, %36 : vector<17x17xf32>
    %38 = math.exp %37 : vector<17x17xf32>
    %cst_12 = arith.constant dense<0.000000e+00> : vector<17xf32>
    %39 = vector.multi_reduction <add>, %38, %cst_12 [1] : vector<17x17xf32> to vector<17xf32>
    %40 = vector.shape_cast %39 : vector<17xf32> to vector<17x1xf32>
    %41 = tpu.reciprocal %40 {approx = true} : vector<17x1xf32> -> vector<17x1xf32>
    %42 = vector.broadcast %41 : vector<17x1xf32> to vector<17x17xf32>
    %43 = arith.mulf %38, %42 : vector<17x17xf32>
    %44 = arith.truncf %43 : vector<17x17xf32> to vector<17x17xbf16>
    %cst_13 = arith.constant dense<0.000000e+00> : vector<17x8xf32>
    %45 = tpu.matmul %44, %32, %cst_13 {dimension_numbers = #tpu.dot_dimension_numbers<[1], [0], [0], [1], [0, 0, 1, 1], [], []>} : vector<17x17xbf16>, vector<17x8xbf16>, vector<17x8xf32> -> vector<17x8xf32>
    %46 = arith.truncf %45 : vector<17x8xf32> to vector<17x8xbf16>
    %c0_14 = arith.constant 0 : index
    %c0_15 = arith.constant 0 : index
    %c8 = arith.constant 8 : index
    %47 = vector.load %arg2[%c0_14, %c0_15, %c8] : memref<1x17x32xbf16, #tpu.memory_space<vmem>>, vector<1x17x8xbf16>
    %48 = vector.shape_cast %47 : vector<1x17x8xbf16> to vector<17x8xbf16>
    %49 = vector.shape_cast %46 : vector<17x8xbf16> to vector<1x17x8xbf16>
    tpu.vector_store %arg2[%c0_14, %c0_15, %c8], %49 {strides = array<i32>} : memref<1x17x32xbf16, #tpu.memory_space<vmem>>, vector<1x17x8xbf16>,
    %50 = vector.extract_strided_slice %1 {offsets = [0, 16], sizes = [17, 8], strides = [1, 1]} : vector<17x96xbf16> to vector<17x8xbf16>
    %51 = arith.extf %50 : vector<17x8xbf16> to vector<17x8xf32>
    %cst_16 = arith.constant 0.353553385 : f32
    %52 = vector.broadcast %cst_16 : f32 to vector<17x8xf32>
    %53 = arith.mulf %51, %52 : vector<17x8xf32>
    %54 = arith.truncf %53 : vector<17x8xf32> to vector<17x8xbf16>
    %55 = vector.extract_strided_slice %1 {offsets = [0, 48], sizes = [17, 8], strides = [1, 1]} : vector<17x96xbf16> to vector<17x8xbf16>
    %56 = vector.extract_strided_slice %1 {offsets = [0, 80], sizes = [17, 8], strides = [1, 1]} : vector<17x96xbf16> to vector<17x8xbf16>
    %cst_17 = arith.constant dense<0.000000e+00> : vector<17x17xf32>
    %57 = tpu.matmul %54, %55, %cst_17 {dimension_numbers = #tpu.dot_dimension_numbers<[1], [1], [0], [0], [0, 0, 1, 0], [], []>} : vector<17x8xbf16>, vector<17x8xbf16>, vector<17x17xf32> -> vector<17x17xf32>
    %cst_18 = arith.constant dense<0xFF800000> : vector<17xf32>
    %58 = vector.multi_reduction <maximumf>, %57, %cst_18 [1] : vector<17x17xf32> to vector<17xf32>
    %59 = vector.shape_cast %58 : vector<17xf32> to vector<17x1xf32>
    %60 = vector.broadcast %59 : vector<17x1xf32> to vector<17x17xf32>
    %61 = arith.subf %57, %60 : vector<17x17xf32>
    %62 = math.exp %61 : vector<17x17xf32>
    %cst_19 = arith.constant dense<0.000000e+00> : vector<17xf32>
    %63 = vector.multi_reduction <add>, %62, %cst_19 [1] : vector<17x17xf32> to vector<17xf32>
    %64 = vector.shape_cast %63 : vector<17xf32> to vector<17x1xf32>
    %65 = tpu.reciprocal %64 {approx = true} : vector<17x1xf32> -> vector<17x1xf32>
    %66 = vector.broadcast %65 : vector<17x1xf32> to vector<17x17xf32>
    %67 = arith.mulf %62, %66 : vector<17x17xf32>
    %68 = arith.truncf %67 : vector<17x17xf32> to vector<17x17xbf16>
    %cst_20 = arith.constant dense<0.000000e+00> : vector<17x8xf32>
    %69 = tpu.matmul %68, %56, %cst_20 {dimension_numbers = #tpu.dot_dimension_numbers<[1], [0], [0], [1], [0, 0, 1, 1], [], []>} : vector<17x17xbf16>, vector<17x8xbf16>, vector<17x8xf32> -> vector<17x8xf32>
    %70 = arith.truncf %69 : vector<17x8xf32> to vector<17x8xbf16>
    %c0_21 = arith.constant 0 : index
    %c0_22 = arith.constant 0 : index
    %c16 = arith.constant 16 : index
    %71 = vector.load %arg2[%c0_21, %c0_22, %c16] : memref<1x17x32xbf16, #tpu.memory_space<vmem>>, vector<1x17x8xbf16>
    %72 = vector.shape_cast %71 : vector<1x17x8xbf16> to vector<17x8xbf16>
    %73 = vector.shape_cast %70 : vector<17x8xbf16> to vector<1x17x8xbf16>
    tpu.vector_store %arg2[%c0_21, %c0_22, %c16], %73 {strides = array<i32>} : memref<1x17x32xbf16, #tpu.memory_space<vmem>>, vector<1x17x8xbf16>,
    %74 = vector.extract_strided_slice %1 {offsets = [0, 24], sizes = [17, 8], strides = [1, 1]} : vector<17x96xbf16> to vector<17x8xbf16>
    %75 = arith.extf %74 : vector<17x8xbf16> to vector<17x8xf32>
    %cst_23 = arith.constant 0.353553385 : f32
    %76 = vector.broadcast %cst_23 : f32 to vector<17x8xf32>
    %77 = arith.mulf %75, %76 : vector<17x8xf32>
    %78 = arith.truncf %77 : vector<17x8xf32> to vector<17x8xbf16>
    %79 = vector.extract_strided_slice %1 {offsets = [0, 56], sizes = [17, 8], strides = [1, 1]} : vector<17x96xbf16> to vector<17x8xbf16>
    %80 = vector.extract_strided_slice %1 {offsets = [0, 88], sizes = [17, 8], strides = [1, 1]} : vector<17x96xbf16> to vector<17x8xbf16>
    %cst_24 = arith.constant dense<0.000000e+00> : vector<17x17xf32>
    %81 = tpu.matmul %78, %79, %cst_24 {dimension_numbers = #tpu.dot_dimension_numbers<[1], [1], [0], [0], [0, 0, 1, 0], [], []>} : vector<17x8xbf16>, vector<17x8xbf16>, vector<17x17xf32> -> vector<17x17xf32>
    %cst_25 = arith.constant dense<0xFF800000> : vector<17xf32>
    %82 = vector.multi_reduction <maximumf>, %81, %cst_25 [1] : vector<17x17xf32> to vector<17xf32>
    %83 = vector.shape_cast %82 : vector<17xf32> to vector<17x1xf32>
    %84 = vector.broadcast %83 : vector<17x1xf32> to vector<17x17xf32>
    %85 = arith.subf %81, %84 : vector<17x17xf32>
    %86 = math.exp %85 : vector<17x17xf32>
    %cst_26 = arith.constant dense<0.000000e+00> : vector<17xf32>
    %87 = vector.multi_reduction <add>, %86, %cst_26 [1] : vector<17x17xf32> to vector<17xf32>
    %88 = vector.shape_cast %87 : vector<17xf32> to vector<17x1xf32>
    %89 = tpu.reciprocal %88 {approx = true} : vector<17x1xf32> -> vector<17x1xf32>
    %90 = vector.broadcast %89 : vector<17x1xf32> to vector<17x17xf32>
    %91 = arith.mulf %86, %90 : vector<17x17xf32>
    %92 = arith.truncf %91 : vector<17x17xf32> to vector<17x17xbf16>
    %cst_27 = arith.constant dense<0.000000e+00> : vector<17x8xf32>
    %93 = tpu.matmul %92, %80, %cst_27 {dimension_numbers = #tpu.dot_dimension_numbers<[1], [0], [0], [1], [0, 0, 1, 1], [], []>} : vector<17x17xbf16>, vector<17x8xbf16>, vector<17x8xf32> -> vector<17x8xf32>
    %94 = arith.truncf %93 : vector<17x8xf32> to vector<17x8xbf16>
    %c0_28 = arith.constant 0 : index
    %c0_29 = arith.constant 0 : index
    %c24 = arith.constant 24 : index
    %95 = vector.load %arg2[%c0_28, %c0_29, %c24] : memref<1x17x32xbf16, #tpu.memory_space<vmem>>, vector<1x17x8xbf16>
    %96 = vector.shape_cast %95 : vector<1x17x8xbf16> to vector<17x8xbf16>
    %97 = vector.shape_cast %94 : vector<17x8xbf16> to vector<1x17x8xbf16>
    tpu.vector_store %arg2[%c0_28, %c0_29, %c24], %97 {strides = array<i32>} : memref<1x17x32xbf16, #tpu.memory_space<vmem>>, vector<1x17x8xbf16>,
    return
  }
  func.func @transform_0(%arg0: i32) -> (i32, i32, i32) {
    %c0_i32 = arith.constant 0 : i32
    %c0_i32_0 = arith.constant 0 : i32
    %c0_i32_1 = arith.constant 0 : i32
    return %arg0, %c0_i32, %c0_i32_0 : i32, i32, i32
  }
  func.func @transform_1(%arg0: i32) -> (i32, i32, i32) {
    %c0_i32 = arith.constant 0 : i32
    %c0_i32_0 = arith.constant 0 : i32
    %c0_i32_1 = arith.constant 0 : i32
    return %arg0, %c0_i32, %c0_i32_0 : i32, i32, i32
  }
}

module attributes {stable_mosaic.version = 11 : i64} {
  func.func @_ln_matmul_kernel(%arg0: i32, %arg1: i32, %arg2: memref<34x32xbf16, #tpu.memory_space<vmem>>, %arg3: memref<1x32xf32, #tpu.memory_space<vmem>>, %arg4: memref<1x32xf32, #tpu.memory_space<vmem>>, %arg5: memref<32x128xbf16, #tpu.memory_space<vmem>>, %arg6: memref<1x128xf32, #tpu.memory_space<vmem>>, %arg7: memref<34x128xbf16, #tpu.memory_space<vmem>>, %arg8: memref<34x32xbf16, #tpu.memory_space<vmem>>) attributes {dimension_semantics = [#tpu.dimension_semantics<parallel>, #tpu.dimension_semantics<arbitrary>], iteration_bounds = array<i64: 1, 1>, scalar_prefetch = 0 : i64, scratch_operands = 1 : i64, tpu.core_type = #tpu.core_type<tc>, window_params = [{transform_indices = @transform_0, window_bounds = array<i64: 34, 32>}, {pipeline_mode = #tpu.pipeline_mode<synchronous>, transform_indices = @transform_1, window_bounds = array<i64: 1, 32>}, {pipeline_mode = #tpu.pipeline_mode<synchronous>, transform_indices = @transform_2, window_bounds = array<i64: 1, 32>}, {transform_indices = @transform_3, window_bounds = array<i64: 32, 128>}, {transform_indices = @transform_4, window_bounds = array<i64: 1, 128>}, {transform_indices = @transform_5, window_bounds = array<i64: 34, 128>}]} {
    %c0_i32 = arith.constant 0 : i32
    %0 = arith.cmpi eq, %arg1, %c0_i32 : i32
    %1 = arith.extui %0 : i1 to i32
    %c0_i32_0 = arith.constant 0 : i32
    %2 = arith.cmpi ne, %1, %c0_i32_0 : i32
    scf.if %2 {
      %c0_22 = arith.constant 0 : index
      %c0_23 = arith.constant 0 : index
      %50 = vector.load %arg2[%c0_22, %c0_23] : memref<34x32xbf16, #tpu.memory_space<vmem>>, vector<34x32xbf16>
      %51 = arith.extf %50 : vector<34x32xbf16> to vector<34x32xf32>
      %cst_24 = arith.constant dense<0.000000e+00> : vector<34xf32>
      %52 = vector.multi_reduction <add>, %51, %cst_24 [1] : vector<34x32xf32> to vector<34xf32>
      %53 = vector.shape_cast %52 : vector<34xf32> to vector<34x1xf32>
      %cst_25 = arith.constant 3.200000e+01 : f32
      %54 = vector.broadcast %cst_25 : f32 to vector<34x1xf32>
      %55 = arith.divf %53, %54 : vector<34x1xf32>
      %56 = vector.broadcast %55 : vector<34x1xf32> to vector<34x32xf32>
      %57 = arith.subf %51, %56 : vector<34x32xf32>
      %58 = vector.broadcast %55 : vector<34x1xf32> to vector<34x32xf32>
      %59 = arith.subf %51, %58 : vector<34x32xf32>
      %60 = arith.mulf %57, %59 : vector<34x32xf32>
      %cst_26 = arith.constant dense<0.000000e+00> : vector<34xf32>
      %61 = vector.multi_reduction <add>, %60, %cst_26 [1] : vector<34x32xf32> to vector<34xf32>
      %62 = vector.shape_cast %61 : vector<34xf32> to vector<34x1xf32>
      %cst_27 = arith.constant 3.200000e+01 : f32
      %63 = vector.broadcast %cst_27 : f32 to vector<34x1xf32>
      %64 = arith.divf %62, %63 : vector<34x1xf32>
      %65 = vector.broadcast %55 : vector<34x1xf32> to vector<34x32xf32>
      %66 = arith.subf %51, %65 : vector<34x32xf32>
      %cst_28 = arith.constant 9.99999974E-6 : f32
      %67 = vector.broadcast %cst_28 : f32 to vector<34x1xf32>
      %68 = arith.addf %64, %67 : vector<34x1xf32>
      %69 = math.rsqrt %68 : vector<34x1xf32>
      %70 = vector.broadcast %69 : vector<34x1xf32> to vector<34x32xf32>
      %71 = arith.mulf %66, %70 : vector<34x32xf32>
      %c0_29 = arith.constant 0 : index
      %c0_30 = arith.constant 0 : index
      %72 = vector.load %arg3[%c0_29, %c0_30] : memref<1x32xf32, #tpu.memory_space<vmem>>, vector<1x32xf32>
      %73 = vector.broadcast %72 : vector<1x32xf32> to vector<34x32xf32>
      %74 = arith.mulf %71, %73 : vector<34x32xf32>
      %c0_31 = arith.constant 0 : index
      %c0_32 = arith.constant 0 : index
      %75 = vector.load %arg4[%c0_31, %c0_32] : memref<1x32xf32, #tpu.memory_space<vmem>>, vector<1x32xf32>
      %76 = vector.broadcast %75 : vector<1x32xf32> to vector<34x32xf32>
      %77 = arith.addf %74, %76 : vector<34x32xf32>
      %78 = arith.truncf %77 : vector<34x32xf32> to vector<34x32xbf16>
      %c0_33 = arith.constant 0 : index
      %c0_34 = arith.constant 0 : index
      %79 = vector.load %arg8[%c0_33, %c0_34] : memref<34x32xbf16, #tpu.memory_space<vmem>>, vector<34x32xbf16>
      tpu.vector_store %arg8[%c0_33, %c0_34], %78 {strides = array<i32>} : memref<34x32xbf16, #tpu.memory_space<vmem>>, vector<34x32xbf16>,
    } else {
    }
    %c0 = arith.constant 0 : index
    %c0_1 = arith.constant 0 : index
    %3 = vector.load %arg8[%c0, %c0_1] : memref<34x32xbf16, #tpu.memory_space<vmem>>, vector<34x32xbf16>
    %c0_2 = arith.constant 0 : index
    %c0_3 = arith.constant 0 : index
    %4 = vector.load %arg5[%c0_2, %c0_3] : memref<32x128xbf16, #tpu.memory_space<vmem>>, vector<32x128xbf16>
    %cst = arith.constant dense<0.000000e+00> : vector<34x128xf32>
    %5 = tpu.matmul %3, %4, %cst {dimension_numbers = #tpu.dot_dimension_numbers<[1], [0], [0], [1], [0, 0, 1, 1], [], []>} : vector<34x32xbf16>, vector<32x128xbf16>, vector<34x128xf32> -> vector<34x128xf32>
    %c0_4 = arith.constant 0 : index
    %c0_5 = arith.constant 0 : index
    %6 = vector.load %arg6[%c0_4, %c0_5] : memref<1x128xf32, #tpu.memory_space<vmem>>, vector<1x128xf32>
    %7 = vector.broadcast %6 : vector<1x128xf32> to vector<34x128xf32>
    %8 = arith.addf %5, %7 : vector<34x128xf32>
    %cst_6 = arith.constant 5.000000e-01 : f32
    %9 = vector.broadcast %cst_6 : f32 to vector<34x128xf32>
    %10 = arith.mulf %9, %8 : vector<34x128xf32>
    %cst_7 = arith.constant 0.707106769 : f32
    %11 = vector.broadcast %cst_7 : f32 to vector<34x128xf32>
    %12 = arith.mulf %8, %11 : vector<34x128xf32>
    %13 = math.absf %12 : vector<34x128xf32>
    %cst_8 = arith.constant 0.327591091 : f32
    %14 = vector.broadcast %cst_8 : f32 to vector<34x128xf32>
    %15 = arith.mulf %14, %13 : vector<34x128xf32>
    %cst_9 = arith.constant 1.000000e+00 : f32
    %16 = vector.broadcast %cst_9 : f32 to vector<34x128xf32>
    %17 = arith.addf %16, %15 : vector<34x128xf32>
    %18 = tpu.reciprocal %17 {approx = true} : vector<34x128xf32> -> vector<34x128xf32>
    %cst_10 = arith.constant 1.06140542 : f32
    %19 = vector.broadcast %cst_10 : f32 to vector<34x128xf32>
    %20 = arith.mulf %19, %18 : vector<34x128xf32>
    %cst_11 = arith.constant -1.45315206 : f32
    %21 = vector.broadcast %cst_11 : f32 to vector<34x128xf32>
    %22 = arith.addf %20, %21 : vector<34x128xf32>
    %23 = arith.mulf %22, %18 : vector<34x128xf32>
    %cst_12 = arith.constant 1.42141378 : f32
    %24 = vector.broadcast %cst_12 : f32 to vector<34x128xf32>
    %25 = arith.addf %23, %24 : vector<34x128xf32>
    %26 = arith.mulf %25, %18 : vector<34x128xf32>
    %cst_13 = arith.constant -0.284496725 : f32
    %27 = vector.broadcast %cst_13 : f32 to vector<34x128xf32>
    %28 = arith.addf %26, %27 : vector<34x128xf32>
    %29 = arith.mulf %28, %18 : vector<34x128xf32>
    %cst_14 = arith.constant 0.254829586 : f32
    %30 = vector.broadcast %cst_14 : f32 to vector<34x128xf32>
    %31 = arith.addf %29, %30 : vector<34x128xf32>
    %32 = arith.mulf %31, %18 : vector<34x128xf32>
    %cst_15 = arith.constant 0.000000e+00 : f32
    %33 = vector.broadcast %cst_15 : f32 to vector<34x128xf32>
    %34 = arith.subf %33, %13 : vector<34x128xf32>
    %35 = arith.mulf %34, %13 : vector<34x128xf32>
    %36 = math.exp %35 : vector<34x128xf32>
    %37 = arith.mulf %32, %36 : vector<34x128xf32>
    %cst_16 = arith.constant 1.000000e+00 : f32
    %38 = vector.broadcast %cst_16 : f32 to vector<34x128xf32>
    %39 = arith.subf %38, %37 : vector<34x128xf32>
    %cst_17 = arith.constant 0.000000e+00 : f32
    %40 = vector.broadcast %cst_17 : f32 to vector<34x128xf32>
    %41 = arith.cmpf oge, %12, %40 : vector<34x128xf32>
    %cst_18 = arith.constant 0.000000e+00 : f32
    %42 = vector.broadcast %cst_18 : f32 to vector<34x128xf32>
    %43 = arith.subf %42, %39 : vector<34x128xf32>
    %44 = arith.select %41, %39, %43 : vector<34x128xi1>, vector<34x128xf32>
    %cst_19 = arith.constant 1.000000e+00 : f32
    %45 = vector.broadcast %cst_19 : f32 to vector<34x128xf32>
    %46 = arith.addf %45, %44 : vector<34x128xf32>
    %47 = arith.mulf %10, %46 : vector<34x128xf32>
    %48 = arith.truncf %47 : vector<34x128xf32> to vector<34x128xbf16>
    %c0_20 = arith.constant 0 : index
    %c0_21 = arith.constant 0 : index
    %49 = vector.load %arg7[%c0_20, %c0_21] : memref<34x128xbf16, #tpu.memory_space<vmem>>, vector<34x128xbf16>
    tpu.vector_store %arg7[%c0_20, %c0_21], %48 {strides = array<i32>} : memref<34x128xbf16, #tpu.memory_space<vmem>>, vector<34x128xbf16>,
    return
  }
  func.func @transform_0(%arg0: i32, %arg1: i32) -> (i32, i32) {
    %c0_i32 = arith.constant 0 : i32
    %c0_i32_0 = arith.constant 0 : i32
    return %arg0, %c0_i32 : i32, i32
  }
  func.func @transform_1(%arg0: i32, %arg1: i32) -> (i32, i32) {
    %c0_i32 = arith.constant 0 : i32
    %c0_i32_0 = arith.constant 0 : i32
    %c0_i32_1 = arith.constant 0 : i32
    return %c0_i32, %c0_i32_0 : i32, i32
  }
  func.func @transform_2(%arg0: i32, %arg1: i32) -> (i32, i32) {
    %c0_i32 = arith.constant 0 : i32
    %c0_i32_0 = arith.constant 0 : i32
    %c0_i32_1 = arith.constant 0 : i32
    return %c0_i32, %c0_i32_0 : i32, i32
  }
  func.func @transform_3(%arg0: i32, %arg1: i32) -> (i32, i32) {
    %c0_i32 = arith.constant 0 : i32
    %c0_i32_0 = arith.constant 0 : i32
    return %c0_i32, %arg1 : i32, i32
  }
  func.func @transform_4(%arg0: i32, %arg1: i32) -> (i32, i32) {
    %c0_i32 = arith.constant 0 : i32
    %c0_i32_0 = arith.constant 0 : i32
    return %c0_i32, %arg1 : i32, i32
  }
  func.func @transform_5(%arg0: i32, %arg1: i32) -> (i32, i32) {
    %c0_i32 = arith.constant 0 : i32
    return %arg0, %arg1 : i32, i32
  }
}

module attributes {stable_mosaic.version = 11 : i64} {
  func.func @_matmul_kernel(%arg0: i32, %arg1: i32, %arg2: i32, %arg3: memref<34x128xbf16, #tpu.memory_space<vmem>>, %arg4: memref<128x32xbf16, #tpu.memory_space<vmem>>, %arg5: memref<1x32xf32, #tpu.memory_space<vmem>>, %arg6: memref<34x32xbf16, #tpu.memory_space<vmem>>, %arg7: memref<34x32xbf16, #tpu.memory_space<vmem>>, %arg8: memref<34x32xf32, #tpu.memory_space<vmem>>) attributes {dimension_semantics = [#tpu.dimension_semantics<parallel>, #tpu.dimension_semantics<parallel>, #tpu.dimension_semantics<arbitrary>], iteration_bounds = array<i64: 1, 1, 1>, scalar_prefetch = 0 : i64, scratch_operands = 1 : i64, tpu.core_type = #tpu.core_type<tc>, window_params = [{transform_indices = @transform_0, window_bounds = array<i64: 34, 128>}, {transform_indices = @transform_1, window_bounds = array<i64: 128, 32>}, {transform_indices = @transform_2, window_bounds = array<i64: 1, 32>}, {transform_indices = @transform_3, window_bounds = array<i64: 34, 32>}, {transform_indices = @transform_4, window_bounds = array<i64: 34, 32>}]} {
    %c0_i32 = arith.constant 0 : i32
    %0 = arith.cmpi eq, %arg2, %c0_i32 : i32
    %1 = arith.extui %0 : i1 to i32
    %c0_i32_0 = arith.constant 0 : i32
    %2 = arith.cmpi ne, %1, %c0_i32_0 : i32
    scf.if %2 {
      %cst_10 = arith.constant 0.000000e+00 : f32
      %12 = vector.broadcast %cst_10 : f32 to vector<34x32xf32>
      %c0_11 = arith.constant 0 : index
      %c0_12 = arith.constant 0 : index
      %13 = vector.load %arg8[%c0_11, %c0_12] : memref<34x32xf32, #tpu.memory_space<vmem>>, vector<34x32xf32>
      tpu.vector_store %arg8[%c0_11, %c0_12], %12 {strides = array<i32>} : memref<34x32xf32, #tpu.memory_space<vmem>>, vector<34x32xf32>,
    } else {
    }
    %c0 = arith.constant 0 : index
    %c0_1 = arith.constant 0 : index
    %3 = vector.load %arg8[%c0, %c0_1] : memref<34x32xf32, #tpu.memory_space<vmem>>, vector<34x32xf32>
    %c0_2 = arith.constant 0 : index
    %c0_3 = arith.constant 0 : index
    %4 = vector.load %arg3[%c0_2, %c0_3] : memref<34x128xbf16, #tpu.memory_space<vmem>>, vector<34x128xbf16>
    %c0_4 = arith.constant 0 : index
    %c0_5 = arith.constant 0 : index
    %5 = vector.load %arg4[%c0_4, %c0_5] : memref<128x32xbf16, #tpu.memory_space<vmem>>, vector<128x32xbf16>
    %cst = arith.constant dense<0.000000e+00> : vector<34x32xf32>
    %6 = tpu.matmul %4, %5, %cst {dimension_numbers = #tpu.dot_dimension_numbers<[1], [0], [0], [1], [0, 0, 1, 1], [], []>} : vector<34x128xbf16>, vector<128x32xbf16>, vector<34x32xf32> -> vector<34x32xf32>
    %7 = arith.addf %3, %6 : vector<34x32xf32>
    %c0_6 = arith.constant 0 : index
    %c0_7 = arith.constant 0 : index
    %8 = vector.load %arg8[%c0_6, %c0_7] : memref<34x32xf32, #tpu.memory_space<vmem>>, vector<34x32xf32>
    tpu.vector_store %arg8[%c0_6, %c0_7], %7 {strides = array<i32>} : memref<34x32xf32, #tpu.memory_space<vmem>>, vector<34x32xf32>,
    %c0_i32_8 = arith.constant 0 : i32
    %9 = arith.cmpi eq, %arg2, %c0_i32_8 : i32
    %10 = arith.extui %9 : i1 to i32
    %c0_i32_9 = arith.constant 0 : i32
    %11 = arith.cmpi ne, %10, %c0_i32_9 : i32
    scf.if %11 {
      %c0_10 = arith.constant 0 : index
      %c0_11 = arith.constant 0 : index
      %12 = vector.load %arg8[%c0_10, %c0_11] : memref<34x32xf32, #tpu.memory_space<vmem>>, vector<34x32xf32>
      %c0_12 = arith.constant 0 : index
      %c0_13 = arith.constant 0 : index
      %13 = vector.load %arg5[%c0_12, %c0_13] : memref<1x32xf32, #tpu.memory_space<vmem>>, vector<1x32xf32>
      %14 = vector.broadcast %13 : vector<1x32xf32> to vector<34x32xf32>
      %15 = arith.addf %12, %14 : vector<34x32xf32>
      %c0_14 = arith.constant 0 : index
      %c0_15 = arith.constant 0 : index
      %16 = vector.load %arg6[%c0_14, %c0_15] : memref<34x32xbf16, #tpu.memory_space<vmem>>, vector<34x32xbf16>
      %17 = arith.extf %16 : vector<34x32xbf16> to vector<34x32xf32>
      %18 = arith.addf %15, %17 : vector<34x32xf32>
      %19 = arith.truncf %18 : vector<34x32xf32> to vector<34x32xbf16>
      %c0_16 = arith.constant 0 : index
      %c0_17 = arith.constant 0 : index
      %20 = vector.load %arg7[%c0_16, %c0_17] : memref<34x32xbf16, #tpu.memory_space<vmem>>, vector<34x32xbf16>
      tpu.vector_store %arg7[%c0_16, %c0_17], %19 {strides = array<i32>} : memref<34x32xbf16, #tpu.memory_space<vmem>>, vector<34x32xbf16>,
    } else {
    }
    return
  }
  func.func @transform_0(%arg0: i32, %arg1: i32, %arg2: i32) -> (i32, i32) {
    %c0_i32 = arith.constant 0 : i32
    return %arg0, %arg2 : i32, i32
  }
  func.func @transform_1(%arg0: i32, %arg1: i32, %arg2: i32) -> (i32, i32) {
    %c0_i32 = arith.constant 0 : i32
    return %arg2, %arg1 : i32, i32
  }
  func.func @transform_2(%arg0: i32, %arg1: i32, %arg2: i32) -> (i32, i32) {
    %c0_i32 = arith.constant 0 : i32
    %c0_i32_0 = arith.constant 0 : i32
    return %c0_i32, %arg1 : i32, i32
  }
  func.func @transform_3(%arg0: i32, %arg1: i32, %arg2: i32) -> (i32, i32) {
    %c0_i32 = arith.constant 0 : i32
    return %arg0, %arg1 : i32, i32
  }
  func.func @transform_4(%arg0: i32, %arg1: i32, %arg2: i32) -> (i32, i32) {
    %c0_i32 = arith.constant 0 : i32
    return %arg0, %arg1 : i32, i32
  }
}

module attributes {stable_mosaic.version = 11 : i64} {
  func.func @_ln_matmul_kernel(%arg0: i32, %arg1: i32, %arg2: memref<34x32xbf16, #tpu.memory_space<vmem>>, %arg3: memref<1x32xf32, #tpu.memory_space<vmem>>, %arg4: memref<1x32xf32, #tpu.memory_space<vmem>>, %arg5: memref<32x256xbf16, #tpu.memory_space<vmem>>, %arg6: memref<1x256xf32, #tpu.memory_space<vmem>>, %arg7: memref<34x256xf32, #tpu.memory_space<vmem>>, %arg8: memref<34x32xbf16, #tpu.memory_space<vmem>>) attributes {dimension_semantics = [#tpu.dimension_semantics<parallel>, #tpu.dimension_semantics<arbitrary>], iteration_bounds = array<i64: 1, 1>, scalar_prefetch = 0 : i64, scratch_operands = 1 : i64, tpu.core_type = #tpu.core_type<tc>, window_params = [{transform_indices = @transform_0, window_bounds = array<i64: 34, 32>}, {pipeline_mode = #tpu.pipeline_mode<synchronous>, transform_indices = @transform_1, window_bounds = array<i64: 1, 32>}, {pipeline_mode = #tpu.pipeline_mode<synchronous>, transform_indices = @transform_2, window_bounds = array<i64: 1, 32>}, {transform_indices = @transform_3, window_bounds = array<i64: 32, 256>}, {transform_indices = @transform_4, window_bounds = array<i64: 1, 256>}, {transform_indices = @transform_5, window_bounds = array<i64: 34, 256>}]} {
    %c0_i32 = arith.constant 0 : i32
    %0 = arith.cmpi eq, %arg1, %c0_i32 : i32
    %1 = arith.extui %0 : i1 to i32
    %c0_i32_0 = arith.constant 0 : i32
    %2 = arith.cmpi ne, %1, %c0_i32_0 : i32
    scf.if %2 {
      %c0_8 = arith.constant 0 : index
      %c0_9 = arith.constant 0 : index
      %10 = vector.load %arg2[%c0_8, %c0_9] : memref<34x32xbf16, #tpu.memory_space<vmem>>, vector<34x32xbf16>
      %11 = arith.extf %10 : vector<34x32xbf16> to vector<34x32xf32>
      %cst_10 = arith.constant dense<0.000000e+00> : vector<34xf32>
      %12 = vector.multi_reduction <add>, %11, %cst_10 [1] : vector<34x32xf32> to vector<34xf32>
      %13 = vector.shape_cast %12 : vector<34xf32> to vector<34x1xf32>
      %cst_11 = arith.constant 3.200000e+01 : f32
      %14 = vector.broadcast %cst_11 : f32 to vector<34x1xf32>
      %15 = arith.divf %13, %14 : vector<34x1xf32>
      %16 = vector.broadcast %15 : vector<34x1xf32> to vector<34x32xf32>
      %17 = arith.subf %11, %16 : vector<34x32xf32>
      %18 = vector.broadcast %15 : vector<34x1xf32> to vector<34x32xf32>
      %19 = arith.subf %11, %18 : vector<34x32xf32>
      %20 = arith.mulf %17, %19 : vector<34x32xf32>
      %cst_12 = arith.constant dense<0.000000e+00> : vector<34xf32>
      %21 = vector.multi_reduction <add>, %20, %cst_12 [1] : vector<34x32xf32> to vector<34xf32>
      %22 = vector.shape_cast %21 : vector<34xf32> to vector<34x1xf32>
      %cst_13 = arith.constant 3.200000e+01 : f32
      %23 = vector.broadcast %cst_13 : f32 to vector<34x1xf32>
      %24 = arith.divf %22, %23 : vector<34x1xf32>
      %25 = vector.broadcast %15 : vector<34x1xf32> to vector<34x32xf32>
      %26 = arith.subf %11, %25 : vector<34x32xf32>
      %cst_14 = arith.constant 9.99999974E-6 : f32
      %27 = vector.broadcast %cst_14 : f32 to vector<34x1xf32>
      %28 = arith.addf %24, %27 : vector<34x1xf32>
      %29 = math.rsqrt %28 : vector<34x1xf32>
      %30 = vector.broadcast %29 : vector<34x1xf32> to vector<34x32xf32>
      %31 = arith.mulf %26, %30 : vector<34x32xf32>
      %c0_15 = arith.constant 0 : index
      %c0_16 = arith.constant 0 : index
      %32 = vector.load %arg3[%c0_15, %c0_16] : memref<1x32xf32, #tpu.memory_space<vmem>>, vector<1x32xf32>
      %33 = vector.broadcast %32 : vector<1x32xf32> to vector<34x32xf32>
      %34 = arith.mulf %31, %33 : vector<34x32xf32>
      %c0_17 = arith.constant 0 : index
      %c0_18 = arith.constant 0 : index
      %35 = vector.load %arg4[%c0_17, %c0_18] : memref<1x32xf32, #tpu.memory_space<vmem>>, vector<1x32xf32>
      %36 = vector.broadcast %35 : vector<1x32xf32> to vector<34x32xf32>
      %37 = arith.addf %34, %36 : vector<34x32xf32>
      %38 = arith.truncf %37 : vector<34x32xf32> to vector<34x32xbf16>
      %c0_19 = arith.constant 0 : index
      %c0_20 = arith.constant 0 : index
      %39 = vector.load %arg8[%c0_19, %c0_20] : memref<34x32xbf16, #tpu.memory_space<vmem>>, vector<34x32xbf16>
      tpu.vector_store %arg8[%c0_19, %c0_20], %38 {strides = array<i32>} : memref<34x32xbf16, #tpu.memory_space<vmem>>, vector<34x32xbf16>,
    } else {
    }
    %c0 = arith.constant 0 : index
    %c0_1 = arith.constant 0 : index
    %3 = vector.load %arg8[%c0, %c0_1] : memref<34x32xbf16, #tpu.memory_space<vmem>>, vector<34x32xbf16>
    %c0_2 = arith.constant 0 : index
    %c0_3 = arith.constant 0 : index
    %4 = vector.load %arg5[%c0_2, %c0_3] : memref<32x256xbf16, #tpu.memory_space<vmem>>, vector<32x256xbf16>
    %cst = arith.constant dense<0.000000e+00> : vector<34x256xf32>
    %5 = tpu.matmul %3, %4, %cst {dimension_numbers = #tpu.dot_dimension_numbers<[1], [0], [0], [1], [0, 0, 1, 1], [], []>} : vector<34x32xbf16>, vector<32x256xbf16>, vector<34x256xf32> -> vector<34x256xf32>
    %c0_4 = arith.constant 0 : index
    %c0_5 = arith.constant 0 : index
    %6 = vector.load %arg6[%c0_4, %c0_5] : memref<1x256xf32, #tpu.memory_space<vmem>>, vector<1x256xf32>
    %7 = vector.broadcast %6 : vector<1x256xf32> to vector<34x256xf32>
    %8 = arith.addf %5, %7 : vector<34x256xf32>
    %c0_6 = arith.constant 0 : index
    %c0_7 = arith.constant 0 : index
    %9 = vector.load %arg7[%c0_6, %c0_7] : memref<34x256xf32, #tpu.memory_space<vmem>>, vector<34x256xf32>
    tpu.vector_store %arg7[%c0_6, %c0_7], %8 {strides = array<i32>} : memref<34x256xf32, #tpu.memory_space<vmem>>, vector<34x256xf32>,
    return
  }
  func.func @transform_0(%arg0: i32, %arg1: i32) -> (i32, i32) {
    %c0_i32 = arith.constant 0 : i32
    %c0_i32_0 = arith.constant 0 : i32
    return %arg0, %c0_i32 : i32, i32
  }
  func.func @transform_1(%arg0: i32, %arg1: i32) -> (i32, i32) {
    %c0_i32 = arith.constant 0 : i32
    %c0_i32_0 = arith.constant 0 : i32
    %c0_i32_1 = arith.constant 0 : i32
    return %c0_i32, %c0_i32_0 : i32, i32
  }
  func.func @transform_2(%arg0: i32, %arg1: i32) -> (i32, i32) {
    %c0_i32 = arith.constant 0 : i32
    %c0_i32_0 = arith.constant 0 : i32
    %c0_i32_1 = arith.constant 0 : i32
    return %c0_i32, %c0_i32_0 : i32, i32
  }
  func.func @transform_3(%arg0: i32, %arg1: i32) -> (i32, i32) {
    %c0_i32 = arith.constant 0 : i32
    %c0_i32_0 = arith.constant 0 : i32
    return %c0_i32, %arg1 : i32, i32
  }
  func.func @transform_4(%arg0: i32, %arg1: i32) -> (i32, i32) {
    %c0_i32 = arith.constant 0 : i32
    %c0_i32_0 = arith.constant 0 : i32
    return %c0_i32, %arg1 : i32, i32
  }
  func.func @transform_5(%arg0: i32, %arg1: i32) -> (i32, i32) {
    %c0_i32 = arith.constant 0 : i32
    return %arg0, %arg1 : i32, i32
  }
}

module attributes {stable_mosaic.version = 11 : i64} {
  func.func @_masked_mse_kernel(%arg0: i32, %arg1: memref<32x256xf32, #tpu.memory_space<vmem>>, %arg2: memref<32x256xf32, #tpu.memory_space<vmem>>, %arg3: memref<32x1xf32, #tpu.memory_space<vmem>>, %arg4: memref<1x1xf32, #tpu.memory_space<vmem>>, %arg5: memref<1x1xf32, #tpu.memory_space<vmem>>) attributes {dimension_semantics = [#tpu.dimension_semantics<arbitrary>], iteration_bounds = array<i64: 1>, scalar_prefetch = 0 : i64, scratch_operands = 0 : i64, tpu.core_type = #tpu.core_type<tc>, window_params = [{transform_indices = @transform_0, window_bounds = array<i64: 32, 256>}, {transform_indices = @transform_1, window_bounds = array<i64: 32, 256>}, {transform_indices = @transform_2, window_bounds = array<i64: 32, 1>}, {pipeline_mode = #tpu.pipeline_mode<synchronous>, transform_indices = @transform_3, window_bounds = array<i64: 1, 1>}, {pipeline_mode = #tpu.pipeline_mode<synchronous>, transform_indices = @transform_4, window_bounds = array<i64: 1, 1>}]} {
    %c0_i32 = arith.constant 0 : i32
    %0 = arith.cmpi eq, %arg0, %c0_i32 : i32
    %1 = arith.extui %0 : i1 to i32
    %c0_i32_0 = arith.constant 0 : i32
    %2 = arith.cmpi ne, %1, %c0_i32_0 : i32
    scf.if %2 {
      %cst_17 = arith.constant 0.000000e+00 : f32
      %29 = vector.broadcast %cst_17 : f32 to vector<1x1xf32>
      %c0_18 = arith.constant 0 : index
      %c0_19 = arith.constant 0 : index
      %30 = vector.load %arg4[%c0_18, %c0_19] : memref<1x1xf32, #tpu.memory_space<vmem>>, vector<1x1xf32>
      tpu.vector_store %arg4[%c0_18, %c0_19], %29 {strides = array<i32>} : memref<1x1xf32, #tpu.memory_space<vmem>>, vector<1x1xf32>,
      %cst_20 = arith.constant 0.000000e+00 : f32
      %31 = vector.broadcast %cst_20 : f32 to vector<1x1xf32>
      %c0_21 = arith.constant 0 : index
      %c0_22 = arith.constant 0 : index
      %32 = vector.load %arg5[%c0_21, %c0_22] : memref<1x1xf32, #tpu.memory_space<vmem>>, vector<1x1xf32>
      tpu.vector_store %arg5[%c0_21, %c0_22], %31 {strides = array<i32>} : memref<1x1xf32, #tpu.memory_space<vmem>>, vector<1x1xf32>,
    } else {
    }
    %c0 = arith.constant 0 : index
    %c0_1 = arith.constant 0 : index
    %3 = vector.load %arg1[%c0, %c0_1] : memref<32x256xf32, #tpu.memory_space<vmem>>, vector<32x256xf32>
    %c0_2 = arith.constant 0 : index
    %c0_3 = arith.constant 0 : index
    %4 = vector.load %arg2[%c0_2, %c0_3] : memref<32x256xf32, #tpu.memory_space<vmem>>, vector<32x256xf32>
    %5 = arith.subf %3, %4 : vector<32x256xf32>
    %6 = arith.mulf %5, %5 : vector<32x256xf32>
    %cst = arith.constant dense<0.000000e+00> : vector<32xf32>
    %7 = vector.multi_reduction <add>, %6, %cst [1] : vector<32x256xf32> to vector<32xf32>
    %8 = vector.shape_cast %7 : vector<32xf32> to vector<32x1xf32>
    %cst_4 = arith.constant 2.560000e+02 : f32
    %9 = vector.broadcast %cst_4 : f32 to vector<32x1xf32>
    %10 = arith.divf %8, %9 : vector<32x1xf32>
    %c0_5 = arith.constant 0 : index
    %c0_6 = arith.constant 0 : index
    %11 = vector.load %arg3[%c0_5, %c0_6] : memref<32x1xf32, #tpu.memory_space<vmem>>, vector<32x1xf32>
    %c0_7 = arith.constant 0 : index
    %c0_8 = arith.constant 0 : index
    %12 = vector.load %arg4[%c0_7, %c0_8] : memref<1x1xf32, #tpu.memory_space<vmem>>, vector<1x1xf32>
    %13 = arith.mulf %10, %11 : vector<32x1xf32>
    %14 = vector.shape_cast %13 : vector<32x1xf32> to vector<1x32x1xf32>
    %cst_9 = arith.constant dense<0.000000e+00> : vector<1xf32>
    %15 = vector.multi_reduction <add>, %14, %cst_9 [1, 2] : vector<1x32x1xf32> to vector<1xf32>
    %16 = vector.shape_cast %15 : vector<1xf32> to vector<1x1x1xf32>
    %17 = vector.extract %16[0, 0, 0] : f32 from vector<1x1x1xf32>
    %18 = vector.broadcast %17 : f32 to vector<1x1xf32>
    %19 = arith.addf %12, %18 : vector<1x1xf32>
    %c0_10 = arith.constant 0 : index
    %c0_11 = arith.constant 0 : index
    %20 = vector.load %arg4[%c0_10, %c0_11] : memref<1x1xf32, #tpu.memory_space<vmem>>, vector<1x1xf32>
    tpu.vector_store %arg4[%c0_10, %c0_11], %19 {strides = array<i32>} : memref<1x1xf32, #tpu.memory_space<vmem>>, vector<1x1xf32>,
    %c0_12 = arith.constant 0 : index
    %c0_13 = arith.constant 0 : index
    %21 = vector.load %arg5[%c0_12, %c0_13] : memref<1x1xf32, #tpu.memory_space<vmem>>, vector<1x1xf32>
    %22 = vector.shape_cast %11 : vector<32x1xf32> to vector<1x32x1xf32>
    %cst_14 = arith.constant dense<0.000000e+00> : vector<1xf32>
    %23 = vector.multi_reduction <add>, %22, %cst_14 [1, 2] : vector<1x32x1xf32> to vector<1xf32>
    %24 = vector.shape_cast %23 : vector<1xf32> to vector<1x1x1xf32>
    %25 = vector.extract %24[0, 0, 0] : f32 from vector<1x1x1xf32>
    %26 = vector.broadcast %25 : f32 to vector<1x1xf32>
    %27 = arith.addf %21, %26 : vector<1x1xf32>
    %c0_15 = arith.constant 0 : index
    %c0_16 = arith.constant 0 : index
    %28 = vector.load %arg5[%c0_15, %c0_16] : memref<1x1xf32, #tpu.memory_space<vmem>>, vector<1x1xf32>
    tpu.vector_store %arg5[%c0_15, %c0_16], %27 {strides = array<i32>} : memref<1x1xf32, #tpu.memory_space<vmem>>, vector<1x1xf32>,
    return
  }
  func.func @transform_0(%arg0: i32) -> (i32, i32) {
    %c0_i32 = arith.constant 0 : i32
    %c0_i32_0 = arith.constant 0 : i32
    return %arg0, %c0_i32 : i32, i32
  }
  func.func @transform_1(%arg0: i32) -> (i32, i32) {
    %c0_i32 = arith.constant 0 : i32
    %c0_i32_0 = arith.constant 0 : i32
    return %arg0, %c0_i32 : i32, i32
  }
  func.func @transform_2(%arg0: i32) -> (i32, i32) {
    %c0_i32 = arith.constant 0 : i32
    %c0_i32_0 = arith.constant 0 : i32
    return %arg0, %c0_i32 : i32, i32
  }
  func.func @transform_3(%arg0: i32) -> (i32, i32) {
    %c0_i32 = arith.constant 0 : i32
    %c0_i32_0 = arith.constant 0 : i32
    %c0_i32_1 = arith.constant 0 : i32
    return %c0_i32, %c0_i32_0 : i32, i32
  }
  func.func @transform_4(%arg0: i32) -> (i32, i32) {
    %c0_i32 = arith.constant 0 : i32
    %c0_i32_0 = arith.constant 0 : i32
    %c0_i32_1 = arith.constant 0 : i32
    return %c0_i32, %c0_i32_0 : i32, i32
  }
}

</mosaic_0001>

<bundles_post_ra>
// kernel: forward.19
= control target key start
LH: loop header
LB: loop body
LE: loop exit
PB: predicated region body
PF: predicated region fallthrough
CT: control target
= control target key end

     0   :  { %8 = vsyncpa [#allocation4], 0  ;;  %s624_s0 = inlined_call_operand.hbm [shape: bf16[32,256], index: 0, kind: input, shape index: {}]   ;;  %s625_s1 = inlined_call_operand.hbm [shape: bf16[256,64], index: 1, kind: input, shape index: {}]   ;;  %s626_s2 = inlined_call_operand.hbm [shape: f32[1,64], index: 2, kind: input, shape index: {}]   ;;  %s627_s3 = inlined_call_operand.hbm [shape: bf16[32,64], index: 3, kind: output, shape index: {}]  }
   0x1   :  { %9 = vsyncpa [#allocation7], 0 }
   0x2   :  { %10 = vsyncpa [#allocation5], 0  ;;  %s533_s12 = smov [#allocation6]   ;;  %s439_s16 = scalar_lea.hbm %s625_s1, 2048 }
   0x3   :  { %s28_s13 = sshll.u32 %s533_s12, 4  ;;  %p440_p0 = scmp.ne.s32.totalorder %s625_s1, %s439_s16  ;;  %s29_s13 = int_to_ptr.vmem [resolvable:$true] %s28_s13 }
   0x4   :  { %p443_p1 = scmp.lt.u32.totalorder %s439_s16, %s625_s1 }
   0x6   :  { %p445_p2 = pnand %p443_p1, %p440_p0 }
   0x8   :  { %448 = shalt.err (!%p445_p2)
}
   0x9   :  { %s449_s21 = scalar_lea.vmem %s29_s13, 2048  ;;  %p454_p4 = scmp.lt.s32.totalorder %s29_s13, %s29_s13 }
   0xa   :  { %p450_p3 = scmp.ne.s32.totalorder %s29_s13, %s449_s21  ;;  %p455_p5 = scmp.lt.s32.totalorder %s449_s21, %s449_s21 }
   0xc   :  { %p456_p6 = por %p455_p5, %p454_p4 }
   0xe   :  { %p457_p7 = pnand %p456_p6, %p450_p3 }
  0x10   :  { %460 = shalt.err (!%p457_p7)
}
  0x11   :  { %s534_s22 = smov 64   ;;  %s535_s23 = smov 4  }
  0x12   :  { %34 = dma.hbm_to_vmem [thread:$0]  %s625_s1, 2048, %s29_s13, [#allocation7], %s534_s22, %s534_s22, %s535_s23  }
  0x13   :  { %s536_s26 = smov [#allocation3]   ;;  %s461_s30 = scalar_lea.hbm %s624_s0, 512 }
  0x14   :  { %s16_s27 = sshll.u32 %s536_s26, 4  ;;  %p462_p8 = scmp.ne.s32.totalorder %s624_s0, %s461_s30  ;;  %s17_s27 = int_to_ptr.vmem [resolvable:$true] %s16_s27 }
  0x15   :  { %p465_p9 = scmp.lt.u32.totalorder %s461_s30, %s624_s0 }
  0x17   :  { %p467_p10 = pnand %p465_p9, %p462_p8 }
  0x19   :  { %470 = shalt.err (!%p467_p10)
}
  0x1a   :  { %s471_s8 = scalar_lea.vmem %s17_s27, 512  ;;  %p476_p12 = scmp.lt.s32.totalorder %s17_s27, %s17_s27 }
  0x1b   :  { %p472_p11 = scmp.ne.s32.totalorder %s17_s27, %s471_s8  ;;  %p477_p13 = scmp.lt.s32.totalorder %s471_s8, %s471_s8 }
  0x1d   :  { %p478_p0 = por %p477_p13, %p476_p12 }
  0x1f   :  { %p479_p1 = pnand %p478_p0, %p472_p11 }
  0x21   :  { %482 = shalt.err (!%p479_p1)
}
  0x22   :  { %s537_s1 = smov 128   ;;  %s538_s9 = smov 8  }
  0x23   :  { %22 = dma.hbm_to_vmem [thread:$0]  %s624_s0, 512, %s17_s27, [#allocation4], %s537_s1, %s537_s1, %s538_s9  }
  0x24   :  { %s539_s12 = smov [#allocation8]   ;;  %s483_s16 = scalar_lea.hbm %s626_s2, 16 }
  0x25   :  { %s41_s13 = sshll.u32 %s539_s12, 4  ;;  %p484_p2 = scmp.ne.s32.totalorder %s626_s2, %s483_s16  ;;  %s42_s13 = int_to_ptr.vmem [resolvable:$true] %s41_s13 }
  0x26   :  { %p487_p3 = scmp.lt.u32.totalorder %s483_s16, %s626_s2 }
  0x28   :  { %p489_p4 = pnand %p487_p3, %p484_p2 }
  0x2a   :  { %492 = shalt.err (!%p489_p4)
}
  0x2b   :  { %s493_s21 = scalar_lea.vmem %s42_s13, 16  ;;  %s497_s0 = scalar_lea.vmem %s42_s13, 32 }
  0x2c   :  { %p494_p5 = scmp.ne.s32.totalorder %s42_s13, %s493_s21  ;;  %p498_p6 = scmp.lt.s32.totalorder %s42_s13, %s42_s13 }
  0x2d   :  { %p499_p7 = scmp.lt.s32.totalorder %s497_s0, %s493_s21 }
  0x2f   :  { %p500_p8 = por %p499_p7, %p498_p6 }
  0x31   :  { %p501_p9 = pnand %p500_p8, %p494_p5 }
  0x33   :  { %504 = shalt.err (!%p501_p9)
}
  0x34   :  { %44 = dma.hbm_to_vmem [thread:$0]  %s626_s2, 16, %s42_s13, [#allocation7]  }
  0x35   :  { %527 = dma.done.wait [#allocation4], 512  }
  0x36   :  { %528 = vsyncadd [#allocation4], 4294966784 }
  0x37   :  { %529 = dma.done.wait [#allocation7], 2064  }
  0x38   :  { %530 = vsyncadd [#allocation7], 4294965232  ;;  %v417_v0 = vld [vmem:[#allocation6 + $0x40] sm:$0xff]   ;;  %v419_v2 = vld [vmem:[#allocation6 + $0x48] sm:$0xff]   ;;  %vm59_vm0 = vcmask 523264   ;;  %v540_v20 = vmov 0.0  }
  0x39   :  { %v418_v1 = vld [vmem:[#allocation6] sm:$0xff]   ;;  %364 = vmatprep.subr.bf16.mxu0 %v417_v0  ;;  %392 = vmatprep.subr.bf16.mxu1 %v417_v0  ;;  %v420_v3 = vld [vmem:[#allocation6 + $0x8] sm:$0xff]   ;;  %v421_v4 = vld [vmem:[#allocation6 + $0x50] sm:$0xff]   ;;  %60 = vst.msk [vmem:[#allocation2] sm:$0xff] %vm59_vm0, %v540_v20  ;;  %vm312_vm1 = vcmask 519168   ;;  %s541_s2 = smov [#allocation9]  }
  0x3a   :  { %365 = vmatpush3.bf16.msra.mxu0 %v418_v1  ;;  %400 = vmatpush3.bf16.msra.mxu1 %v418_v1  ;;  %v422_v5 = vld [vmem:[#allocation6 + $0x10] sm:$0xff]   ;;  %v423_v6 = vld [vmem:[#allocation6 + $0x58] sm:$0xff]   ;;  %v425_v8 = vld [vmem:[#allocation6 + $0x60] sm:$0xff]   ;;  %61 = vst.msk [vmem:[#allocation2 + $0x8] sm:$0xff] %vm59_vm0, %v540_v20  ;;  %s322_s26 = sshll.u32 %s541_s2, 4  ;;  %s323_s26 = int_to_ptr.vmem [resolvable:$true] %s322_s26 }
  0x3b   :  { %366 = vmatprep.subr.bf16.mxu0 %v419_v2  ;;  %393 = vmatprep.subr.bf16.mxu1 %v419_v2  ;;  %v424_v7 = vld [vmem:[#allocation6 + $0x18] sm:$0xff]   ;;  %v426_v9 = vld [vmem:[#allocation6 + $0x20] sm:$0xff]   ;;  %v427_v10 = vld [vmem:[#allocation6 + $0x68] sm:$0xff]   ;;  %62 = vst.msk [vmem:[#allocation2 + $0x10] sm:$0xff] %vm59_vm0, %v540_v20  ;;  %s505_s27 = scalar_lea.vmem %s323_s26, 256  ;;  %p510_p11 = scmp.lt.s32.totalorder %s323_s26, %s323_s26 }
  0x3c   :  { %v435_v11 = vld [vmem:[#allocation3 + $0x4] ss:$8 sps:$4 sm:$0xff]   ;;  %v438_v12 = vld [vmem:[#allocation3 + $0x14] ss:$8 sps:$4 sm:$0xff]   ;;  %v433_v18 = vld [vmem:[#allocation3] ss:$8 sps:$4 sm:$0xff]   ;;  %p506_p10 = scmp.ne.s32.totalorder %s323_s26, %s505_s27  ;;  %p511_p12 = scmp.lt.s32.totalorder %s505_s27, %s505_s27 }
  0x3d   :  { %v428_v13 = vld [vmem:[#allocation6 + $0x28] sm:$0xff]   ;;  %v429_v14 = vld [vmem:[#allocation6 + $0x70] sm:$0xff]   ;;  %252 = vmatprep.mubr.bf16.mxu0 %v435_v11  ;;  %260 = vmatprep.mubr.bf16.mxu1 %v438_v12  ;;  %v431_v16 = vld [vmem:[#allocation6 + $0x78] sm:$0xff]   ;;  %63 = vst.msk [vmem:[#allocation2 + $0x18] sm:$0xff] %vm59_vm0, %v540_v20 }
  0x3e   :  { %367 = vmatpush3.bf16.msra.mxu0 %v420_v3  ;;  %401 = vmatpush3.bf16.msra.mxu1 %v420_v3  ;;  %v430_v15 = vld [vmem:[#allocation6 + $0x30] sm:$0xff]   ;;  %v432_v17 = vld [vmem:[#allocation6 + $0x38] sm:$0xff]   ;;  %v355_v41 = vld [vmem:[#allocation8] ss:$0 sm:$0xff]  ;;  %p512_p13 = por %p511_p12, %p510_p11 }
  0x3f   :  { %368 = vmatprep.subr.bf16.mxu0 %v421_v4  ;;  %394 = vmatprep.subr.bf16.mxu1 %v421_v4  ;;  %v436_v19 = vld [vmem:[#allocation3 + $0x10] ss:$8 sps:$4 sm:$0xff]  }
  0x40   :  { %v64_v23 = vld [vmem:[#allocation2] sm:$0xff]  ;;  %p513_p0 = pnand %p512_p13, %p506_p10 }
  0x41   :  { %v65_v31 = vld [vmem:[#allocation2 + $0x8] sm:$0xff] }
  0x42   :  { %369 = vmatpush3.bf16.msra.mxu0 %v422_v5  ;;  %402 = vmatpush3.bf16.msra.mxu1 %v422_v5  ;;  %v66_v25 = vld [vmem:[#allocation2 + $0x10] sm:$0xff] }
  0x43   :  { %370 = vmatprep.subr.bf16.mxu0 %v423_v6  ;;  %395 = vmatprep.subr.bf16.mxu1 %v423_v6 }
  0x44   :  { %v67_v33 = vld [vmem:[#allocation2 + $0x18] sm:$0xff] }
  0x46   :  { %371 = vmatpush3.bf16.msra.mxu0 %v424_v7  ;;  %403 = vmatpush3.bf16.msra.mxu1 %v424_v7 }
  0x47   :  { %372 = vmatprep.subr.bf16.mxu0 %v425_v8  ;;  %396 = vmatprep.subr.bf16.mxu1 %v425_v8 }
  0x4a   :  { %373 = vmatpush3.bf16.msra.mxu0 %v426_v9  ;;  %404 = vmatpush3.bf16.msra.mxu1 %v426_v9 }
  0x4b   :  { %374 = vmatprep.subr.bf16.mxu0 %v427_v10  ;;  %397 = vmatprep.subr.bf16.mxu1 %v427_v10 }
  0x4e   :  { %375 = vmatpush3.bf16.msra.mxu0 %v428_v13  ;;  %405 = vmatpush3.bf16.msra.mxu1 %v428_v13 }
  0x4f   :  { %376 = vmatprep.subr.bf16.mxu0 %v429_v14  ;;  %398 = vmatprep.subr.bf16.mxu1 %v429_v14 }
  0x52   :  { %377 = vmatpush3.bf16.msra.mxu0 %v430_v15  ;;  %406 = vmatpush3.bf16.msra.mxu1 %v430_v15 }
  0x53   :  { %378 = vmatprep.subr.bf16.mxu0 %v431_v16  ;;  %399 = vmatprep.subr.bf16.mxu1 %v431_v16 }
  0x56   :  { %379 = vmatpush3.bf16.msra.mxu0 %v432_v17  ;;  %407 = vmatpush3.bf16.msra.mxu1 %v432_v17 }
  0x59   :  { %253 = vmatmul.mubr.bf16.vlgmr.msra.gmra.mrb[0].mxu0 %v433_v18  ;;  %261 = vmatmul.mubr.bf16.vlgmr.msra.gmra.mrb[0].mxu1 %v436_v19 }
 0x12c   :  { %v380_v21 = vpop.f32.mrb[0].mxu0  ;;  %v386_v22 = vpop.f32.mrb[0].mxu1 }
 0x12d   :  { %v381_v24 = vpop.f32.mrb[1].mxu0  ;;  %v387_v26 = vpop.f32.mrb[1].mxu1 }
 0x12e   :  { %v382_v27 = vadd.f32 %v381_v24, %v380_v21  ;;  %v388_v28 = vadd.f32 %v387_v26, %v386_v22  ;;  %v383_v29 = vpop.f32.mrb[2].mxu0  ;;  %v389_v30 = vpop.f32.mrb[2].mxu1 }
 0x12f   :  { %v384_v32 = vpop.f32.mrb[3].mxu0  ;;  %v390_v34 = vpop.f32.mrb[3].mxu1 }
 0x130   :  { %v269_v35 = vadd.f32 %v382_v27, %v64_v23  ;;  %v271_v36 = vadd.f32 %v388_v28, %v66_v25  ;;  %v385_v37 = vadd.f32 %v384_v32, %v383_v29  ;;  %v391_v38 = vadd.f32 %v390_v34, %v389_v30 }
 0x132   :  { %274 = vst.msk [vmem:[#allocation2] sm:$0xff] %vm59_vm0, %v269_v35  ;;  %276 = vst.msk [vmem:[#allocation2 + $0x10] sm:$0xff] %vm59_vm0, %v271_v36  ;;  %v270_v39 = vadd.f32 %v385_v37, %v65_v31  ;;  %v272_v40 = vadd.f32 %v391_v38, %v67_v33 }
 0x134   :  { %275 = vst.msk [vmem:[#allocation2 + $0x8] sm:$0xff] %vm59_vm0, %v270_v39  ;;  %277 = vst.msk [vmem:[#allocation2 + $0x18] sm:$0xff] %vm59_vm0, %v272_v40 }
 0x139   :  { %v281_v42 = vld [vmem:[#allocation2] sm:$0xff]  ;;  %v283_v43 = vld [vmem:[#allocation2 + $0x10] sm:$0xff] }
 0x13a   :  { %v292_v44 = vadd.f32 %v355_v41, %v281_v42  ;;  %v294_v45 = vadd.f32 %v355_v41, %v283_v43 }
 0x13b   :  { %v282_v46 = vld [vmem:[#allocation2 + $0x8] sm:$0xff]  ;;  %v284_v47 = vld [vmem:[#allocation2 + $0x18] sm:$0xff] }
 0x13c   :  { %v293_v48 = vadd.f32 %v355_v41, %v282_v46  ;;  %v295_v49 = vadd.f32 %v355_v41, %v284_v47  ;;  %v360_v50 = vpack.c.bf16 %v292_v44, %v292_v44  ;;  %v362_v51 = vpack.c.bf16 %v294_v45, %v294_v45 }
 0x13e   :  { %v361_v52 = vpack.c.bf16 %v293_v48, %v293_v48  ;;  %v363_v53 = vpack.c.bf16 %v295_v49, %v295_v49  ;;  %313 = vst.msk [vmem:[#allocation9] sm:$0xf] %vm312_vm1, %v360_v50  ;;  %315 = vst.msk [vmem:[#allocation9 + $0x8] sm:$0xf] %vm312_vm1, %v362_v51 }
 0x140   :  { %314 = vst.msk [vmem:[#allocation9 + $0x4] sm:$0xf] %vm312_vm1, %v361_v52  ;;  %316 = vst.msk [vmem:[#allocation9 + $0xc] sm:$0xf] %vm312_vm1, %v363_v53 }
 0x141   :  { %516 = shalt.err (!%p513_p0)
}
 0x142   :  { %s517_s30 = scalar_lea.hbm %s627_s3, 256 }
 0x143   :  { %p518_p1 = scmp.ne.s32.totalorder %s627_s3, %s517_s30  ;;  %p521_p2 = scmp.lt.u32.totalorder %s517_s30, %s627_s3 }
 0x145   :  { %p523_p3 = pnand %p521_p2, %p518_p1 }
 0x147   :  { %526 = shalt.err (!%p523_p3)
}
 0x148   :  { %328 = dma.vmem_to_hbm [thread:$0]  %s323_s26, 256, %s627_s3, [#allocation5], %s534_s22, %s534_s22, %s535_s23  }
 0x149   :  { %531 = dma.done.wait [#allocation5], 256  }
 0x14a   :  { %532 = vsyncadd [#allocation5], 4294967040 }
 0x14b   :  { %332 = vsyncpa [#allocation4], 1 }
 0x14c   :  { %333 = vsyncpa [#allocation7], 1 }
 0x14d   :  { %334 = vsyncpa [#allocation5], 1 }

// kernel: forward.20
= control target key start
LH: loop header
LB: loop body
LE: loop exit
PB: predicated region body
PF: predicated region fallthrough
CT: control target
= control target key end

     0   :  { %10 = vsyncpa [#allocation4], 0  ;;  %s621_s0 = inlined_call_operand.hbm [shape: bf16[10,64], index: 0, kind: input, shape index: {}]   ;;  %s622_s1 = inlined_call_operand.hbm [shape: f32[1,64], index: 1, kind: input, shape index: {}]   ;;  %s623_s2 = inlined_call_operand.hbm [shape: f32[1,64], index: 2, kind: input, shape index: {}]   ;;  %s624_s3 = inlined_call_operand.hbm [shape: bf16[64,192], index: 3, kind: input, shape index: {}]   ;;  %s625_s4 = inlined_call_operand.hbm [shape: f32[1,192], index: 4, kind: input, shape index: {}]   ;;  %s626_s5 = inlined_call_operand.hbm [shape: bf16[10,192], index: 5, kind: output, shape index: {}]  }
   0x1   :  { %11 = vsyncpa [#allocation7], 0 }
   0x2   :  { %12 = vsyncpa [#allocation10], 0 }
   0x3   :  { %13 = vsyncpa [#allocation5], 0  ;;  %s492_s18 = smov [#allocation6]   ;;  %s493_s20 = smov [#allocation9]  }
   0x4   :  { %s32_s19 = sshll.u32 %s492_s18, 4  ;;  %s51_s21 = sshll.u32 %s493_s20, 4  ;;  %s33_s19 = int_to_ptr.vmem [resolvable:$true] %s32_s19  ;;  %s533_s21 = int_to_ptr.vmem [resolvable:$true] %s51_s21 }
   0x5   :  { %s352_s24 = scalar_lea.hbm %s622_s1, 16 }
   0x6   :  { %p353_p0 = scmp.ne.s32.totalorder %s622_s1, %s352_s24  ;;  %p356_p1 = scmp.lt.u32.totalorder %s352_s24, %s622_s1 }
   0x8   :  { %p358_p2 = pnand %p356_p1, %p353_p0 }
   0xa   :  { %361 = shalt.err (!%p358_p2)
}
   0xb   :  { %s362_s29 = scalar_lea.vmem %s33_s19, 16  ;;  %s366_s30 = scalar_lea.vmem %s33_s19, 32 }
   0xc   :  { %p363_p3 = scmp.ne.s32.totalorder %s33_s19, %s362_s29  ;;  %p367_p4 = scmp.lt.s32.totalorder %s33_s19, %s33_s19 }
   0xd   :  { %p368_p5 = scmp.lt.s32.totalorder %s366_s30, %s362_s29 }
   0xf   :  { %p369_p6 = por %p368_p5, %p367_p4 }
  0x11   :  { %p370_p7 = pnand %p369_p6, %p363_p3 }
  0x13   :  { %373 = shalt.err (!%p370_p7)
}
  0x14   :  { %35 = dma.hbm_to_vmem [thread:$0]  %s622_s1, 16, %s33_s19, [#allocation7]  }
  0x15   :  { %s374_s10 = scalar_lea.hbm %s624_s3, 1024 }
  0x16   :  { %p375_p8 = scmp.ne.s32.totalorder %s624_s3, %s374_s10  ;;  %p378_p9 = scmp.lt.u32.totalorder %s374_s10, %s624_s3 }
  0x18   :  { %p380_p10 = pnand %p378_p9, %p375_p8 }
  0x1a   :  { %383 = shalt.err (!%p380_p10)
}
  0x1b   :  { %s384_s15 = scalar_lea.vmem %s533_s21, 1024  ;;  %p389_p12 = scmp.lt.s32.totalorder %s533_s21, %s533_s21 }
  0x1c   :  { %p385_p11 = scmp.ne.s32.totalorder %s533_s21, %s384_s15  ;;  %p390_p13 = scmp.lt.s32.totalorder %s384_s15, %s384_s15 }
  0x1e   :  { %p391_p0 = por %p390_p13, %p389_p12 }
  0x20   :  { %p392_p1 = pnand %p391_p0, %p385_p11 }
  0x22   :  { %395 = shalt.err (!%p392_p1)
}
  0x23   :  { %s494_s1 = smov 128   ;;  %s495_s16 = smov 8  }
  0x24   :  { %57 = dma.hbm_to_vmem [thread:$0]  %s624_s3, 1024, %s533_s21, [#allocation10], %s494_s1, %s494_s1, %s495_s16  }
  0x25   :  { %s496_s19 = smov [#allocation3]   ;;  %s396_s24 = scalar_lea.hbm %s621_s0, 128 }
  0x26   :  { %s19_s20 = sshll.u32 %s496_s19, 4  ;;  %p397_p2 = scmp.ne.s32.totalorder %s621_s0, %s396_s24  ;;  %s20_s20 = int_to_ptr.vmem [resolvable:$true] %s19_s20 }
  0x27   :  { %p400_p3 = scmp.lt.u32.totalorder %s396_s24, %s621_s0 }
  0x29   :  { %p402_p4 = pnand %p400_p3, %p397_p2 }
  0x2b   :  { %405 = shalt.err (!%p402_p4)
}
  0x2c   :  { %s406_s29 = scalar_lea.vmem %s20_s20, 128  ;;  %p411_p6 = scmp.lt.s32.totalorder %s20_s20, %s20_s20 }
  0x2d   :  { %p407_p5 = scmp.ne.s32.totalorder %s20_s20, %s406_s29  ;;  %p412_p7 = scmp.lt.s32.totalorder %s406_s29, %s406_s29 }
  0x2f   :  { %p413_p8 = por %p412_p7, %p411_p6 }
  0x31   :  { %p414_p9 = pnand %p413_p8, %p407_p5 }
  0x33   :  { %417 = shalt.err (!%p414_p9)
}
  0x34   :  { %s497_s3 = smov 64   ;;  %s498_s21 = smov 4  }
  0x35   :  { %25 = dma.hbm_to_vmem [thread:$0]  %s621_s0, 128, %s20_s20, [#allocation4], %s497_s3, %s497_s3, %s498_s21  }
  0x36   :  { %s499_s7 = smov [#allocation8]   ;;  %s500_s9 = smov [#allocation11]  }
  0x37   :  { %s42_s8 = sshll.u32 %s499_s7, 4  ;;  %s64_s10 = sshll.u32 %s500_s9, 4  ;;  %s43_s8 = int_to_ptr.vmem [resolvable:$true] %s42_s8  ;;  %s65_s10 = int_to_ptr.vmem [resolvable:$true] %s64_s10 }
  0x38   :  { %s418_s13 = scalar_lea.hbm %s623_s2, 16 }
  0x39   :  { %p419_p10 = scmp.ne.s32.totalorder %s623_s2, %s418_s13  ;;  %p422_p11 = scmp.lt.u32.totalorder %s418_s13, %s623_s2 }
  0x3b   :  { %p424_p12 = pnand %p422_p11, %p419_p10 }
  0x3d   :  { %427 = shalt.err (!%p424_p12)
}
  0x3e   :  { %s428_s0 = scalar_lea.vmem %s43_s8, 16  ;;  %s432_s19 = scalar_lea.vmem %s43_s8, 32 }
  0x3f   :  { %p429_p13 = scmp.ne.s32.totalorder %s43_s8, %s428_s0  ;;  %p433_p0 = scmp.lt.s32.totalorder %s43_s8, %s43_s8 }
  0x40   :  { %p434_p1 = scmp.lt.s32.totalorder %s432_s19, %s428_s0 }
  0x42   :  { %p435_p2 = por %p434_p1, %p433_p0 }
  0x44   :  { %p436_p3 = pnand %p435_p2, %p429_p13 }
  0x46   :  { %439 = shalt.err (!%p436_p3)
}
  0x47   :  { %45 = dma.hbm_to_vmem [thread:$0]  %s623_s2, 16, %s43_s8, [#allocation7]  }
  0x48   :  { %s440_s25 = scalar_lea.hbm %s625_s4, 32 }
  0x49   :  { %p441_p4 = scmp.ne.s32.totalorder %s625_s4, %s440_s25  ;;  %p444_p5 = scmp.lt.u32.totalorder %s440_s25, %s625_s4 }
  0x4b   :  { %p446_p6 = pnand %p444_p5, %p441_p4 }
  0x4d   :  { %449 = shalt.err (!%p446_p6)
}
  0x4e   :  { %s450_s3 = scalar_lea.vmem %s65_s10, 32  ;;  %p455_p8 = scmp.lt.s32.totalorder %s65_s10, %s65_s10 }
  0x4f   :  { %p451_p7 = scmp.ne.s32.totalorder %s65_s10, %s450_s3  ;;  %p456_p9 = scmp.lt.s32.totalorder %s450_s3, %s450_s3 }
  0x51   :  { %p457_p10 = por %p456_p9, %p455_p8 }
  0x53   :  { %p458_p11 = pnand %p457_p10, %p451_p7 }
  0x55   :  { %461 = shalt.err (!%p458_p11)
}
  0x56   :  { %67 = dma.hbm_to_vmem [thread:$0]  %s625_s4, 32, %s65_s10, [#allocation10]  }
  0x57   :  { %484 = dma.done.wait [#allocation4], 128  }
  0x58   :  { %485 = vsyncadd [#allocation4], 4294967168 }
  0x59   :  { %486 = dma.done.wait [#allocation7], 32  }
  0x5a   :  { %487 = vsyncadd [#allocation7], 4294967264 }
  0x5b   :  { %488 = dma.done.wait [#allocation10], 1056  }
  0x5c   :  { %489 = vsyncadd [#allocation10], 4294966240  ;;  %v88_v0 = vld [vmem:[#allocation3] sm:$0xf]  ;;  %vm92_vm0 = vcmask 523264   ;;  %vm96_vm1 = vcmask 517120   ;;  %v163_v44 = vlaneseq }
  0x5d   :  { %v89_v1 = vld [vmem:[#allocation3 + $0x4] sm:$0x1]  ;;  %v90_v2 = vunpack.c.l.bf16 %v88_v0  ;;  %v335_v16 = vld [vmem:[#allocation9 + $0x4] ss:$8 sps:$4 sm:$0xff]   ;;  %v337_v17 = vld [vmem:[#allocation9] ss:$8 sps:$4 sm:$0xff]  }
  0x5e   :  { %v91_v3 = vunpack.c.l.bf16 %v89_v1  ;;  %222 = vmatprep.subr.bf16.mxu0 %v335_v16  ;;  %v338_v18 = vld [vmem:[#allocation9 + $0x14] ss:$8 sps:$4 sm:$0xff]   ;;  %v340_v19 = vld [vmem:[#allocation9 + $0x10] ss:$8 sps:$4 sm:$0xff]   ;;  %v341_v20 = vld [vmem:[#allocation9 + $0x24] ss:$8 sps:$4 sm:$0xff]  }
  0x5f   :  { %v93_v4 = vsel %vm92_vm0, %v90_v2, 0.0  ;;  %223 = vmatpush1.bf16.msra.mxu0 %v337_v17  ;;  %v343_v21 = vld [vmem:[#allocation9 + $0x20] ss:$8 sps:$4 sm:$0xff]   ;;  %v344_v22 = vld [vmem:[#allocation9 + $0x34] ss:$8 sps:$4 sm:$0xff]   ;;  %v501_v24 = vmov 0  }
  0x60   :  { %94 = vadd.xlane.f32.xlu0 %v93_v4  ;;  %v97_v5 = vsel %vm96_vm1, %v91_v3, 0.0  ;;  %224 = vmatprep.subr.bf16.mxu0 %v338_v18  ;;  %v346_v23 = vld [vmem:[#allocation9 + $0x30] ss:$8 sps:$4 sm:$0xff]   ;;  %v304_v32 = vld [vmem:[#allocation6] ss:$0 sm:$0xff]  ;;  %vm147_vm2 = vcmask 519168  }
  0x61   :  { %254 = vmatprep.mubr.bf16.mxu0 %v501_v24  ;;  %v305_v34 = vld [vmem:[#allocation8] ss:$0 sm:$0xff]  ;;  %vm149_vm3 = vcmask 516096   ;;  %v164_v45 = vshrl.u32 %v163_v44, 7  ;;  %v161_v47 = vld [vmem:[#allocation11] sm:$0x3] }
  0x62   :  { %vm277_vm4 = vcmask 1043456   ;;  %vm278_vm5 = vcmask 523268   ;;  %vm281_vm6 = vcmask 1040384   ;;  %vm282_vm7 = vcmask 520196   ;;  %s502_s4 = smov [#allocation12]  }
  0x63   :  { %225 = vmatpush1.bf16.msra.mxu0 %v340_v19  ;;  %v165_v46 = vsub.s32 0, %v164_v45  ;;  %v169_v48 = vsub.s32 1, %v164_v45  ;;  %vm279_vm8 = vmor %vm278_vm5, %vm277_vm4  ;;  %s290_s30 = sshll.u32 %s502_s4, 4  ;;  %s291_s30 = int_to_ptr.vmem [resolvable:$true] %s290_s30 }
  0x64   :  { %98 = vadd.xlane.f32.xlu0 %v97_v5  ;;  %226 = vmatprep.subr.bf16.mxu0 %v341_v20  ;;  %vm283_vm9 = vmor %vm282_vm7, %vm281_vm6  ;;  %s462_s6 = scalar_lea.vmem %s291_s30, 256  ;;  %p467_p13 = scmp.lt.s32.totalorder %s291_s30, %s291_s30 }
  0x65   :  { %v166_v49 = vrot.slane %v161_v47, %v165_v46  ;;  %v170_v50 = vrot.slane %v161_v47, %v169_v48  ;;  %p463_p12 = scmp.ne.s32.totalorder %s291_s30, %s462_s6  ;;  %p468_p0 = scmp.lt.s32.totalorder %s462_s6, %s462_s6 }
  0x67   :  { %227 = vmatpush1.bf16.msra.mxu0 %v343_v21  ;;  %p469_p1 = por %p468_p0, %p467_p13 }
  0x68   :  { %228 = vmatprep.subr.bf16.mxu0 %v344_v22 }
  0x69   :  { %p470_p2 = pnand %p469_p1, %p463_p12 }
  0x6b   :  { %229 = vmatpush1.bf16.msra.mxu0 %v346_v23 }
  0xed   :  { %v95_v6 = vpop.xlane.xlu0 %94 }
  0xee   :  { %v101_v7 = vmul.f32 0.015625, %v95_v6 }
  0xf0   :  { %v103_v8 = vsub.f32 %v90_v2, %v101_v7 }
  0xf1   :  { %v99_v9 = vpop.xlane.xlu0 %98 }
  0xf2   :  { %v102_v10 = vmul.f32 0.015625, %v99_v9  ;;  %v105_v11 = vmul.f32 %v103_v8, %v103_v8 }
  0xf4   :  { %v104_v12 = vsub.f32 %v91_v3, %v102_v10  ;;  %v107_v13 = vsel %vm92_vm0, %v105_v11, 0.0 }
  0xf5   :  { %108 = vadd.xlane.f32.xlu1 %v107_v13 }
  0xf6   :  { %v106_v14 = vmul.f32 %v104_v12, %v104_v12 }
  0xf8   :  { %v110_v15 = vsel %vm96_vm1, %v106_v14, 0.0 }
  0xf9   :  { %111 = vadd.xlane.f32.xlu1 %v110_v15 }
 0x182   :  { %v109_v25 = vpop.xlane.xlu1 %108 }
 0x183   :  { %v113_v26 = vmul.f32 0.015625, %v109_v25 }
 0x185   :  { %v115_v27 = vadd.f32 1e-05, %v113_v26 }
 0x186   :  { %v112_v28 = vpop.xlane.xlu1 %111 }
 0x187   :  { %348 = vrsqrt.f32 %v115_v27  ;;  %v114_v29 = vmul.f32 0.015625, %v112_v28 }
 0x189   :  { %v116_v30 = vadd.f32 1e-05, %v114_v29 }
 0x18b   :  { %350 = vrsqrt.f32 %v116_v30 }
 0x191   :  { %v349_v31 = vpop.eup %348 }
 0x192   :  { %v119_v33 = vmul.f32 %v349_v31, %v103_v8 }
 0x194   :  { %v128_v35 = vmul.f32 %v304_v32, %v119_v33 }
 0x195   :  { %v351_v36 = vpop.eup %350 }
 0x196   :  { %v137_v37 = vadd.f32 %v305_v34, %v128_v35  ;;  %v120_v38 = vmul.f32 %v351_v36, %v104_v12 }
 0x198   :  { %v320_v39 = vpack.c.bf16 %v137_v37, %v137_v37  ;;  %v129_v40 = vmul.f32 %v304_v32, %v120_v38 }
 0x19a   :  { %148 = vst.msk [vmem:[#allocation2] sm:$0xf] %vm147_vm2, %v320_v39  ;;  %v138_v41 = vadd.f32 %v305_v34, %v129_v40 }
 0x19c   :  { %v321_v42 = vpack.c.bf16 %v138_v41, %v138_v41 }
 0x19e   :  { %150 = vst.msk [vmem:[#allocation2 + $0x4] sm:$0x1] %vm149_vm3, %v321_v42 }
 0x1a5   :  { %v347_v43 = vld [vmem:[#allocation2] sm:$0x1f]  }
 0x1a6   :  { %317 = vmatmul.mubr.msk.bf16.vlgmr.msra.gmra.mrb[0].mxu0 %vm92_vm0, %v347_v43 }
 0x279   :  { %v256_v51 = vpop.f32.mrb[0].mxu0 }
 0x27a   :  { %v257_v52 = vadd.f32 %v256_v51, %v166_v49  ;;  %v258_v53 = vpop.f32.mrb[1].mxu0 }
 0x27b   :  { %v259_v54 = vadd.f32 %v258_v53, %v170_v50  ;;  %v260_v55 = vpop.f32.mrb[2].mxu0 }
 0x27c   :  { %v261_v56 = vadd.f32 %v260_v55, %v166_v49  ;;  %v262_v57 = vpop.f32.mrb[3].mxu0 }
 0x27d   :  { %v322_v58 = vpack.c.bf16 %v259_v54, %v257_v52  ;;  %v263_v59 = vadd.f32 %v262_v57, %v170_v50 }
 0x27f   :  { %v323_v60 = vpack.c.bf16 %v263_v59, %v261_v56  ;;  %280 = vst.msk [vmem:[#allocation12] sm:$0xff] %vm279_vm8, %v322_v58 }
 0x281   :  { %284 = vst.msk [vmem:[#allocation12 + $0x8] sm:$0x11] %vm283_vm9, %v323_v60 }
 0x282   :  { %473 = shalt.err (!%p470_p2)
}
 0x283   :  { %s474_s9 = scalar_lea.hbm %s626_s5, 256 }
 0x284   :  { %p475_p3 = scmp.ne.s32.totalorder %s626_s5, %s474_s9  ;;  %p478_p4 = scmp.lt.u32.totalorder %s474_s9, %s626_s5 }
 0x286   :  { %p480_p5 = pnand %p478_p4, %p475_p3 }
 0x288   :  { %483 = shalt.err (!%p480_p5)
}
 0x289   :  { %296 = dma.vmem_to_hbm [thread:$0]  %s291_s30, 256, %s626_s5, [#allocation5], %s494_s1, %s494_s1, %s495_s16  }
 0x28a   :  { %490 = dma.done.wait [#allocation5], 256  }
 0x28b   :  { %491 = vsyncadd [#allocation5], 4294967040 }
 0x28c   :  { %300 = vsyncpa [#allocation4], 1 }
 0x28d   :  { %301 = vsyncpa [#allocation7], 1 }
 0x28e   :  { %302 = vsyncpa [#allocation10], 1 }
 0x28f   :  { %303 = vsyncpa [#allocation5], 1 }

// kernel: forward.21
= control target key start
LH: loop header
LB: loop body
LE: loop exit
PB: predicated region body
PF: predicated region fallthrough
CT: control target
= control target key end

     0   :  { %6 = vsyncpa [#allocation3], 0  ;;  %s1247_s0 = inlined_call_operand.hbm [shape: bf16[2,5,192], index: 0, kind: input, shape index: {}]   ;;  %s1248_s1 = inlined_call_operand.hbm [shape: bf16[2,5,64], index: 1, kind: output, shape index: {}]  }
   0x1   :  { %8 = vsyncpa [#allocation3 + $0x1], 0 }
   0x2   :  { %9 = vsyncpa [#allocation4], 0 }
   0x3   :  { %11 = vsyncpa [#allocation4 + $0x1], 0  ;;  %s1002_s6 = smov 0   ;;  %s1004_s7 = smov 0  }
   0x4   :  { %s1006_s8 = smov 0   ;;  %s1008_s9 = smov 0  }
   0x5 LB: > { %s1023_s10 = sadd.s32 4294967295, %s978_s9   ;;  %s714_s11 = sadd.s32 4294967294, %s978_s9   ;;  %s978_s9 = sphi %s1008_s9, %s1263_s9   ;;  %s974_s8 = sphi %s1006_s8, %s1262_s8   ;;  %s970_s7 = sphi %s1004_s7, %s1261_s7   ;;  %s966_s6 = sphi %s1002_s6, %s1260_s6  }
   0x6   : > { %s1027_s12 = sadd.s32 1, %s978_s9   ;;  %s24_s13 = sadd.s32 1, %s974_s8 }
   0x7   : > { %s21_s14 = ssub.s32 %s978_s9, %s1027_s12  ;;  %p31_p0 = scmp.ne.s32.totalorder %s974_s8, %s970_s7 }
   0x8   : > { %p22_p1 = scmp.eq.s32.totalorder %s21_s14, 0  ;;  %p32_p2 = scmp.eq.s32.totalorder %s978_s9, 0 }
   0x9   : > { %p37_p3 = scmp.ne.s32.totalorder %s970_s7, %s966_s6  ;;  %p38_p4 = scmp.eq.s32.totalorder %s1023_s10, 0 }
   0xa   : > { %s1039_s15 = scalar_select %p22_p1, %s974_s8, %s24_s13  }
   0xb   : > { %p1041_p5 = por %p32_p2, %p31_p0  ;;  %p1045_p6 = por %p38_p4, %p37_p3 }
   0xc   : > { %p61_p7 = scmp.eq.s32.totalorder %s1023_s10, 1  ;;  %p67_p8 = scmp.eq.s32.totalorder %s714_s11, 1 }
   0xd   : > { %p820_p10 = scmp.lt.s32.totalorder %s978_s9, 2  ;;  %s87_s20 = sand.u32 1, %s974_s8  }
   0xe   : > { %p1052_p11 = por %p61_p7, %p31_p0  ;;  %p1056_p12 = por %p67_p8, %p37_p3 }
   0xf   : > { %s740_s21 = sshll.u32 %s978_s9, 7  ;;  %s717_s22 = sshll.u32 %s87_s20, 3 }
  0x10   : > { %s1252_s18 = scalar_select %p1052_p11, 1, 0 }
  0x11   : > { %s1253_s19 = scalar_select %p1056_p12, 1, 0 }
  0x12   : > { %s1065_s25 = scalar_lea.hbm %s1247_s0, %s740_s21  ;;  %s91_s26 = scalar_lea.vmem [#allocation2], %s717_s22 }
  0x13   : > { %s99_s27 = sshll.u32 %s91_s26, 4  ;;  %p1069_p13 = pnand %p820_p10, %p1041_p5  ;;  %s1073_s27 = int_to_ptr.vmem [resolvable:$true] %s99_s27 }
  0x14   : > { %s88_s29 = scalar_lea.sflag [#allocation3], %s87_s20  ;;  %s882_s30 = scalar_lea.hbm %s1065_s25, 128 }
  0x15   : > { %p883_p2 = scmp.ne.s32.totalorder %s1065_s25, %s882_s30  ;;  %p884_p3 = pneg %p1069_p13 }
  0x16   : > { %s887_s4 = scalar_lea.hbm %s1247_s0, 256  ;;  %p888_p5 = scmp.lt.u32.totalorder %s1065_s25, %s1247_s0 }
  0x17   : > { %p885_p4 = pnand %p884_p3, %p883_p2  ;;  %p889_p8 = scmp.lt.u32.totalorder %s887_s4, %s882_s30 }
  0x18   : > { %p891_p9 = scmp.lt.u32.totalorder %s882_s30, %s1065_s25 }
  0x19   : > { %p886_p7 = pneg %p885_p4  ;;  %p890_p10 = por %p889_p8, %p888_p5 }
  0x1b   : > { %p892_p0 = por %p891_p9, %p890_p10 }
  0x1d   : > { %p893_p1 = pnand %p892_p0, %p886_p7 }
  0x1f   : > { %896 = shalt.err (!%p893_p1)
}
  0x20   : > { %s897_s13 = scalar_lea.vmem %s1073_s27, 128  ;;  %s980_s14 = smov [#allocation2]  }
  0x21   : > { %p898_p2 = scmp.ne.s32.totalorder %s1073_s27, %s897_s13  ;;  %s902_s16 = sshll.u32 %s980_s14, 4  ;;  %s903_s16 = int_to_ptr.vmem [resolvable:$false] %s902_s16 }
  0x22   : > { %s904_s20 = scalar_lea.vmem %s903_s16, 256  ;;  %p905_p11 = scmp.lt.s32.totalorder %s1073_s27, %s903_s16 }
  0x23   : > { %p900_p4 = pnand %p898_p2, %p884_p3  ;;  %p906_p5 = scmp.lt.s32.totalorder %s904_s20, %s897_s13 }
  0x25   : > { %p901_p12 = pneg %p900_p4  ;;  %p907_p8 = por %p906_p5, %p905_p11 }
  0x27   : > { %p908_p9 = pnand %p907_p8, %p901_p12 }
  0x29   : > { %911 = shalt.err (!%p908_p9)
}
  0x2a   : > { %815 = dma.hbm_to_vmem [thread:$0]  (!%p1069_p13), %s1065_s25, 128, %s1073_s27, %s88_s29  }
  0x2b   : > { %p1255_p0 = scmp.lt.s32.totalorder %s978_s9, 3  ;;  %p1256_p1 = scmp.ge.s32.totalorder %s978_s9, 1 }
  0x2d   : > { %p105_p3 = pnand %p1256_p1, %p1255_p0 }
  0x2e   : > { %s1107_s21 = sand.u32 (!%p105_p3), 1, %s970_s7  }
  0x2f   : > { %108 = sbr.rel (%p105_p3) target bundleno = 1607 (0x647), region = 24  ;;  %s721_s22 = sshll.u32 (!%p105_p3), %s1107_s21, 3 }
  0x30   : > { %s111_s23 = scalar_lea.sflag (!%p105_p3), [#allocation3], %s1107_s21  ;;  %s114_s24 = scalar_lea.vmem (!%p105_p3), [#allocation2], %s721_s22 }
  0x36   : > { %957 = dma.done.wait (%p1045_p6), %s111_s23, 128  }
  0x37   : > { %959 = vsyncadd (%p1045_p6), %s111_s23, 4294967168  ;;  %v981_v0 = vmov 0.0   ;;  %vm982_vm0 = vmmov 0   ;;  %v134_v1 = vld [vmem:[%s114_s24] sm:$0x77]  ;;  %s983_s25 = smov 64  }
  0x38   : > { %760 = vmatprep.subr.bf16.mxu0 %v981_v0  ;;  %762 = vmatprep.mubr.msk.bf16.mxu0 %vm982_vm0, %v981_v0  ;;  %v723_v2 = vcombine.low %v134_v1, %v134_v1  ;;  %v135_v3 = vunpack.c.l.bf16 %v134_v1  ;;  %vm143_vm1 = vcmask 130048   ;;  %s984_s17 = smov 48   ;;  %vm190_vm2 = vcmask 36864   ;;  %s985_s26 = smov 80  }
  0x39   : > { %766 = vmatprep.subr.bf16.mxu1 %v981_v0  ;;  %768 = vmatprep.mubr.msk.bf16.mxu1 %vm982_vm0, %v981_v0  ;;  %v1130_v18 = vcombine.high %v134_v1, %v134_v1  ;;  %vm209_vm3 = vcmask 1041408   ;;  %vm210_vm4 = vcmask 1042432   ;;  %v986_v19 = vmov 65535   ;;  %s987_s27 = smov 112   ;;  %s988_s28 = smov 32  }
  0x3a   : > { %141 = vrot.lane.b32.xlu0 %v723_v2, %s983_s25  ;;  %v136_v6 = vmul.f32 0.25, %v135_v3  ;;  %266 = vrot.lane.b32.xlu1 %v723_v2, %s984_s17  ;;  %v211_v20 = vsel %vm209_vm3, 4294967295, %v986_v19  ;;  %s989_s29 = smov 96   ;;  %s990_s30 = smov 16   ;;  %vm205_vm5 = vcmask 39936   ;;  %vm257_vm6 = vcmask 124928  }
  0x3b   : > { %v1132_v21 = vsel %vm210_vm4, %v211_v20, 0  ;;  %s722_s2 = sshll.u32 %s1107_s21, 2  ;;  %vm258_vm7 = vsmask.f32 2304  ;;  %vm381_vm9 = vcmask 256128   ;;  %vm503_vm11 = vcmask 387328  }
  0x3c   : > { %v137_v7 = vpack.c.bf16 %v136_v6, %v136_v6  ;;  %v214_v22 = vand.u32 %v1130_v18, %v1132_v21  ;;  %vm259_vm8 = vmand %vm257_vm6, %vm258_vm7  ;;  %s1158_s3 = scalar_lea.vmem [#allocation5], %s722_s2  ;;  %vm625_vm13 = vcmask 518528   ;;  %s737_s4 = sshll.u32 %s1023_s10, 6 }
  0x3d   : > { %v260_v37 = vld [vmem:[%s1158_s3] sm:$0x7]  ;;  %vm382_vm10 = vmand %vm381_vm9, %vm258_vm7  ;;  %s644_s5 = sshll.u32 %s1158_s3, 4  ;;  %s1202_s14 = scalar_lea.hbm %s1248_s1, %s737_s4  ;;  %s1204_s5 = int_to_ptr.vmem [resolvable:$true] %s644_s5 }
  0x3e   : > { %767 = vmatpush3.bf16.msra.mxu1 %v214_v22  ;;  %vm504_vm12 = vmand %vm503_vm11, %vm258_vm7  ;;  %s631_s16 = scalar_lea.sflag [#allocation4], %s1107_s21  ;;  %s912_s20 = scalar_lea.vmem %s1204_s5, 64 }
  0x3f   : > { %772 = vmatprep.subr.bf16.mxu1 %v981_v0  ;;  %vm626_vm14 = vmand %vm625_vm13, %vm258_vm7  ;;  %p913_p6 = scmp.ne.s32.totalorder %s1204_s5, %s912_s20  ;;  %p1257_p11 = scmp.ne.s32.totalorder %s1252_s18, 0 }
  0x40   : > { %s991_s10 = smov [#allocation5]  }
  0x41   : > { %p914_p12 = pnand %p913_p6, %p1257_p11  ;;  %s916_s22 = sshll.u32 %s991_s10, 4  ;;  %s917_s22 = int_to_ptr.vmem [resolvable:$false] %s916_s22 }
  0x42   : > { %s918_s23 = scalar_lea.vmem %s917_s22, 128  ;;  %p919_p7 = scmp.lt.s32.totalorder %s1204_s5, %s917_s22 }
  0x43   : > { %p915_p13 = pneg %p914_p12  ;;  %p920_p10 = scmp.lt.s32.totalorder %s918_s23, %s912_s20 }
  0x45   : > { %p921_p2 = por %p920_p10, %p919_p7 }
  0x47   : > { %p922_p4 = pnand %p921_p2, %p915_p13 }
  0xac   : > { %v142_v4 = vpop.permute.xlu0 %141  ;;  %v267_v23 = vpop.permute.xlu1 %266 }
  0xad   : > { %v148_v5 = vsel %vm143_vm1, %v142_v4, 0  ;;  %v272_v30 = vsel %vm143_vm1, %v267_v23, 0 }
  0xae   : > { %761 = vmatpush3.bf16.xpose.msra.mxu0 %v148_v5 }
  0xaf   : > { %778 = vmatprep.subr.bf16.mxu0 %v981_v0 }
  0xb5   : > { %763 = vmatmul.mubr.msk.bf16.vlgmr.msra.gmra.mrb[0].mxu0 %vm143_vm1, %v137_v7 }
  0xb6   : > { %780 = vmatprep.mubr.msk.bf16.mxu0 %vm982_vm0, %v981_v0 }
 0x188   : > { %v184_v8 = vpop.f32.mrb[0].mxu0 }
 0x189   : > { %v764_v9 = vpop.f32.mrb[1].mxu0  ;;  %v191_v10 = vsel %vm190_vm2, %v184_v8, -inf }
 0x18a   : > { %192 = vmax.xlane.f32.xlu0 %v191_v10  ;;  %v187_v11 = vpop.f32.mrb[2].mxu0 }
 0x18b   : > { %v765_v12 = vpop.f32.mrb[3].mxu0 }
 0x1a0   : > { %508 = vrot.lane.b32.xlu0 %v137_v7, %s985_s26 }
 0x217   : > { %v193_v13 = vpop.xlane.xlu0 %192 }
 0x218   : > { %v194_v14 = vsub.f32 %v184_v8, %v193_v13 }
 0x21a   : > { %v195_v15 = vmul.f32 1.442695, %v194_v14 }
 0x21b   : > { %v509_v35 = vpop.permute.xlu0 %508 }
 0x21c   : > { %866 = vpow2.f32 %v195_v15 }
 0x226   : > { %v867_v16 = vpop.eup %866 }
 0x227   : > { %v197_v17 = vsel %vm190_vm2, %v867_v16, 0.0 }
 0x228   : > { %198 = vadd.xlane.f32.xlu1 %v197_v17 }
 0x239   : > { %264 = vrot.lane.b32.xlu1 %v137_v7, %s987_s27 }
 0x23d   : > { %388 = vrot.lane.b32.xlu1 %v723_v2, %s988_s28 }
 0x241   : > { %386 = vrot.lane.b32.xlu1 %v137_v7, %s989_s29 }
 0x245   : > { %510 = vrot.lane.b32.xlu1 %v723_v2, %s990_s30 }
 0x2b5   : > { %v199_v24 = vpop.xlane.xlu1 %198 }
 0x2b6   : > { %868 = vrcp.f32 %v199_v24 }
 0x2b9   : > { %v265_v25 = vpop.permute.xlu1 %264 }
 0x2bd   : > { %v389_v29 = vpop.permute.xlu1 %388 }
 0x2be   : > { %v394_v32 = vsel %vm143_vm1, %v389_v29, 0 }
 0x2c0   : > { %v869_v26 = vpop.eup %868 }
 0x2c1   : > { %v201_v27 = vmul.f32 %v869_v26, %v867_v16  ;;  %v387_v31 = vpop.permute.xlu1 %386 }
 0x2c3   : > { %v202_v28 = vpack.c.bf16 %v201_v27, %v201_v27 }
 0x2c5   : > { %769 = vmatmul.mubr.msk.bf16.vlgmr.msra.gmra.mrb[0].mxu1 %vm205_vm5, %v202_v28  ;;  %v511_v33 = vpop.permute.xlu1 %510 }
 0x2c6   : > { %773 = vmatpush3.bf16.xpose.msra.mxu1 %v272_v30  ;;  %774 = vmatprep.mubr.msk.bf16.mxu1 %vm982_vm0, %v981_v0  ;;  %v516_v34 = vsel %vm143_vm1, %v511_v33, 0 }
 0x2c7   : > { %784 = vmatprep.subr.bf16.mxu1 %v981_v0 }
 0x2cd   : > { %775 = vmatmul.mubr.msk.bf16.vlgmr.msra.gmra.mrb[4].mxu1 %vm143_vm1, %v265_v25 }
 0x2ce   : > { %785 = vmatpush3.bf16.xpose.msra.mxu1 %v394_v32  ;;  %786 = vmatprep.mubr.msk.bf16.mxu1 %vm982_vm0, %v981_v0 }
 0x2cf   : > { %796 = vmatprep.subr.bf16.mxu1 %v981_v0 }
 0x2d5   : > { %787 = vmatmul.mubr.msk.bf16.vlgmr.msra.gmra.mrb[8].mxu1 %vm143_vm1, %v387_v31 }
 0x2d6   : > { %797 = vmatpush3.bf16.xpose.msra.mxu1 %v516_v34  ;;  %798 = vmatprep.mubr.msk.bf16.mxu1 %vm982_vm0, %v981_v0 }
 0x2dd   : > { %799 = vmatmul.mubr.msk.bf16.vlgmr.msra.gmra.mrb[12].mxu1 %vm143_vm1, %v509_v35 }
 0x398   : > { %v250_v36 = vpop.f32.mrb[0].mxu1 }
 0x399   : > { %v256_v38 = vpack.c.bf16 %v250_v36, %v250_v36  ;;  %v770_v39 = vpop.f32.mrb[1].mxu1 }
 0x39a   : > { %v253_v40 = vpop.f32.mrb[2].mxu1 }
 0x39b   : > { %v261_v41 = vsel %vm259_vm8, %v256_v38, %v260_v37  ;;  %v771_v42 = vpop.f32.mrb[3].mxu1 }
 0x39c   : > { %262 = vst [vmem:[%s1158_s3] sm:$0x7] %v261_v41 }
 0x3a0   : > { %v308_v43 = vpop.f32.mrb[4].mxu1 }
 0x3a1   : > { %v776_v44 = vpop.f32.mrb[5].mxu1  ;;  %v314_v45 = vsel %vm190_vm2, %v308_v43, -inf }
 0x3a2   : > { %315 = vmax.xlane.f32.xlu1 %v314_v45  ;;  %v311_v46 = vpop.f32.mrb[6].mxu1 }
 0x3a3   : > { %v777_v47 = vpop.f32.mrb[7].mxu1  ;;  %v383_v42 = vld [vmem:[%s1158_s3] sm:$0x7] }
 0x3a8   : > { %v430_v48 = vpop.f32.mrb[8].mxu1 }
 0x3a9   : > { %v788_v49 = vpop.f32.mrb[9].mxu1  ;;  %v436_v50 = vsel %vm190_vm2, %v430_v48, -inf }
 0x3aa   : > { %437 = vmax.xlane.f32.xlu0 %v436_v50  ;;  %v433_v51 = vpop.f32.mrb[10].mxu1 }
 0x3ab   : > { %v789_v52 = vpop.f32.mrb[11].mxu1 }
 0x3b0   : > { %v552_v53 = vpop.f32.mrb[12].mxu1 }
 0x3b1   : > { %v800_v54 = vpop.f32.mrb[13].mxu1  ;;  %v558_v55 = vsel %vm190_vm2, %v552_v53, -inf }
 0x3b2   : > { %559 = vmax.xlane.f32.xlu1 %v558_v55  ;;  %v555_v56 = vpop.f32.mrb[14].mxu1 }
 0x3b3   : > { %v801_v57 = vpop.f32.mrb[15].mxu1 }
 0x3c0   : > { %326 = vrot.lane.b32.xlu0 %v1130_v18, %s987_s27 }
 0x3c3   : > { %448 = vrot.lane.b32.xlu1 %v1130_v18, %s989_s29 }
 0x42f   : > { %v316_v58 = vpop.xlane.xlu1 %315 }
 0x430   : > { %v317_v59 = vsub.f32 %v308_v43, %v316_v58 }
 0x432   : > { %v318_v60 = vmul.f32 1.442695, %v317_v59 }
 0x434   : > { %870 = vpow2.f32 %v318_v60 }
 0x437   : > { %v438_v61 = vpop.xlane.xlu0 %437 }
 0x438   : > { %v439_v62 = vsub.f32 %v430_v48, %v438_v61 }
 0x43a   : > { %v440_v63 = vmul.f32 1.442695, %v439_v62 }
 0x43b   : > { %v327_v10 = vpop.permute.xlu0 %326 }
 0x43c   : > { %872 = vpow2.f32 %v440_v63  ;;  %v332_v11 = vand.u32 %v327_v10, %v1132_v21 }
 0x43e   : > { %v871_v1 = vpop.eup %870  ;;  %779 = vmatpush3.bf16.msra.mxu0 %v332_v11 }
 0x43f   : > { %v560_v2 = vpop.xlane.xlu1 %559  ;;  %v320_v3 = vsel %vm190_vm2, %v871_v1, 0.0  ;;  %790 = vmatprep.subr.bf16.mxu0 %v981_v0 }
 0x440   : > { %v561_v4 = vsub.f32 %v552_v53, %v560_v2  ;;  %321 = vadd.xlane.f32.xlu1 %v320_v3 }
 0x442   : > { %v562_v5 = vmul.f32 1.442695, %v561_v4 }
 0x443   : > { %v449_v12 = vpop.permute.xlu1 %448 }
 0x444   : > { %874 = vpow2.f32 %v562_v5  ;;  %v454_v19 = vand.u32 %v449_v12, %v1132_v21 }
 0x446   : > { %v873_v6 = vpop.eup %872 }
 0x447   : > { %v442_v7 = vsel %vm190_vm2, %v873_v6, 0.0 }
 0x448   : > { %443 = vadd.xlane.f32.xlu1 %v442_v7 }
 0x44e   : > { %v875_v8 = vpop.eup %874 }
 0x44f   : > { %v564_v9 = vsel %vm190_vm2, %v875_v8, 0.0 }
 0x450   : > { %565 = vadd.xlane.f32.xlu1 %v564_v9 }
 0x461   : > { %570 = vrot.lane.b32.xlu1 %v1130_v18, %s985_s26 }
 0x4cd   : > { %v322_v13 = vpop.xlane.xlu1 %321 }
 0x4ce   : > { %876 = vrcp.f32 %v322_v13 }
 0x4d5   : > { %v444_v14 = vpop.xlane.xlu1 %443 }
 0x4d6   : > { %878 = vrcp.f32 %v444_v14 }
 0x4d8   : > { %v877_v15 = vpop.eup %876 }
 0x4d9   : > { %v324_v16 = vmul.f32 %v877_v15, %v871_v1 }
 0x4db   : > { %v325_v17 = vpack.c.bf16 %v324_v16, %v324_v16 }
 0x4dd   : > { %v566_v20 = vpop.xlane.xlu1 %565  ;;  %781 = vmatmul.mubr.msk.bf16.vlgmr.msra.gmra.mrb[4].mxu0 %vm205_vm5, %v325_v17 }
 0x4de   : > { %880 = vrcp.f32 %v566_v20  ;;  %791 = vmatpush3.bf16.msra.mxu0 %v454_v19  ;;  %792 = vmatprep.mubr.msk.bf16.mxu0 %vm982_vm0, %v981_v0 }
 0x4df   : > { %802 = vmatprep.subr.bf16.mxu0 %v981_v0 }
 0x4e0   : > { %v879_v18 = vpop.eup %878 }
 0x4e1   : > { %v446_v22 = vmul.f32 %v879_v18, %v873_v6  ;;  %v571_v23 = vpop.permute.xlu1 %570 }
 0x4e2   : > { %v576_v24 = vand.u32 %v571_v23, %v1132_v21 }
 0x4e3   : > { %v447_v25 = vpack.c.bf16 %v446_v22, %v446_v22 }
 0x4e5   : > { %793 = vmatmul.mubr.msk.bf16.vlgmr.msra.gmra.mrb[8].mxu0 %vm205_vm5, %v447_v25 }
 0x4e6   : > { %803 = vmatpush3.bf16.msra.mxu0 %v576_v24  ;;  %804 = vmatprep.mubr.msk.bf16.mxu0 %vm982_vm0, %v981_v0 }
 0x4e8   : > { %v881_v26 = vpop.eup %880 }
 0x4e9   : > { %v568_v27 = vmul.f32 %v881_v26, %v875_v8 }
 0x4eb   : > { %v569_v28 = vpack.c.bf16 %v568_v27, %v568_v27 }
 0x4ed   : > { %805 = vmatmul.mubr.msk.bf16.vlgmr.msra.gmra.mrb[12].mxu0 %vm205_vm5, %v569_v28 }
 0x5b0   : > { %v368_v29 = vpop.f32.mrb[4].mxu0 }
 0x5b1   : > { %v741_v30 = vpack.c.bf16 %v368_v29, %v368_v29  ;;  %v782_v31 = vpop.f32.mrb[5].mxu0 }
 0x5b2   : > { %v371_v32 = vpop.f32.mrb[6].mxu0 }
 0x5b3   : > { %378 = vrot.lane.b32.xlu0 %v741_v30, %s990_s30  ;;  %v783_v21 = vpop.f32.mrb[7].mxu0 }
 0x5b8   : > { %v490_v33 = vpop.f32.mrb[8].mxu0 }
 0x5b9   : > { %v742_v34 = vpack.c.bf16 %v490_v33, %v490_v33  ;;  %v794_v35 = vpop.f32.mrb[9].mxu0 }
 0x5ba   : > { %v493_v36 = vpop.f32.mrb[10].mxu0 }
 0x5bb   : > { %500 = vrot.lane.b32.xlu1 %v742_v34, %s988_s28  ;;  %v795_v0 = vpop.f32.mrb[11].mxu0 }
 0x5c0   : > { %v612_v37 = vpop.f32.mrb[12].mxu0 }
 0x5c1   : > { %v743_v38 = vpack.c.bf16 %v612_v37, %v612_v37  ;;  %v806_v39 = vpop.f32.mrb[13].mxu0 }
 0x5c2   : > { %v615_v40 = vpop.f32.mrb[14].mxu0 }
 0x5c3   : > { %622 = vrot.lane.b32.xlu0 %v743_v38, %s984_s17  ;;  %v807_v41 = vpop.f32.mrb[15].mxu0 }
 0x625   : > { %v379_v43 = vpop.permute.xlu0 %378 }
 0x626   : > { %v384_v44 = vsel %vm382_vm10, %v379_v43, %v383_v42 }
 0x627   : > { %385 = vst [vmem:[%s1158_s3] sm:$0x7] %v384_v44 }
 0x62d   : > { %v501_v45 = vpop.permute.xlu1 %500 }
 0x62e   : > { %v505_v46 = vld [vmem:[%s1158_s3] sm:$0x7] }
 0x62f   : > { %v506_v47 = vsel %vm504_vm12, %v501_v45, %v505_v46 }
 0x630   : > { %507 = vst [vmem:[%s1158_s3] sm:$0x7] %v506_v47 }
 0x635   : > { %v623_v49 = vpop.permute.xlu0 %622 }
 0x637   : > { %v627_v48 = vld [vmem:[%s1158_s3] sm:$0x7] }
 0x638   : > { %v628_v50 = vsel %vm626_vm14, %v623_v49, %v627_v48 }
 0x639   : > { %629 = vst [vmem:[%s1158_s3] sm:$0x7] %v628_v50 }
 0x63a   : > { %925 = shalt.err (!%p922_p4)
}
 0x63b   : > { %s926_s21 = scalar_lea.hbm %s1202_s14, 64  ;;  %s930_s17 = scalar_lea.hbm %s1248_s1, 128 }
 0x63c   : > { %p927_p5 = scmp.ne.s32.totalorder %s1202_s14, %s926_s21  ;;  %p931_p0 = scmp.lt.u32.totalorder %s1202_s14, %s1248_s1 }
 0x63d   : > { %p932_p1 = scmp.lt.u32.totalorder %s930_s17, %s926_s21  ;;  %p934_p6 = scmp.lt.u32.totalorder %s926_s21, %s1202_s14 }
 0x63e   : > { %p928_p8 = pnand %p927_p5, %p1257_p11 }
 0x63f   : > { %p933_p3 = por %p932_p1, %p931_p0 }
 0x640   : > { %p929_p9 = pneg %p928_p8 }
 0x641   : > { %p935_p12 = por %p934_p6, %p933_p3 }
 0x643   : > { %p936_p13 = pnand %p935_p12, %p929_p9 }
 0x645   : > { %939 = shalt.err (!%p936_p13)
}
 0x646   : > { %810 = dma.vmem_to_hbm [thread:$0]  (%p1257_p11), %s1204_s5, 64, %s1202_s14, %s631_s16  }
 0x647 PF: > { %s656_s28 = sand.u32 1, %s966_s6   ;;  %p1258_p7 = scmp.ne.s32.totalorder %s1253_s19, 0 }
 0x648   : > { %p1259_p10 = scmp.ge.s32.totalorder %s978_s9, 2  ;;  %s657_s29 = scalar_lea.sflag [#allocation4], %s656_s28 }
 0x64a   : > { %p817_p2 = pnand %p1259_p10, %p1258_p7 }
 0x64c   : > { %961 = dma.done.wait (!%p817_p2), %s657_s29, 64  }
 0x64d   : > { %963 = vsyncadd (!%p817_p2), %s657_s29, 4294967232  ;;  %p14_p4 = scmp.ge.s32.totalorder %s1027_s12, 4   ;;  %s1260_s6 = smov %s970_s7 }
 0x64e   : > { %s1261_s7 = smov %s974_s8  ;;  %s1262_s8 = smov %s1039_s15 }
 0x64f   : > { %s1263_s9 = smov %s1027_s12  ;;  %16 = sbr.rel (!%p14_p4) target bundleno = 5 (0x5), region = 69 }
 0x656   :  { %662 = vsyncpa [#allocation3], 1 }
 0x657   :  { %664 = vsyncpa [#allocation3 + $0x1], 1 }
 0x658   :  { %665 = vsyncpa [#allocation4], 1 }
 0x659   :  { %667 = vsyncpa [#allocation4 + $0x1], 1 }

// kernel: forward.22
= control target key start
LH: loop header
LB: loop body
LE: loop exit
PB: predicated region body
PF: predicated region fallthrough
CT: control target
= control target key end

     0   :  { %9 = vsyncpa [#allocation4], 0  ;;  %s505_s0 = inlined_call_operand.hbm [shape: bf16[10,64], index: 0, kind: input, shape index: {}]   ;;  %s506_s1 = inlined_call_operand.hbm [shape: bf16[64,64], index: 1, kind: input, shape index: {}]   ;;  %s507_s2 = inlined_call_operand.hbm [shape: f32[1,64], index: 2, kind: input, shape index: {}]   ;;  %s508_s3 = inlined_call_operand.hbm [shape: bf16[10,64], index: 3, kind: input, shape index: {}]   ;;  %s509_s4 = inlined_call_operand.hbm [shape: bf16[10,64], index: 4, kind: output, shape index: {}]  }
   0x1   :  { %10 = vsyncpa [#allocation7], 0 }
   0x2   :  { %11 = vsyncpa [#allocation10], 0 }
   0x3   :  { %12 = vsyncpa [#allocation5], 0  ;;  %s382_s15 = smov [#allocation6]   ;;  %s383_s17 = smov [#allocation3]  }
   0x4   :  { %s30_s16 = sshll.u32 %s382_s15, 4  ;;  %s18_s18 = sshll.u32 %s383_s17, 4  ;;  %s31_s16 = int_to_ptr.vmem [resolvable:$true] %s30_s16  ;;  %s416_s18 = int_to_ptr.vmem [resolvable:$true] %s18_s18 }
   0x5   :  { %s264_s21 = scalar_lea.hbm %s506_s1, 512 }
   0x6   :  { %p265_p0 = scmp.ne.s32.totalorder %s506_s1, %s264_s21  ;;  %p268_p1 = scmp.lt.u32.totalorder %s264_s21, %s506_s1 }
   0x8   :  { %p270_p2 = pnand %p268_p1, %p265_p0 }
   0xa   :  { %273 = shalt.err (!%p270_p2)
}
   0xb   :  { %s274_s26 = scalar_lea.vmem %s31_s16, 512  ;;  %p279_p4 = scmp.lt.s32.totalorder %s31_s16, %s31_s16 }
   0xc   :  { %p275_p3 = scmp.ne.s32.totalorder %s31_s16, %s274_s26  ;;  %p280_p5 = scmp.lt.s32.totalorder %s274_s26, %s274_s26 }
   0xe   :  { %p281_p6 = por %p280_p5, %p279_p4 }
  0x10   :  { %p282_p7 = pnand %p281_p6, %p275_p3 }
  0x12   :  { %285 = shalt.err (!%p282_p7)
}
  0x13   :  { %s384_s27 = smov 64   ;;  %s385_s28 = smov 4  }
  0x14   :  { %36 = dma.hbm_to_vmem [thread:$0]  %s506_s1, 512, %s31_s16, [#allocation7], %s384_s27, %s384_s27, %s385_s28  }
  0x15   :  { %s286_s7 = scalar_lea.hbm %s505_s0, 128 }
  0x16   :  { %p287_p8 = scmp.ne.s32.totalorder %s505_s0, %s286_s7  ;;  %p290_p9 = scmp.lt.u32.totalorder %s286_s7, %s505_s0 }
  0x18   :  { %p292_p10 = pnand %p290_p9, %p287_p8 }
  0x1a   :  { %295 = shalt.err (!%p292_p10)
}
  0x1b   :  { %s296_s12 = scalar_lea.vmem %s416_s18, 128  ;;  %p301_p12 = scmp.lt.s32.totalorder %s416_s18, %s416_s18 }
  0x1c   :  { %p297_p11 = scmp.ne.s32.totalorder %s416_s18, %s296_s12  ;;  %p302_p13 = scmp.lt.s32.totalorder %s296_s12, %s296_s12 }
  0x1e   :  { %p303_p0 = por %p302_p13, %p301_p12 }
  0x20   :  { %p304_p1 = pnand %p303_p0, %p297_p11 }
  0x22   :  { %307 = shalt.err (!%p304_p1)
}
  0x23   :  { %24 = dma.hbm_to_vmem [thread:$0]  %s505_s0, 128, %s416_s18, [#allocation4], %s384_s27, %s384_s27, %s385_s28  }
  0x24   :  { %s386_s14 = smov [#allocation8]   ;;  %s387_s16 = smov [#allocation9]  }
  0x25   :  { %s43_s15 = sshll.u32 %s386_s14, 4  ;;  %s52_s17 = sshll.u32 %s387_s16, 4  ;;  %s44_s15 = int_to_ptr.vmem [resolvable:$true] %s43_s15  ;;  %s453_s17 = int_to_ptr.vmem [resolvable:$true] %s52_s17 }
  0x26   :  { %s308_s21 = scalar_lea.hbm %s507_s2, 16 }
  0x27   :  { %p309_p2 = scmp.ne.s32.totalorder %s507_s2, %s308_s21  ;;  %p312_p3 = scmp.lt.u32.totalorder %s308_s21, %s507_s2 }
  0x29   :  { %p314_p4 = pnand %p312_p3, %p309_p2 }
  0x2b   :  { %317 = shalt.err (!%p314_p4)
}
  0x2c   :  { %s318_s0 = scalar_lea.vmem %s44_s15, 16  ;;  %s322_s18 = scalar_lea.vmem %s44_s15, 32 }
  0x2d   :  { %p319_p5 = scmp.ne.s32.totalorder %s44_s15, %s318_s0  ;;  %p323_p6 = scmp.lt.s32.totalorder %s44_s15, %s44_s15 }
  0x2e   :  { %p324_p7 = scmp.lt.s32.totalorder %s322_s18, %s318_s0 }
  0x30   :  { %p325_p8 = por %p324_p7, %p323_p6 }
  0x32   :  { %p326_p9 = pnand %p325_p8, %p319_p5 }
  0x34   :  { %329 = shalt.err (!%p326_p9)
}
  0x35   :  { %46 = dma.hbm_to_vmem [thread:$0]  %s507_s2, 16, %s44_s15, [#allocation7]  }
  0x36   :  { %s330_s6 = scalar_lea.hbm %s508_s3, 128 }
  0x37   :  { %p331_p10 = scmp.ne.s32.totalorder %s508_s3, %s330_s6  ;;  %p334_p11 = scmp.lt.u32.totalorder %s330_s6, %s508_s3 }
  0x39   :  { %p336_p12 = pnand %p334_p11, %p331_p10 }
  0x3b   :  { %339 = shalt.err (!%p336_p12)
}
  0x3c   :  { %s340_s11 = scalar_lea.vmem %s453_s17, 128  ;;  %p345_p0 = scmp.lt.s32.totalorder %s453_s17, %s453_s17 }
  0x3d   :  { %p341_p13 = scmp.ne.s32.totalorder %s453_s17, %s340_s11  ;;  %p346_p1 = scmp.lt.s32.totalorder %s340_s11, %s340_s11 }
  0x3f   :  { %p347_p2 = por %p346_p1, %p345_p0 }
  0x41   :  { %p348_p3 = pnand %p347_p2, %p341_p13 }
  0x43   :  { %351 = shalt.err (!%p348_p3)
}
  0x44   :  { %58 = dma.hbm_to_vmem [thread:$0]  %s508_s3, 128, %s453_s17, [#allocation10], %s384_s27, %s384_s27, %s385_s28  }
  0x45   :  { %374 = dma.done.wait [#allocation4], 128  }
  0x46   :  { %375 = vsyncadd [#allocation4], 4294967168 }
  0x47   :  { %376 = dma.done.wait [#allocation7], 528  }
  0x48   :  { %377 = vsyncadd [#allocation7], 4294966768 }
  0x49   :  { %378 = dma.done.wait [#allocation10], 128  }
  0x4a   :  { %379 = vsyncadd [#allocation10], 4294967168  ;;  %vm76_vm0 = vcmask 523264   ;;  %v388_v0 = vmov 0.0   ;;  %vm389_vm1 = vmmov 0   ;;  %v259_v1 = vld [vmem:[#allocation6] sm:$0xff]  }
  0x4b   :  { %238 = vmatprep.subr.bf16.mxu0 %v388_v0  ;;  %246 = vmatprep.mubr.msk.bf16.mxu0 %vm389_vm1, %v388_v0  ;;  %77 = vst.msk [vmem:[#allocation2] sm:$0xff] %vm76_vm0, %v388_v0  ;;  %v260_v2 = vld [vmem:[#allocation6 + $0x8] sm:$0xff]   ;;  %v261_v3 = vld [vmem:[#allocation6 + $0x10] sm:$0xff]   ;;  %v262_v4 = vld [vmem:[#allocation6 + $0x18] sm:$0xff]   ;;  %vm78_vm2 = vcmask 517120   ;;  %vm199_vm3 = vcmask 519168  }
  0x4c   :  { %239 = vmatpush3.bf16.msra.mxu0 %v259_v1  ;;  %v263_v5 = vld [vmem:[#allocation3] sm:$0x1f]   ;;  %79 = vst.msk [vmem:[#allocation2 + $0x8] sm:$0x3] %vm78_vm2, %v388_v0  ;;  %v185_v14 = vld [vmem:[#allocation9] sm:$0xf] }
  0x4d   :  { %240 = vmatprep.subr.bf16.mxu0 %v388_v0  ;;  %v228_v15 = vld [vmem:[#allocation8] ss:$0 sm:$0xff]  ;;  %v186_v16 = vld [vmem:[#allocation9 + $0x4] sm:$0x1]  ;;  %v187_v17 = vunpack.c.l.bf16 %v185_v14  ;;  %s390_s3 = smov [#allocation11]   ;;  %vm201_vm4 = vcmask 516096  }
  0x4e   :  { %v188_v20 = vunpack.c.l.bf16 %v186_v16  ;;  %s208_s1 = sshll.u32 %s390_s3, 4  ;;  %s209_s1 = int_to_ptr.vmem [resolvable:$true] %s208_s1 }
  0x4f   :  { %s352_s13 = scalar_lea.vmem %s209_s1, 128  ;;  %p357_p5 = scmp.lt.s32.totalorder %s209_s1, %s209_s1 }
  0x50   :  { %241 = vmatpush3.bf16.msra.mxu0 %v260_v2  ;;  %p353_p4 = scmp.ne.s32.totalorder %s209_s1, %s352_s13  ;;  %p358_p6 = scmp.lt.s32.totalorder %s352_s13, %s352_s13 }
  0x51   :  { %242 = vmatprep.subr.bf16.mxu0 %v388_v0 }
  0x52   :  { %v80_v6 = vld [vmem:[#allocation2] sm:$0xff]  ;;  %p359_p7 = por %p358_p6, %p357_p5 }
  0x53   :  { %v81_v8 = vld [vmem:[#allocation2 + $0x8] sm:$0x3] }
  0x54   :  { %243 = vmatpush3.bf16.msra.mxu0 %v261_v3  ;;  %p360_p8 = pnand %p359_p7, %p353_p4 }
  0x55   :  { %244 = vmatprep.subr.bf16.mxu0 %v388_v0 }
  0x58   :  { %245 = vmatpush3.bf16.msra.mxu0 %v262_v4 }
  0x5b   :  { %247 = vmatmul.mubr.msk.bf16.vlgmr.msra.gmra.mrb[0].mxu0 %vm76_vm0, %v263_v5 }
 0x12e   :  { %v159_v7 = vpop.f32.mrb[0].mxu0 }
 0x12f   :  { %v166_v9 = vadd.f32 %v159_v7, %v80_v6  ;;  %v248_v10 = vpop.f32.mrb[1].mxu0 }
 0x130   :  { %v162_v11 = vpop.f32.mrb[2].mxu0 }
 0x131   :  { %168 = vst.msk [vmem:[#allocation2] sm:$0xff] %vm76_vm0, %v166_v9  ;;  %v167_v12 = vadd.f32 %v162_v11, %v81_v8  ;;  %v249_v13 = vpop.f32.mrb[3].mxu0 }
 0x133   :  { %170 = vst.msk [vmem:[#allocation2 + $0x8] sm:$0x3] %vm78_vm2, %v167_v12 }
 0x138   :  { %v174_v18 = vld [vmem:[#allocation2] sm:$0xff] }
 0x139   :  { %v183_v19 = vadd.f32 %v228_v15, %v174_v18 }
 0x13a   :  { %v175_v21 = vld [vmem:[#allocation2 + $0x8] sm:$0x3] }
 0x13b   :  { %v184_v22 = vadd.f32 %v228_v15, %v175_v21  ;;  %v189_v23 = vadd.f32 %v187_v17, %v183_v19 }
 0x13d   :  { %v190_v24 = vadd.f32 %v188_v20, %v184_v22  ;;  %v231_v25 = vpack.c.bf16 %v189_v23, %v189_v23 }
 0x13f   :  { %v232_v26 = vpack.c.bf16 %v190_v24, %v190_v24  ;;  %200 = vst.msk [vmem:[#allocation11] sm:$0xf] %vm199_vm3, %v231_v25 }
 0x141   :  { %202 = vst.msk [vmem:[#allocation11 + $0x4] sm:$0x1] %vm201_vm4, %v232_v26 }
 0x142   :  { %363 = shalt.err (!%p360_p8)
}
 0x143   :  { %s364_s16 = scalar_lea.hbm %s509_s4, 128 }
 0x144   :  { %p365_p9 = scmp.ne.s32.totalorder %s509_s4, %s364_s16  ;;  %p368_p10 = scmp.lt.u32.totalorder %s364_s16, %s509_s4 }
 0x146   :  { %p370_p11 = pnand %p368_p10, %p365_p9 }
 0x148   :  { %373 = shalt.err (!%p370_p11)
}
 0x149   :  { %214 = dma.vmem_to_hbm [thread:$0]  %s209_s1, 128, %s509_s4, [#allocation5], %s384_s27, %s384_s27, %s385_s28  }
 0x14a   :  { %380 = dma.done.wait [#allocation5], 128  }
 0x14b   :  { %381 = vsyncadd [#allocation5], 4294967168 }
 0x14c   :  { %218 = vsyncpa [#allocation4], 1 }
 0x14d   :  { %219 = vsyncpa [#allocation7], 1 }
 0x14e   :  { %220 = vsyncpa [#allocation10], 1 }
 0x14f   :  { %221 = vsyncpa [#allocation5], 1 }

// kernel: forward.24
= control target key start
LH: loop header
LB: loop body
LE: loop exit
PB: predicated region body
PF: predicated region fallthrough
CT: control target
= control target key end

     0   :  { %9 = vsyncpa [#allocation4], 0  ;;  %s623_s0 = inlined_call_operand.hbm [shape: bf16[10,256], index: 0, kind: input, shape index: {}]   ;;  %s624_s1 = inlined_call_operand.hbm [shape: bf16[256,64], index: 1, kind: input, shape index: {}]   ;;  %s625_s2 = inlined_call_operand.hbm [shape: f32[1,64], index: 2, kind: input, shape index: {}]   ;;  %s626_s3 = inlined_call_operand.hbm [shape: bf16[10,64], index: 3, kind: input, shape index: {}]   ;;  %s627_s4 = inlined_call_operand.hbm [shape: bf16[10,64], index: 4, kind: output, shape index: {}]  }
   0x1   :  { %10 = vsyncpa [#allocation7], 0 }
   0x2   :  { %11 = vsyncpa [#allocation10], 0 }
   0x3   :  { %12 = vsyncpa [#allocation5], 0  ;;  %s512_s15 = smov [#allocation6]   ;;  %s394_s19 = scalar_lea.hbm %s624_s1, 2048 }
   0x4   :  { %s30_s16 = sshll.u32 %s512_s15, 4  ;;  %p395_p0 = scmp.ne.s32.totalorder %s624_s1, %s394_s19  ;;  %s31_s16 = int_to_ptr.vmem [resolvable:$true] %s30_s16 }
   0x5   :  { %p398_p1 = scmp.lt.u32.totalorder %s394_s19, %s624_s1 }
   0x7   :  { %p400_p2 = pnand %p398_p1, %p395_p0 }
   0x9   :  { %403 = shalt.err (!%p400_p2)
}
   0xa   :  { %s404_s24 = scalar_lea.vmem %s31_s16, 2048  ;;  %p409_p4 = scmp.lt.s32.totalorder %s31_s16, %s31_s16 }
   0xb   :  { %p405_p3 = scmp.ne.s32.totalorder %s31_s16, %s404_s24  ;;  %p410_p5 = scmp.lt.s32.totalorder %s404_s24, %s404_s24 }
   0xd   :  { %p411_p6 = por %p410_p5, %p409_p4 }
   0xf   :  { %p412_p7 = pnand %p411_p6, %p405_p3 }
  0x11   :  { %415 = shalt.err (!%p412_p7)
}
  0x12   :  { %s513_s25 = smov 64   ;;  %s514_s26 = smov 4  }
  0x13   :  { %36 = dma.hbm_to_vmem [thread:$0]  %s624_s1, 2048, %s31_s16, [#allocation7], %s513_s25, %s513_s25, %s514_s26  }
  0x14   :  { %s515_s29 = smov [#allocation3]   ;;  %s416_s7 = scalar_lea.hbm %s623_s0, 256 }
  0x15   :  { %s18_s30 = sshll.u32 %s515_s29, 4  ;;  %p417_p8 = scmp.ne.s32.totalorder %s623_s0, %s416_s7  ;;  %s19_s30 = int_to_ptr.vmem [resolvable:$true] %s18_s30 }
  0x16   :  { %p420_p9 = scmp.lt.u32.totalorder %s416_s7, %s623_s0 }
  0x18   :  { %p422_p10 = pnand %p420_p9, %p417_p8 }
  0x1a   :  { %425 = shalt.err (!%p422_p10)
}
  0x1b   :  { %s426_s12 = scalar_lea.vmem %s19_s30, 256  ;;  %p431_p12 = scmp.lt.s32.totalorder %s19_s30, %s19_s30 }
  0x1c   :  { %p427_p11 = scmp.ne.s32.totalorder %s19_s30, %s426_s12  ;;  %p432_p13 = scmp.lt.s32.totalorder %s426_s12, %s426_s12 }
  0x1e   :  { %p433_p0 = por %p432_p13, %p431_p12 }
  0x20   :  { %p434_p1 = pnand %p433_p0, %p427_p11 }
  0x22   :  { %437 = shalt.err (!%p434_p1)
}
  0x23   :  { %s516_s1 = smov 128   ;;  %s517_s13 = smov 8  }
  0x24   :  { %24 = dma.hbm_to_vmem [thread:$0]  %s623_s0, 256, %s19_s30, [#allocation4], %s516_s1, %s516_s1, %s517_s13  }
  0x25   :  { %s518_s16 = smov [#allocation8]   ;;  %s519_s18 = smov [#allocation9]  }
  0x26   :  { %s43_s17 = sshll.u32 %s518_s16, 4  ;;  %s52_s19 = sshll.u32 %s519_s18, 4  ;;  %s44_s17 = int_to_ptr.vmem [resolvable:$true] %s43_s17  ;;  %s574_s19 = int_to_ptr.vmem [resolvable:$true] %s52_s19 }
  0x27   :  { %s438_s22 = scalar_lea.hbm %s625_s2, 16 }
  0x28   :  { %p439_p2 = scmp.ne.s32.totalorder %s625_s2, %s438_s22  ;;  %p442_p3 = scmp.lt.u32.totalorder %s438_s22, %s625_s2 }
  0x2a   :  { %p444_p4 = pnand %p442_p3, %p439_p2 }
  0x2c   :  { %447 = shalt.err (!%p444_p4)
}
  0x2d   :  { %s448_s0 = scalar_lea.vmem %s44_s17, 16  ;;  %s452_s29 = scalar_lea.vmem %s44_s17, 32 }
  0x2e   :  { %p449_p5 = scmp.ne.s32.totalorder %s44_s17, %s448_s0  ;;  %p453_p6 = scmp.lt.s32.totalorder %s44_s17, %s44_s17 }
  0x2f   :  { %p454_p7 = scmp.lt.s32.totalorder %s452_s29, %s448_s0 }
  0x31   :  { %p455_p8 = por %p454_p7, %p453_p6 }
  0x33   :  { %p456_p9 = pnand %p455_p8, %p449_p5 }
  0x35   :  { %459 = shalt.err (!%p456_p9)
}
  0x36   :  { %46 = dma.hbm_to_vmem [thread:$0]  %s625_s2, 16, %s44_s17, [#allocation7]  }
  0x37   :  { %s460_s8 = scalar_lea.hbm %s626_s3, 128 }
  0x38   :  { %p461_p10 = scmp.ne.s32.totalorder %s626_s3, %s460_s8  ;;  %p464_p11 = scmp.lt.u32.totalorder %s460_s8, %s626_s3 }
  0x3a   :  { %p466_p12 = pnand %p464_p11, %p461_p10 }
  0x3c   :  { %469 = shalt.err (!%p466_p12)
}
  0x3d   :  { %s470_s1 = scalar_lea.vmem %s574_s19, 128  ;;  %p475_p0 = scmp.lt.s32.totalorder %s574_s19, %s574_s19 }
  0x3e   :  { %p471_p13 = scmp.ne.s32.totalorder %s574_s19, %s470_s1  ;;  %p476_p1 = scmp.lt.s32.totalorder %s470_s1, %s470_s1 }
  0x40   :  { %p477_p2 = por %p476_p1, %p475_p0 }
  0x42   :  { %p478_p3 = pnand %p477_p2, %p471_p13 }
  0x44   :  { %481 = shalt.err (!%p478_p3)
}
  0x45   :  { %58 = dma.hbm_to_vmem [thread:$0]  %s626_s3, 128, %s574_s19, [#allocation10], %s513_s25, %s513_s25, %s514_s26  }
  0x46   :  { %504 = dma.done.wait [#allocation4], 256  }
  0x47   :  { %505 = vsyncadd [#allocation4], 4294967040 }
  0x48   :  { %506 = dma.done.wait [#allocation7], 2064  }
  0x49   :  { %507 = vsyncadd [#allocation7], 4294965232 }
  0x4a   :  { %508 = dma.done.wait [#allocation10], 128  }
  0x4b   :  { %509 = vsyncadd [#allocation10], 4294967168  ;;  %v375_v0 = vld [vmem:[#allocation6 + $0x40] sm:$0xff]   ;;  %v377_v2 = vld [vmem:[#allocation6 + $0x48] sm:$0xff]   ;;  %vm76_vm0 = vcmask 523264   ;;  %v520_v18 = vmov 0.0  }
  0x4c   :  { %v376_v1 = vld [vmem:[#allocation6] sm:$0xff]   ;;  %343 = vmatprep.subr.bf16.mxu0 %v375_v0  ;;  %v378_v3 = vld [vmem:[#allocation6 + $0x8] sm:$0xff]   ;;  %v379_v4 = vld [vmem:[#allocation6 + $0x50] sm:$0xff]   ;;  %77 = vst.msk [vmem:[#allocation2] sm:$0xff] %vm76_vm0, %v520_v18  ;;  %vm78_vm1 = vcmask 517120   ;;  %vm297_vm2 = vcmask 519168  }
  0x4d   :  { %344 = vmatpush3.bf16.msra.mxu0 %v376_v1  ;;  %v380_v5 = vld [vmem:[#allocation6 + $0x10] sm:$0xff]   ;;  %v381_v6 = vld [vmem:[#allocation6 + $0x58] sm:$0xff]   ;;  %v383_v8 = vld [vmem:[#allocation6 + $0x60] sm:$0xff]   ;;  %79 = vst.msk [vmem:[#allocation2 + $0x8] sm:$0x3] %vm78_vm1, %v520_v18  ;;  %s521_s3 = smov [#allocation11]  }
  0x4e   :  { %345 = vmatprep.subr.bf16.mxu0 %v377_v2  ;;  %v382_v7 = vld [vmem:[#allocation6 + $0x18] sm:$0xff]   ;;  %v384_v9 = vld [vmem:[#allocation6 + $0x20] sm:$0xff]   ;;  %v385_v10 = vld [vmem:[#allocation6 + $0x68] sm:$0xff]   ;;  %s306_s14 = sshll.u32 %s521_s3, 4  ;;  %vm299_vm3 = vcmask 516096   ;;  %s307_s14 = int_to_ptr.vmem [resolvable:$true] %s306_s14 }
  0x4f   :  { %v393_v11 = vld [vmem:[#allocation3 + $0x4] ss:$8 sps:$4 sm:$0x1f]   ;;  %v386_v12 = vld [vmem:[#allocation6 + $0x28] sm:$0xff]   ;;  %v283_v29 = vld [vmem:[#allocation9] sm:$0xf]  ;;  %p487_p5 = scmp.lt.s32.totalorder %s307_s14, %s307_s14 }
  0x50   :  { %254 = vmatprep.mubr.bf16.mxu0 %v393_v11  ;;  %v387_v13 = vld [vmem:[#allocation6 + $0x70] sm:$0xff]   ;;  %v389_v15 = vld [vmem:[#allocation6 + $0x78] sm:$0xff]   ;;  %v338_v30 = vld [vmem:[#allocation8] ss:$0 sm:$0xff]  ;;  %v285_v32 = vunpack.c.l.bf16 %v283_v29  ;;  %s482_s15 = scalar_lea.vmem %s307_s14, 128 }
  0x51   :  { %346 = vmatpush3.bf16.msra.mxu0 %v378_v3  ;;  %v388_v14 = vld [vmem:[#allocation6 + $0x30] sm:$0xff]   ;;  %v390_v16 = vld [vmem:[#allocation6 + $0x38] sm:$0xff]   ;;  %v284_v31 = vld [vmem:[#allocation9 + $0x4] sm:$0x1]  ;;  %p483_p4 = scmp.ne.s32.totalorder %s307_s14, %s482_s15  ;;  %p488_p6 = scmp.lt.s32.totalorder %s482_s15, %s482_s15 }
  0x52   :  { %347 = vmatprep.subr.bf16.mxu0 %v379_v4  ;;  %v391_v17 = vld [vmem:[#allocation3] ss:$8 sps:$4 sm:$0x1f]   ;;  %v286_v35 = vunpack.c.l.bf16 %v284_v31 }
  0x53   :  { %v80_v20 = vld [vmem:[#allocation2] sm:$0xff]  ;;  %p489_p7 = por %p488_p6, %p487_p5 }
  0x54   :  { %v81_v24 = vld [vmem:[#allocation2 + $0x8] sm:$0x3] }
  0x55   :  { %348 = vmatpush3.bf16.msra.mxu0 %v380_v5  ;;  %p490_p8 = pnand %p489_p7, %p483_p4 }
  0x56   :  { %349 = vmatprep.subr.bf16.mxu0 %v381_v6 }
  0x59   :  { %350 = vmatpush3.bf16.msra.mxu0 %v382_v7 }
  0x5a   :  { %351 = vmatprep.subr.bf16.mxu0 %v383_v8 }
  0x5d   :  { %352 = vmatpush3.bf16.msra.mxu0 %v384_v9 }
  0x5e   :  { %353 = vmatprep.subr.bf16.mxu0 %v385_v10 }
  0x61   :  { %354 = vmatpush3.bf16.msra.mxu0 %v386_v12 }
  0x62   :  { %355 = vmatprep.subr.bf16.mxu0 %v387_v13 }
  0x65   :  { %356 = vmatpush3.bf16.msra.mxu0 %v388_v14 }
  0x66   :  { %357 = vmatprep.subr.bf16.mxu0 %v389_v15 }
  0x69   :  { %358 = vmatpush3.bf16.msra.mxu0 %v390_v16 }
  0x6c   :  { %255 = vmatmul.mubr.bf16.vlgmr.msra.gmra.mrb[0].mxu0 %v391_v17 }
 0x13f   :  { %v359_v19 = vpop.f32.mrb[0].mxu0 }
 0x140   :  { %v360_v21 = vpop.f32.mrb[1].mxu0 }
 0x141   :  { %v361_v22 = vadd.f32 %v360_v21, %v359_v19  ;;  %v362_v23 = vpop.f32.mrb[2].mxu0 }
 0x142   :  { %v363_v25 = vpop.f32.mrb[3].mxu0 }
 0x143   :  { %v263_v26 = vadd.f32 %v361_v22, %v80_v20  ;;  %v364_v27 = vadd.f32 %v363_v25, %v362_v23 }
 0x145   :  { %266 = vst.msk [vmem:[#allocation2] sm:$0xff] %vm76_vm0, %v263_v26  ;;  %v264_v28 = vadd.f32 %v364_v27, %v81_v24 }
 0x147   :  { %268 = vst.msk [vmem:[#allocation2 + $0x8] sm:$0x3] %vm78_vm1, %v264_v28 }
 0x14c   :  { %v272_v33 = vld [vmem:[#allocation2] sm:$0xff] }
 0x14d   :  { %v281_v34 = vadd.f32 %v338_v30, %v272_v33 }
 0x14e   :  { %v273_v36 = vld [vmem:[#allocation2 + $0x8] sm:$0x3] }
 0x14f   :  { %v282_v37 = vadd.f32 %v338_v30, %v273_v36  ;;  %v287_v38 = vadd.f32 %v285_v32, %v281_v34 }
 0x151   :  { %v288_v39 = vadd.f32 %v286_v35, %v282_v37  ;;  %v341_v40 = vpack.c.bf16 %v287_v38, %v287_v38 }
 0x153   :  { %v342_v41 = vpack.c.bf16 %v288_v39, %v288_v39  ;;  %298 = vst.msk [vmem:[#allocation11] sm:$0xf] %vm297_vm2, %v341_v40 }
 0x155   :  { %300 = vst.msk [vmem:[#allocation11 + $0x4] sm:$0x1] %vm299_vm3, %v342_v41 }
 0x156   :  { %493 = shalt.err (!%p490_p8)
}
 0x157   :  { %s494_s18 = scalar_lea.hbm %s627_s4, 128 }
 0x158   :  { %p495_p9 = scmp.ne.s32.totalorder %s627_s4, %s494_s18  ;;  %p498_p10 = scmp.lt.u32.totalorder %s494_s18, %s627_s4 }
 0x15a   :  { %p500_p11 = pnand %p498_p10, %p495_p9 }
 0x15c   :  { %503 = shalt.err (!%p500_p11)
}
 0x15d   :  { %312 = dma.vmem_to_hbm [thread:$0]  %s307_s14, 128, %s627_s4, [#allocation5], %s513_s25, %s513_s25, %s514_s26  }
 0x15e   :  { %510 = dma.done.wait [#allocation5], 128  }
 0x15f   :  { %511 = vsyncadd [#allocation5], 4294967168 }
 0x160   :  { %316 = vsyncpa [#allocation4], 1 }
 0x161   :  { %317 = vsyncpa [#allocation7], 1 }
 0x162   :  { %318 = vsyncpa [#allocation10], 1 }
 0x163   :  { %319 = vsyncpa [#allocation5], 1 }

// kernel: forward.23
= control target key start
LH: loop header
LB: loop body
LE: loop exit
PB: predicated region body
PF: predicated region fallthrough
CT: control target
= control target key end

     0   :  { %10 = vsyncpa [#allocation4], 0  ;;  %s767_s0 = inlined_call_operand.hbm [shape: bf16[10,64], index: 0, kind: input, shape index: {}]   ;;  %s768_s1 = inlined_call_operand.hbm [shape: f32[1,64], index: 1, kind: input, shape index: {}]   ;;  %s769_s2 = inlined_call_operand.hbm [shape: f32[1,64], index: 2, kind: input, shape index: {}]   ;;  %s770_s3 = inlined_call_operand.hbm [shape: bf16[64,256], index: 3, kind: input, shape index: {}]   ;;  %s771_s4 = inlined_call_operand.hbm [shape: f32[1,256], index: 4, kind: input, shape index: {}]   ;;  %s772_s5 = inlined_call_operand.hbm [shape: bf16[10,256], index: 5, kind: output, shape index: {}]  }
   0x1   :  { %11 = vsyncpa [#allocation7], 0 }
   0x2   :  { %12 = vsyncpa [#allocation10], 0 }
   0x3   :  { %13 = vsyncpa [#allocation5], 0  ;;  %s606_s18 = smov [#allocation6]   ;;  %s607_s20 = smov [#allocation9]  }
   0x4   :  { %s32_s19 = sshll.u32 %s606_s18, 4  ;;  %s51_s21 = sshll.u32 %s607_s20, 4  ;;  %s33_s19 = int_to_ptr.vmem [resolvable:$true] %s32_s19  ;;  %s647_s21 = int_to_ptr.vmem [resolvable:$true] %s51_s21 }
   0x5   :  { %s466_s24 = scalar_lea.hbm %s768_s1, 16 }
   0x6   :  { %p467_p0 = scmp.ne.s32.totalorder %s768_s1, %s466_s24  ;;  %p470_p1 = scmp.lt.u32.totalorder %s466_s24, %s768_s1 }
   0x8   :  { %p472_p2 = pnand %p470_p1, %p467_p0 }
   0xa   :  { %475 = shalt.err (!%p472_p2)
}
   0xb   :  { %s476_s29 = scalar_lea.vmem %s33_s19, 16  ;;  %s480_s30 = scalar_lea.vmem %s33_s19, 32 }
   0xc   :  { %p477_p3 = scmp.ne.s32.totalorder %s33_s19, %s476_s29  ;;  %p481_p4 = scmp.lt.s32.totalorder %s33_s19, %s33_s19 }
   0xd   :  { %p482_p5 = scmp.lt.s32.totalorder %s480_s30, %s476_s29 }
   0xf   :  { %p483_p6 = por %p482_p5, %p481_p4 }
  0x11   :  { %p484_p7 = pnand %p483_p6, %p477_p3 }
  0x13   :  { %487 = shalt.err (!%p484_p7)
}
  0x14   :  { %35 = dma.hbm_to_vmem [thread:$0]  %s768_s1, 16, %s33_s19, [#allocation7]  }
  0x15   :  { %s488_s10 = scalar_lea.hbm %s770_s3, 1024 }
  0x16   :  { %p489_p8 = scmp.ne.s32.totalorder %s770_s3, %s488_s10  ;;  %p492_p9 = scmp.lt.u32.totalorder %s488_s10, %s770_s3 }
  0x18   :  { %p494_p10 = pnand %p492_p9, %p489_p8 }
  0x1a   :  { %497 = shalt.err (!%p494_p10)
}
  0x1b   :  { %s498_s15 = scalar_lea.vmem %s647_s21, 1024  ;;  %p503_p12 = scmp.lt.s32.totalorder %s647_s21, %s647_s21 }
  0x1c   :  { %p499_p11 = scmp.ne.s32.totalorder %s647_s21, %s498_s15  ;;  %p504_p13 = scmp.lt.s32.totalorder %s498_s15, %s498_s15 }
  0x1e   :  { %p505_p0 = por %p504_p13, %p503_p12 }
  0x20   :  { %p506_p1 = pnand %p505_p0, %p499_p11 }
  0x22   :  { %509 = shalt.err (!%p506_p1)
}
  0x23   :  { %s608_s1 = smov 128   ;;  %s609_s16 = smov 8  }
  0x24   :  { %57 = dma.hbm_to_vmem [thread:$0]  %s770_s3, 1024, %s647_s21, [#allocation10], %s608_s1, %s608_s1, %s609_s16  }
  0x25   :  { %s610_s19 = smov [#allocation3]   ;;  %s510_s24 = scalar_lea.hbm %s767_s0, 128 }
  0x26   :  { %s19_s20 = sshll.u32 %s610_s19, 4  ;;  %p511_p2 = scmp.ne.s32.totalorder %s767_s0, %s510_s24  ;;  %s20_s20 = int_to_ptr.vmem [resolvable:$true] %s19_s20 }
  0x27   :  { %p514_p3 = scmp.lt.u32.totalorder %s510_s24, %s767_s0 }
  0x29   :  { %p516_p4 = pnand %p514_p3, %p511_p2 }
  0x2b   :  { %519 = shalt.err (!%p516_p4)
}
  0x2c   :  { %s520_s29 = scalar_lea.vmem %s20_s20, 128  ;;  %p525_p6 = scmp.lt.s32.totalorder %s20_s20, %s20_s20 }
  0x2d   :  { %p521_p5 = scmp.ne.s32.totalorder %s20_s20, %s520_s29  ;;  %p526_p7 = scmp.lt.s32.totalorder %s520_s29, %s520_s29 }
  0x2f   :  { %p527_p8 = por %p526_p7, %p525_p6 }
  0x31   :  { %p528_p9 = pnand %p527_p8, %p521_p5 }
  0x33   :  { %531 = shalt.err (!%p528_p9)
}
  0x34   :  { %s611_s3 = smov 64   ;;  %s612_s21 = smov 4  }
  0x35   :  { %25 = dma.hbm_to_vmem [thread:$0]  %s767_s0, 128, %s20_s20, [#allocation4], %s611_s3, %s611_s3, %s612_s21  }
  0x36   :  { %s613_s7 = smov [#allocation8]   ;;  %s614_s9 = smov [#allocation11]  }
  0x37   :  { %s42_s8 = sshll.u32 %s613_s7, 4  ;;  %s64_s10 = sshll.u32 %s614_s9, 4  ;;  %s43_s8 = int_to_ptr.vmem [resolvable:$true] %s42_s8  ;;  %s65_s10 = int_to_ptr.vmem [resolvable:$true] %s64_s10 }
  0x38   :  { %s532_s13 = scalar_lea.hbm %s769_s2, 16 }
  0x39   :  { %p533_p10 = scmp.ne.s32.totalorder %s769_s2, %s532_s13  ;;  %p536_p11 = scmp.lt.u32.totalorder %s532_s13, %s769_s2 }
  0x3b   :  { %p538_p12 = pnand %p536_p11, %p533_p10 }
  0x3d   :  { %541 = shalt.err (!%p538_p12)
}
  0x3e   :  { %s542_s0 = scalar_lea.vmem %s43_s8, 16  ;;  %s546_s19 = scalar_lea.vmem %s43_s8, 32 }
  0x3f   :  { %p543_p13 = scmp.ne.s32.totalorder %s43_s8, %s542_s0  ;;  %p547_p0 = scmp.lt.s32.totalorder %s43_s8, %s43_s8 }
  0x40   :  { %p548_p1 = scmp.lt.s32.totalorder %s546_s19, %s542_s0 }
  0x42   :  { %p549_p2 = por %p548_p1, %p547_p0 }
  0x44   :  { %p550_p3 = pnand %p549_p2, %p543_p13 }
  0x46   :  { %553 = shalt.err (!%p550_p3)
}
  0x47   :  { %45 = dma.hbm_to_vmem [thread:$0]  %s769_s2, 16, %s43_s8, [#allocation7]  }
  0x48   :  { %s554_s25 = scalar_lea.hbm %s771_s4, 32 }
  0x49   :  { %p555_p4 = scmp.ne.s32.totalorder %s771_s4, %s554_s25  ;;  %p558_p5 = scmp.lt.u32.totalorder %s554_s25, %s771_s4 }
  0x4b   :  { %p560_p6 = pnand %p558_p5, %p555_p4 }
  0x4d   :  { %563 = shalt.err (!%p560_p6)
}
  0x4e   :  { %s564_s3 = scalar_lea.vmem %s65_s10, 32  ;;  %p569_p8 = scmp.lt.s32.totalorder %s65_s10, %s65_s10 }
  0x4f   :  { %p565_p7 = scmp.ne.s32.totalorder %s65_s10, %s564_s3  ;;  %p570_p9 = scmp.lt.s32.totalorder %s564_s3, %s564_s3 }
  0x51   :  { %p571_p10 = por %p570_p9, %p569_p8 }
  0x53   :  { %p572_p11 = pnand %p571_p10, %p565_p7 }
  0x55   :  { %575 = shalt.err (!%p572_p11)
}
  0x56   :  { %67 = dma.hbm_to_vmem [thread:$0]  %s771_s4, 32, %s65_s10, [#allocation10]  }
  0x57   :  { %598 = dma.done.wait [#allocation4], 128  }
  0x58   :  { %599 = vsyncadd [#allocation4], 4294967168 }
  0x59   :  { %600 = dma.done.wait [#allocation7], 32  }
  0x5a   :  { %601 = vsyncadd [#allocation7], 4294967264 }
  0x5b   :  { %602 = dma.done.wait [#allocation10], 1056  }
  0x5c   :  { %603 = vsyncadd [#allocation10], 4294966240  ;;  %v88_v0 = vld [vmem:[#allocation3] sm:$0xf]  ;;  %vm92_vm0 = vcmask 523264   ;;  %vm96_vm1 = vcmask 517120   ;;  %v163_v44 = vlaneseq }
  0x5d   :  { %v89_v1 = vld [vmem:[#allocation3 + $0x4] sm:$0x1]  ;;  %v90_v2 = vunpack.c.l.bf16 %v88_v0  ;;  %v433_v16 = vld [vmem:[#allocation9 + $0x4] ss:$8 sps:$4 sm:$0xff]   ;;  %v435_v17 = vld [vmem:[#allocation9] ss:$8 sps:$4 sm:$0xff]  }
  0x5e   :  { %v91_v3 = vunpack.c.l.bf16 %v89_v1  ;;  %222 = vmatprep.subr.bf16.mxu0 %v433_v16  ;;  %v436_v18 = vld [vmem:[#allocation9 + $0x14] ss:$8 sps:$4 sm:$0xff]   ;;  %v438_v19 = vld [vmem:[#allocation9 + $0x10] ss:$8 sps:$4 sm:$0xff]   ;;  %v439_v20 = vld [vmem:[#allocation9 + $0x24] ss:$8 sps:$4 sm:$0xff]  }
  0x5f   :  { %v93_v4 = vsel %vm92_vm0, %v90_v2, 0.0  ;;  %223 = vmatpush1.bf16.msra.mxu0 %v435_v17  ;;  %v441_v21 = vld [vmem:[#allocation9 + $0x20] ss:$8 sps:$4 sm:$0xff]   ;;  %v442_v22 = vld [vmem:[#allocation9 + $0x34] ss:$8 sps:$4 sm:$0xff]   ;;  %v615_v24 = vmov 0  }
  0x60   :  { %94 = vadd.xlane.f32.xlu0 %v93_v4  ;;  %v97_v5 = vsel %vm96_vm1, %v91_v3, 0.0  ;;  %224 = vmatprep.subr.bf16.mxu0 %v436_v18  ;;  %v444_v23 = vld [vmem:[#allocation9 + $0x30] ss:$8 sps:$4 sm:$0xff]   ;;  %v402_v32 = vld [vmem:[#allocation6] ss:$0 sm:$0xff]  ;;  %vm147_vm2 = vcmask 519168  }
  0x61   :  { %254 = vmatprep.mubr.bf16.mxu0 %v615_v24  ;;  %v403_v34 = vld [vmem:[#allocation8] ss:$0 sm:$0xff]  ;;  %vm149_vm3 = vcmask 516096   ;;  %v164_v45 = vshrl.u32 %v163_v44, 7  ;;  %v161_v47 = vld [vmem:[#allocation11] sm:$0x3] }
  0x62   :  { %s616_s4 = smov [#allocation12]  }
  0x63   :  { %225 = vmatpush1.bf16.msra.mxu0 %v438_v19  ;;  %v165_v46 = vsub.s32 0, %v164_v45  ;;  %v169_v48 = vsub.s32 1, %v164_v45  ;;  %s388_s30 = sshll.u32 %s616_s4, 4  ;;  %s389_s30 = int_to_ptr.vmem [resolvable:$true] %s388_s30 }
  0x64   :  { %98 = vadd.xlane.f32.xlu0 %v97_v5  ;;  %226 = vmatprep.subr.bf16.mxu0 %v439_v20  ;;  %s576_s6 = scalar_lea.vmem %s389_s30, 256  ;;  %p581_p13 = scmp.lt.s32.totalorder %s389_s30, %s389_s30 }
  0x65   :  { %v166_v49 = vrot.slane %v161_v47, %v165_v46  ;;  %v170_v50 = vrot.slane %v161_v47, %v169_v48  ;;  %p577_p12 = scmp.ne.s32.totalorder %s389_s30, %s576_s6  ;;  %p582_p0 = scmp.lt.s32.totalorder %s576_s6, %s576_s6 }
  0x67   :  { %227 = vmatpush1.bf16.msra.mxu0 %v441_v21  ;;  %p583_p1 = por %p582_p0, %p581_p13 }
  0x68   :  { %228 = vmatprep.subr.bf16.mxu0 %v442_v22 }
  0x69   :  { %p584_p2 = pnand %p583_p1, %p577_p12 }
  0x6b   :  { %229 = vmatpush1.bf16.msra.mxu0 %v444_v23 }
  0xed   :  { %v95_v6 = vpop.xlane.xlu0 %94 }
  0xee   :  { %v101_v7 = vmul.f32 0.015625, %v95_v6 }
  0xf0   :  { %v103_v8 = vsub.f32 %v90_v2, %v101_v7 }
  0xf1   :  { %v99_v9 = vpop.xlane.xlu0 %98 }
  0xf2   :  { %v102_v10 = vmul.f32 0.015625, %v99_v9  ;;  %v105_v11 = vmul.f32 %v103_v8, %v103_v8 }
  0xf4   :  { %v104_v12 = vsub.f32 %v91_v3, %v102_v10  ;;  %v107_v13 = vsel %vm92_vm0, %v105_v11, 0.0 }
  0xf5   :  { %108 = vadd.xlane.f32.xlu1 %v107_v13 }
  0xf6   :  { %v106_v14 = vmul.f32 %v104_v12, %v104_v12 }
  0xf8   :  { %v110_v15 = vsel %vm96_vm1, %v106_v14, 0.0 }
  0xf9   :  { %111 = vadd.xlane.f32.xlu1 %v110_v15 }
 0x182   :  { %v109_v25 = vpop.xlane.xlu1 %108 }
 0x183   :  { %v113_v26 = vmul.f32 0.015625, %v109_v25 }
 0x185   :  { %v115_v27 = vadd.f32 1e-05, %v113_v26 }
 0x186   :  { %v112_v28 = vpop.xlane.xlu1 %111 }
 0x187   :  { %446 = vrsqrt.f32 %v115_v27  ;;  %v114_v29 = vmul.f32 0.015625, %v112_v28 }
 0x189   :  { %v116_v30 = vadd.f32 1e-05, %v114_v29 }
 0x18b   :  { %448 = vrsqrt.f32 %v116_v30 }
 0x191   :  { %v447_v31 = vpop.eup %446 }
 0x192   :  { %v119_v33 = vmul.f32 %v447_v31, %v103_v8 }
 0x194   :  { %v128_v35 = vmul.f32 %v402_v32, %v119_v33 }
 0x195   :  { %v449_v36 = vpop.eup %448 }
 0x196   :  { %v137_v37 = vadd.f32 %v403_v34, %v128_v35  ;;  %v120_v38 = vmul.f32 %v449_v36, %v104_v12 }
 0x198   :  { %v418_v39 = vpack.c.bf16 %v137_v37, %v137_v37  ;;  %v129_v40 = vmul.f32 %v402_v32, %v120_v38 }
 0x19a   :  { %148 = vst.msk [vmem:[#allocation2] sm:$0xf] %vm147_vm2, %v418_v39  ;;  %v138_v41 = vadd.f32 %v403_v34, %v129_v40 }
 0x19c   :  { %v419_v42 = vpack.c.bf16 %v138_v41, %v138_v41 }
 0x19e   :  { %150 = vst.msk [vmem:[#allocation2 + $0x4] sm:$0x1] %vm149_vm3, %v419_v42 }
 0x1a5   :  { %v445_v43 = vld [vmem:[#allocation2] sm:$0x1f]  }
 0x1a6   :  { %415 = vmatmul.mubr.msk.bf16.vlgmr.msra.gmra.mrb[0].mxu0 %vm92_vm0, %v445_v43 }
 0x279   :  { %v256_v51 = vpop.f32.mrb[0].mxu0 }
 0x27a   :  { %v720_v52 = vadd.f32 %v256_v51, %v166_v49  ;;  %v258_v53 = vpop.f32.mrb[1].mxu0 }
 0x27b   :  { %v722_v54 = vadd.f32 %v258_v53, %v170_v50  ;;  %v260_v55 = vpop.f32.mrb[2].mxu0 }
 0x27c   :  { %v725_v56 = vmul.f32 0.70710677, %v720_v52  ;;  %v727_v57 = vadd.f32 %v260_v55, %v166_v49  ;;  %v262_v58 = vpop.f32.mrb[3].mxu0 }
 0x27d   :  { %v730_v59 = vmul.f32 0.70710677, %v722_v54  ;;  %v732_v60 = vadd.f32 %v262_v58, %v170_v50 }
 0x27e   :  { %v273_v61 = vand.u32 2147483647, %v725_v56  ;;  %v736_v62 = vmul.f32 0.70710677, %v727_v57  ;;  %vm349_vm4 = vcmp.ge.f32.partialorder %v725_v56, 0.0 }
 0x27f   :  { %v274_v63 = vand.u32 2147483647, %v730_v59  ;;  %v740_v0 = vmul.f32 0.70710677, %v732_v60  ;;  %vm350_vm5 = vcmp.ge.f32.partialorder %v730_v59, 0.0 }
 0x280   :  { %v277_v1 = vmul.f32 0.3275911, %v273_v61  ;;  %v275_v2 = vand.u32 2147483647, %v736_v62  ;;  %v325_v11 = vsub.f32 0.0, %v273_v61  ;;  %vm351_vm6 = vcmp.ge.f32.partialorder %v736_v62, 0.0 }
 0x281   :  { %v278_v3 = vmul.f32 0.3275911, %v274_v63  ;;  %v276_v4 = vand.u32 2147483647, %v740_v0  ;;  %v326_v12 = vsub.f32 0.0, %v274_v63  ;;  %vm352_vm7 = vcmp.ge.f32.partialorder %v740_v0, 0.0 }
 0x282   :  { %v281_v5 = vadd.f32 1.0, %v277_v1  ;;  %v279_v6 = vmul.f32 0.3275911, %v275_v2  ;;  %v329_v14 = vmul.f32 %v325_v11, %v273_v61  ;;  %v327_v15 = vsub.f32 0.0, %v275_v2 }
 0x283   :  { %v282_v7 = vadd.f32 1.0, %v278_v3  ;;  %v280_v8 = vmul.f32 0.3275911, %v276_v4  ;;  %v330_v18 = vmul.f32 %v326_v12, %v274_v63  ;;  %v328_v20 = vsub.f32 0.0, %v276_v4 }
 0x284   :  { %450 = vrcp.f32 %v281_v5  ;;  %v283_v9 = vadd.f32 1.0, %v279_v6  ;;  %v333_v23 = vmul.f32 1.442695, %v329_v14  ;;  %v331_v25 = vmul.f32 %v327_v15, %v275_v2 }
 0x285   :  { %452 = vrcp.f32 %v282_v7  ;;  %v284_v10 = vadd.f32 1.0, %v280_v8  ;;  %v335_v27 = vmul.f32 1.442695, %v330_v18  ;;  %v332_v31 = vmul.f32 %v328_v20, %v276_v4 }
 0x286   :  { %454 = vrcp.f32 %v283_v9  ;;  %v337_v36 = vmul.f32 1.442695, %v331_v25 }
 0x287   :  { %456 = vrcp.f32 %v284_v10  ;;  %v339_v41 = vmul.f32 1.442695, %v332_v31  ;;  %v267_v31 = vmul.f32 0.5, %v727_v57 }
 0x288   :  { %458 = vpow2.f32 %v333_v23 }
 0x289   :  { %460 = vpow2.f32 %v335_v27 }
 0x28a   :  { %462 = vpow2.f32 %v337_v36 }
 0x28b   :  { %464 = vpow2.f32 %v339_v41 }
 0x28e   :  { %v451_v13 = vpop.eup %450 }
 0x28f   :  { %v453_v16 = vpop.eup %452  ;;  %v289_v17 = vmul.f32 1.0614054, %v451_v13 }
 0x290   :  { %v290_v19 = vmul.f32 1.0614054, %v453_v16  ;;  %v455_v22 = vpop.eup %454 }
 0x291   :  { %v293_v21 = vadd.f32 -1.4531521, %v289_v17  ;;  %v291_v28 = vmul.f32 1.0614054, %v455_v22  ;;  %v457_v29 = vpop.eup %456 }
 0x292   :  { %v294_v24 = vadd.f32 -1.4531521, %v290_v19  ;;  %v292_v34 = vmul.f32 1.0614054, %v457_v29  ;;  %v459_v1 = vpop.eup %458 }
 0x293   :  { %v297_v26 = vmul.f32 %v451_v13, %v293_v21  ;;  %v295_v33 = vadd.f32 -1.4531521, %v291_v28  ;;  %v461_v3 = vpop.eup %460  ;;  %v265_v21 = vmul.f32 0.5, %v720_v52 }
 0x294   :  { %v298_v30 = vmul.f32 %v453_v16, %v294_v24  ;;  %v296_v39 = vadd.f32 -1.4531521, %v292_v34  ;;  %v463_v11 = vpop.eup %462  ;;  %v268_v34 = vmul.f32 0.5, %v732_v60 }
 0x295   :  { %v301_v32 = vadd.f32 1.4214138, %v297_v26  ;;  %v299_v38 = vmul.f32 %v455_v22, %v295_v33  ;;  %v465_v18 = vpop.eup %464 }
 0x296   :  { %v302_v35 = vadd.f32 1.4214138, %v298_v30  ;;  %v300_v44 = vmul.f32 %v457_v29, %v296_v39 }
 0x297   :  { %v305_v37 = vmul.f32 %v451_v13, %v301_v32  ;;  %v303_v43 = vadd.f32 1.4214138, %v299_v38 }
 0x298   :  { %v306_v40 = vmul.f32 %v453_v16, %v302_v35  ;;  %v304_v48 = vadd.f32 1.4214138, %v300_v44 }
 0x299   :  { %v309_v42 = vadd.f32 -0.28449672, %v305_v37  ;;  %v307_v47 = vmul.f32 %v455_v22, %v303_v43 }
 0x29a   :  { %v310_v45 = vadd.f32 -0.28449672, %v306_v40  ;;  %v308_v53 = vmul.f32 %v457_v29, %v304_v48 }
 0x29b   :  { %v313_v46 = vmul.f32 %v451_v13, %v309_v42  ;;  %v311_v51 = vadd.f32 -0.28449672, %v307_v47 }
 0x29c   :  { %v314_v49 = vmul.f32 %v453_v16, %v310_v45  ;;  %v312_v63 = vadd.f32 -0.28449672, %v308_v53 }
 0x29d   :  { %v317_v50 = vadd.f32 0.2548296, %v313_v46  ;;  %v315_v61 = vmul.f32 %v455_v22, %v311_v51 }
 0x29e   :  { %v318_v55 = vadd.f32 0.2548296, %v314_v49  ;;  %v316_v6 = vmul.f32 %v457_v29, %v312_v63 }
 0x29f   :  { %v321_v58 = vmul.f32 %v451_v13, %v317_v50  ;;  %v319_v5 = vadd.f32 0.2548296, %v315_v61 }
 0x2a0   :  { %v322_v2 = vmul.f32 %v453_v16, %v318_v55  ;;  %v320_v10 = vadd.f32 0.2548296, %v316_v6 }
 0x2a1   :  { %v341_v4 = vmul.f32 %v459_v1, %v321_v58  ;;  %v323_v9 = vmul.f32 %v455_v22, %v319_v5  ;;  %v266_v22 = vmul.f32 0.5, %v722_v54 }
 0x2a2   :  { %v342_v7 = vmul.f32 %v461_v3, %v322_v2  ;;  %v324_v17 = vmul.f32 %v457_v29, %v320_v10 }
 0x2a3   :  { %v345_v8 = vsub.f32 1.0, %v341_v4  ;;  %v343_v15 = vmul.f32 %v463_v11, %v323_v9 }
 0x2a4   :  { %v346_v12 = vsub.f32 1.0, %v342_v7  ;;  %v344_v20 = vmul.f32 %v465_v18, %v324_v17 }
 0x2a5   :  { %v353_v14 = vsub.f32 0.0, %v345_v8  ;;  %v347_v16 = vsub.f32 1.0, %v343_v15 }
 0x2a6   :  { %v354_v13 = vsub.f32 0.0, %v346_v12  ;;  %v348_v27 = vsub.f32 1.0, %v344_v20 }
 0x2a7   :  { %v357_v19 = vsel %vm349_vm4, %v345_v8, %v353_v14  ;;  %v355_v26 = vsub.f32 0.0, %v347_v16 }
 0x2a8   :  { %v361_v23 = vadd.f32 1.0, %v357_v19  ;;  %v358_v24 = vsel %vm350_vm5, %v346_v12, %v354_v13  ;;  %v356_v30 = vsub.f32 0.0, %v348_v27 }
 0x2a9   :  { %v362_v25 = vadd.f32 1.0, %v358_v24  ;;  %v359_v56 = vsel %vm351_vm6, %v347_v16, %v355_v26 }
 0x2aa   :  { %v365_v28 = vmul.f32 %v361_v23, %v265_v21  ;;  %v363_v59 = vadd.f32 1.0, %v359_v56  ;;  %v360_v32 = vsel %vm352_vm7, %v348_v27, %v356_v30 }
 0x2ab   :  { %v366_v29 = vmul.f32 %v362_v25, %v266_v22  ;;  %v364_v54 = vadd.f32 1.0, %v360_v32 }
 0x2ac   :  { %v367_v33 = vmul.f32 %v363_v59, %v267_v31 }
 0x2ad   :  { %v420_v52 = vpack.c.bf16 %v366_v29, %v365_v28  ;;  %v368_v35 = vmul.f32 %v364_v54, %v268_v34 }
 0x2af   :  { %381 = vst [vmem:[#allocation12] sm:$0xff] %v420_v52  ;;  %v421_v36 = vpack.c.bf16 %v368_v35, %v367_v33 }
 0x2b1   :  { %382 = vst [vmem:[#allocation12 + $0x8] sm:$0x11] %v421_v36 }
 0x2b2   :  { %587 = shalt.err (!%p584_p2)
}
 0x2b3   :  { %s588_s9 = scalar_lea.hbm %s772_s5, 256 }
 0x2b4   :  { %p589_p3 = scmp.ne.s32.totalorder %s772_s5, %s588_s9  ;;  %p592_p4 = scmp.lt.u32.totalorder %s588_s9, %s772_s5 }
 0x2b6   :  { %p594_p5 = pnand %p592_p4, %p589_p3 }
 0x2b8   :  { %597 = shalt.err (!%p594_p5)
}
 0x2b9   :  { %394 = dma.vmem_to_hbm [thread:$0]  %s389_s30, 256, %s772_s5, [#allocation5], %s608_s1, %s608_s1, %s609_s16  }
 0x2ba   :  { %604 = dma.done.wait [#allocation5], 256  }
 0x2bb   :  { %605 = vsyncadd [#allocation5], 4294967040 }
 0x2bc   :  { %398 = vsyncpa [#allocation4], 1 }
 0x2bd   :  { %399 = vsyncpa [#allocation7], 1 }
 0x2be   :  { %400 = vsyncpa [#allocation10], 1 }
 0x2bf   :  { %401 = vsyncpa [#allocation5], 1 }

// kernel: forward.30
= control target key start
LH: loop header
LB: loop body
LE: loop exit
PB: predicated region body
PF: predicated region fallthrough
CT: control target
= control target key end

     0   :  { %10 = vsyncpa [#allocation4], 0  ;;  %s592_s0 = inlined_call_operand.hbm [shape: bf16[10,64], index: 0, kind: input, shape index: {}]   ;;  %s593_s1 = inlined_call_operand.hbm [shape: f32[1,64], index: 1, kind: input, shape index: {}]   ;;  %s594_s2 = inlined_call_operand.hbm [shape: f32[1,64], index: 2, kind: input, shape index: {}]   ;;  %s595_s3 = inlined_call_operand.hbm [shape: bf16[64,32], index: 3, kind: input, shape index: {}]   ;;  %s596_s4 = inlined_call_operand.hbm [shape: f32[1,32], index: 4, kind: input, shape index: {}]   ;;  %s597_s5 = inlined_call_operand.hbm [shape: bf16[10,32], index: 5, kind: output, shape index: {}]  }
   0x1   :  { %11 = vsyncpa [#allocation7], 0 }
   0x2   :  { %12 = vsyncpa [#allocation10], 0 }
   0x3   :  { %13 = vsyncpa [#allocation5], 0  ;;  %s466_s18 = smov [#allocation6]   ;;  %s326_s22 = scalar_lea.hbm %s593_s1, 16 }
   0x4   :  { %s32_s19 = sshll.u32 %s466_s18, 4  ;;  %p327_p0 = scmp.ne.s32.totalorder %s593_s1, %s326_s22  ;;  %s33_s19 = int_to_ptr.vmem [resolvable:$true] %s32_s19 }
   0x5   :  { %p330_p1 = scmp.lt.u32.totalorder %s326_s22, %s593_s1 }
   0x7   :  { %p332_p2 = pnand %p330_p1, %p327_p0 }
   0x9   :  { %335 = shalt.err (!%p332_p2)
}
   0xa   :  { %s336_s27 = scalar_lea.vmem %s33_s19, 16  ;;  %s340_s28 = scalar_lea.vmem %s33_s19, 32 }
   0xb   :  { %p337_p3 = scmp.ne.s32.totalorder %s33_s19, %s336_s27  ;;  %p341_p4 = scmp.lt.s32.totalorder %s33_s19, %s33_s19 }
   0xc   :  { %p342_p5 = scmp.lt.s32.totalorder %s340_s28, %s336_s27 }
   0xe   :  { %p343_p6 = por %p342_p5, %p341_p4 }
  0x10   :  { %p344_p7 = pnand %p343_p6, %p337_p3 }
  0x12   :  { %347 = shalt.err (!%p344_p7)
}
  0x13   :  { %35 = dma.hbm_to_vmem [thread:$0]  %s593_s1, 16, %s33_s19, [#allocation7]  }
  0x14   :  { %s467_s6 = smov [#allocation9]   ;;  %s468_s8 = smov [#allocation3]  }
  0x15   :  { %s51_s7 = sshll.u32 %s467_s6, 4  ;;  %s19_s9 = sshll.u32 %s468_s8, 4  ;;  %s52_s7 = int_to_ptr.vmem [resolvable:$true] %s51_s7  ;;  %s20_s9 = int_to_ptr.vmem [resolvable:$true] %s19_s9 }
  0x16   :  { %s348_s12 = scalar_lea.hbm %s595_s3, 512 }
  0x17   :  { %p349_p8 = scmp.ne.s32.totalorder %s595_s3, %s348_s12  ;;  %p352_p9 = scmp.lt.u32.totalorder %s348_s12, %s595_s3 }
  0x19   :  { %p354_p10 = pnand %p352_p9, %p349_p8 }
  0x1b   :  { %357 = shalt.err (!%p354_p10)
}
  0x1c   :  { %s358_s1 = scalar_lea.vmem %s52_s7, 512  ;;  %p363_p12 = scmp.lt.s32.totalorder %s52_s7, %s52_s7 }
  0x1d   :  { %p359_p11 = scmp.ne.s32.totalorder %s52_s7, %s358_s1  ;;  %p364_p13 = scmp.lt.s32.totalorder %s358_s1, %s358_s1 }
  0x1f   :  { %p365_p0 = por %p364_p13, %p363_p12 }
  0x21   :  { %p366_p1 = pnand %p365_p0, %p359_p11 }
  0x23   :  { %369 = shalt.err (!%p366_p1)
}
  0x24   :  { %s469_s17 = smov 64   ;;  %s470_s18 = smov 4  }
  0x25   :  { %57 = dma.hbm_to_vmem [thread:$0]  %s595_s3, 512, %s52_s7, [#allocation10], %s469_s17, %s469_s17, %s470_s18  }
  0x26   :  { %s370_s23 = scalar_lea.hbm %s592_s0, 128 }
  0x27   :  { %p371_p2 = scmp.ne.s32.totalorder %s592_s0, %s370_s23  ;;  %p374_p3 = scmp.lt.u32.totalorder %s370_s23, %s592_s0 }
  0x29   :  { %p376_p4 = pnand %p374_p3, %p371_p2 }
  0x2b   :  { %379 = shalt.err (!%p376_p4)
}
  0x2c   :  { %s380_s28 = scalar_lea.vmem %s20_s9, 128  ;;  %p385_p6 = scmp.lt.s32.totalorder %s20_s9, %s20_s9 }
  0x2d   :  { %p381_p5 = scmp.ne.s32.totalorder %s20_s9, %s380_s28  ;;  %p386_p7 = scmp.lt.s32.totalorder %s380_s28, %s380_s28 }
  0x2f   :  { %p387_p8 = por %p386_p7, %p385_p6 }
  0x31   :  { %p388_p9 = pnand %p387_p8, %p381_p5 }
  0x33   :  { %391 = shalt.err (!%p388_p9)
}
  0x34   :  { %25 = dma.hbm_to_vmem [thread:$0]  %s592_s0, 128, %s20_s9, [#allocation4], %s469_s17, %s469_s17, %s470_s18  }
  0x35   :  { %s471_s30 = smov [#allocation8]   ;;  %s472_s7 = smov [#allocation11]  }
  0x36   :  { %s42_s6 = sshll.u32 %s471_s30, 4  ;;  %s64_s8 = sshll.u32 %s472_s7, 4  ;;  %s43_s6 = int_to_ptr.vmem [resolvable:$true] %s42_s6  ;;  %s65_s8 = int_to_ptr.vmem [resolvable:$true] %s64_s8 }
  0x37   :  { %s392_s12 = scalar_lea.hbm %s594_s2, 16 }
  0x38   :  { %p393_p10 = scmp.ne.s32.totalorder %s594_s2, %s392_s12  ;;  %p396_p11 = scmp.lt.u32.totalorder %s392_s12, %s594_s2 }
  0x3a   :  { %p398_p12 = pnand %p396_p11, %p393_p10 }
  0x3c   :  { %401 = shalt.err (!%p398_p12)
}
  0x3d   :  { %s402_s0 = scalar_lea.vmem %s43_s6, 16  ;;  %s406_s9 = scalar_lea.vmem %s43_s6, 32 }
  0x3e   :  { %p403_p13 = scmp.ne.s32.totalorder %s43_s6, %s402_s0  ;;  %p407_p0 = scmp.lt.s32.totalorder %s43_s6, %s43_s6 }
  0x3f   :  { %p408_p1 = scmp.lt.s32.totalorder %s406_s9, %s402_s0 }
  0x41   :  { %p409_p2 = por %p408_p1, %p407_p0 }
  0x43   :  { %p410_p3 = pnand %p409_p2, %p403_p13 }
  0x45   :  { %413 = shalt.err (!%p410_p3)
}
  0x46   :  { %45 = dma.hbm_to_vmem [thread:$0]  %s594_s2, 16, %s43_s6, [#allocation7]  }
  0x47   :  { %s414_s22 = scalar_lea.hbm %s596_s4, 16 }
  0x48   :  { %p415_p4 = scmp.ne.s32.totalorder %s596_s4, %s414_s22  ;;  %p418_p5 = scmp.lt.u32.totalorder %s414_s22, %s596_s4 }
  0x4a   :  { %p420_p6 = pnand %p418_p5, %p415_p4 }
  0x4c   :  { %423 = shalt.err (!%p420_p6)
}
  0x4d   :  { %s424_s27 = scalar_lea.vmem %s65_s8, 16  ;;  %s428_s28 = scalar_lea.vmem %s65_s8, 32 }
  0x4e   :  { %p425_p7 = scmp.ne.s32.totalorder %s65_s8, %s424_s27  ;;  %p429_p8 = scmp.lt.s32.totalorder %s65_s8, %s65_s8 }
  0x4f   :  { %p430_p9 = scmp.lt.s32.totalorder %s428_s28, %s424_s27 }
  0x51   :  { %p431_p10 = por %p430_p9, %p429_p8 }
  0x53   :  { %p432_p11 = pnand %p431_p10, %p425_p7 }
  0x55   :  { %435 = shalt.err (!%p432_p11)
}
  0x56   :  { %67 = dma.hbm_to_vmem [thread:$0]  %s596_s4, 16, %s65_s8, [#allocation10]  }
  0x57   :  { %458 = dma.done.wait [#allocation4], 128  }
  0x58   :  { %459 = vsyncadd [#allocation4], 4294967168 }
  0x59   :  { %460 = dma.done.wait [#allocation7], 32  }
  0x5a   :  { %461 = vsyncadd [#allocation7], 4294967264 }
  0x5b   :  { %462 = dma.done.wait [#allocation10], 528  }
  0x5c   :  { %463 = vsyncadd [#allocation10], 4294966768  ;;  %vm92_vm0 = vcmask 523264   ;;  %vm96_vm1 = vcmask 517120   ;;  %v88_v0 = vld [vmem:[#allocation3] sm:$0xf] }
  0x5d   :  { %v89_v1 = vld [vmem:[#allocation3 + $0x4] sm:$0x1]  ;;  %v90_v2 = vunpack.c.l.bf16 %v88_v0  ;;  %v317_v16 = vld [vmem:[#allocation9] sm:$0xff]   ;;  %v473_v17 = vmov 0.0   ;;  %v318_v18 = vld [vmem:[#allocation9 + $0x8] sm:$0xff]   ;;  %vm474_vm2 = vmmov 0  }
  0x5e   :  { %v91_v3 = vunpack.c.l.bf16 %v89_v1  ;;  %295 = vmatprep.subr.bf16.mxu0 %v473_v17  ;;  %v319_v19 = vld [vmem:[#allocation9 + $0x10] sm:$0xff]   ;;  %303 = vmatprep.mubr.msk.bf16.mxu0 %vm474_vm2, %v473_v17  ;;  %v320_v20 = vld [vmem:[#allocation9 + $0x18] sm:$0xff]   ;;  %vm147_vm3 = vcmask 519168   ;;  %vm149_vm4 = vcmask 516096   ;;  %v277_v40 = vld [vmem:[#allocation11] ss:$0 sm:$0xff] }
  0x5f   :  { %v93_v4 = vsel %vm92_vm0, %v90_v2, 0.0  ;;  %296 = vmatpush3.bf16.msra.mxu0 %v317_v16  ;;  %v273_v28 = vld [vmem:[#allocation6] ss:$0 sm:$0xff]  ;;  %v274_v30 = vld [vmem:[#allocation8] ss:$0 sm:$0xff]  ;;  %vm250_vm5 = vcmask 257024  }
  0x60   :  { %94 = vadd.xlane.f32.xlu0 %v93_v4  ;;  %v97_v5 = vsel %vm96_vm1, %v91_v3, 0.0  ;;  %297 = vmatprep.subr.bf16.mxu0 %v473_v17  ;;  %s475_s4 = smov [#allocation12]   ;;  %vm252_vm6 = vcmask 253952  }
  0x61   :  { %s259_s29 = sshll.u32 %s475_s4, 4  ;;  %s260_s29 = int_to_ptr.vmem [resolvable:$true] %s259_s29 }
  0x62   :  { %s436_s30 = scalar_lea.vmem %s260_s29, 128  ;;  %p441_p13 = scmp.lt.s32.totalorder %s260_s29, %s260_s29 }
  0x63   :  { %298 = vmatpush3.bf16.msra.mxu0 %v318_v18  ;;  %p437_p12 = scmp.ne.s32.totalorder %s260_s29, %s436_s30  ;;  %p442_p0 = scmp.lt.s32.totalorder %s436_s30, %s436_s30 }
  0x64   :  { %98 = vadd.xlane.f32.xlu0 %v97_v5  ;;  %299 = vmatprep.subr.bf16.mxu0 %v473_v17 }
  0x65   :  { %p443_p1 = por %p442_p0, %p441_p13 }
  0x67   :  { %300 = vmatpush3.bf16.msra.mxu0 %v319_v19  ;;  %p444_p2 = pnand %p443_p1, %p437_p12 }
  0x68   :  { %301 = vmatprep.subr.bf16.mxu0 %v473_v17 }
  0x6b   :  { %302 = vmatpush3.bf16.msra.mxu0 %v320_v20 }
  0xed   :  { %v95_v6 = vpop.xlane.xlu0 %94 }
  0xee   :  { %v101_v7 = vmul.f32 0.015625, %v95_v6 }
  0xf0   :  { %v103_v8 = vsub.f32 %v90_v2, %v101_v7 }
  0xf1   :  { %v99_v9 = vpop.xlane.xlu0 %98 }
  0xf2   :  { %v102_v10 = vmul.f32 0.015625, %v99_v9  ;;  %v105_v11 = vmul.f32 %v103_v8, %v103_v8 }
  0xf4   :  { %v104_v12 = vsub.f32 %v91_v3, %v102_v10  ;;  %v107_v13 = vsel %vm92_vm0, %v105_v11, 0.0 }
  0xf5   :  { %108 = vadd.xlane.f32.xlu1 %v107_v13 }
  0xf6   :  { %v106_v14 = vmul.f32 %v104_v12, %v104_v12 }
  0xf8   :  { %v110_v15 = vsel %vm96_vm1, %v106_v14, 0.0 }
  0xf9   :  { %111 = vadd.xlane.f32.xlu1 %v110_v15 }
 0x182   :  { %v109_v21 = vpop.xlane.xlu1 %108 }
 0x183   :  { %v113_v22 = vmul.f32 0.015625, %v109_v21 }
 0x185   :  { %v115_v23 = vadd.f32 1e-05, %v113_v22 }
 0x186   :  { %v112_v24 = vpop.xlane.xlu1 %111 }
 0x187   :  { %322 = vrsqrt.f32 %v115_v23  ;;  %v114_v25 = vmul.f32 0.015625, %v112_v24 }
 0x189   :  { %v116_v26 = vadd.f32 1e-05, %v114_v25 }
 0x18b   :  { %324 = vrsqrt.f32 %v116_v26 }
 0x191   :  { %v323_v27 = vpop.eup %322 }
 0x192   :  { %v119_v29 = vmul.f32 %v323_v27, %v103_v8 }
 0x194   :  { %v128_v31 = vmul.f32 %v273_v28, %v119_v29 }
 0x195   :  { %v325_v32 = vpop.eup %324 }
 0x196   :  { %v137_v33 = vadd.f32 %v274_v30, %v128_v31  ;;  %v120_v34 = vmul.f32 %v325_v32, %v104_v12 }
 0x198   :  { %v286_v35 = vpack.c.bf16 %v137_v33, %v137_v33  ;;  %v129_v36 = vmul.f32 %v273_v28, %v120_v34 }
 0x19a   :  { %148 = vst.msk [vmem:[#allocation2] sm:$0xf] %vm147_vm3, %v286_v35  ;;  %v138_v37 = vadd.f32 %v274_v30, %v129_v36 }
 0x19c   :  { %v287_v38 = vpack.c.bf16 %v138_v37, %v138_v37 }
 0x19e   :  { %150 = vst.msk [vmem:[#allocation2 + $0x4] sm:$0x1] %vm149_vm4, %v287_v38 }
 0x1a5   :  { %v321_v39 = vld [vmem:[#allocation2] sm:$0x1f]  }
 0x1a6   :  { %304 = vmatmul.mubr.msk.bf16.vlgmr.msra.gmra.mrb[0].mxu0 %vm92_vm0, %v321_v39 }
 0x279   :  { %v235_v41 = vpop.f32.mrb[0].mxu0 }
 0x27a   :  { %v236_v42 = vadd.f32 %v277_v40, %v235_v41  ;;  %v305_v43 = vpop.f32.mrb[1].mxu0 }
 0x27b   :  { %v238_v44 = vpop.f32.mrb[2].mxu0 }
 0x27c   :  { %v288_v45 = vpack.c.bf16 %v236_v42, %v236_v42  ;;  %v239_v46 = vadd.f32 %v277_v40, %v238_v44  ;;  %v306_v47 = vpop.f32.mrb[3].mxu0 }
 0x27e   :  { %v289_v48 = vpack.c.bf16 %v239_v46, %v239_v46  ;;  %251 = vst.msk [vmem:[#allocation12] sm:$0xf] %vm250_vm5, %v288_v45 }
 0x280   :  { %253 = vst.msk [vmem:[#allocation12 + $0x4] sm:$0x1] %vm252_vm6, %v289_v48 }
 0x281   :  { %447 = shalt.err (!%p444_p2)
}
 0x282   :  { %s448_s8 = scalar_lea.hbm %s597_s5, 128 }
 0x283   :  { %p449_p3 = scmp.ne.s32.totalorder %s597_s5, %s448_s8  ;;  %p452_p4 = scmp.lt.u32.totalorder %s448_s8, %s597_s5 }
 0x285   :  { %p454_p5 = pnand %p452_p4, %p449_p3 }
 0x287   :  { %457 = shalt.err (!%p454_p5)
}
 0x288   :  { %265 = dma.vmem_to_hbm [thread:$0]  %s260_s29, 128, %s597_s5, [#allocation5], %s469_s17, %s469_s17, %s470_s18  }
 0x289   :  { %464 = dma.done.wait [#allocation5], 128  }
 0x28a   :  { %465 = vsyncadd [#allocation5], 4294967168 }
 0x28b   :  { %269 = vsyncpa [#allocation4], 1 }
 0x28c   :  { %270 = vsyncpa [#allocation7], 1 }
 0x28d   :  { %271 = vsyncpa [#allocation10], 1 }
 0x28e   :  { %272 = vsyncpa [#allocation5], 1 }

// kernel: forward.31
= control target key start
LH: loop header
LB: loop body
LE: loop exit
PB: predicated region body
PF: predicated region fallthrough
CT: control target
= control target key end

     0   :  { %10 = vsyncpa [#allocation4], 0  ;;  %s769_s0 = inlined_call_operand.hbm [shape: bf16[34,32], index: 0, kind: input, shape index: {}]   ;;  %s770_s1 = inlined_call_operand.hbm [shape: f32[1,32], index: 1, kind: input, shape index: {}]   ;;  %s771_s2 = inlined_call_operand.hbm [shape: f32[1,32], index: 2, kind: input, shape index: {}]   ;;  %s772_s3 = inlined_call_operand.hbm [shape: bf16[32,96], index: 3, kind: input, shape index: {}]   ;;  %s773_s4 = inlined_call_operand.hbm [shape: f32[1,96], index: 4, kind: input, shape index: {}]   ;;  %s774_s5 = inlined_call_operand.hbm [shape: bf16[34,96], index: 5, kind: output, shape index: {}]  }
   0x1   :  { %11 = vsyncpa [#allocation7], 0 }
   0x2   :  { %12 = vsyncpa [#allocation10], 0 }
   0x3   :  { %13 = vsyncpa [#allocation5], 0  ;;  %s602_s18 = smov [#allocation6]   ;;  %s462_s22 = scalar_lea.hbm %s770_s1, 16 }
   0x4   :  { %s32_s19 = sshll.u32 %s602_s18, 4  ;;  %p463_p0 = scmp.ne.s32.totalorder %s770_s1, %s462_s22  ;;  %s33_s19 = int_to_ptr.vmem [resolvable:$true] %s32_s19 }
   0x5   :  { %p466_p1 = scmp.lt.u32.totalorder %s462_s22, %s770_s1 }
   0x7   :  { %p468_p2 = pnand %p466_p1, %p463_p0 }
   0x9   :  { %471 = shalt.err (!%p468_p2)
}
   0xa   :  { %s472_s27 = scalar_lea.vmem %s33_s19, 16  ;;  %s476_s28 = scalar_lea.vmem %s33_s19, 32 }
   0xb   :  { %p473_p3 = scmp.ne.s32.totalorder %s33_s19, %s472_s27  ;;  %p477_p4 = scmp.lt.s32.totalorder %s33_s19, %s33_s19 }
   0xc   :  { %p478_p5 = scmp.lt.s32.totalorder %s476_s28, %s472_s27 }
   0xe   :  { %p479_p6 = por %p478_p5, %p477_p4 }
  0x10   :  { %p480_p7 = pnand %p479_p6, %p473_p3 }
  0x12   :  { %483 = shalt.err (!%p480_p7)
}
  0x13   :  { %35 = dma.hbm_to_vmem [thread:$0]  %s770_s1, 16, %s33_s19, [#allocation7]  }
  0x14   :  { %s603_s6 = smov [#allocation9]   ;;  %s604_s8 = smov [#allocation3]  }
  0x15   :  { %s51_s7 = sshll.u32 %s603_s6, 4  ;;  %s19_s9 = sshll.u32 %s604_s8, 4  ;;  %s52_s7 = int_to_ptr.vmem [resolvable:$true] %s51_s7  ;;  %s20_s9 = int_to_ptr.vmem [resolvable:$true] %s19_s9 }
  0x16   :  { %s484_s12 = scalar_lea.hbm %s772_s3, 256 }
  0x17   :  { %p485_p8 = scmp.ne.s32.totalorder %s772_s3, %s484_s12  ;;  %p488_p9 = scmp.lt.u32.totalorder %s484_s12, %s772_s3 }
  0x19   :  { %p490_p10 = pnand %p488_p9, %p485_p8 }
  0x1b   :  { %493 = shalt.err (!%p490_p10)
}
  0x1c   :  { %s494_s1 = scalar_lea.vmem %s52_s7, 256  ;;  %p499_p12 = scmp.lt.s32.totalorder %s52_s7, %s52_s7 }
  0x1d   :  { %p495_p11 = scmp.ne.s32.totalorder %s52_s7, %s494_s1  ;;  %p500_p13 = scmp.lt.s32.totalorder %s494_s1, %s494_s1 }
  0x1f   :  { %p501_p0 = por %p500_p13, %p499_p12 }
  0x21   :  { %p502_p1 = pnand %p501_p0, %p495_p11 }
  0x23   :  { %505 = shalt.err (!%p502_p1)
}
  0x24   :  { %s605_s17 = smov 64   ;;  %s606_s18 = smov 4  }
  0x25   :  { %57 = dma.hbm_to_vmem [thread:$0]  %s772_s3, 256, %s52_s7, [#allocation10], %s605_s17, %s605_s17, %s606_s18  }
  0x26   :  { %s506_s23 = scalar_lea.hbm %s769_s0, 320 }
  0x27   :  { %p507_p2 = scmp.ne.s32.totalorder %s769_s0, %s506_s23  ;;  %p510_p3 = scmp.lt.u32.totalorder %s506_s23, %s769_s0 }
  0x29   :  { %p512_p4 = pnand %p510_p3, %p507_p2 }
  0x2b   :  { %515 = shalt.err (!%p512_p4)
}
  0x2c   :  { %s516_s28 = scalar_lea.vmem %s20_s9, 320  ;;  %p521_p6 = scmp.lt.s32.totalorder %s20_s9, %s20_s9 }
  0x2d   :  { %p517_p5 = scmp.ne.s32.totalorder %s20_s9, %s516_s28  ;;  %p522_p7 = scmp.lt.s32.totalorder %s516_s28, %s516_s28 }
  0x2f   :  { %p523_p8 = por %p522_p7, %p521_p6 }
  0x31   :  { %p524_p9 = pnand %p523_p8, %p517_p5 }
  0x33   :  { %527 = shalt.err (!%p524_p9)
}
  0x34   :  { %25 = dma.hbm_to_vmem [thread:$0]  %s769_s0, 320, %s20_s9, [#allocation4], %s605_s17, %s605_s17, %s606_s18  }
  0x35   :  { %s607_s30 = smov [#allocation8]   ;;  %s608_s7 = smov [#allocation11]  }
  0x36   :  { %s42_s6 = sshll.u32 %s607_s30, 4  ;;  %s64_s8 = sshll.u32 %s608_s7, 4  ;;  %s43_s6 = int_to_ptr.vmem [resolvable:$true] %s42_s6  ;;  %s65_s8 = int_to_ptr.vmem [resolvable:$true] %s64_s8 }
  0x37   :  { %s528_s12 = scalar_lea.hbm %s771_s2, 16 }
  0x38   :  { %p529_p10 = scmp.ne.s32.totalorder %s771_s2, %s528_s12  ;;  %p532_p11 = scmp.lt.u32.totalorder %s528_s12, %s771_s2 }
  0x3a   :  { %p534_p12 = pnand %p532_p11, %p529_p10 }
  0x3c   :  { %537 = shalt.err (!%p534_p12)
}
  0x3d   :  { %s538_s0 = scalar_lea.vmem %s43_s6, 16  ;;  %s542_s9 = scalar_lea.vmem %s43_s6, 32 }
  0x3e   :  { %p539_p13 = scmp.ne.s32.totalorder %s43_s6, %s538_s0  ;;  %p543_p0 = scmp.lt.s32.totalorder %s43_s6, %s43_s6 }
  0x3f   :  { %p544_p1 = scmp.lt.s32.totalorder %s542_s9, %s538_s0 }
  0x41   :  { %p545_p2 = por %p544_p1, %p543_p0 }
  0x43   :  { %p546_p3 = pnand %p545_p2, %p539_p13 }
  0x45   :  { %549 = shalt.err (!%p546_p3)
}
  0x46   :  { %45 = dma.hbm_to_vmem [thread:$0]  %s771_s2, 16, %s43_s6, [#allocation7]  }
  0x47   :  { %s550_s22 = scalar_lea.hbm %s773_s4, 16 }
  0x48   :  { %p551_p4 = scmp.ne.s32.totalorder %s773_s4, %s550_s22  ;;  %p554_p5 = scmp.lt.u32.totalorder %s550_s22, %s773_s4 }
  0x4a   :  { %p556_p6 = pnand %p554_p5, %p551_p4 }
  0x4c   :  { %559 = shalt.err (!%p556_p6)
}
  0x4d   :  { %s560_s27 = scalar_lea.vmem %s65_s8, 16  ;;  %s564_s28 = scalar_lea.vmem %s65_s8, 32 }
  0x4e   :  { %p561_p7 = scmp.ne.s32.totalorder %s65_s8, %s560_s27  ;;  %p565_p8 = scmp.lt.s32.totalorder %s65_s8, %s65_s8 }
  0x4f   :  { %p566_p9 = scmp.lt.s32.totalorder %s564_s28, %s560_s27 }
  0x51   :  { %p567_p10 = por %p566_p9, %p565_p8 }
  0x53   :  { %p568_p11 = pnand %p567_p10, %p561_p7 }
  0x55   :  { %571 = shalt.err (!%p568_p11)
}
  0x56   :  { %67 = dma.hbm_to_vmem [thread:$0]  %s773_s4, 16, %s65_s8, [#allocation10]  }
  0x57   :  { %594 = dma.done.wait [#allocation4], 320  }
  0x58   :  { %595 = vsyncadd [#allocation4], 4294966976 }
  0x59   :  { %596 = dma.done.wait [#allocation7], 32  }
  0x5a   :  { %597 = vsyncadd [#allocation7], 4294967264 }
  0x5b   :  { %598 = dma.done.wait [#allocation10], 272  }
  0x5c   :  { %599 = vsyncadd [#allocation10], 4294967024  ;;  %v411_v0 = vld [vmem:[#allocation3 + $0x8] sm:$0xff]   ;;  %vm98_vm0 = vcmask 261120   ;;  %v404_v1 = vld [vmem:[#allocation3] sm:$0xff]   ;;  %vm111_vm1 = vcmask 254976  }
  0x5d   :  { %v409_v2 = vunpack.c.l.bf16 %v411_v0  ;;  %v410_v3 = vunpack.c.h.bf16 %v411_v0  ;;  %v405_v4 = vunpack.c.l.bf16 %v404_v1  ;;  %v92_v5 = vld [vmem:[#allocation3 + $0x10] sm:$0x1]  ;;  %v406_v6 = vunpack.c.h.bf16 %v404_v1  ;;  %v447_v38 = vld [vmem:[#allocation9] sm:$0xff]   ;;  %v448_v40 = vld [vmem:[#allocation9 + $0x8] sm:$0xff]   ;;  %s611_s4 = smov [#allocation12]  }
  0x5e   :  { %v97_v10 = vunpack.c.l.bf16 %v92_v5  ;;  %v609_v39 = vmov 0.0   ;;  %vm610_vm2 = vmmov 0   ;;  %v372_v57 = vld [vmem:[#allocation6] ss:$0 sm:$0xff]  ;;  %v373_v59 = vld [vmem:[#allocation8] ss:$0 sm:$0xff] }
  0x5f   :  { %v105_v7 = vsel %vm98_vm0, %v409_v2, 0.0  ;;  %v99_v8 = vsel %vm98_vm0, %v405_v4, 0.0  ;;  %v108_v9 = vsel %vm98_vm0, %v410_v3, 0.0  ;;  %v102_v11 = vsel %vm98_vm0, %v406_v6, 0.0  ;;  %433 = vmatprep.subr.bf16.mxu1 %v609_v39  ;;  %417 = vmatprep.subr.bf16.mxu0 %v609_v39  ;;  %s358_s29 = sshll.u32 %s611_s4, 4  ;;  %s359_s29 = int_to_ptr.vmem [resolvable:$true] %s358_s29 }
  0x60   :  { %106 = vadd.xlane.f32.xlu0 %v105_v7  ;;  %100 = vadd.xlane.f32.xlu1 %v99_v8  ;;  %v112_v12 = vsel %vm111_vm1, %v97_v10, 0.0  ;;  %vm211_vm3 = vcmask 257024   ;;  %vm216_vm4 = vcmask 253952   ;;  %vm346_vm5 = vcmask 781312   ;;  %s572_s30 = scalar_lea.vmem %s359_s29, 320  ;;  %p577_p13 = scmp.lt.s32.totalorder %s359_s29, %s359_s29 }
  0x61   :  { %435 = vmatpush3.bf16.msra.mxu1 %v447_v38  ;;  %418 = vmatpush3.bf16.msra.mxu0 %v447_v38  ;;  %vm351_vm6 = vcmask 778240   ;;  %p573_p12 = scmp.ne.s32.totalorder %s359_s29, %s572_s30  ;;  %p578_p0 = scmp.lt.s32.totalorder %s572_s30, %s572_s30 }
  0x62   :  { %434 = vmatprep.subr.bf16.mxu1 %v609_v39  ;;  %419 = vmatprep.subr.bf16.mxu0 %v609_v39 }
  0x63   :  { %425 = vmatprep.mubr.msk.bf16.mxu1 %vm610_vm2, %v609_v39  ;;  %421 = vmatprep.mubr.msk.bf16.mxu0 %vm610_vm2, %v609_v39  ;;  %p579_p1 = por %p578_p0, %p577_p13 }
  0x64   :  { %109 = vadd.xlane.f32.xlu0 %v108_v9  ;;  %103 = vadd.xlane.f32.xlu1 %v102_v11 }
  0x65   :  { %436 = vmatpush3.bf16.msra.mxu1 %v448_v40  ;;  %420 = vmatpush3.bf16.msra.mxu0 %v448_v40  ;;  %p580_p2 = pnand %p579_p1, %p573_p12 }
  0x68   :  { %113 = vadd.xlane.f32.xlu0 %v112_v12 }
  0xed   :  { %v107_v13 = vpop.xlane.xlu0 %106  ;;  %v101_v14 = vpop.xlane.xlu1 %100 }
  0xee   :  { %v118_v15 = vmul.f32 0.03125, %v107_v13  ;;  %v116_v16 = vmul.f32 0.03125, %v101_v14 }
  0xf0   :  { %v123_v17 = vsub.f32 %v409_v2, %v118_v15  ;;  %v713_v18 = vsub.f32 %v405_v4, %v116_v16 }
  0xf1   :  { %v110_v19 = vpop.xlane.xlu0 %109  ;;  %v104_v20 = vpop.xlane.xlu1 %103 }
  0xf2   :  { %v119_v21 = vmul.f32 0.03125, %v110_v19  ;;  %v128_v22 = vmul.f32 %v123_v17, %v123_v17  ;;  %v117_v23 = vmul.f32 0.03125, %v104_v20  ;;  %v126_v24 = vmul.f32 %v713_v18, %v713_v18 }
  0xf4   :  { %v124_v25 = vsub.f32 %v410_v3, %v119_v21  ;;  %v137_v26 = vsel %vm98_vm0, %v128_v22, 0.0  ;;  %v718_v27 = vsub.f32 %v406_v6, %v117_v23  ;;  %v131_v31 = vsel %vm98_vm0, %v126_v24, 0.0  ;;  %v379_v22 = vld [vmem:[#allocation11] ss:$0 sm:$0xff] }
  0xf5   :  { %v114_v28 = vpop.xlane.xlu0 %113  ;;  %138 = vadd.xlane.f32.xlu1 %v137_v26 }
  0xf6   :  { %v120_v29 = vmul.f32 0.03125, %v114_v28  ;;  %v129_v30 = vmul.f32 %v124_v25, %v124_v25  ;;  %v127_v32 = vmul.f32 %v718_v27, %v718_v27 }
  0xf8   :  { %v723_v33 = vsub.f32 %v97_v10, %v120_v29  ;;  %v140_v34 = vsel %vm98_vm0, %v129_v30, 0.0  ;;  %v134_v36 = vsel %vm98_vm0, %v127_v32, 0.0 }
  0xf9   :  { %141 = vadd.xlane.f32.xlu0 %v140_v34  ;;  %132 = vadd.xlane.f32.xlu1 %v131_v31 }
  0xfa   :  { %v130_v35 = vmul.f32 %v723_v33, %v723_v33 }
  0xfc   :  { %v143_v37 = vsel %vm111_vm1, %v130_v35, 0.0 }
  0xfd   :  { %144 = vadd.xlane.f32.xlu1 %v143_v37  ;;  %135 = vadd.xlane.f32.xlu0 %v134_v36 }
 0x182   :  { %v139_v41 = vpop.xlane.xlu1 %138 }
 0x183   :  { %v148_v42 = vmul.f32 0.03125, %v139_v41 }
 0x185   :  { %v153_v43 = vadd.f32 1e-05, %v148_v42 }
 0x186   :  { %v142_v44 = vpop.xlane.xlu0 %141  ;;  %v133_v45 = vpop.xlane.xlu1 %132 }
 0x187   :  { %452 = vrsqrt.f32 %v153_v43  ;;  %v149_v46 = vmul.f32 0.03125, %v142_v44  ;;  %v146_v47 = vmul.f32 0.03125, %v133_v45 }
 0x189   :  { %v154_v48 = vadd.f32 1e-05, %v149_v46  ;;  %v151_v49 = vadd.f32 1e-05, %v146_v47 }
 0x18a   :  { %v136_v50 = vpop.xlane.xlu0 %135  ;;  %v145_v51 = vpop.xlane.xlu1 %144 }
 0x18b   :  { %454 = vrsqrt.f32 %v154_v48  ;;  %v147_v52 = vmul.f32 0.03125, %v136_v50  ;;  %v150_v53 = vmul.f32 0.03125, %v145_v51 }
 0x18c   :  { %456 = vrsqrt.f32 %v151_v49 }
 0x18d   :  { %v152_v54 = vadd.f32 1e-05, %v147_v52  ;;  %v155_v55 = vadd.f32 1e-05, %v150_v53 }
 0x18f   :  { %458 = vrsqrt.f32 %v152_v54 }
 0x190   :  { %460 = vrsqrt.f32 %v155_v55 }
 0x191   :  { %v453_v56 = vpop.eup %452 }
 0x192   :  { %v163_v58 = vmul.f32 %v453_v56, %v123_v17 }
 0x194   :  { %v175_v60 = vmul.f32 %v372_v57, %v163_v58 }
 0x195   :  { %v455_v61 = vpop.eup %454 }
 0x196   :  { %v457_v62 = vpop.eup %456  ;;  %v187_v63 = vadd.f32 %v373_v59, %v175_v60  ;;  %v164_v0 = vmul.f32 %v455_v61, %v124_v25 }
 0x197   :  { %v161_v1 = vmul.f32 %v457_v62, %v713_v18 }
 0x198   :  { %v395_v2 = vpack.c.bf16 %v187_v63, %v187_v63  ;;  %v176_v3 = vmul.f32 %v372_v57, %v164_v0 }
 0x199   :  { %v459_v4 = vpop.eup %458  ;;  %v173_v5 = vmul.f32 %v372_v57, %v161_v1 }
 0x19a   :  { %v461_v6 = vpop.eup %460  ;;  %214 = vst.msk [vmem:[#allocation2 + $0x8] sm:$0xf] %vm211_vm3, %v395_v2  ;;  %v188_v7 = vadd.f32 %v373_v59, %v176_v3  ;;  %v162_v8 = vmul.f32 %v459_v4, %v718_v27 }
 0x19b   :  { %v185_v9 = vadd.f32 %v373_v59, %v173_v5  ;;  %v165_v10 = vmul.f32 %v461_v6, %v723_v33 }
 0x19c   :  { %v396_v11 = vpack.c.bf16 %v188_v7, %v188_v7  ;;  %v174_v12 = vmul.f32 %v372_v57, %v162_v8 }
 0x19d   :  { %v393_v13 = vpack.c.bf16 %v185_v9, %v185_v9  ;;  %v177_v14 = vmul.f32 %v372_v57, %v165_v10 }
 0x19e   :  { %215 = vst.msk [vmem:[#allocation2 + $0xc] sm:$0xf] %vm211_vm3, %v396_v11  ;;  %v186_v15 = vadd.f32 %v373_v59, %v174_v12 }
 0x19f   :  { %212 = vst.msk [vmem:[#allocation2] sm:$0xf] %vm211_vm3, %v393_v13  ;;  %v189_v16 = vadd.f32 %v373_v59, %v177_v14 }
 0x1a0   :  { %v394_v17 = vpack.c.bf16 %v186_v15, %v186_v15 }
 0x1a1   :  { %v397_v18 = vpack.c.bf16 %v189_v16, %v189_v16 }
 0x1a2   :  { %213 = vst.msk [vmem:[#allocation2 + $0x4] sm:$0xf] %vm211_vm3, %v394_v17 }
 0x1a3   :  { %217 = vst.msk [vmem:[#allocation2 + $0x10] sm:$0x1] %vm216_vm4, %v397_v18 }
 0x1a5   :  { %v449_v19 = vld [vmem:[#allocation2 + $0x8] sm:$0xff]  }
 0x1a6   :  { %426 = vmatmul.mubr.msk.bf16.vlgmr.msra.gmra.mrb[0].mxu1 %vm98_vm0, %v449_v19 }
 0x1a7   :  { %429 = vmatprep.mubr.msk.bf16.mxu1 %vm610_vm2, %v609_v39 }
 0x1a9   :  { %v450_v20 = vld [vmem:[#allocation2] sm:$0xff]  }
 0x1aa   :  { %422 = vmatmul.mubr.msk.bf16.vlgmr.msra.gmra.mrb[0].mxu0 %vm98_vm0, %v450_v20  ;;  %v451_v21 = vld [vmem:[#allocation2 + $0x10] ss:$0 sps:$4 sm:$0x11]  }
 0x1ae   :  { %430 = vmatmul.mubr.msk.bf16.gmra.mrb[4].mxu1 %vm98_vm0, %v451_v21 }
 0x279   :  { %v311_v23 = vpop.f32.mrb[0].mxu1 }
 0x27a   :  { %v312_v24 = vadd.f32 %v379_v22, %v311_v23  ;;  %v427_v25 = vpop.f32.mrb[1].mxu1 }
 0x27b   :  { %v314_v26 = vpop.f32.mrb[2].mxu1 }
 0x27c   :  { %v400_v27 = vpack.c.bf16 %v312_v24, %v312_v24  ;;  %v315_v28 = vadd.f32 %v379_v22, %v314_v26  ;;  %v428_v29 = vpop.f32.mrb[3].mxu1 }
 0x27d   :  { %v303_v30 = vpop.f32.mrb[0].mxu0 }
 0x27e   :  { %349 = vst.msk [vmem:[#allocation12 + $0x8] sm:$0xf] %vm346_vm5, %v400_v27  ;;  %v401_v31 = vpack.c.bf16 %v315_v28, %v315_v28  ;;  %v304_v32 = vadd.f32 %v379_v22, %v303_v30  ;;  %v423_v33 = vpop.f32.mrb[1].mxu0 }
 0x27f   :  { %v306_v34 = vpop.f32.mrb[2].mxu0 }
 0x280   :  { %350 = vst.msk [vmem:[#allocation12 + $0xc] sm:$0xf] %vm346_vm5, %v401_v31  ;;  %v398_v35 = vpack.c.bf16 %v304_v32, %v304_v32  ;;  %v307_v36 = vadd.f32 %v379_v22, %v306_v34  ;;  %v424_v37 = vpop.f32.mrb[3].mxu0 }
 0x281   :  { %v319_v38 = vpop.f32.mrb[4].mxu1 }
 0x282   :  { %347 = vst.msk [vmem:[#allocation12] sm:$0xf] %vm346_vm5, %v398_v35  ;;  %v399_v39 = vpack.c.bf16 %v307_v36, %v307_v36  ;;  %v320_v40 = vadd.f32 %v379_v22, %v319_v38  ;;  %v431_v41 = vpop.f32.mrb[5].mxu1 }
 0x283   :  { %v322_v42 = vpop.f32.mrb[6].mxu1 }
 0x284   :  { %348 = vst.msk [vmem:[#allocation12 + $0x4] sm:$0xf] %vm346_vm5, %v399_v39  ;;  %v402_v43 = vpack.c.bf16 %v320_v40, %v320_v40  ;;  %v432_v44 = vpop.f32.mrb[7].mxu1 }
 0x286   :  { %352 = vst.msk [vmem:[#allocation12 + $0x10] sm:$0x1] %vm351_vm6, %v402_v43 }
 0x287   :  { %583 = shalt.err (!%p580_p2)
}
 0x288   :  { %s584_s8 = scalar_lea.hbm %s774_s5, 320 }
 0x289   :  { %p585_p3 = scmp.ne.s32.totalorder %s774_s5, %s584_s8  ;;  %p588_p4 = scmp.lt.u32.totalorder %s584_s8, %s774_s5 }
 0x28b   :  { %p590_p5 = pnand %p588_p4, %p585_p3 }
 0x28d   :  { %593 = shalt.err (!%p590_p5)
}
 0x28e   :  { %364 = dma.vmem_to_hbm [thread:$0]  %s359_s29, 320, %s774_s5, [#allocation5], %s605_s17, %s605_s17, %s606_s18  }
 0x28f   :  { %600 = dma.done.wait [#allocation5], 320  }
 0x290   :  { %601 = vsyncadd [#allocation5], 4294966976 }
 0x291   :  { %368 = vsyncpa [#allocation4], 1 }
 0x292   :  { %369 = vsyncpa [#allocation7], 1 }
 0x293   :  { %370 = vsyncpa [#allocation10], 1 }
 0x294   :  { %371 = vsyncpa [#allocation5], 1 }

// kernel: forward.33
= control target key start
LH: loop header
LB: loop body
LE: loop exit
PB: predicated region body
PF: predicated region fallthrough
CT: control target
= control target key end

     0   :  { %9 = vsyncpa [#allocation4], 0  ;;  %s599_s0 = inlined_call_operand.hbm [shape: bf16[34,32], index: 0, kind: input, shape index: {}]   ;;  %s600_s1 = inlined_call_operand.hbm [shape: bf16[32,32], index: 1, kind: input, shape index: {}]   ;;  %s601_s2 = inlined_call_operand.hbm [shape: f32[1,32], index: 2, kind: input, shape index: {}]   ;;  %s602_s3 = inlined_call_operand.hbm [shape: bf16[34,32], index: 3, kind: input, shape index: {}]   ;;  %s603_s4 = inlined_call_operand.hbm [shape: bf16[34,32], index: 4, kind: output, shape index: {}]  }
   0x1   :  { %10 = vsyncpa [#allocation7], 0 }
   0x2   :  { %11 = vsyncpa [#allocation10], 0 }
   0x3   :  { %12 = vsyncpa [#allocation5], 0  ;;  %s466_s15 = smov [#allocation6]   ;;  %s467_s17 = smov [#allocation3]  }
   0x4   :  { %s30_s16 = sshll.u32 %s466_s15, 4  ;;  %s18_s18 = sshll.u32 %s467_s17, 4  ;;  %s31_s16 = int_to_ptr.vmem [resolvable:$true] %s30_s16  ;;  %s500_s18 = int_to_ptr.vmem [resolvable:$true] %s18_s18 }
   0x5   :  { %s348_s21 = scalar_lea.hbm %s600_s1, 256 }
   0x6   :  { %p349_p0 = scmp.ne.s32.totalorder %s600_s1, %s348_s21  ;;  %p352_p1 = scmp.lt.u32.totalorder %s348_s21, %s600_s1 }
   0x8   :  { %p354_p2 = pnand %p352_p1, %p349_p0 }
   0xa   :  { %357 = shalt.err (!%p354_p2)
}
   0xb   :  { %s358_s26 = scalar_lea.vmem %s31_s16, 256  ;;  %p363_p4 = scmp.lt.s32.totalorder %s31_s16, %s31_s16 }
   0xc   :  { %p359_p3 = scmp.ne.s32.totalorder %s31_s16, %s358_s26  ;;  %p364_p5 = scmp.lt.s32.totalorder %s358_s26, %s358_s26 }
   0xe   :  { %p365_p6 = por %p364_p5, %p363_p4 }
  0x10   :  { %p366_p7 = pnand %p365_p6, %p359_p3 }
  0x12   :  { %369 = shalt.err (!%p366_p7)
}
  0x13   :  { %s468_s27 = smov 64   ;;  %s469_s28 = smov 4  }
  0x14   :  { %36 = dma.hbm_to_vmem [thread:$0]  %s600_s1, 256, %s31_s16, [#allocation7], %s468_s27, %s468_s27, %s469_s28  }
  0x15   :  { %s370_s7 = scalar_lea.hbm %s599_s0, 320 }
  0x16   :  { %p371_p8 = scmp.ne.s32.totalorder %s599_s0, %s370_s7  ;;  %p374_p9 = scmp.lt.u32.totalorder %s370_s7, %s599_s0 }
  0x18   :  { %p376_p10 = pnand %p374_p9, %p371_p8 }
  0x1a   :  { %379 = shalt.err (!%p376_p10)
}
  0x1b   :  { %s380_s12 = scalar_lea.vmem %s500_s18, 320  ;;  %p385_p12 = scmp.lt.s32.totalorder %s500_s18, %s500_s18 }
  0x1c   :  { %p381_p11 = scmp.ne.s32.totalorder %s500_s18, %s380_s12  ;;  %p386_p13 = scmp.lt.s32.totalorder %s380_s12, %s380_s12 }
  0x1e   :  { %p387_p0 = por %p386_p13, %p385_p12 }
  0x20   :  { %p388_p1 = pnand %p387_p0, %p381_p11 }
  0x22   :  { %391 = shalt.err (!%p388_p1)
}
  0x23   :  { %24 = dma.hbm_to_vmem [thread:$0]  %s599_s0, 320, %s500_s18, [#allocation4], %s468_s27, %s468_s27, %s469_s28  }
  0x24   :  { %s470_s14 = smov [#allocation8]   ;;  %s471_s16 = smov [#allocation9]  }
  0x25   :  { %s43_s15 = sshll.u32 %s470_s14, 4  ;;  %s52_s17 = sshll.u32 %s471_s16, 4  ;;  %s44_s15 = int_to_ptr.vmem [resolvable:$true] %s43_s15  ;;  %s537_s17 = int_to_ptr.vmem [resolvable:$true] %s52_s17 }
  0x26   :  { %s392_s21 = scalar_lea.hbm %s601_s2, 16 }
  0x27   :  { %p393_p2 = scmp.ne.s32.totalorder %s601_s2, %s392_s21  ;;  %p396_p3 = scmp.lt.u32.totalorder %s392_s21, %s601_s2 }
  0x29   :  { %p398_p4 = pnand %p396_p3, %p393_p2 }
  0x2b   :  { %401 = shalt.err (!%p398_p4)
}
  0x2c   :  { %s402_s0 = scalar_lea.vmem %s44_s15, 16  ;;  %s406_s18 = scalar_lea.vmem %s44_s15, 32 }
  0x2d   :  { %p403_p5 = scmp.ne.s32.totalorder %s44_s15, %s402_s0  ;;  %p407_p6 = scmp.lt.s32.totalorder %s44_s15, %s44_s15 }
  0x2e   :  { %p408_p7 = scmp.lt.s32.totalorder %s406_s18, %s402_s0 }
  0x30   :  { %p409_p8 = por %p408_p7, %p407_p6 }
  0x32   :  { %p410_p9 = pnand %p409_p8, %p403_p5 }
  0x34   :  { %413 = shalt.err (!%p410_p9)
}
  0x35   :  { %46 = dma.hbm_to_vmem [thread:$0]  %s601_s2, 16, %s44_s15, [#allocation7]  }
  0x36   :  { %s414_s6 = scalar_lea.hbm %s602_s3, 320 }
  0x37   :  { %p415_p10 = scmp.ne.s32.totalorder %s602_s3, %s414_s6  ;;  %p418_p11 = scmp.lt.u32.totalorder %s414_s6, %s602_s3 }
  0x39   :  { %p420_p12 = pnand %p418_p11, %p415_p10 }
  0x3b   :  { %423 = shalt.err (!%p420_p12)
}
  0x3c   :  { %s424_s11 = scalar_lea.vmem %s537_s17, 320  ;;  %p429_p0 = scmp.lt.s32.totalorder %s537_s17, %s537_s17 }
  0x3d   :  { %p425_p13 = scmp.ne.s32.totalorder %s537_s17, %s424_s11  ;;  %p430_p1 = scmp.lt.s32.totalorder %s424_s11, %s424_s11 }
  0x3f   :  { %p431_p2 = por %p430_p1, %p429_p0 }
  0x41   :  { %p432_p3 = pnand %p431_p2, %p425_p13 }
  0x43   :  { %435 = shalt.err (!%p432_p3)
}
  0x44   :  { %58 = dma.hbm_to_vmem [thread:$0]  %s602_s3, 320, %s537_s17, [#allocation10], %s468_s27, %s468_s27, %s469_s28  }
  0x45   :  { %458 = dma.done.wait [#allocation4], 320  }
  0x46   :  { %459 = vsyncadd [#allocation4], 4294966976 }
  0x47   :  { %460 = dma.done.wait [#allocation7], 272  }
  0x48   :  { %461 = vsyncadd [#allocation7], 4294967024 }
  0x49   :  { %462 = dma.done.wait [#allocation10], 320  }
  0x4a   :  { %463 = vsyncadd [#allocation10], 4294966976  ;;  %vm76_vm0 = vcmask 261120   ;;  %v472_v0 = vmov 0.0   ;;  %vm473_vm1 = vmmov 0   ;;  %v343_v1 = vld [vmem:[#allocation6] sm:$0xff]  }
  0x4b   :  { %330 = vmatprep.subr.bf16.mxu1 %v472_v0  ;;  %314 = vmatprep.subr.bf16.mxu0 %v472_v0  ;;  %77 = vst.msk [vmem:[#allocation2] sm:$0xff] %vm76_vm0, %v472_v0  ;;  %78 = vst.msk [vmem:[#allocation2 + $0x8] sm:$0xff] %vm76_vm0, %v472_v0  ;;  %v344_v2 = vld [vmem:[#allocation6 + $0x8] sm:$0xff]   ;;  %v345_v3 = vld [vmem:[#allocation3 + $0x8] sm:$0xff]   ;;  %vm81_vm2 = vcmask 254976   ;;  %vm255_vm3 = vcmask 257024  }
  0x4c   :  { %79 = vst.msk [vmem:[#allocation2 + $0x10] sm:$0xff] %vm76_vm0, %v472_v0  ;;  %80 = vst.msk [vmem:[#allocation2 + $0x18] sm:$0xff] %vm76_vm0, %v472_v0  ;;  %322 = vmatprep.mubr.msk.bf16.mxu1 %vm473_vm1, %v472_v0  ;;  %318 = vmatprep.mubr.msk.bf16.mxu0 %vm473_vm1, %v472_v0  ;;  %v346_v4 = vld [vmem:[#allocation3] sm:$0xff]   ;;  %v347_v5 = vld [vmem:[#allocation3 + $0x10] ss:$0 sps:$4 sm:$0x11]  }
  0x4d   :  { %332 = vmatpush3.bf16.msra.mxu1 %v343_v1  ;;  %315 = vmatpush3.bf16.msra.mxu0 %v343_v1  ;;  %82 = vst.msk [vmem:[#allocation2 + $0x20] sm:$0x3] %vm81_vm2, %v472_v0  ;;  %v301_v23 = vld [vmem:[#allocation9] sm:$0xff]   ;;  %v308_v24 = vld [vmem:[#allocation9 + $0x8] sm:$0xff]   ;;  %v289_v26 = vld [vmem:[#allocation8] ss:$0 sm:$0xff] }
  0x4e   :  { %331 = vmatprep.subr.bf16.mxu1 %v472_v0  ;;  %316 = vmatprep.subr.bf16.mxu0 %v472_v0  ;;  %v302_v29 = vunpack.c.l.bf16 %v301_v23  ;;  %v306_v30 = vunpack.c.l.bf16 %v308_v24  ;;  %v303_v37 = vunpack.c.h.bf16 %v301_v23  ;;  %v307_v38 = vunpack.c.h.bf16 %v308_v24  ;;  %v223_v45 = vld [vmem:[#allocation9 + $0x10] sm:$0x1]  ;;  %s474_s3 = smov [#allocation11]  }
  0x4f   :  { %v228_v50 = vunpack.c.l.bf16 %v223_v45  ;;  %s267_s1 = sshll.u32 %s474_s3, 4  ;;  %vm260_vm4 = vcmask 253952   ;;  %s268_s1 = int_to_ptr.vmem [resolvable:$true] %s267_s1 }
  0x50   :  { %s436_s13 = scalar_lea.vmem %s268_s1, 320  ;;  %p441_p5 = scmp.lt.s32.totalorder %s268_s1, %s268_s1 }
  0x51   :  { %333 = vmatpush3.bf16.msra.mxu1 %v344_v2  ;;  %317 = vmatpush3.bf16.msra.mxu0 %v344_v2  ;;  %p437_p4 = scmp.ne.s32.totalorder %s268_s1, %s436_s13  ;;  %p442_p6 = scmp.lt.s32.totalorder %s436_s13, %s436_s13 }
  0x52   :  { %v83_v7 = vld [vmem:[#allocation2] sm:$0xff]  ;;  %v84_v11 = vld [vmem:[#allocation2 + $0x8] sm:$0xff] }
  0x53   :  { %v85_v6 = vld [vmem:[#allocation2 + $0x10] sm:$0xff]  ;;  %v86_v9 = vld [vmem:[#allocation2 + $0x18] sm:$0xff]  ;;  %p443_p7 = por %p442_p6, %p441_p5 }
  0x54   :  { %323 = vmatmul.mubr.msk.bf16.vlgmr.msra.gmra.mrb[0].mxu1 %vm76_vm0, %v345_v3  ;;  %319 = vmatmul.mubr.msk.bf16.vlgmr.msra.gmra.mrb[0].mxu0 %vm76_vm0, %v346_v4  ;;  %v87_v22 = vld [vmem:[#allocation2 + $0x20] sm:$0x3] }
  0x55   :  { %326 = vmatprep.mubr.msk.bf16.mxu1 %vm473_vm1, %v472_v0  ;;  %p444_p8 = pnand %p443_p7, %p437_p4 }
  0x5c   :  { %327 = vmatmul.mubr.msk.bf16.gmra.mrb[4].mxu1 %vm76_vm0, %v347_v5 }
 0x127   :  { %v174_v8 = vpop.f32.mrb[0].mxu1  ;;  %v166_v10 = vpop.f32.mrb[0].mxu0 }
 0x128   :  { %v190_v12 = vadd.f32 %v174_v8, %v85_v6  ;;  %v324_v13 = vpop.f32.mrb[1].mxu1  ;;  %v188_v14 = vadd.f32 %v166_v10, %v83_v7  ;;  %v320_v15 = vpop.f32.mrb[1].mxu0 }
 0x129   :  { %v177_v16 = vpop.f32.mrb[2].mxu1  ;;  %v169_v17 = vpop.f32.mrb[2].mxu0 }
 0x12a   :  { %195 = vst.msk [vmem:[#allocation2 + $0x10] sm:$0xff] %vm76_vm0, %v190_v12  ;;  %v191_v18 = vadd.f32 %v177_v16, %v86_v9  ;;  %193 = vst.msk [vmem:[#allocation2] sm:$0xff] %vm76_vm0, %v188_v14  ;;  %v325_v19 = vpop.f32.mrb[3].mxu1  ;;  %v189_v20 = vadd.f32 %v169_v17, %v84_v11  ;;  %v321_v21 = vpop.f32.mrb[3].mxu0 }
 0x12c   :  { %196 = vst.msk [vmem:[#allocation2 + $0x18] sm:$0xff] %vm76_vm0, %v191_v18  ;;  %194 = vst.msk [vmem:[#allocation2 + $0x8] sm:$0xff] %vm76_vm0, %v189_v20 }
 0x12f   :  { %v182_v25 = vpop.f32.mrb[4].mxu1 }
 0x130   :  { %v192_v27 = vadd.f32 %v182_v25, %v87_v22  ;;  %v328_v28 = vpop.f32.mrb[5].mxu1 }
 0x131   :  { %v185_v31 = vpop.f32.mrb[6].mxu1  ;;  %v202_v32 = vld [vmem:[#allocation2] sm:$0xff]  ;;  %v204_v33 = vld [vmem:[#allocation2 + $0x10] sm:$0xff] }
 0x132   :  { %198 = vst.msk [vmem:[#allocation2 + $0x20] sm:$0x3] %vm81_vm2, %v192_v27  ;;  %v329_v34 = vpop.f32.mrb[7].mxu1  ;;  %v214_v35 = vadd.f32 %v289_v26, %v202_v32  ;;  %v216_v36 = vadd.f32 %v289_v26, %v204_v33 }
 0x133   :  { %v203_v39 = vld [vmem:[#allocation2 + $0x8] sm:$0xff]  ;;  %v205_v40 = vld [vmem:[#allocation2 + $0x18] sm:$0xff] }
 0x134   :  { %v215_v41 = vadd.f32 %v289_v26, %v203_v39  ;;  %v217_v42 = vadd.f32 %v289_v26, %v205_v40  ;;  %v229_v43 = vadd.f32 %v302_v29, %v214_v35  ;;  %v231_v44 = vadd.f32 %v306_v30, %v216_v36 }
 0x136   :  { %v230_v46 = vadd.f32 %v303_v37, %v215_v41  ;;  %v232_v47 = vadd.f32 %v307_v38, %v217_v42  ;;  %v295_v48 = vpack.c.bf16 %v229_v43, %v229_v43  ;;  %v297_v49 = vpack.c.bf16 %v231_v44, %v231_v44 }
 0x138   :  { %v296_v51 = vpack.c.bf16 %v230_v46, %v230_v46  ;;  %v298_v52 = vpack.c.bf16 %v232_v47, %v232_v47  ;;  %256 = vst.msk [vmem:[#allocation11] sm:$0xf] %vm255_vm3, %v295_v48  ;;  %258 = vst.msk [vmem:[#allocation11 + $0x8] sm:$0xf] %vm255_vm3, %v297_v49 }
 0x139   :  { %v206_v53 = vld [vmem:[#allocation2 + $0x20] sm:$0x3] }
 0x13a   :  { %v218_v54 = vadd.f32 %v289_v26, %v206_v53  ;;  %257 = vst.msk [vmem:[#allocation11 + $0x4] sm:$0xf] %vm255_vm3, %v296_v51  ;;  %259 = vst.msk [vmem:[#allocation11 + $0xc] sm:$0xf] %vm255_vm3, %v298_v52 }
 0x13c   :  { %v233_v55 = vadd.f32 %v228_v50, %v218_v54 }
 0x13e   :  { %v299_v56 = vpack.c.bf16 %v233_v55, %v233_v55 }
 0x140   :  { %261 = vst.msk [vmem:[#allocation11 + $0x10] sm:$0x1] %vm260_vm4, %v299_v56 }
 0x141   :  { %447 = shalt.err (!%p444_p8)
}
 0x142   :  { %s448_s16 = scalar_lea.hbm %s603_s4, 320 }
 0x143   :  { %p449_p9 = scmp.ne.s32.totalorder %s603_s4, %s448_s16  ;;  %p452_p10 = scmp.lt.u32.totalorder %s448_s16, %s603_s4 }
 0x145   :  { %p454_p11 = pnand %p452_p10, %p449_p9 }
 0x147   :  { %457 = shalt.err (!%p454_p11)
}
 0x148   :  { %273 = dma.vmem_to_hbm [thread:$0]  %s268_s1, 320, %s603_s4, [#allocation5], %s468_s27, %s468_s27, %s469_s28  }
 0x149   :  { %464 = dma.done.wait [#allocation5], 320  }
 0x14a   :  { %465 = vsyncadd [#allocation5], 4294966976 }
 0x14b   :  { %277 = vsyncpa [#allocation4], 1 }
 0x14c   :  { %278 = vsyncpa [#allocation7], 1 }
 0x14d   :  { %279 = vsyncpa [#allocation10], 1 }
 0x14e   :  { %280 = vsyncpa [#allocation5], 1 }

// kernel: forward.32
= control target key start
LH: loop header
LB: loop body
LE: loop exit
PB: predicated region body
PF: predicated region fallthrough
CT: control target
= control target key end

     0   :  { %6 = vsyncpa [#allocation3], 0  ;;  %s1709_s0 = inlined_call_operand.hbm [shape: bf16[2,17,96], index: 0, kind: input, shape index: {}]   ;;  %s1710_s1 = inlined_call_operand.hbm [shape: bf16[2,17,32], index: 1, kind: output, shape index: {}]  }
   0x1   :  { %8 = vsyncpa [#allocation3 + $0x1], 0 }
   0x2   :  { %9 = vsyncpa [#allocation4], 0 }
   0x3   :  { %11 = vsyncpa [#allocation4 + $0x1], 0  ;;  %s1410_s6 = smov 0   ;;  %s1412_s7 = smov 0  }
   0x4   :  { %s1414_s8 = smov 0   ;;  %s1416_s9 = smov 0  }
   0x5 LB: > { %s1431_s10 = sadd.s32 4294967295, %s1378_s9   ;;  %s1009_s11 = sadd.s32 4294967294, %s1378_s9   ;;  %s1378_s9 = sphi %s1416_s9, %s1722_s9   ;;  %s1374_s8 = sphi %s1414_s8, %s1721_s8   ;;  %s1370_s7 = sphi %s1412_s7, %s1720_s7   ;;  %s1366_s6 = sphi %s1410_s6, %s1719_s6  }
   0x6   : > { %s1435_s12 = sadd.s32 1, %s1378_s9   ;;  %s24_s13 = sadd.s32 1, %s1374_s8 }
   0x7   : > { %s21_s14 = ssub.s32 %s1378_s9, %s1435_s12  ;;  %p31_p0 = scmp.ne.s32.totalorder %s1374_s8, %s1370_s7 }
   0x8   : > { %p22_p1 = scmp.eq.s32.totalorder %s21_s14, 0  ;;  %p32_p2 = scmp.eq.s32.totalorder %s1378_s9, 0 }
   0x9   : > { %p37_p3 = scmp.ne.s32.totalorder %s1370_s7, %s1366_s6  ;;  %p38_p4 = scmp.eq.s32.totalorder %s1431_s10, 0 }
   0xa   : > { %s1447_s15 = scalar_select %p22_p1, %s1374_s8, %s24_s13  }
   0xb   : > { %p33_p5 = por %p32_p2, %p31_p0  ;;  %p1449_p6 = por %p38_p4, %p37_p3 }
   0xc   : > { %p61_p7 = scmp.eq.s32.totalorder %s1431_s10, 1  ;;  %p67_p8 = scmp.eq.s32.totalorder %s1009_s11, 1 }
   0xd   : > { %p1179_p10 = scmp.lt.s32.totalorder %s1378_s9, 2  ;;  %s87_s19 = sand.u32 1, %s1374_s8  }
   0xe   : > { %p1456_p11 = por %p61_p7, %p31_p0  ;;  %p1460_p12 = por %p67_p8, %p37_p3 }
   0xf   : > { %s1164_s20 = smul.u32 192, %s1378_s9  ;;  %p1471_p13 = pnand %p1179_p10, %p33_p5 }
  0x10   : > { %s1713_s17 = scalar_select %p1456_p11, 1, 0 }
  0x11   : > { %s1714_s18 = scalar_select %p1460_p12, 1, 0 }
  0x12   : > { %s1163_s21 = smul.u32 12, %s87_s19  ;;  %s1469_s24 = scalar_lea.hbm %s1709_s0, %s1164_s20 }
  0x13   : > { %s1477_s28 = scalar_lea.sflag [#allocation3], %s87_s19  ;;  %s1282_s29 = scalar_lea.hbm %s1469_s24, 192 }
  0x14   : > { %s91_s26 = scalar_lea.vmem [#allocation2], %s1163_s21  ;;  %p1283_p0 = scmp.ne.s32.totalorder %s1469_s24, %s1282_s29 }
  0x15   : > { %s98_s27 = sshll.u32 %s91_s26, 4  ;;  %p1284_p1 = pneg %p1471_p13  ;;  %s1475_s27 = int_to_ptr.vmem [resolvable:$true] %s98_s27 }
  0x16   : > { %s1287_s3 = scalar_lea.hbm %s1709_s0, 384  ;;  %p1288_p4 = scmp.lt.u32.totalorder %s1469_s24, %s1709_s0 }
  0x17   : > { %p1285_p2 = pnand %p1284_p1, %p1283_p0  ;;  %p1289_p5 = scmp.lt.u32.totalorder %s1287_s3, %s1282_s29 }
  0x18   : > { %p1291_p8 = scmp.lt.u32.totalorder %s1282_s29, %s1469_s24 }
  0x19   : > { %p1286_p3 = pneg %p1285_p2  ;;  %p1290_p7 = por %p1289_p5, %p1288_p4 }
  0x1b   : > { %p1292_p10 = por %p1291_p8, %p1290_p7 }
  0x1d   : > { %p1293_p9 = pnand %p1292_p10, %p1286_p3 }
  0x1f   : > { %1296 = shalt.err (!%p1293_p9)
}
  0x20   : > { %s1297_s11 = scalar_lea.vmem %s1475_s27, 192  ;;  %s1380_s13 = smov [#allocation2]  }
  0x21   : > { %p1298_p0 = scmp.ne.s32.totalorder %s1475_s27, %s1297_s11  ;;  %s1302_s14 = sshll.u32 %s1380_s13, 4  ;;  %s1303_s14 = int_to_ptr.vmem [resolvable:$false] %s1302_s14 }
  0x22   : > { %s1304_s19 = scalar_lea.vmem %s1303_s14, 384  ;;  %p1305_p11 = scmp.lt.s32.totalorder %s1475_s27, %s1303_s14 }
  0x23   : > { %p1300_p2 = pnand %p1298_p0, %p1284_p1  ;;  %p1306_p4 = scmp.lt.s32.totalorder %s1304_s19, %s1297_s11 }
  0x25   : > { %p1301_p12 = pneg %p1300_p2  ;;  %p1307_p5 = por %p1306_p4, %p1305_p11 }
  0x27   : > { %p1308_p7 = pnand %p1307_p5, %p1301_p12 }
  0x29   : > { %1311 = shalt.err (!%p1308_p7)
}
  0x2a   : > { %s1381_s20 = smov 64   ;;  %s1382_s21 = smov 4  }
  0x2b   : > { %1174 = dma.hbm_to_vmem [thread:$0]  (!%p1471_p13), %s1469_s24, 192, %s1475_s27, %s1477_s28, %s1381_s20, %s1381_s20, %s1382_s21  }
  0x2c   : > { %p1013_p9 = scmp.ge.s32.totalorder %s1378_s9, 1  ;;  %p106_p1 = scmp.lt.s32.totalorder %s1378_s9, 3 }
  0x2e   : > { %p107_p3 = pnand %p1013_p9, %p106_p1 }
  0x2f   : > { %s1508_s22 = sand.u32 (!%p107_p3), 1, %s1370_s7  }
  0x30   : > { %110 = sbr.rel (%p107_p3) target bundleno = 2735 (0xaaf), region = 24  ;;  %s113_s26 = scalar_lea.sflag (!%p107_p3), [#allocation3], %s1508_s22 }
  0x31   : > { %s1165_s23 = smul.u32 (!%p107_p3), 12, %s1508_s22 }
  0x33   : > { %s116_s29 = scalar_lea.vmem (!%p107_p3), [#allocation2], %s1165_s23 }
  0x37   : > { %1357 = dma.done.wait (%p1449_p6), %s113_s26, 192  }
  0x38   : > { %1359 = vsyncadd (%p1449_p6), %s113_s26, 4294967104  ;;  %v1518_v0 = vld [vmem:[%s116_s29] sm:$0xff]   ;;  %v138_v1 = vld [vmem:[%s116_s29 + $0x8] sm:$0x1]  ;;  %s1383_s24 = smov 96   ;;  %vm159_vm0 = vcmask 64512  }
  0x39   : > { %v139_v2 = vunpack.c.l.bf16 %v1518_v0  ;;  %v140_v3 = vunpack.c.h.bf16 %v1518_v0  ;;  %155 = vrot.lane.b32.xlu0 %v1518_v0, %s1383_s24  ;;  %v1523_v4 = vcombine.low %v138_v1, %v138_v1  ;;  %v141_v11 = vunpack.c.l.bf16 %v138_v1  ;;  %s1384_s16 = smov 64   ;;  %s1385_s25 = smov 88  }
  0x3a   : > { %vm227_vm1 = vcmask 131072   ;;  %vm220_vm2 = vcmask 138240   ;;  %s1386_s27 = smov 120   ;;  %vm268_vm3 = vcmask 1040384   ;;  %v1387_v41 = vmov 0   ;;  %s1566_s28 = scalar_lea.vmem [#allocation5], %s1165_s23 }
  0x3b   : > { %v142_v5 = vmul.f32 0.35355338, %v139_v2  ;;  %v143_v6 = vmul.f32 0.35355338, %v140_v3  ;;  %v144_v13 = vmul.f32 0.35355338, %v141_v11 }
  0x3c   : > { %v1552_v42 = vsel %vm268_vm3, 65535, %v1387_v41  ;;  %vm338_vm4 = vcmask 57344   ;;  %vm339_vm5 = vsmask.f32 256  ;;  %v341_v60 = vld [vmem:[%s1566_s28 + $0x8] sm:$0x1] }
  0x3d   : > { %v1525_v7 = vpack.c.bf16 %v143_v6, %v142_v5  ;;  %157 = vrot.lane.b32.xlu0 %v1523_v4, %s1383_s24  ;;  %v1534_v14 = vpack.c.bf16 %v144_v13, %v144_v13  ;;  %vm340_vm6 = vmand %vm338_vm4, %vm339_vm5  ;;  %vm335_vm7 = vcmask 60416   ;;  %s1388_s30 = smov 56   ;;  %s1389_s2 = smov 80   ;;  %vm533_vm8 = vcmask 122944  }
  0x3e   : > { %s1390_s3 = smov 112   ;;  %s1391_s4 = smov 48   ;;  %vm534_vm9 = vmand %vm533_vm8, %vm339_vm5  ;;  %vm725_vm10 = vcmask 188544   ;;  %vm530_vm11 = vcmask 126016   ;;  %vm722_vm13 = vcmask 191616   ;;  %vm917_vm14 = vcmask 254144  }
  0x3f   : > { %1095 = vmatprep.mubr.msk.bf16.mxu0 %vm159_vm0, %v1525_v7  ;;  %s1392_s5 = smov 72   ;;  %s1393_s11 = smov 104   ;;  %vm726_vm12 = vmand %vm725_vm10, %vm339_vm5 }
  0x40   : > { %s1394_s13 = smov 40   ;;  %s1395_s14 = smov 8   ;;  %vm918_vm15 = vmand %vm917_vm14, %vm339_vm5 }
  0x41   : > { %s1396_s19 = smov 16   ;;  %s1397_s20 = smov 24  }
  0x42   : > { %s1166_s21 = smul.u32 192, %s1431_s10  ;;  %s936_s23 = sshll.u32 %s1566_s28, 4  ;;  %s1662_s23 = int_to_ptr.vmem [resolvable:$true] %s936_s23 }
  0x43   : > { %s923_s10 = scalar_lea.sflag [#allocation4], %s1508_s22  ;;  %p1716_p11 = scmp.ne.s32.totalorder %s1713_s17, 0 }
  0x44   : > { %s1660_s24 = scalar_lea.hbm %s1710_s1, %s1166_s21 }
  0xab   : > { %v156_v8 = vpop.permute.xlu0 %155 }
  0xac   : > { %1155 = vmatprep.subr.msk.bf16.mxu0 %vm159_vm0, %v156_v8  ;;  %v167_v9 = vsel %vm159_vm0, %v156_v8, 0 }
  0xad   : > { %1092 = vmatpush3.bf16.xpose.msra.mxu0 %v167_v9 }
  0xaf   : > { %v158_v10 = vpop.permute.xlu0 %157 }
  0xb0   : > { %1156 = vmatprep.subr.msk.bf16.mxu0 %vm159_vm0, %v158_v10  ;;  %v170_v12 = vsel %vm159_vm0, %v158_v10, 0 }
  0xb5   : > { %1094 = vmatpush3.bf16.xpose.msra.mxu0 %v170_v12 }
  0xbc   : > { %1096 = vmatmul.mubr.msk.bf16.vlgmr.msra.gmra.mrb[0].mxu0 %vm159_vm0, %v1534_v14 }
 0x18f   : > { %v1097_v15 = vpop.f32.mrb[0].mxu0 }
 0x190   : > { %v206_v16 = vpop.f32.mrb[1].mxu0  ;;  %v228_v17 = vsel %vm227_vm1, %v1097_v15, -inf }
 0x191   : > { %229 = vmax.xlane.f32.xlu0 %v228_v17  ;;  %v1098_v18 = vpop.f32.mrb[2].mxu0  ;;  %v221_v19 = vsel %vm220_vm2, %v206_v16, -inf }
 0x192   : > { %222 = vmax.xlane.f32.xlu1 %v221_v19  ;;  %v209_v20 = vpop.f32.mrb[3].mxu0 }
 0x193   : > { %v224_v21 = vsel %vm220_vm2, %v209_v20, -inf }
 0x196   : > { %225 = vmax.xlane.f32.xlu1 %v224_v21 }
 0x1a7   : > { %257 = vrot.lane.b32.xlu1 %v1518_v0, %s1384_s16  ;;  %350 = vrot.lane.b32.xlu0 %v1518_v0, %s1385_s25 }
 0x21e   : > { %v230_v22 = vpop.xlane.xlu0 %229 }
 0x21f   : > { %v233_v23 = vsub.f32 %v1097_v15, %v230_v22  ;;  %v223_v24 = vpop.xlane.xlu1 %222 }
 0x220   : > { %v231_v25 = vsub.f32 %v206_v16, %v223_v24 }
 0x221   : > { %v238_v26 = vmul.f32 1.442695, %v233_v23 }
 0x222   : > { %v234_v27 = vmul.f32 1.442695, %v231_v25  ;;  %v351_v45 = vpop.permute.xlu0 %350 }
 0x223   : > { %1234 = vpow2.f32 %v238_v26  ;;  %v226_v28 = vpop.xlane.xlu1 %225  ;;  %v361_v54 = vsel %vm159_vm0, %v351_v45, 0 }
 0x224   : > { %v232_v29 = vsub.f32 %v209_v20, %v226_v28  ;;  %1236 = vpow2.f32 %v234_v27 }
 0x226   : > { %v236_v30 = vmul.f32 1.442695, %v232_v29 }
 0x227   : > { %v258_v31 = vpop.permute.xlu1 %257 }
 0x228   : > { %1099 = vmatprep.subr.bf16.mxu1 %v258_v31  ;;  %1238 = vpow2.f32 %v236_v30 }
 0x229   : > { %1100 = vmatpush3.bf16.msra.mxu1 %v258_v31 }
 0x22d   : > { %v1235_v32 = vpop.eup %1234 }
 0x22e   : > { %v246_v33 = vsel %vm227_vm1, %v1235_v32, 0.0  ;;  %v1237_v34 = vpop.eup %1236 }
 0x22f   : > { %247 = vadd.xlane.f32.xlu1 %v246_v33  ;;  %v240_v35 = vsel %vm220_vm2, %v1237_v34, 0.0 }
 0x232   : > { %v1239_v36 = vpop.eup %1238 }
 0x233   : > { %241 = vadd.xlane.f32.xlu1 %v240_v35  ;;  %v243_v37 = vsel %vm220_vm2, %v1239_v36, 0.0 }
 0x237   : > { %244 = vadd.xlane.f32.xlu1 %v243_v37 }
 0x248   : > { %259 = vrot.lane.b32.xlu1 %v1523_v4, %s1384_s16 }
 0x24c   : > { %352 = vrot.lane.b32.xlu1 %v1523_v4, %s1385_s25  ;;  %s1312_s25 = scalar_lea.vmem %s1662_s23, 192 }
 0x24d   : > { %p1313_p6 = scmp.ne.s32.totalorder %s1662_s23, %s1312_s25 }
 0x24f   : > { %p1314_p12 = pnand %p1313_p6, %p1716_p11 }
 0x250   : > { %346 = vrot.lane.b32.xlu1 %v1525_v7, %s1386_s27 }
 0x251   : > { %p1315_p13 = pneg %p1314_p12 }
 0x254   : > { %348 = vrot.lane.b32.xlu1 %v1534_v14, %s1386_s27  ;;  %s1398_s27 = smov [#allocation5]  }
 0x2bc   : > { %v248_v38 = vpop.xlane.xlu1 %247 }
 0x2bd   : > { %1240 = vrcp.f32 %v248_v38 }
 0x2c0   : > { %v242_v39 = vpop.xlane.xlu1 %241 }
 0x2c1   : > { %1242 = vrcp.f32 %v242_v39 }
 0x2c4   : > { %v245_v40 = vpop.xlane.xlu1 %244 }
 0x2c5   : > { %1244 = vrcp.f32 %v245_v40 }
 0x2c7   : > { %v1241_v46 = vpop.eup %1240 }
 0x2c8   : > { %v260_v43 = vpop.permute.xlu1 %259  ;;  %v254_v50 = vmul.f32 %v1241_v46, %v1235_v32 }
 0x2c9   : > { %v272_v44 = vand.u32 %v1552_v42, %v260_v43 }
 0x2ca   : > { %v256_v55 = vpack.c.bf16 %v254_v50, %v254_v50 }
 0x2cb   : > { %1101 = vmatprep.subr.bf16.mxu1 %v272_v44  ;;  %v1243_v47 = vpop.eup %1242 }
 0x2cc   : > { %1102 = vmatpush3.bf16.msra.mxu1 %v272_v44  ;;  %v353_v48 = vpop.permute.xlu1 %352  ;;  %v252_v51 = vmul.f32 %v1243_v47, %v1237_v34 }
 0x2cd   : > { %1157 = vmatprep.subr.msk.bf16.mxu1 %vm159_vm0, %v351_v45  ;;  %v364_v57 = vsel %vm159_vm0, %v353_v48, 0 }
 0x2cf   : > { %v1245_v49 = vpop.eup %1244 }
 0x2d0   : > { %v253_v52 = vmul.f32 %v1245_v49, %v1239_v36  ;;  %v347_v56 = vpop.permute.xlu1 %346 }
 0x2d2   : > { %v255_v53 = vpack.c.bf16 %v253_v52, %v252_v51 }
 0x2d4   : > { %1103 = vmatprep.mubr.msk.bf16.mxu1 %vm220_vm2, %v255_v53  ;;  %v349_v58 = vpop.permute.xlu1 %348 }
 0x2d5   : > { %1104 = vmatmul.mubr.msk.bf16.vlgmr.msra.gmra.mrb[0].mxu1 %vm220_vm2, %v256_v55 }
 0x2d6   : > { %1108 = vmatpush3.bf16.xpose.msra.mxu1 %v361_v54  ;;  %1111 = vmatprep.mubr.msk.bf16.mxu1 %vm159_vm0, %v347_v56 }
 0x2d7   : > { %1158 = vmatprep.subr.msk.bf16.mxu1 %vm159_vm0, %v353_v48 }
 0x2de   : > { %1110 = vmatpush3.bf16.xpose.msra.mxu1 %v364_v57 }
 0x2e5   : > { %1112 = vmatmul.mubr.msk.bf16.vlgmr.msra.gmra.mrb[4].mxu1 %vm159_vm0, %v349_v58 }
 0x3a8   : > { %v1105_v59 = vpop.f32.mrb[0].mxu1 }
 0x3a9   : > { %v1049_v61 = vpack.c.bf16 %v1105_v59, %v1105_v59  ;;  %v308_v62 = vpop.f32.mrb[1].mxu1 }
 0x3aa   : > { %v1047_v63 = vpack.c.bf16 %v308_v62, %v308_v62  ;;  %v1106_v1 = vpop.f32.mrb[2].mxu1 }
 0x3ab   : > { %v342_v2 = vsel %vm340_vm6, %v1049_v61, %v341_v60  ;;  %v311_v3 = vpop.f32.mrb[3].mxu1 }
 0x3ac   : > { %343 = vst [vmem:[%s1566_s28 + $0x8] sm:$0x1] %v342_v2  ;;  %336 = vst.msk [vmem:[%s1566_s28] sm:$0xf] %vm335_vm7, %v1047_v63  ;;  %v1048_v5 = vpack.c.bf16 %v311_v3, %v311_v3 }
 0x3ae   : > { %337 = vst.msk [vmem:[%s1566_s28 + $0x4] sm:$0xf] %vm335_vm7, %v1048_v5 }
 0x3b8   : > { %v1113_v6 = vpop.f32.mrb[4].mxu1 }
 0x3b9   : > { %v400_v8 = vpop.f32.mrb[5].mxu1  ;;  %v420_v13 = vsel %vm227_vm1, %v1113_v6, -inf }
 0x3ba   : > { %v1114_v9 = vpop.f32.mrb[6].mxu1  ;;  %v414_v10 = vsel %vm220_vm2, %v400_v8, -inf }
 0x3bb   : > { %415 = vmax.xlane.f32.xlu1 %v414_v10  ;;  %v403_v11 = vpop.f32.mrb[7].mxu1 }
 0x3bc   : > { %v417_v12 = vsel %vm220_vm2, %v403_v11, -inf }
 0x3bd   : > { %418 = vmax.xlane.f32.xlu0 %v417_v12 }
 0x3bf   : > { %421 = vmax.xlane.f32.xlu1 %v420_v13 }
 0x3d0   : > { %449 = vrot.lane.b32.xlu1 %v1518_v0, %s1388_s30 }
 0x448   : > { %v416_v15 = vpop.xlane.xlu1 %415 }
 0x449   : > { %v423_v17 = vsub.f32 %v400_v8, %v416_v15 }
 0x44a   : > { %v419_v16 = vpop.xlane.xlu0 %418 }
 0x44b   : > { %v424_v18 = vsub.f32 %v403_v11, %v419_v16  ;;  %v426_v22 = vmul.f32 1.442695, %v423_v17 }
 0x44c   : > { %v422_v19 = vpop.xlane.xlu1 %421 }
 0x44d   : > { %v428_v20 = vmul.f32 1.442695, %v424_v18  ;;  %v425_v21 = vsub.f32 %v1113_v6, %v422_v19 }
 0x44f   : > { %1246 = vpow2.f32 %v428_v20  ;;  %v430_v23 = vmul.f32 1.442695, %v425_v21 }
 0x450   : > { %v450_v24 = vpop.permute.xlu1 %449 }
 0x451   : > { %1248 = vpow2.f32 %v430_v23  ;;  %1115 = vmatprep.subr.bf16.mxu0 %v450_v24 }
 0x452   : > { %1116 = vmatpush3.bf16.msra.mxu0 %v450_v24  ;;  %1250 = vpow2.f32 %v426_v22 }
 0x459   : > { %v1247_v25 = vpop.eup %1246 }
 0x45a   : > { %v435_v26 = vsel %vm220_vm2, %v1247_v25, 0.0 }
 0x45b   : > { %v1249_v27 = vpop.eup %1248  ;;  %436 = vadd.xlane.f32.xlu1 %v435_v26 }
 0x45c   : > { %v438_v28 = vsel %vm227_vm1, %v1249_v27, 0.0  ;;  %v1251_v29 = vpop.eup %1250 }
 0x45d   : > { %439 = vadd.xlane.f32.xlu0 %v438_v28  ;;  %v432_v30 = vsel %vm220_vm2, %v1251_v29, 0.0 }
 0x461   : > { %433 = vadd.xlane.f32.xlu0 %v432_v30 }
 0x46c   : > { %542 = vrot.lane.b32.xlu1 %v1518_v0, %s1389_s2 }
 0x470   : > { %544 = vrot.lane.b32.xlu1 %v1523_v4, %s1389_s2 }
 0x474   : > { %540 = vrot.lane.b32.xlu1 %v1534_v14, %s1390_s3 }
 0x477   : > { %451 = vrot.lane.b32.xlu0 %v1523_v4, %s1388_s30  ;;  %s1316_s30 = sshll.u32 %s1398_s27, 4  ;;  %s1317_s30 = int_to_ptr.vmem [resolvable:$false] %s1316_s30 }
 0x478   : > { %s1318_s2 = scalar_lea.vmem %s1317_s30, 384  ;;  %p1319_p8 = scmp.lt.s32.totalorder %s1662_s23, %s1317_s30 }
 0x479   : > { %p1320_p10 = scmp.lt.s32.totalorder %s1318_s2, %s1312_s25 }
 0x47b   : > { %538 = vrot.lane.b32.xlu0 %v1525_v7, %s1390_s3  ;;  %p1321_p0 = por %p1320_p10, %p1319_p8 }
 0x47d   : > { %p1322_p2 = pnand %p1321_p0, %p1315_p13 }
 0x4e8   : > { %v437_v31 = vpop.xlane.xlu1 %436 }
 0x4ea   : > { %v440_v32 = vpop.xlane.xlu0 %439 }
 0x4eb   : > { %1252 = vrcp.f32 %v440_v32 }
 0x4ec   : > { %1254 = vrcp.f32 %v437_v31  ;;  %v543_v36 = vpop.permute.xlu1 %542 }
 0x4ed   : > { %v553_v45 = vsel %vm159_vm0, %v543_v36, 0 }
 0x4ee   : > { %v434_v33 = vpop.xlane.xlu0 %433 }
 0x4ef   : > { %1256 = vrcp.f32 %v434_v33 }
 0x4f0   : > { %v545_v48 = vpop.permute.xlu1 %544 }
 0x4f1   : > { %v556_v49 = vsel %vm159_vm0, %v545_v48, 0 }
 0x4f2   : > { %v452_v34 = vpop.permute.xlu0 %451 }
 0x4f3   : > { %v461_v35 = vand.u32 %v452_v34, %v1552_v42 }
 0x4f4   : > { %v541_v50 = vpop.permute.xlu1 %540 }
 0x4f5   : > { %1117 = vmatprep.subr.bf16.mxu0 %v461_v35  ;;  %v1253_v37 = vpop.eup %1252 }
 0x4f6   : > { %1118 = vmatpush3.bf16.msra.mxu0 %v461_v35  ;;  %v1255_v38 = vpop.eup %1254  ;;  %v446_v40 = vmul.f32 %v1253_v37, %v1249_v27  ;;  %v539_v47 = vpop.permute.xlu0 %538 }
 0x4f7   : > { %1159 = vmatprep.subr.msk.bf16.mxu0 %vm159_vm0, %v543_v36  ;;  %v445_v43 = vmul.f32 %v1255_v38, %v1247_v25 }
 0x4f8   : > { %v448_v46 = vpack.c.bf16 %v446_v40, %v446_v40 }
 0x4f9   : > { %v1257_v39 = vpop.eup %1256 }
 0x4fa   : > { %v444_v41 = vmul.f32 %v1257_v39, %v1251_v29 }
 0x4fc   : > { %v447_v44 = vpack.c.bf16 %v445_v43, %v444_v41 }
 0x4fe   : > { %1119 = vmatprep.mubr.msk.bf16.mxu0 %vm220_vm2, %v447_v44 }
 0x4ff   : > { %1120 = vmatmul.mubr.msk.bf16.vlgmr.msra.gmra.mrb[4].mxu0 %vm220_vm2, %v448_v46 }
 0x500   : > { %1124 = vmatpush3.bf16.xpose.msra.mxu0 %v553_v45  ;;  %1127 = vmatprep.mubr.msk.bf16.mxu0 %vm159_vm0, %v539_v47 }
 0x501   : > { %1160 = vmatprep.subr.msk.bf16.mxu0 %vm159_vm0, %v545_v48 }
 0x508   : > { %1126 = vmatpush3.bf16.xpose.msra.mxu0 %v556_v49 }
 0x50f   : > { %1128 = vmatmul.mubr.msk.bf16.vlgmr.msra.gmra.mrb[8].mxu0 %vm159_vm0, %v541_v50 }
 0x5d2   : > { %v1595_v51 = vpop.f32.mrb[4].mxu0 }
 0x5d3   : > { %v1597_v52 = vpop.f32.mrb[5].mxu0 }
 0x5d4   : > { %v1122_v53 = vpop.f32.mrb[6].mxu0 }
 0x5d5   : > { %v1599_v54 = vpop.f32.mrb[7].mxu0 }
 0x5e2   : > { %v1129_v55 = vpop.f32.mrb[8].mxu0 }
 0x5e3   : > { %v592_v56 = vpop.f32.mrb[9].mxu0  ;;  %v612_v61 = vsel %vm227_vm1, %v1129_v55, -inf }
 0x5e4   : > { %v1130_v57 = vpop.f32.mrb[10].mxu0  ;;  %v606_v58 = vsel %vm220_vm2, %v592_v56, -inf }
 0x5e5   : > { %607 = vmax.xlane.f32.xlu0 %v606_v58  ;;  %v595_v59 = vpop.f32.mrb[11].mxu0 }
 0x5e6   : > { %v609_v60 = vsel %vm220_vm2, %v595_v59, -inf }
 0x5e7   : > { %610 = vmax.xlane.f32.xlu1 %v609_v60 }
 0x5e9   : > { %613 = vmax.xlane.f32.xlu0 %v612_v61 }
 0x5f8   : > { %641 = vrot.lane.b32.xlu1 %v1518_v0, %s1391_s4 }
 0x672   : > { %v608_v62 = vpop.xlane.xlu0 %607 }
 0x673   : > { %v615_v1 = vsub.f32 %v592_v56, %v608_v62 }
 0x674   : > { %v611_v63 = vpop.xlane.xlu1 %610 }
 0x675   : > { %v616_v2 = vsub.f32 %v595_v59, %v611_v63  ;;  %v618_v9 = vmul.f32 1.442695, %v615_v1 }
 0x676   : > { %v614_v3 = vpop.xlane.xlu0 %613 }
 0x677   : > { %v620_v5 = vmul.f32 1.442695, %v616_v2  ;;  %v617_v6 = vsub.f32 %v1129_v55, %v614_v3  ;;  %v1052_v2 = vpack.c.bf16 %v1595_v51, %v1595_v51 }
 0x678   : > { %v642_v8 = vpop.permute.xlu1 %641 }
 0x679   : > { %1258 = vpow2.f32 %v620_v5  ;;  %v622_v10 = vmul.f32 1.442695, %v617_v6  ;;  %1131 = vmatprep.subr.bf16.mxu1 %v642_v8  ;;  %v1051_v5 = vpack.c.bf16 %v1599_v54, %v1599_v54  ;;  %v1050_v6 = vpack.c.bf16 %v1597_v52, %v1597_v52 }
 0x67a   : > { %1132 = vmatpush3.bf16.msra.mxu1 %v642_v8 }
 0x67b   : > { %1260 = vpow2.f32 %v622_v10 }
 0x67c   : > { %1262 = vpow2.f32 %v618_v9 }
 0x683   : > { %v1259_v11 = vpop.eup %1258 }
 0x684   : > { %v627_v12 = vsel %vm220_vm2, %v1259_v11, 0.0 }
 0x685   : > { %v1261_v13 = vpop.eup %1260  ;;  %628 = vadd.xlane.f32.xlu1 %v627_v12 }
 0x686   : > { %v630_v15 = vsel %vm227_vm1, %v1261_v13, 0.0  ;;  %v1263_v16 = vpop.eup %1262 }
 0x687   : > { %631 = vadd.xlane.f32.xlu0 %v630_v15  ;;  %v624_v17 = vsel %vm220_vm2, %v1263_v16, 0.0 }
 0x68b   : > { %625 = vadd.xlane.f32.xlu0 %v624_v17 }
 0x696   : > { %734 = vrot.lane.b32.xlu1 %v1518_v0, %s1392_s5 }
 0x69a   : > { %736 = vrot.lane.b32.xlu1 %v1523_v4, %s1392_s5 }
 0x69e   : > { %732 = vrot.lane.b32.xlu1 %v1534_v14, %s1393_s11 }
 0x6a1   : > { %643 = vrot.lane.b32.xlu0 %v1523_v4, %s1391_s4 }
 0x6a5   : > { %730 = vrot.lane.b32.xlu0 %v1525_v7, %s1393_s11 }
 0x712   : > { %v629_v18 = vpop.xlane.xlu1 %628 }
 0x714   : > { %v632_v19 = vpop.xlane.xlu0 %631 }
 0x715   : > { %1264 = vrcp.f32 %v632_v19 }
 0x716   : > { %1266 = vrcp.f32 %v629_v18  ;;  %v735_v23 = vpop.permute.xlu1 %734 }
 0x717   : > { %v745_v29 = vsel %vm159_vm0, %v735_v23, 0 }
 0x718   : > { %v626_v20 = vpop.xlane.xlu0 %625 }
 0x719   : > { %1268 = vrcp.f32 %v626_v20 }
 0x71a   : > { %v737_v32 = vpop.permute.xlu1 %736 }
 0x71b   : > { %v748_v33 = vsel %vm159_vm0, %v737_v32, 0 }
 0x71c   : > { %v644_v21 = vpop.permute.xlu0 %643 }
 0x71d   : > { %v653_v22 = vand.u32 %v644_v21, %v1552_v42 }
 0x71e   : > { %v733_v34 = vpop.permute.xlu1 %732 }
 0x71f   : > { %1133 = vmatprep.subr.bf16.mxu1 %v653_v22  ;;  %v1265_v24 = vpop.eup %1264 }
 0x720   : > { %1134 = vmatpush3.bf16.msra.mxu1 %v653_v22  ;;  %v1267_v25 = vpop.eup %1266  ;;  %v638_v26 = vmul.f32 %v1265_v24, %v1261_v13  ;;  %v731_v31 = vpop.permute.xlu0 %730 }
 0x721   : > { %1161 = vmatprep.subr.msk.bf16.mxu1 %vm159_vm0, %v735_v23  ;;  %v637_v7 = vmul.f32 %v1267_v25, %v1259_v11 }
 0x722   : > { %v640_v30 = vpack.c.bf16 %v638_v26, %v638_v26 }
 0x723   : > { %v1269_v14 = vpop.eup %1268 }
 0x724   : > { %v636_v27 = vmul.f32 %v1269_v14, %v1263_v16 }
 0x726   : > { %v639_v28 = vpack.c.bf16 %v637_v7, %v636_v27 }
 0x728   : > { %1135 = vmatprep.mubr.msk.bf16.mxu1 %vm220_vm2, %v639_v28 }
 0x729   : > { %1136 = vmatmul.mubr.msk.bf16.vlgmr.msra.gmra.mrb[8].mxu1 %vm220_vm2, %v640_v30 }
 0x72a   : > { %1140 = vmatpush3.bf16.xpose.msra.mxu1 %v745_v29  ;;  %1143 = vmatprep.mubr.msk.bf16.mxu1 %vm159_vm0, %v731_v31 }
 0x72b   : > { %1162 = vmatprep.subr.msk.bf16.mxu1 %vm159_vm0, %v737_v32 }
 0x732   : > { %1142 = vmatpush3.bf16.xpose.msra.mxu1 %v748_v33 }
 0x739   : > { %1144 = vmatmul.mubr.msk.bf16.vlgmr.msra.gmra.mrb[12].mxu1 %vm159_vm0, %v733_v34  ;;  %vm914_vm0 = vcmask 257216  }
 0x7fc   : > { %v1137_v35 = vpop.f32.mrb[8].mxu1 }
 0x7fd   : > { %v689_v36 = vpop.f32.mrb[9].mxu1  ;;  %v1055_v3 = vpack.c.bf16 %v1137_v35, %v1137_v35 }
 0x7fe   : > { %v1138_v37 = vpop.f32.mrb[10].mxu1 }
 0x7ff   : > { %v692_v38 = vpop.f32.mrb[11].mxu1 }
 0x800   : > { %v1054_v8 = vpack.c.bf16 %v692_v38, %v692_v38 }
 0x80c   : > { %v1145_v39 = vpop.f32.mrb[12].mxu1 }
 0x80d   : > { %v784_v40 = vpop.f32.mrb[13].mxu1  ;;  %v804_v46 = vsel %vm227_vm1, %v1145_v39, -inf }
 0x80e   : > { %v1146_v41 = vpop.f32.mrb[14].mxu1  ;;  %v798_v43 = vsel %vm220_vm2, %v784_v40, -inf }
 0x80f   : > { %799 = vmax.xlane.f32.xlu0 %v798_v43  ;;  %v787_v44 = vpop.f32.mrb[15].mxu1 }
 0x810   : > { %v801_v45 = vsel %vm220_vm2, %v787_v44, -inf }
 0x811   : > { %802 = vmax.xlane.f32.xlu1 %v801_v45 }
 0x813   : > { %805 = vmax.xlane.f32.xlu0 %v804_v46 }
 0x89c   : > { %v800_v47 = vpop.xlane.xlu0 %799 }
 0x89d   : > { %v807_v49 = vsub.f32 %v784_v40, %v800_v47 }
 0x89e   : > { %v803_v48 = vpop.xlane.xlu1 %802 }
 0x89f   : > { %v808_v50 = vsub.f32 %v787_v44, %v803_v48  ;;  %v810_v57 = vmul.f32 1.442695, %v807_v49 }
 0x8a0   : > { %v806_v53 = vpop.xlane.xlu0 %805 }
 0x8a1   : > { %v812_v55 = vmul.f32 1.442695, %v808_v50  ;;  %v809_v56 = vsub.f32 %v1145_v39, %v806_v53 }
 0x8a3   : > { %1270 = vpow2.f32 %v812_v55  ;;  %v814_v58 = vmul.f32 1.442695, %v809_v56 }
 0x8a5   : > { %1272 = vpow2.f32 %v814_v58 }
 0x8a6   : > { %1274 = vpow2.f32 %v810_v57 }
 0x8ad   : > { %v1271_v59 = vpop.eup %1270 }
 0x8ae   : > { %v819_v60 = vsel %vm220_vm2, %v1271_v59, 0.0 }
 0x8af   : > { %v1273_v61 = vpop.eup %1272  ;;  %820 = vadd.xlane.f32.xlu1 %v819_v60 }
 0x8b0   : > { %v822_v62 = vsel %vm227_vm1, %v1273_v61, 0.0  ;;  %v1275_v63 = vpop.eup %1274 }
 0x8b1   : > { %823 = vadd.xlane.f32.xlu0 %v822_v62  ;;  %v816_v1 = vsel %vm220_vm2, %v1275_v63, 0.0 }
 0x8b5   : > { %817 = vadd.xlane.f32.xlu0 %v816_v1 }
 0x8c0   : > { %833 = vrot.lane.b32.xlu1 %v1518_v0, %s1394_s13  ;;  %v1053_v0 = vpack.c.bf16 %v689_v36, %v689_v36 }
 0x8c4   : > { %525 = vrot.lane.b32.xlu1 %v1052_v2, %s1395_s14 }
 0x8c8   : > { %717 = vrot.lane.b32.xlu1 %v1055_v3, %s1396_s19 }
 0x8cb   : > { %835 = vrot.lane.b32.xlu0 %v1523_v4, %s1394_s13  ;;  %v535_v4 = vld [vmem:[%s1566_s28 + $0x8] sm:$0x1] }
 0x8cc   : > { %523 = vrot.lane.b32.xlu1 %v1051_v5, %s1395_s14 }
 0x8cf   : > { %521 = vrot.lane.b32.xlu0 %v1050_v6, %s1395_s14 }
 0x8d0   : > { %715 = vrot.lane.b32.xlu1 %v1054_v8, %s1396_s19 }
 0x8d3   : > { %713 = vrot.lane.b32.xlu0 %v1053_v0, %s1396_s19 }
 0x93c   : > { %v821_v51 = vpop.xlane.xlu1 %820 }
 0x93e   : > { %v824_v9 = vpop.xlane.xlu0 %823 }
 0x93f   : > { %1276 = vrcp.f32 %v824_v9 }
 0x940   : > { %v834_v10 = vpop.permute.xlu1 %833  ;;  %1278 = vrcp.f32 %v821_v51 }
 0x941   : > { %1147 = vmatprep.subr.bf16.mxu0 %v834_v10 }
 0x942   : > { %v818_v54 = vpop.xlane.xlu0 %817  ;;  %1148 = vmatpush3.bf16.msra.mxu0 %v834_v10 }
 0x943   : > { %1280 = vrcp.f32 %v818_v54 }
 0x944   : > { %v526_v52 = vpop.permute.xlu1 %525 }
 0x945   : > { %v536_v11 = vsel %vm534_vm9, %v526_v52, %v535_v4 }
 0x946   : > { %537 = vst [vmem:[%s1566_s28 + $0x8] sm:$0x1] %v536_v11  ;;  %v836_v12 = vpop.permute.xlu0 %835 }
 0x947   : > { %v845_v13 = vand.u32 %v836_v12, %v1552_v42 }
 0x948   : > { %v718_v15 = vpop.permute.xlu1 %717 }
 0x949   : > { %1149 = vmatprep.subr.bf16.mxu0 %v845_v13  ;;  %v1277_v16 = vpop.eup %1276 }
 0x94a   : > { %v522_v17 = vpop.permute.xlu0 %521  ;;  %1150 = vmatpush3.bf16.msra.mxu0 %v845_v13  ;;  %v1279_v18 = vpop.eup %1278  ;;  %v830_v21 = vmul.f32 %v1277_v16, %v1273_v61 }
 0x94b   : > { %531 = vst.msk [vmem:[%s1566_s28] sm:$0xf] %vm530_vm11, %v522_v17  ;;  %v829_v25 = vmul.f32 %v1279_v18, %v1271_v59 }
 0x94c   : > { %v524_v19 = vpop.permute.xlu1 %523  ;;  %v832_v27 = vpack.c.bf16 %v830_v21, %v830_v21 }
 0x94d   : > { %v1281_v20 = vpop.eup %1280  ;;  %v727_v42 = vld [vmem:[%s1566_s28 + $0x8] sm:$0x1]  ;;  %532 = vst.msk [vmem:[%s1566_s28 + $0x4] sm:$0xf] %vm530_vm11, %v524_v19 }
 0x94e   : > { %v728_v22 = vsel %vm726_vm12, %v718_v15, %v727_v42  ;;  %v714_v23 = vpop.permute.xlu0 %713  ;;  %v828_v24 = vmul.f32 %v1281_v20, %v1275_v63 }
 0x94f   : > { %729 = vst [vmem:[%s1566_s28 + $0x8] sm:$0x1] %v728_v22  ;;  %723 = vst.msk [vmem:[%s1566_s28] sm:$0xf] %vm722_vm13, %v714_v23 }
 0x950   : > { %v716_v14 = vpop.permute.xlu1 %715  ;;  %v831_v26 = vpack.c.bf16 %v829_v25, %v828_v24 }
 0x951   : > { %724 = vst.msk [vmem:[%s1566_s28 + $0x4] sm:$0xf] %vm722_vm13, %v716_v14 }
 0x952   : > { %1151 = vmatprep.mubr.msk.bf16.mxu0 %vm220_vm2, %v831_v26 }
 0x953   : > { %1152 = vmatmul.mubr.msk.bf16.vlgmr.msra.gmra.mrb[12].mxu0 %vm220_vm2, %v832_v27 }
 0x956   : > { %v919_v35 = vld [vmem:[%s1566_s28 + $0x8] sm:$0x1] }
 0xa26   : > { %v1153_v7 = vpop.f32.mrb[12].mxu0 }
 0xa27   : > { %v1058_v28 = vpack.c.bf16 %v1153_v7, %v1153_v7  ;;  %v881_v29 = vpop.f32.mrb[13].mxu0 }
 0xa28   : > { %v1056_v30 = vpack.c.bf16 %v881_v29, %v881_v29  ;;  %v1154_v31 = vpop.f32.mrb[14].mxu0 }
 0xa29   : > { %909 = vrot.lane.b32.xlu0 %v1058_v28, %s1397_s20  ;;  %v884_v32 = vpop.f32.mrb[15].mxu0 }
 0xa2a   : > { %v1057_v33 = vpack.c.bf16 %v884_v32, %v884_v32  ;;  %905 = vrot.lane.b32.xlu1 %v1056_v30, %s1397_s20 }
 0xa2d   : > { %907 = vrot.lane.b32.xlu0 %v1057_v33, %s1397_s20 }
 0xa9b   : > { %v910_v34 = vpop.permute.xlu0 %909 }
 0xa9c   : > { %v920_v36 = vsel %vm918_vm15, %v910_v34, %v919_v35  ;;  %v906_v37 = vpop.permute.xlu1 %905 }
 0xa9d   : > { %921 = vst [vmem:[%s1566_s28 + $0x8] sm:$0x1] %v920_v36  ;;  %915 = vst.msk [vmem:[%s1566_s28] sm:$0xf] %vm914_vm0, %v906_v37 }
 0xa9f   : > { %v908_v38 = vpop.permute.xlu0 %907 }
 0xaa0   : > { %916 = vst.msk [vmem:[%s1566_s28 + $0x4] sm:$0xf] %vm914_vm0, %v908_v38 }
 0xaa1   : > { %1325 = shalt.err (!%p1322_p2)
}
 0xaa2   : > { %s1326_s28 = scalar_lea.hbm %s1660_s24, 192  ;;  %s1330_s5 = scalar_lea.hbm %s1710_s1, 384 }
 0xaa3   : > { %p1327_p4 = scmp.ne.s32.totalorder %s1660_s24, %s1326_s28  ;;  %p1331_p9 = scmp.lt.u32.totalorder %s1660_s24, %s1710_s1 }
 0xaa4   : > { %p1332_p1 = scmp.lt.u32.totalorder %s1330_s5, %s1326_s28  ;;  %p1334_p6 = scmp.lt.u32.totalorder %s1326_s28, %s1660_s24 }
 0xaa5   : > { %p1328_p5 = pnand %p1327_p4, %p1716_p11 }
 0xaa6   : > { %p1333_p3 = por %p1332_p1, %p1331_p9 }
 0xaa7   : > { %p1329_p7 = pneg %p1328_p5 }
 0xaa8   : > { %p1335_p12 = por %p1334_p6, %p1333_p3 }
 0xaaa   : > { %p1336_p13 = pnand %p1335_p12, %p1329_p7 }
 0xaac   : > { %1339 = shalt.err (!%p1336_p13)
}
 0xaad   : > { %s1399_s14 = smov 4  }
 0xaae   : > { %1169 = dma.vmem_to_hbm [thread:$0]  (%p1716_p11), %s1662_s23, 192, %s1660_s24, %s923_s10, %s1384_s16, %s1384_s16, %s1399_s14  }
 0xaaf PF: > { %s951_s19 = sand.u32 1, %s1366_s6   ;;  %p1717_p8 = scmp.ne.s32.totalorder %s1714_s18, 0 }
 0xab0   : > { %p1718_p10 = scmp.ge.s32.totalorder %s1378_s9, 2  ;;  %s952_s20 = scalar_lea.sflag [#allocation4], %s951_s19 }
 0xab2   : > { %p1176_p0 = pnand %p1718_p10, %p1717_p8 }
 0xab4   : > { %1361 = dma.done.wait (!%p1176_p0), %s952_s20, 192  }
 0xab5   : > { %1363 = vsyncadd (!%p1176_p0), %s952_s20, 4294967104  ;;  %p14_p2 = scmp.ge.s32.totalorder %s1435_s12, 4   ;;  %s1719_s6 = smov %s1370_s7 }
 0xab6   : > { %s1720_s7 = smov %s1374_s8  ;;  %s1721_s8 = smov %s1447_s15 }
 0xab7   : > { %s1722_s9 = smov %s1435_s12  ;;  %16 = sbr.rel (!%p14_p2) target bundleno = 5 (0x5), region = 69 }
 0xabe   :  { %957 = vsyncpa [#allocation3], 1 }
 0xabf   :  { %959 = vsyncpa [#allocation3 + $0x1], 1 }
 0xac0   :  { %960 = vsyncpa [#allocation4], 1 }
 0xac1   :  { %962 = vsyncpa [#allocation4 + $0x1], 1 }

// kernel: forward.35
= control target key start
LH: loop header
LB: loop body
LE: loop exit
PB: predicated region body
PF: predicated region fallthrough
CT: control target
= control target key end

     0   :  { %9 = vsyncpa [#allocation4], 0  ;;  %s680_s0 = inlined_call_operand.hbm [shape: bf16[34,128], index: 0, kind: input, shape index: {}]   ;;  %s681_s1 = inlined_call_operand.hbm [shape: bf16[128,32], index: 1, kind: input, shape index: {}]   ;;  %s682_s2 = inlined_call_operand.hbm [shape: f32[1,32], index: 2, kind: input, shape index: {}]   ;;  %s683_s3 = inlined_call_operand.hbm [shape: bf16[34,32], index: 3, kind: input, shape index: {}]   ;;  %s684_s4 = inlined_call_operand.hbm [shape: bf16[34,32], index: 4, kind: output, shape index: {}]  }
   0x1   :  { %10 = vsyncpa [#allocation7], 0 }
   0x2   :  { %11 = vsyncpa [#allocation10], 0 }
   0x3   :  { %12 = vsyncpa [#allocation5], 0  ;;  %s547_s15 = smov [#allocation6]   ;;  %s548_s17 = smov [#allocation3]  }
   0x4   :  { %s30_s16 = sshll.u32 %s547_s15, 4  ;;  %s18_s18 = sshll.u32 %s548_s17, 4  ;;  %s31_s16 = int_to_ptr.vmem [resolvable:$true] %s30_s16  ;;  %s581_s18 = int_to_ptr.vmem [resolvable:$true] %s18_s18 }
   0x5   :  { %s429_s21 = scalar_lea.hbm %s681_s1, 1024 }
   0x6   :  { %p430_p0 = scmp.ne.s32.totalorder %s681_s1, %s429_s21  ;;  %p433_p1 = scmp.lt.u32.totalorder %s429_s21, %s681_s1 }
   0x8   :  { %p435_p2 = pnand %p433_p1, %p430_p0 }
   0xa   :  { %438 = shalt.err (!%p435_p2)
}
   0xb   :  { %s439_s26 = scalar_lea.vmem %s31_s16, 1024  ;;  %p444_p4 = scmp.lt.s32.totalorder %s31_s16, %s31_s16 }
   0xc   :  { %p440_p3 = scmp.ne.s32.totalorder %s31_s16, %s439_s26  ;;  %p445_p5 = scmp.lt.s32.totalorder %s439_s26, %s439_s26 }
   0xe   :  { %p446_p6 = por %p445_p5, %p444_p4 }
  0x10   :  { %p447_p7 = pnand %p446_p6, %p440_p3 }
  0x12   :  { %450 = shalt.err (!%p447_p7)
}
  0x13   :  { %s549_s27 = smov 64   ;;  %s550_s28 = smov 4  }
  0x14   :  { %36 = dma.hbm_to_vmem [thread:$0]  %s681_s1, 1024, %s31_s16, [#allocation7], %s549_s27, %s549_s27, %s550_s28  }
  0x15   :  { %s451_s7 = scalar_lea.hbm %s680_s0, 320 }
  0x16   :  { %p452_p8 = scmp.ne.s32.totalorder %s680_s0, %s451_s7  ;;  %p455_p9 = scmp.lt.u32.totalorder %s451_s7, %s680_s0 }
  0x18   :  { %p457_p10 = pnand %p455_p9, %p452_p8 }
  0x1a   :  { %460 = shalt.err (!%p457_p10)
}
  0x1b   :  { %s461_s12 = scalar_lea.vmem %s581_s18, 320  ;;  %p466_p12 = scmp.lt.s32.totalorder %s581_s18, %s581_s18 }
  0x1c   :  { %p462_p11 = scmp.ne.s32.totalorder %s581_s18, %s461_s12  ;;  %p467_p13 = scmp.lt.s32.totalorder %s461_s12, %s461_s12 }
  0x1e   :  { %p468_p0 = por %p467_p13, %p466_p12 }
  0x20   :  { %p469_p1 = pnand %p468_p0, %p462_p11 }
  0x22   :  { %472 = shalt.err (!%p469_p1)
}
  0x23   :  { %24 = dma.hbm_to_vmem [thread:$0]  %s680_s0, 320, %s581_s18, [#allocation4], %s549_s27, %s549_s27, %s550_s28  }
  0x24   :  { %s551_s14 = smov [#allocation8]   ;;  %s552_s16 = smov [#allocation9]  }
  0x25   :  { %s43_s15 = sshll.u32 %s551_s14, 4  ;;  %s52_s17 = sshll.u32 %s552_s16, 4  ;;  %s44_s15 = int_to_ptr.vmem [resolvable:$true] %s43_s15  ;;  %s618_s17 = int_to_ptr.vmem [resolvable:$true] %s52_s17 }
  0x26   :  { %s473_s21 = scalar_lea.hbm %s682_s2, 16 }
  0x27   :  { %p474_p2 = scmp.ne.s32.totalorder %s682_s2, %s473_s21  ;;  %p477_p3 = scmp.lt.u32.totalorder %s473_s21, %s682_s2 }
  0x29   :  { %p479_p4 = pnand %p477_p3, %p474_p2 }
  0x2b   :  { %482 = shalt.err (!%p479_p4)
}
  0x2c   :  { %s483_s0 = scalar_lea.vmem %s44_s15, 16  ;;  %s487_s18 = scalar_lea.vmem %s44_s15, 32 }
  0x2d   :  { %p484_p5 = scmp.ne.s32.totalorder %s44_s15, %s483_s0  ;;  %p488_p6 = scmp.lt.s32.totalorder %s44_s15, %s44_s15 }
  0x2e   :  { %p489_p7 = scmp.lt.s32.totalorder %s487_s18, %s483_s0 }
  0x30   :  { %p490_p8 = por %p489_p7, %p488_p6 }
  0x32   :  { %p491_p9 = pnand %p490_p8, %p484_p5 }
  0x34   :  { %494 = shalt.err (!%p491_p9)
}
  0x35   :  { %46 = dma.hbm_to_vmem [thread:$0]  %s682_s2, 16, %s44_s15, [#allocation7]  }
  0x36   :  { %s495_s6 = scalar_lea.hbm %s683_s3, 320 }
  0x37   :  { %p496_p10 = scmp.ne.s32.totalorder %s683_s3, %s495_s6  ;;  %p499_p11 = scmp.lt.u32.totalorder %s495_s6, %s683_s3 }
  0x39   :  { %p501_p12 = pnand %p499_p11, %p496_p10 }
  0x3b   :  { %504 = shalt.err (!%p501_p12)
}
  0x3c   :  { %s505_s11 = scalar_lea.vmem %s618_s17, 320  ;;  %p510_p0 = scmp.lt.s32.totalorder %s618_s17, %s618_s17 }
  0x3d   :  { %p506_p13 = scmp.ne.s32.totalorder %s618_s17, %s505_s11  ;;  %p511_p1 = scmp.lt.s32.totalorder %s505_s11, %s505_s11 }
  0x3f   :  { %p512_p2 = por %p511_p1, %p510_p0 }
  0x41   :  { %p513_p3 = pnand %p512_p2, %p506_p13 }
  0x43   :  { %516 = shalt.err (!%p513_p3)
}
  0x44   :  { %58 = dma.hbm_to_vmem [thread:$0]  %s683_s3, 320, %s618_s17, [#allocation10], %s549_s27, %s549_s27, %s550_s28  }
  0x45   :  { %539 = dma.done.wait [#allocation4], 320  }
  0x46   :  { %540 = vsyncadd [#allocation4], 4294966976 }
  0x47   :  { %541 = dma.done.wait [#allocation7], 1040  }
  0x48   :  { %542 = vsyncadd [#allocation7], 4294966256 }
  0x49   :  { %543 = dma.done.wait [#allocation10], 320  }
  0x4a   :  { %544 = vsyncadd [#allocation10], 4294966976  ;;  %vm76_vm0 = vcmask 261120   ;;  %v553_v0 = vmov 0.0   ;;  %vm554_vm1 = vmmov 0   ;;  %v418_v1 = vld [vmem:[#allocation6] sm:$0xff]  }
  0x4b   :  { %393 = vmatprep.subr.bf16.mxu1 %v553_v0  ;;  %365 = vmatprep.subr.bf16.mxu0 %v553_v0  ;;  %79 = vst.msk [vmem:[#allocation2 + $0x10] sm:$0xff] %vm76_vm0, %v553_v0  ;;  %77 = vst.msk [vmem:[#allocation2] sm:$0xff] %vm76_vm0, %v553_v0  ;;  %v419_v2 = vld [vmem:[#allocation6 + $0x8] sm:$0xff]   ;;  %v420_v3 = vld [vmem:[#allocation6 + $0x10] sm:$0xff]   ;;  %vm81_vm2 = vcmask 254976   ;;  %vm297_vm3 = vcmask 257024  }
  0x4c   :  { %78 = vst.msk [vmem:[#allocation2 + $0x8] sm:$0xff] %vm76_vm0, %v553_v0  ;;  %80 = vst.msk [vmem:[#allocation2 + $0x18] sm:$0xff] %vm76_vm0, %v553_v0  ;;  %385 = vmatprep.mubr.msk.bf16.mxu1 %vm554_vm1, %v553_v0  ;;  %381 = vmatprep.mubr.msk.bf16.mxu0 %vm554_vm1, %v553_v0  ;;  %v421_v4 = vld [vmem:[#allocation6 + $0x18] sm:$0xff]   ;;  %v422_v5 = vld [vmem:[#allocation6 + $0x20] sm:$0xff]   ;;  %s555_s3 = smov [#allocation11]   ;;  %vm302_vm4 = vcmask 253952  }
  0x4d   :  { %401 = vmatpush3.bf16.msra.mxu1 %v418_v1  ;;  %366 = vmatpush3.bf16.msra.mxu0 %v418_v1  ;;  %v423_v6 = vld [vmem:[#allocation6 + $0x28] sm:$0xff]   ;;  %v424_v7 = vld [vmem:[#allocation6 + $0x30] sm:$0xff]   ;;  %v425_v8 = vld [vmem:[#allocation6 + $0x38] sm:$0xff]   ;;  %82 = vst.msk [vmem:[#allocation2 + $0x20] sm:$0x3] %vm81_vm2, %v553_v0  ;;  %s309_s1 = sshll.u32 %s555_s3, 4  ;;  %s310_s1 = int_to_ptr.vmem [resolvable:$true] %s309_s1 }
  0x4e   :  { %394 = vmatprep.subr.bf16.mxu1 %v553_v0  ;;  %367 = vmatprep.subr.bf16.mxu0 %v553_v0  ;;  %v426_v9 = vld [vmem:[#allocation3 + $0x8] sm:$0xff]   ;;  %v427_v10 = vld [vmem:[#allocation3] sm:$0xff]   ;;  %v428_v11 = vld [vmem:[#allocation3 + $0x10] ss:$0 sps:$4 sm:$0x11]   ;;  %s517_s13 = scalar_lea.vmem %s310_s1, 320  ;;  %p522_p5 = scmp.lt.s32.totalorder %s310_s1, %s310_s1 }
  0x4f   :  { %v346_v29 = vld [vmem:[#allocation9] sm:$0xff]   ;;  %v353_v30 = vld [vmem:[#allocation9 + $0x8] sm:$0xff]   ;;  %v334_v32 = vld [vmem:[#allocation8] ss:$0 sm:$0xff]  ;;  %p518_p4 = scmp.ne.s32.totalorder %s310_s1, %s517_s13  ;;  %p523_p6 = scmp.lt.s32.totalorder %s517_s13, %s517_s13 }
  0x50   :  { %v347_v35 = vunpack.c.l.bf16 %v346_v29  ;;  %v351_v36 = vunpack.c.l.bf16 %v353_v30  ;;  %v348_v43 = vunpack.c.h.bf16 %v346_v29  ;;  %v352_v44 = vunpack.c.h.bf16 %v353_v30  ;;  %v265_v51 = vld [vmem:[#allocation9 + $0x10] sm:$0x1] }
  0x51   :  { %402 = vmatpush3.bf16.msra.mxu1 %v419_v2  ;;  %368 = vmatpush3.bf16.msra.mxu0 %v419_v2  ;;  %v270_v56 = vunpack.c.l.bf16 %v265_v51  ;;  %p524_p7 = por %p523_p6, %p522_p5 }
  0x52   :  { %395 = vmatprep.subr.bf16.mxu1 %v553_v0  ;;  %369 = vmatprep.subr.bf16.mxu0 %v553_v0  ;;  %v85_v12 = vld [vmem:[#allocation2 + $0x10] sm:$0xff]  ;;  %v83_v13 = vld [vmem:[#allocation2] sm:$0xff] }
  0x53   :  { %v86_v15 = vld [vmem:[#allocation2 + $0x18] sm:$0xff]  ;;  %v84_v17 = vld [vmem:[#allocation2 + $0x8] sm:$0xff]  ;;  %p525_p8 = pnand %p524_p7, %p518_p4 }
  0x54   :  { %v87_v28 = vld [vmem:[#allocation2 + $0x20] sm:$0x3] }
  0x55   :  { %403 = vmatpush3.bf16.msra.mxu1 %v420_v3  ;;  %370 = vmatpush3.bf16.msra.mxu0 %v420_v3 }
  0x56   :  { %396 = vmatprep.subr.bf16.mxu1 %v553_v0  ;;  %371 = vmatprep.subr.bf16.mxu0 %v553_v0 }
  0x59   :  { %404 = vmatpush3.bf16.msra.mxu1 %v421_v4  ;;  %372 = vmatpush3.bf16.msra.mxu0 %v421_v4 }
  0x5a   :  { %397 = vmatprep.subr.bf16.mxu1 %v553_v0  ;;  %373 = vmatprep.subr.bf16.mxu0 %v553_v0 }
  0x5d   :  { %405 = vmatpush3.bf16.msra.mxu1 %v422_v5  ;;  %374 = vmatpush3.bf16.msra.mxu0 %v422_v5 }
  0x5e   :  { %398 = vmatprep.subr.bf16.mxu1 %v553_v0  ;;  %375 = vmatprep.subr.bf16.mxu0 %v553_v0 }
  0x61   :  { %406 = vmatpush3.bf16.msra.mxu1 %v423_v6  ;;  %376 = vmatpush3.bf16.msra.mxu0 %v423_v6 }
  0x62   :  { %399 = vmatprep.subr.bf16.mxu1 %v553_v0  ;;  %377 = vmatprep.subr.bf16.mxu0 %v553_v0 }
  0x65   :  { %407 = vmatpush3.bf16.msra.mxu1 %v424_v7  ;;  %378 = vmatpush3.bf16.msra.mxu0 %v424_v7 }
  0x66   :  { %400 = vmatprep.subr.bf16.mxu1 %v553_v0  ;;  %379 = vmatprep.subr.bf16.mxu0 %v553_v0 }
  0x69   :  { %408 = vmatpush3.bf16.msra.mxu1 %v425_v8  ;;  %380 = vmatpush3.bf16.msra.mxu0 %v425_v8 }
  0x6c   :  { %386 = vmatmul.mubr.bf16.vlgmr.msra.gmra.mrb[0].mxu1 %v426_v9  ;;  %382 = vmatmul.mubr.bf16.vlgmr.msra.gmra.mrb[0].mxu0 %v427_v10 }
  0x6d   :  { %389 = vmatprep.mubr.msk.bf16.mxu1 %vm554_vm1, %v553_v0 }
  0x74   :  { %390 = vmatmul.mubr.bf16.gmra.mrb[4].mxu1 %v428_v11 }
 0x13f   :  { %v215_v14 = vpop.f32.mrb[0].mxu1  ;;  %v207_v16 = vpop.f32.mrb[0].mxu0 }
 0x140   :  { %v231_v18 = vadd.f32 %v215_v14, %v85_v12  ;;  %v387_v19 = vpop.f32.mrb[1].mxu1  ;;  %v229_v20 = vadd.f32 %v207_v16, %v83_v13  ;;  %v383_v21 = vpop.f32.mrb[1].mxu0 }
 0x141   :  { %v218_v22 = vpop.f32.mrb[2].mxu1  ;;  %v210_v23 = vpop.f32.mrb[2].mxu0 }
 0x142   :  { %237 = vst.msk [vmem:[#allocation2 + $0x10] sm:$0xff] %vm76_vm0, %v231_v18  ;;  %v232_v24 = vadd.f32 %v218_v22, %v86_v15  ;;  %235 = vst.msk [vmem:[#allocation2] sm:$0xff] %vm76_vm0, %v229_v20  ;;  %v388_v25 = vpop.f32.mrb[3].mxu1  ;;  %v230_v26 = vadd.f32 %v210_v23, %v84_v17  ;;  %v384_v27 = vpop.f32.mrb[3].mxu0 }
 0x144   :  { %238 = vst.msk [vmem:[#allocation2 + $0x18] sm:$0xff] %vm76_vm0, %v232_v24  ;;  %236 = vst.msk [vmem:[#allocation2 + $0x8] sm:$0xff] %vm76_vm0, %v230_v26 }
 0x147   :  { %v223_v31 = vpop.f32.mrb[4].mxu1 }
 0x148   :  { %v233_v33 = vadd.f32 %v223_v31, %v87_v28  ;;  %v391_v34 = vpop.f32.mrb[5].mxu1 }
 0x149   :  { %v226_v37 = vpop.f32.mrb[6].mxu1  ;;  %v244_v38 = vld [vmem:[#allocation2] sm:$0xff]  ;;  %v246_v39 = vld [vmem:[#allocation2 + $0x10] sm:$0xff] }
 0x14a   :  { %240 = vst.msk [vmem:[#allocation2 + $0x20] sm:$0x3] %vm81_vm2, %v233_v33  ;;  %v392_v40 = vpop.f32.mrb[7].mxu1  ;;  %v256_v41 = vadd.f32 %v334_v32, %v244_v38  ;;  %v258_v42 = vadd.f32 %v334_v32, %v246_v39 }
 0x14b   :  { %v245_v45 = vld [vmem:[#allocation2 + $0x8] sm:$0xff]  ;;  %v247_v46 = vld [vmem:[#allocation2 + $0x18] sm:$0xff] }
 0x14c   :  { %v257_v47 = vadd.f32 %v334_v32, %v245_v45  ;;  %v259_v48 = vadd.f32 %v334_v32, %v247_v46  ;;  %v271_v49 = vadd.f32 %v347_v35, %v256_v41  ;;  %v273_v50 = vadd.f32 %v351_v36, %v258_v42 }
 0x14e   :  { %v272_v52 = vadd.f32 %v348_v43, %v257_v47  ;;  %v274_v53 = vadd.f32 %v352_v44, %v259_v48  ;;  %v340_v54 = vpack.c.bf16 %v271_v49, %v271_v49  ;;  %v342_v55 = vpack.c.bf16 %v273_v50, %v273_v50 }
 0x150   :  { %v341_v57 = vpack.c.bf16 %v272_v52, %v272_v52  ;;  %v343_v58 = vpack.c.bf16 %v274_v53, %v274_v53  ;;  %298 = vst.msk [vmem:[#allocation11] sm:$0xf] %vm297_vm3, %v340_v54  ;;  %300 = vst.msk [vmem:[#allocation11 + $0x8] sm:$0xf] %vm297_vm3, %v342_v55 }
 0x151   :  { %v248_v59 = vld [vmem:[#allocation2 + $0x20] sm:$0x3] }
 0x152   :  { %v260_v60 = vadd.f32 %v334_v32, %v248_v59  ;;  %299 = vst.msk [vmem:[#allocation11 + $0x4] sm:$0xf] %vm297_vm3, %v341_v57  ;;  %301 = vst.msk [vmem:[#allocation11 + $0xc] sm:$0xf] %vm297_vm3, %v343_v58 }
 0x154   :  { %v275_v61 = vadd.f32 %v270_v56, %v260_v60 }
 0x156   :  { %v344_v62 = vpack.c.bf16 %v275_v61, %v275_v61 }
 0x158   :  { %303 = vst.msk [vmem:[#allocation11 + $0x10] sm:$0x1] %vm302_vm4, %v344_v62 }
 0x159   :  { %528 = shalt.err (!%p525_p8)
}
 0x15a   :  { %s529_s16 = scalar_lea.hbm %s684_s4, 320 }
 0x15b   :  { %p530_p9 = scmp.ne.s32.totalorder %s684_s4, %s529_s16  ;;  %p533_p10 = scmp.lt.u32.totalorder %s529_s16, %s684_s4 }
 0x15d   :  { %p535_p11 = pnand %p533_p10, %p530_p9 }
 0x15f   :  { %538 = shalt.err (!%p535_p11)
}
 0x160   :  { %315 = dma.vmem_to_hbm [thread:$0]  %s310_s1, 320, %s684_s4, [#allocation5], %s549_s27, %s549_s27, %s550_s28  }
 0x161   :  { %545 = dma.done.wait [#allocation5], 320  }
 0x162   :  { %546 = vsyncadd [#allocation5], 4294966976 }
 0x163   :  { %319 = vsyncpa [#allocation4], 1 }
 0x164   :  { %320 = vsyncpa [#allocation7], 1 }
 0x165   :  { %321 = vsyncpa [#allocation10], 1 }
 0x166   :  { %322 = vsyncpa [#allocation5], 1 }

// kernel: forward.34
= control target key start
LH: loop header
LB: loop body
LE: loop exit
PB: predicated region body
PF: predicated region fallthrough
CT: control target
= control target key end

     0   :  { %10 = vsyncpa [#allocation4], 0  ;;  %s964_s0 = inlined_call_operand.hbm [shape: bf16[34,32], index: 0, kind: input, shape index: {}]   ;;  %s965_s1 = inlined_call_operand.hbm [shape: f32[1,32], index: 1, kind: input, shape index: {}]   ;;  %s966_s2 = inlined_call_operand.hbm [shape: f32[1,32], index: 2, kind: input, shape index: {}]   ;;  %s967_s3 = inlined_call_operand.hbm [shape: bf16[32,128], index: 3, kind: input, shape index: {}]   ;;  %s968_s4 = inlined_call_operand.hbm [shape: f32[1,128], index: 4, kind: input, shape index: {}]   ;;  %s969_s5 = inlined_call_operand.hbm [shape: bf16[34,128], index: 5, kind: output, shape index: {}]  }
   0x1   :  { %11 = vsyncpa [#allocation7], 0 }
   0x2   :  { %12 = vsyncpa [#allocation10], 0 }
   0x3   :  { %13 = vsyncpa [#allocation5], 0  ;;  %s761_s18 = smov [#allocation6]   ;;  %s621_s22 = scalar_lea.hbm %s965_s1, 16 }
   0x4   :  { %s32_s19 = sshll.u32 %s761_s18, 4  ;;  %p622_p0 = scmp.ne.s32.totalorder %s965_s1, %s621_s22  ;;  %s33_s19 = int_to_ptr.vmem [resolvable:$true] %s32_s19 }
   0x5   :  { %p625_p1 = scmp.lt.u32.totalorder %s621_s22, %s965_s1 }
   0x7   :  { %p627_p2 = pnand %p625_p1, %p622_p0 }
   0x9   :  { %630 = shalt.err (!%p627_p2)
}
   0xa   :  { %s631_s27 = scalar_lea.vmem %s33_s19, 16  ;;  %s635_s28 = scalar_lea.vmem %s33_s19, 32 }
   0xb   :  { %p632_p3 = scmp.ne.s32.totalorder %s33_s19, %s631_s27  ;;  %p636_p4 = scmp.lt.s32.totalorder %s33_s19, %s33_s19 }
   0xc   :  { %p637_p5 = scmp.lt.s32.totalorder %s635_s28, %s631_s27 }
   0xe   :  { %p638_p6 = por %p637_p5, %p636_p4 }
  0x10   :  { %p639_p7 = pnand %p638_p6, %p632_p3 }
  0x12   :  { %642 = shalt.err (!%p639_p7)
}
  0x13   :  { %35 = dma.hbm_to_vmem [thread:$0]  %s965_s1, 16, %s33_s19, [#allocation7]  }
  0x14   :  { %s762_s6 = smov [#allocation9]   ;;  %s763_s8 = smov [#allocation3]  }
  0x15   :  { %s51_s7 = sshll.u32 %s762_s6, 4  ;;  %s19_s9 = sshll.u32 %s763_s8, 4  ;;  %s52_s7 = int_to_ptr.vmem [resolvable:$true] %s51_s7  ;;  %s20_s9 = int_to_ptr.vmem [resolvable:$true] %s19_s9 }
  0x16   :  { %s643_s12 = scalar_lea.hbm %s967_s3, 256 }
  0x17   :  { %p644_p8 = scmp.ne.s32.totalorder %s967_s3, %s643_s12  ;;  %p647_p9 = scmp.lt.u32.totalorder %s643_s12, %s967_s3 }
  0x19   :  { %p649_p10 = pnand %p647_p9, %p644_p8 }
  0x1b   :  { %652 = shalt.err (!%p649_p10)
}
  0x1c   :  { %s653_s1 = scalar_lea.vmem %s52_s7, 256  ;;  %p658_p12 = scmp.lt.s32.totalorder %s52_s7, %s52_s7 }
  0x1d   :  { %p654_p11 = scmp.ne.s32.totalorder %s52_s7, %s653_s1  ;;  %p659_p13 = scmp.lt.s32.totalorder %s653_s1, %s653_s1 }
  0x1f   :  { %p660_p0 = por %p659_p13, %p658_p12 }
  0x21   :  { %p661_p1 = pnand %p660_p0, %p654_p11 }
  0x23   :  { %664 = shalt.err (!%p661_p1)
}
  0x24   :  { %s764_s17 = smov 64   ;;  %s765_s18 = smov 4  }
  0x25   :  { %57 = dma.hbm_to_vmem [thread:$0]  %s967_s3, 256, %s52_s7, [#allocation10], %s764_s17, %s764_s17, %s765_s18  }
  0x26   :  { %s665_s23 = scalar_lea.hbm %s964_s0, 320 }
  0x27   :  { %p666_p2 = scmp.ne.s32.totalorder %s964_s0, %s665_s23  ;;  %p669_p3 = scmp.lt.u32.totalorder %s665_s23, %s964_s0 }
  0x29   :  { %p671_p4 = pnand %p669_p3, %p666_p2 }
  0x2b   :  { %674 = shalt.err (!%p671_p4)
}
  0x2c   :  { %s675_s28 = scalar_lea.vmem %s20_s9, 320  ;;  %p680_p6 = scmp.lt.s32.totalorder %s20_s9, %s20_s9 }
  0x2d   :  { %p676_p5 = scmp.ne.s32.totalorder %s20_s9, %s675_s28  ;;  %p681_p7 = scmp.lt.s32.totalorder %s675_s28, %s675_s28 }
  0x2f   :  { %p682_p8 = por %p681_p7, %p680_p6 }
  0x31   :  { %p683_p9 = pnand %p682_p8, %p676_p5 }
  0x33   :  { %686 = shalt.err (!%p683_p9)
}
  0x34   :  { %25 = dma.hbm_to_vmem [thread:$0]  %s964_s0, 320, %s20_s9, [#allocation4], %s764_s17, %s764_s17, %s765_s18  }
  0x35   :  { %s766_s30 = smov [#allocation8]   ;;  %s767_s7 = smov [#allocation11]  }
  0x36   :  { %s42_s6 = sshll.u32 %s766_s30, 4  ;;  %s64_s8 = sshll.u32 %s767_s7, 4  ;;  %s43_s6 = int_to_ptr.vmem [resolvable:$true] %s42_s6  ;;  %s65_s8 = int_to_ptr.vmem [resolvable:$true] %s64_s8 }
  0x37   :  { %s687_s12 = scalar_lea.hbm %s966_s2, 16 }
  0x38   :  { %p688_p10 = scmp.ne.s32.totalorder %s966_s2, %s687_s12  ;;  %p691_p11 = scmp.lt.u32.totalorder %s687_s12, %s966_s2 }
  0x3a   :  { %p693_p12 = pnand %p691_p11, %p688_p10 }
  0x3c   :  { %696 = shalt.err (!%p693_p12)
}
  0x3d   :  { %s697_s0 = scalar_lea.vmem %s43_s6, 16  ;;  %s701_s9 = scalar_lea.vmem %s43_s6, 32 }
  0x3e   :  { %p698_p13 = scmp.ne.s32.totalorder %s43_s6, %s697_s0  ;;  %p702_p0 = scmp.lt.s32.totalorder %s43_s6, %s43_s6 }
  0x3f   :  { %p703_p1 = scmp.lt.s32.totalorder %s701_s9, %s697_s0 }
  0x41   :  { %p704_p2 = por %p703_p1, %p702_p0 }
  0x43   :  { %p705_p3 = pnand %p704_p2, %p698_p13 }
  0x45   :  { %708 = shalt.err (!%p705_p3)
}
  0x46   :  { %45 = dma.hbm_to_vmem [thread:$0]  %s966_s2, 16, %s43_s6, [#allocation7]  }
  0x47   :  { %s709_s22 = scalar_lea.hbm %s968_s4, 16 }
  0x48   :  { %p710_p4 = scmp.ne.s32.totalorder %s968_s4, %s709_s22  ;;  %p713_p5 = scmp.lt.u32.totalorder %s709_s22, %s968_s4 }
  0x4a   :  { %p715_p6 = pnand %p713_p5, %p710_p4 }
  0x4c   :  { %718 = shalt.err (!%p715_p6)
}
  0x4d   :  { %s719_s27 = scalar_lea.vmem %s65_s8, 16  ;;  %s723_s28 = scalar_lea.vmem %s65_s8, 32 }
  0x4e   :  { %p720_p7 = scmp.ne.s32.totalorder %s65_s8, %s719_s27  ;;  %p724_p8 = scmp.lt.s32.totalorder %s65_s8, %s65_s8 }
  0x4f   :  { %p725_p9 = scmp.lt.s32.totalorder %s723_s28, %s719_s27 }
  0x51   :  { %p726_p10 = por %p725_p9, %p724_p8 }
  0x53   :  { %p727_p11 = pnand %p726_p10, %p720_p7 }
  0x55   :  { %730 = shalt.err (!%p727_p11)
}
  0x56   :  { %67 = dma.hbm_to_vmem [thread:$0]  %s968_s4, 16, %s65_s8, [#allocation10]  }
  0x57   :  { %753 = dma.done.wait [#allocation4], 320  }
  0x58   :  { %754 = vsyncadd [#allocation4], 4294966976 }
  0x59   :  { %755 = dma.done.wait [#allocation7], 32  }
  0x5a   :  { %756 = vsyncadd [#allocation7], 4294967264 }
  0x5b   :  { %757 = dma.done.wait [#allocation10], 272  }
  0x5c   :  { %758 = vsyncadd [#allocation10], 4294967024  ;;  %v549_v0 = vld [vmem:[#allocation3 + $0x8] sm:$0xff]   ;;  %vm98_vm0 = vcmask 261120   ;;  %v532_v1 = vld [vmem:[#allocation3] sm:$0xff]   ;;  %vm111_vm1 = vcmask 254976  }
  0x5d   :  { %v537_v2 = vunpack.c.l.bf16 %v549_v0  ;;  %v538_v3 = vunpack.c.h.bf16 %v549_v0  ;;  %v533_v4 = vunpack.c.l.bf16 %v532_v1  ;;  %v92_v5 = vld [vmem:[#allocation3 + $0x10] sm:$0x1]  ;;  %v534_v6 = vunpack.c.h.bf16 %v532_v1  ;;  %v586_v38 = vld [vmem:[#allocation9] sm:$0xff]   ;;  %v587_v40 = vld [vmem:[#allocation9 + $0x8] sm:$0xff]   ;;  %s770_s4 = smov [#allocation12]  }
  0x5e   :  { %v97_v10 = vunpack.c.l.bf16 %v92_v5  ;;  %v768_v39 = vmov 0.0   ;;  %vm769_vm2 = vmmov 0   ;;  %v500_v57 = vld [vmem:[#allocation6] ss:$0 sm:$0xff]  ;;  %v501_v59 = vld [vmem:[#allocation8] ss:$0 sm:$0xff] }
  0x5f   :  { %v105_v7 = vsel %vm98_vm0, %v537_v2, 0.0  ;;  %v99_v8 = vsel %vm98_vm0, %v533_v4, 0.0  ;;  %v108_v9 = vsel %vm98_vm0, %v538_v3, 0.0  ;;  %v102_v11 = vsel %vm98_vm0, %v534_v6, 0.0  ;;  %572 = vmatprep.subr.bf16.mxu1 %v768_v39  ;;  %556 = vmatprep.subr.bf16.mxu0 %v768_v39  ;;  %s486_s29 = sshll.u32 %s770_s4, 4  ;;  %s487_s29 = int_to_ptr.vmem [resolvable:$true] %s486_s29 }
  0x60   :  { %106 = vadd.xlane.f32.xlu0 %v105_v7  ;;  %100 = vadd.xlane.f32.xlu1 %v99_v8  ;;  %v112_v12 = vsel %vm111_vm1, %v97_v10, 0.0  ;;  %vm211_vm3 = vcmask 257024   ;;  %vm216_vm4 = vcmask 253952   ;;  %s731_s30 = scalar_lea.vmem %s487_s29, 320  ;;  %p736_p13 = scmp.lt.s32.totalorder %s487_s29, %s487_s29 }
  0x61   :  { %574 = vmatpush3.bf16.msra.mxu1 %v586_v38  ;;  %557 = vmatpush3.bf16.msra.mxu0 %v586_v38  ;;  %p732_p12 = scmp.ne.s32.totalorder %s487_s29, %s731_s30  ;;  %p737_p0 = scmp.lt.s32.totalorder %s731_s30, %s731_s30 }
  0x62   :  { %573 = vmatprep.subr.bf16.mxu1 %v768_v39  ;;  %558 = vmatprep.subr.bf16.mxu0 %v768_v39 }
  0x63   :  { %564 = vmatprep.mubr.msk.bf16.mxu1 %vm769_vm2, %v768_v39  ;;  %560 = vmatprep.mubr.msk.bf16.mxu0 %vm769_vm2, %v768_v39  ;;  %p738_p1 = por %p737_p0, %p736_p13 }
  0x64   :  { %109 = vadd.xlane.f32.xlu0 %v108_v9  ;;  %103 = vadd.xlane.f32.xlu1 %v102_v11 }
  0x65   :  { %575 = vmatpush3.bf16.msra.mxu1 %v587_v40  ;;  %559 = vmatpush3.bf16.msra.mxu0 %v587_v40  ;;  %p739_p2 = pnand %p738_p1, %p732_p12 }
  0x68   :  { %113 = vadd.xlane.f32.xlu0 %v112_v12 }
  0xed   :  { %v107_v13 = vpop.xlane.xlu0 %106  ;;  %v101_v14 = vpop.xlane.xlu1 %100 }
  0xee   :  { %v118_v15 = vmul.f32 0.03125, %v107_v13  ;;  %v116_v16 = vmul.f32 0.03125, %v101_v14 }
  0xf0   :  { %v123_v17 = vsub.f32 %v537_v2, %v118_v15  ;;  %v872_v18 = vsub.f32 %v533_v4, %v116_v16 }
  0xf1   :  { %v110_v19 = vpop.xlane.xlu0 %109  ;;  %v104_v20 = vpop.xlane.xlu1 %103 }
  0xf2   :  { %v119_v21 = vmul.f32 0.03125, %v110_v19  ;;  %v128_v22 = vmul.f32 %v123_v17, %v123_v17  ;;  %v117_v23 = vmul.f32 0.03125, %v104_v20  ;;  %v126_v24 = vmul.f32 %v872_v18, %v872_v18 }
  0xf4   :  { %v124_v25 = vsub.f32 %v538_v3, %v119_v21  ;;  %v137_v26 = vsel %vm98_vm0, %v128_v22, 0.0  ;;  %v877_v27 = vsub.f32 %v534_v6, %v117_v23  ;;  %v131_v31 = vsel %vm98_vm0, %v126_v24, 0.0  ;;  %v507_v22 = vld [vmem:[#allocation11] ss:$0 sm:$0xff] }
  0xf5   :  { %v114_v28 = vpop.xlane.xlu0 %113  ;;  %138 = vadd.xlane.f32.xlu1 %v137_v26 }
  0xf6   :  { %v120_v29 = vmul.f32 0.03125, %v114_v28  ;;  %v129_v30 = vmul.f32 %v124_v25, %v124_v25  ;;  %v127_v32 = vmul.f32 %v877_v27, %v877_v27 }
  0xf8   :  { %v882_v33 = vsub.f32 %v97_v10, %v120_v29  ;;  %v140_v34 = vsel %vm98_vm0, %v129_v30, 0.0  ;;  %v134_v36 = vsel %vm98_vm0, %v127_v32, 0.0 }
  0xf9   :  { %141 = vadd.xlane.f32.xlu0 %v140_v34  ;;  %132 = vadd.xlane.f32.xlu1 %v131_v31 }
  0xfa   :  { %v130_v35 = vmul.f32 %v882_v33, %v882_v33 }
  0xfc   :  { %v143_v37 = vsel %vm111_vm1, %v130_v35, 0.0 }
  0xfd   :  { %144 = vadd.xlane.f32.xlu1 %v143_v37  ;;  %135 = vadd.xlane.f32.xlu0 %v134_v36 }
 0x182   :  { %v139_v41 = vpop.xlane.xlu1 %138 }
 0x183   :  { %v148_v42 = vmul.f32 0.03125, %v139_v41 }
 0x185   :  { %v153_v43 = vadd.f32 1e-05, %v148_v42 }
 0x186   :  { %v142_v44 = vpop.xlane.xlu0 %141  ;;  %v133_v45 = vpop.xlane.xlu1 %132 }
 0x187   :  { %591 = vrsqrt.f32 %v153_v43  ;;  %v149_v46 = vmul.f32 0.03125, %v142_v44  ;;  %v146_v47 = vmul.f32 0.03125, %v133_v45 }
 0x189   :  { %v154_v48 = vadd.f32 1e-05, %v149_v46  ;;  %v151_v49 = vadd.f32 1e-05, %v146_v47 }
 0x18a   :  { %v136_v50 = vpop.xlane.xlu0 %135  ;;  %v145_v51 = vpop.xlane.xlu1 %144 }
 0x18b   :  { %593 = vrsqrt.f32 %v154_v48  ;;  %v147_v52 = vmul.f32 0.03125, %v136_v50  ;;  %v150_v53 = vmul.f32 0.03125, %v145_v51 }
 0x18c   :  { %595 = vrsqrt.f32 %v151_v49 }
 0x18d   :  { %v152_v54 = vadd.f32 1e-05, %v147_v52  ;;  %v155_v55 = vadd.f32 1e-05, %v150_v53 }
 0x18f   :  { %597 = vrsqrt.f32 %v152_v54 }
 0x190   :  { %599 = vrsqrt.f32 %v155_v55 }
 0x191   :  { %v592_v56 = vpop.eup %591 }
 0x192   :  { %v163_v58 = vmul.f32 %v592_v56, %v123_v17 }
 0x194   :  { %v175_v60 = vmul.f32 %v500_v57, %v163_v58 }
 0x195   :  { %v594_v61 = vpop.eup %593 }
 0x196   :  { %v596_v62 = vpop.eup %595  ;;  %v187_v63 = vadd.f32 %v501_v59, %v175_v60  ;;  %v164_v0 = vmul.f32 %v594_v61, %v124_v25 }
 0x197   :  { %v161_v1 = vmul.f32 %v596_v62, %v872_v18 }
 0x198   :  { %v523_v2 = vpack.c.bf16 %v187_v63, %v187_v63  ;;  %v176_v3 = vmul.f32 %v500_v57, %v164_v0 }
 0x199   :  { %v598_v4 = vpop.eup %597  ;;  %v173_v5 = vmul.f32 %v500_v57, %v161_v1 }
 0x19a   :  { %v600_v6 = vpop.eup %599  ;;  %214 = vst.msk [vmem:[#allocation2 + $0x8] sm:$0xf] %vm211_vm3, %v523_v2  ;;  %v188_v7 = vadd.f32 %v501_v59, %v176_v3  ;;  %v162_v8 = vmul.f32 %v598_v4, %v877_v27 }
 0x19b   :  { %v185_v9 = vadd.f32 %v501_v59, %v173_v5  ;;  %v165_v10 = vmul.f32 %v600_v6, %v882_v33 }
 0x19c   :  { %v524_v11 = vpack.c.bf16 %v188_v7, %v188_v7  ;;  %v174_v12 = vmul.f32 %v500_v57, %v162_v8 }
 0x19d   :  { %v521_v13 = vpack.c.bf16 %v185_v9, %v185_v9  ;;  %v177_v14 = vmul.f32 %v500_v57, %v165_v10 }
 0x19e   :  { %215 = vst.msk [vmem:[#allocation2 + $0xc] sm:$0xf] %vm211_vm3, %v524_v11  ;;  %v186_v15 = vadd.f32 %v501_v59, %v174_v12 }
 0x19f   :  { %212 = vst.msk [vmem:[#allocation2] sm:$0xf] %vm211_vm3, %v521_v13  ;;  %v189_v16 = vadd.f32 %v501_v59, %v177_v14 }
 0x1a0   :  { %v522_v17 = vpack.c.bf16 %v186_v15, %v186_v15 }
 0x1a1   :  { %v525_v18 = vpack.c.bf16 %v189_v16, %v189_v16 }
 0x1a2   :  { %213 = vst.msk [vmem:[#allocation2 + $0x4] sm:$0xf] %vm211_vm3, %v522_v17 }
 0x1a3   :  { %217 = vst.msk [vmem:[#allocation2 + $0x10] sm:$0x1] %vm216_vm4, %v525_v18 }
 0x1a5   :  { %v588_v19 = vld [vmem:[#allocation2 + $0x8] sm:$0xff]  }
 0x1a6   :  { %565 = vmatmul.mubr.msk.bf16.vlgmr.msra.gmra.mrb[0].mxu1 %vm98_vm0, %v588_v19 }
 0x1a7   :  { %568 = vmatprep.mubr.msk.bf16.mxu1 %vm769_vm2, %v768_v39 }
 0x1a9   :  { %v589_v20 = vld [vmem:[#allocation2] sm:$0xff]  }
 0x1aa   :  { %561 = vmatmul.mubr.msk.bf16.vlgmr.msra.gmra.mrb[0].mxu0 %vm98_vm0, %v589_v20  ;;  %v590_v21 = vld [vmem:[#allocation2 + $0x10] ss:$0 sps:$4 sm:$0x11]  }
 0x1ae   :  { %569 = vmatmul.mubr.msk.bf16.gmra.mrb[4].mxu1 %vm98_vm0, %v590_v21 }
 0x279   :  { %v311_v23 = vpop.f32.mrb[0].mxu1 }
 0x27a   :  { %v909_v24 = vadd.f32 %v507_v22, %v311_v23  ;;  %v566_v25 = vpop.f32.mrb[1].mxu1 }
 0x27b   :  { %v314_v26 = vpop.f32.mrb[2].mxu1 }
 0x27c   :  { %v912_v27 = vmul.f32 0.70710677, %v909_v24  ;;  %v914_v28 = vadd.f32 %v507_v22, %v314_v26  ;;  %v567_v29 = vpop.f32.mrb[3].mxu1 }
 0x27d   :  { %v303_v30 = vpop.f32.mrb[0].mxu0 }
 0x27e   :  { %v337_v31 = vand.u32 2147483647, %v912_v27  ;;  %v918_v32 = vmul.f32 0.70710677, %v914_v28  ;;  %v920_v33 = vadd.f32 %v507_v22, %v303_v30  ;;  %v562_v34 = vpop.f32.mrb[1].mxu0  ;;  %vm432_vm5 = vcmp.ge.f32.partialorder %v912_v27, 0.0 }
 0x27f   :  { %v306_v38 = vpop.f32.mrb[2].mxu0  ;;  %v328_v27 = vmul.f32 0.5, %v914_v28 }
 0x280   :  { %v342_v35 = vmul.f32 0.3275911, %v337_v31  ;;  %v338_v36 = vand.u32 2147483647, %v918_v32  ;;  %v924_v37 = vmul.f32 0.70710677, %v920_v33  ;;  %v927_v45 = vadd.f32 %v507_v22, %v306_v38 }
 0x281   :  { %v319_v39 = vpop.f32.mrb[4].mxu1  ;;  %v563_v42 = vpop.f32.mrb[3].mxu0  ;;  %v402_v57 = vsub.f32 0.0, %v337_v31  ;;  %vm433_vm6 = vcmp.ge.f32.partialorder %v918_v32, 0.0  ;;  %v325_v28 = vmul.f32 0.5, %v920_v33 }
 0x282   :  { %v347_v40 = vadd.f32 1.0, %v342_v35  ;;  %v343_v41 = vmul.f32 0.3275911, %v338_v36  ;;  %v570_v43 = vpop.f32.mrb[5].mxu1  ;;  %v335_v44 = vand.u32 2147483647, %v924_v37  ;;  %v929_v46 = vadd.f32 %v507_v22, %v319_v39 }
 0x283   :  { %v322_v47 = vpop.f32.mrb[6].mxu1  ;;  %v932_v51 = vmul.f32 0.70710677, %v927_v45  ;;  %v403_v61 = vsub.f32 0.0, %v338_v36  ;;  %v407_v63 = vmul.f32 %v402_v57, %v337_v31  ;;  %vm430_vm7 = vcmp.ge.f32.partialorder %v924_v37, 0.0 }
 0x284   :  { %601 = vrcp.f32 %v347_v40  ;;  %v348_v48 = vadd.f32 1.0, %v343_v41  ;;  %v571_v49 = vpop.f32.mrb[7].mxu1  ;;  %v340_v50 = vmul.f32 0.3275911, %v335_v44  ;;  %v935_v52 = vmul.f32 0.70710677, %v929_v46 }
 0x285   :  { %v336_v54 = vand.u32 2147483647, %v932_v51  ;;  %v400_v1 = vsub.f32 0.0, %v335_v44  ;;  %v408_v4 = vmul.f32 %v403_v61, %v338_v36  ;;  %v414_v5 = vmul.f32 1.442695, %v407_v63 }
 0x286   :  { %603 = vrcp.f32 %v348_v48  ;;  %v345_v53 = vadd.f32 1.0, %v340_v50  ;;  %v339_v55 = vand.u32 2147483647, %v935_v52  ;;  %vm431_vm8 = vcmp.ge.f32.partialorder %v932_v51, 0.0 }
 0x287   :  { %v341_v56 = vmul.f32 0.3275911, %v336_v54  ;;  %v405_v9 = vmul.f32 %v400_v1, %v335_v44  ;;  %v401_v10 = vsub.f32 0.0, %v336_v54  ;;  %v416_v15 = vmul.f32 1.442695, %v408_v4 }
 0x288   :  { %605 = vrcp.f32 %v345_v53  ;;  %v344_v58 = vmul.f32 0.3275911, %v339_v55  ;;  %v404_v13 = vsub.f32 0.0, %v339_v55  ;;  %vm434_vm9 = vcmp.ge.f32.partialorder %v935_v52, 0.0 }
 0x289   :  { %v346_v59 = vadd.f32 1.0, %v341_v56  ;;  %v410_v20 = vmul.f32 1.442695, %v405_v9  ;;  %v406_v21 = vmul.f32 %v401_v10, %v336_v54  ;;  %v326_v37 = vmul.f32 0.5, %v927_v45 }
 0x28a   :  { %v349_v60 = vadd.f32 1.0, %v344_v58  ;;  %v409_v29 = vmul.f32 %v404_v13, %v339_v55 }
 0x28b   :  { %607 = vrcp.f32 %v346_v59  ;;  %v412_v39 = vmul.f32 1.442695, %v406_v21 }
 0x28c   :  { %609 = vrcp.f32 %v349_v60  ;;  %v418_v44 = vmul.f32 1.442695, %v409_v29 }
 0x28d   :  { %611 = vpow2.f32 %v414_v5 }
 0x28e   :  { %v602_v62 = vpop.eup %601  ;;  %613 = vpow2.f32 %v416_v15 }
 0x28f   :  { %v357_v0 = vmul.f32 1.0614054, %v602_v62  ;;  %615 = vpow2.f32 %v410_v20 }
 0x290   :  { %v604_v2 = vpop.eup %603  ;;  %617 = vpow2.f32 %v412_v39 }
 0x291   :  { %v362_v3 = vadd.f32 -1.4531521, %v357_v0  ;;  %v358_v6 = vmul.f32 1.0614054, %v604_v2  ;;  %619 = vpow2.f32 %v418_v44  ;;  %v329_v44 = vmul.f32 0.5, %v929_v46 }
 0x292   :  { %v606_v7 = vpop.eup %605 }
 0x293   :  { %v367_v8 = vmul.f32 %v602_v62, %v362_v3  ;;  %v363_v11 = vadd.f32 -1.4531521, %v358_v6  ;;  %v355_v12 = vmul.f32 1.0614054, %v606_v7 }
 0x295   :  { %v372_v14 = vadd.f32 1.4214138, %v367_v8  ;;  %v368_v16 = vmul.f32 %v604_v2, %v363_v11  ;;  %v360_v17 = vadd.f32 -1.4531521, %v355_v12  ;;  %v608_v18 = vpop.eup %607 }
 0x296   :  { %v610_v22 = vpop.eup %609  ;;  %v356_v26 = vmul.f32 1.0614054, %v608_v18 }
 0x297   :  { %v377_v19 = vmul.f32 %v602_v62, %v372_v14  ;;  %v373_v23 = vadd.f32 1.4214138, %v368_v16  ;;  %v365_v25 = vmul.f32 %v606_v7, %v360_v17  ;;  %v359_v31 = vmul.f32 1.0614054, %v610_v22  ;;  %v612_v56 = vpop.eup %611 }
 0x298   :  { %v361_v36 = vadd.f32 -1.4531521, %v356_v26  ;;  %v614_v3 = vpop.eup %613 }
 0x299   :  { %v382_v30 = vadd.f32 -0.28449672, %v377_v19  ;;  %v378_v34 = vmul.f32 %v604_v2, %v373_v23  ;;  %v370_v35 = vadd.f32 1.4214138, %v365_v25  ;;  %v364_v40 = vadd.f32 -1.4531521, %v359_v31  ;;  %v616_v10 = vpop.eup %615 }
 0x29a   :  { %v366_v43 = vmul.f32 %v608_v18, %v361_v36  ;;  %v618_v20 = vpop.eup %617  ;;  %v327_v25 = vmul.f32 0.5, %v909_v24 }
 0x29b   :  { %v387_v38 = vmul.f32 %v602_v62, %v382_v30  ;;  %v383_v41 = vadd.f32 -0.28449672, %v378_v34  ;;  %v375_v42 = vmul.f32 %v606_v7, %v370_v35  ;;  %v369_v48 = vmul.f32 %v610_v22, %v364_v40 }
 0x29c   :  { %v371_v53 = vadd.f32 1.4214138, %v366_v43 }
 0x29d   :  { %v392_v47 = vadd.f32 0.2548296, %v387_v38  ;;  %v388_v49 = vmul.f32 %v604_v2, %v383_v41  ;;  %v380_v50 = vadd.f32 -0.28449672, %v375_v42  ;;  %v374_v55 = vadd.f32 1.4214138, %v369_v48 }
 0x29e   :  { %v376_v59 = vmul.f32 %v608_v18, %v371_v53 }
 0x29f   :  { %v397_v54 = vmul.f32 %v602_v62, %v392_v47  ;;  %v393_v57 = vadd.f32 0.2548296, %v388_v49  ;;  %v385_v58 = vmul.f32 %v606_v7, %v380_v50  ;;  %v379_v61 = vmul.f32 %v610_v22, %v374_v55 }
 0x2a0   :  { %v381_v1 = vadd.f32 -0.28449672, %v376_v59 }
 0x2a1   :  { %v422_v60 = vmul.f32 %v612_v56, %v397_v54  ;;  %v398_v63 = vmul.f32 %v604_v2, %v393_v57  ;;  %v390_v0 = vadd.f32 0.2548296, %v385_v58  ;;  %v384_v5 = vadd.f32 -0.28449672, %v379_v61 }
 0x2a2   :  { %v386_v9 = vmul.f32 %v608_v18, %v381_v1 }
 0x2a3   :  { %v427_v4 = vsub.f32 1.0, %v422_v60  ;;  %v423_v6 = vmul.f32 %v614_v3, %v398_v63  ;;  %v395_v8 = vmul.f32 %v606_v7, %v390_v0  ;;  %v389_v11 = vmul.f32 %v610_v22, %v384_v5  ;;  %v620_v7 = vpop.eup %619 }
 0x2a4   :  { %v391_v14 = vadd.f32 0.2548296, %v386_v9 }
 0x2a5   :  { %v437_v62 = vsub.f32 0.0, %v427_v4  ;;  %v428_v12 = vsub.f32 1.0, %v423_v6  ;;  %v420_v13 = vmul.f32 %v616_v10, %v395_v8  ;;  %v394_v16 = vadd.f32 0.2548296, %v389_v11 }
 0x2a6   :  { %v396_v19 = vmul.f32 %v608_v18, %v391_v14 }
 0x2a7   :  { %v442_v15 = vsel %vm432_vm5, %v427_v4, %v437_v62  ;;  %v438_v17 = vsub.f32 0.0, %v428_v12  ;;  %v425_v2 = vsub.f32 1.0, %v420_v13  ;;  %v399_v23 = vmul.f32 %v610_v22, %v394_v16 }
 0x2a8   :  { %v447_v21 = vadd.f32 1.0, %v442_v15  ;;  %v421_v30 = vmul.f32 %v618_v20, %v396_v19 }
 0x2a9   :  { %v443_v26 = vsel %vm433_vm6, %v428_v12, %v438_v17  ;;  %v435_v29 = vsub.f32 0.0, %v425_v2  ;;  %v424_v34 = vmul.f32 %v620_v7, %v399_v23 }
 0x2aa   :  { %v448_v31 = vadd.f32 1.0, %v443_v26  ;;  %v426_v36 = vsub.f32 1.0, %v421_v30  ;;  %v452_v18 = vmul.f32 %v447_v21, %v327_v25 }
 0x2ab   :  { %v440_v35 = vsel %vm430_vm7, %v425_v2, %v435_v29  ;;  %v429_v39 = vsub.f32 1.0, %v424_v34 }
 0x2ac   :  { %v453_v38 = vmul.f32 %v448_v31, %v328_v27  ;;  %v436_v40 = vsub.f32 0.0, %v426_v36  ;;  %v445_v22 = vadd.f32 1.0, %v440_v35 }
 0x2ad   :  { %v439_v24 = vsub.f32 0.0, %v429_v39 }
 0x2ae   :  { %v547_v32 = vpack.c.bf16 %v453_v38, %v452_v18  ;;  %v441_v41 = vsel %vm431_vm8, %v426_v36, %v436_v40  ;;  %v450_v48 = vmul.f32 %v445_v22, %v325_v28 }
 0x2af   :  { %v446_v42 = vadd.f32 1.0, %v441_v41  ;;  %v444_v43 = vsel %vm434_vm9, %v429_v39, %v439_v24 }
 0x2b0   :  { %550 = vst [vmem:[#allocation12 + $0x8] sm:$0xff] %v547_v32   ;;  %v449_v47 = vadd.f32 1.0, %v444_v43 }
 0x2b1   :  { %v451_v49 = vmul.f32 %v446_v42, %v326_v37 }
 0x2b2   :  { %v454_v50 = vmul.f32 %v449_v47, %v329_v44 }
 0x2b3   :  { %v542_v51 = vpack.c.bf16 %v451_v49, %v450_v48 }
 0x2b4   :  { %v530_v53 = vpack.c.bf16 %v454_v50, %v454_v50 }
 0x2b5   :  { %543 = vst [vmem:[#allocation12] sm:$0xff] %v542_v51  }
 0x2b6   :  { %480 = vst [vmem:[#allocation12 + $0x10] sm:$0x1] %v530_v53 }
 0x2b7   :  { %742 = shalt.err (!%p739_p2)
}
 0x2b8   :  { %s743_s8 = scalar_lea.hbm %s969_s5, 320 }
 0x2b9   :  { %p744_p3 = scmp.ne.s32.totalorder %s969_s5, %s743_s8  ;;  %p747_p4 = scmp.lt.u32.totalorder %s743_s8, %s969_s5 }
 0x2bb   :  { %p749_p5 = pnand %p747_p4, %p744_p3 }
 0x2bd   :  { %752 = shalt.err (!%p749_p5)
}
 0x2be   :  { %492 = dma.vmem_to_hbm [thread:$0]  %s487_s29, 320, %s969_s5, [#allocation5], %s764_s17, %s764_s17, %s765_s18  }
 0x2bf   :  { %759 = dma.done.wait [#allocation5], 320  }
 0x2c0   :  { %760 = vsyncadd [#allocation5], 4294966976 }
 0x2c1   :  { %496 = vsyncpa [#allocation4], 1 }
 0x2c2   :  { %497 = vsyncpa [#allocation7], 1 }
 0x2c3   :  { %498 = vsyncpa [#allocation10], 1 }
 0x2c4   :  { %499 = vsyncpa [#allocation5], 1 }

// kernel: forward.36
= control target key start
LH: loop header
LB: loop body
LE: loop exit
PB: predicated region body
PF: predicated region fallthrough
CT: control target
= control target key end

     0   :  { %10 = vsyncpa [#allocation4], 0  ;;  %s738_s0 = inlined_call_operand.hbm [shape: bf16[34,32], index: 0, kind: input, shape index: {}]   ;;  %s739_s1 = inlined_call_operand.hbm [shape: f32[1,32], index: 1, kind: input, shape index: {}]   ;;  %s740_s2 = inlined_call_operand.hbm [shape: f32[1,32], index: 2, kind: input, shape index: {}]   ;;  %s741_s3 = inlined_call_operand.hbm [shape: bf16[32,256], index: 3, kind: input, shape index: {}]   ;;  %s742_s4 = inlined_call_operand.hbm [shape: f32[1,256], index: 4, kind: input, shape index: {}]   ;;  %s743_s5 = inlined_call_operand.hbm [shape: f32[34,256], index: 5, kind: output, shape index: {}]  }
   0x1   :  { %11 = vsyncpa [#allocation7], 0 }
   0x2   :  { %12 = vsyncpa [#allocation10], 0 }
   0x3   :  { %13 = vsyncpa [#allocation5], 0  ;;  %s579_s18 = smov [#allocation6]   ;;  %s580_s20 = smov [#allocation9]  }
   0x4   :  { %s32_s19 = sshll.u32 %s579_s18, 4  ;;  %s51_s21 = sshll.u32 %s580_s20, 4  ;;  %s33_s19 = int_to_ptr.vmem [resolvable:$true] %s32_s19  ;;  %s622_s21 = int_to_ptr.vmem [resolvable:$true] %s51_s21 }
   0x5   :  { %s439_s24 = scalar_lea.hbm %s739_s1, 16 }
   0x6   :  { %p440_p0 = scmp.ne.s32.totalorder %s739_s1, %s439_s24  ;;  %p443_p1 = scmp.lt.u32.totalorder %s439_s24, %s739_s1 }
   0x8   :  { %p445_p2 = pnand %p443_p1, %p440_p0 }
   0xa   :  { %448 = shalt.err (!%p445_p2)
}
   0xb   :  { %s449_s29 = scalar_lea.vmem %s33_s19, 16  ;;  %s453_s30 = scalar_lea.vmem %s33_s19, 32 }
   0xc   :  { %p450_p3 = scmp.ne.s32.totalorder %s33_s19, %s449_s29  ;;  %p454_p4 = scmp.lt.s32.totalorder %s33_s19, %s33_s19 }
   0xd   :  { %p455_p5 = scmp.lt.s32.totalorder %s453_s30, %s449_s29 }
   0xf   :  { %p456_p6 = por %p455_p5, %p454_p4 }
  0x11   :  { %p457_p7 = pnand %p456_p6, %p450_p3 }
  0x13   :  { %460 = shalt.err (!%p457_p7)
}
  0x14   :  { %35 = dma.hbm_to_vmem [thread:$0]  %s739_s1, 16, %s33_s19, [#allocation7]  }
  0x15   :  { %s461_s10 = scalar_lea.hbm %s741_s3, 512 }
  0x16   :  { %p462_p8 = scmp.ne.s32.totalorder %s741_s3, %s461_s10  ;;  %p465_p9 = scmp.lt.u32.totalorder %s461_s10, %s741_s3 }
  0x18   :  { %p467_p10 = pnand %p465_p9, %p462_p8 }
  0x1a   :  { %470 = shalt.err (!%p467_p10)
}
  0x1b   :  { %s471_s15 = scalar_lea.vmem %s622_s21, 512  ;;  %p476_p12 = scmp.lt.s32.totalorder %s622_s21, %s622_s21 }
  0x1c   :  { %p472_p11 = scmp.ne.s32.totalorder %s622_s21, %s471_s15  ;;  %p477_p13 = scmp.lt.s32.totalorder %s471_s15, %s471_s15 }
  0x1e   :  { %p478_p0 = por %p477_p13, %p476_p12 }
  0x20   :  { %p479_p1 = pnand %p478_p0, %p472_p11 }
  0x22   :  { %482 = shalt.err (!%p479_p1)
}
  0x23   :  { %s581_s1 = smov 128   ;;  %s582_s16 = smov 8  }
  0x24   :  { %57 = dma.hbm_to_vmem [thread:$0]  %s741_s3, 512, %s622_s21, [#allocation10], %s581_s1, %s581_s1, %s582_s16  }
  0x25   :  { %s583_s19 = smov [#allocation3]   ;;  %s483_s24 = scalar_lea.hbm %s738_s0, 320 }
  0x26   :  { %s19_s20 = sshll.u32 %s583_s19, 4  ;;  %p484_p2 = scmp.ne.s32.totalorder %s738_s0, %s483_s24  ;;  %s20_s20 = int_to_ptr.vmem [resolvable:$true] %s19_s20 }
  0x27   :  { %p487_p3 = scmp.lt.u32.totalorder %s483_s24, %s738_s0 }
  0x29   :  { %p489_p4 = pnand %p487_p3, %p484_p2 }
  0x2b   :  { %492 = shalt.err (!%p489_p4)
}
  0x2c   :  { %s493_s29 = scalar_lea.vmem %s20_s20, 320  ;;  %p498_p6 = scmp.lt.s32.totalorder %s20_s20, %s20_s20 }
  0x2d   :  { %p494_p5 = scmp.ne.s32.totalorder %s20_s20, %s493_s29  ;;  %p499_p7 = scmp.lt.s32.totalorder %s493_s29, %s493_s29 }
  0x2f   :  { %p500_p8 = por %p499_p7, %p498_p6 }
  0x31   :  { %p501_p9 = pnand %p500_p8, %p494_p5 }
  0x33   :  { %504 = shalt.err (!%p501_p9)
}
  0x34   :  { %s584_s3 = smov 64   ;;  %s585_s21 = smov 4  }
  0x35   :  { %25 = dma.hbm_to_vmem [thread:$0]  %s738_s0, 320, %s20_s20, [#allocation4], %s584_s3, %s584_s3, %s585_s21  }
  0x36   :  { %s586_s7 = smov [#allocation8]   ;;  %s587_s9 = smov [#allocation11]  }
  0x37   :  { %s42_s8 = sshll.u32 %s586_s7, 4  ;;  %s64_s10 = sshll.u32 %s587_s9, 4  ;;  %s43_s8 = int_to_ptr.vmem [resolvable:$true] %s42_s8  ;;  %s65_s10 = int_to_ptr.vmem [resolvable:$true] %s64_s10 }
  0x38   :  { %s505_s13 = scalar_lea.hbm %s740_s2, 16 }
  0x39   :  { %p506_p10 = scmp.ne.s32.totalorder %s740_s2, %s505_s13  ;;  %p509_p11 = scmp.lt.u32.totalorder %s505_s13, %s740_s2 }
  0x3b   :  { %p511_p12 = pnand %p509_p11, %p506_p10 }
  0x3d   :  { %514 = shalt.err (!%p511_p12)
}
  0x3e   :  { %s515_s0 = scalar_lea.vmem %s43_s8, 16  ;;  %s519_s17 = scalar_lea.vmem %s43_s8, 32 }
  0x3f   :  { %p516_p13 = scmp.ne.s32.totalorder %s43_s8, %s515_s0  ;;  %p520_p0 = scmp.lt.s32.totalorder %s43_s8, %s43_s8 }
  0x40   :  { %p521_p1 = scmp.lt.s32.totalorder %s519_s17, %s515_s0 }
  0x42   :  { %p522_p2 = por %p521_p1, %p520_p0 }
  0x44   :  { %p523_p3 = pnand %p522_p2, %p516_p13 }
  0x46   :  { %526 = shalt.err (!%p523_p3)
}
  0x47   :  { %45 = dma.hbm_to_vmem [thread:$0]  %s740_s2, 16, %s43_s8, [#allocation7]  }
  0x48   :  { %s527_s23 = scalar_lea.hbm %s742_s4, 32 }
  0x49   :  { %p528_p4 = scmp.ne.s32.totalorder %s742_s4, %s527_s23  ;;  %p531_p5 = scmp.lt.u32.totalorder %s527_s23, %s742_s4 }
  0x4b   :  { %p533_p6 = pnand %p531_p5, %p528_p4 }
  0x4d   :  { %536 = shalt.err (!%p533_p6)
}
  0x4e   :  { %s537_s28 = scalar_lea.vmem %s65_s10, 32  ;;  %p542_p8 = scmp.lt.s32.totalorder %s65_s10, %s65_s10 }
  0x4f   :  { %p538_p7 = scmp.ne.s32.totalorder %s65_s10, %s537_s28  ;;  %p543_p9 = scmp.lt.s32.totalorder %s537_s28, %s537_s28 }
  0x51   :  { %p544_p10 = por %p543_p9, %p542_p8 }
  0x53   :  { %p545_p11 = pnand %p544_p10, %p538_p7 }
  0x55   :  { %548 = shalt.err (!%p545_p11)
}
  0x56   :  { %67 = dma.hbm_to_vmem [thread:$0]  %s742_s4, 32, %s65_s10, [#allocation10]  }
  0x57   :  { %571 = dma.done.wait [#allocation4], 320  }
  0x58   :  { %572 = vsyncadd [#allocation4], 4294966976 }
  0x59   :  { %573 = dma.done.wait [#allocation7], 32  }
  0x5a   :  { %574 = vsyncadd [#allocation7], 4294967264 }
  0x5b   :  { %575 = dma.done.wait [#allocation10], 544  }
  0x5c   :  { %576 = vsyncadd [#allocation10], 4294966752  ;;  %v402_v0 = vld [vmem:[#allocation3 + $0x8] sm:$0xff]   ;;  %vm98_vm0 = vcmask 261120   ;;  %v395_v1 = vld [vmem:[#allocation3] sm:$0xff]   ;;  %vm111_vm1 = vcmask 254976  }
  0x5d   :  { %v400_v2 = vunpack.c.l.bf16 %v402_v0  ;;  %v401_v3 = vunpack.c.h.bf16 %v402_v0  ;;  %v396_v4 = vunpack.c.l.bf16 %v395_v1  ;;  %v92_v5 = vld [vmem:[#allocation3 + $0x10] sm:$0x1]  ;;  %v397_v6 = vunpack.c.h.bf16 %v395_v1  ;;  %v420_v38 = vld [vmem:[#allocation9 + $0x4] ss:$8 sps:$4 sm:$0xff]   ;;  %v422_v39 = vld [vmem:[#allocation9] ss:$8 sps:$4 sm:$0xff]  }
  0x5e   :  { %v97_v10 = vunpack.c.l.bf16 %v92_v5  ;;  %403 = vmatprep.subr.bf16.mxu1 %v420_v38  ;;  %282 = vmatprep.subr.bf16.mxu0 %v420_v38  ;;  %v423_v40 = vld [vmem:[#allocation9 + $0x14] ss:$8 sps:$4 sm:$0xff]   ;;  %v425_v41 = vld [vmem:[#allocation9 + $0x10] ss:$8 sps:$4 sm:$0xff]   ;;  %v588_v42 = vmov 0   ;;  %vm211_vm2 = vcmask 257024  }
  0x5f   :  { %v105_v7 = vsel %vm98_vm0, %v400_v2, 0.0  ;;  %v99_v8 = vsel %vm98_vm0, %v396_v4, 0.0  ;;  %v108_v9 = vsel %vm98_vm0, %v401_v3, 0.0  ;;  %v102_v11 = vsel %vm98_vm0, %v397_v6, 0.0  ;;  %405 = vmatpush1.bf16.msra.mxu1 %v422_v39  ;;  %283 = vmatpush1.bf16.msra.mxu0 %v422_v39  ;;  %v372_v59 = vld [vmem:[#allocation6] ss:$0 sm:$0xff] }
  0x60   :  { %106 = vadd.xlane.f32.xlu0 %v105_v7  ;;  %100 = vadd.xlane.f32.xlu1 %v99_v8  ;;  %v112_v12 = vsel %vm111_vm1, %v97_v10, 0.0  ;;  %v373_v61 = vld [vmem:[#allocation8] ss:$0 sm:$0xff]  ;;  %vm216_vm3 = vcmask 253952   ;;  %s589_s4 = smov [#allocation12]  }
  0x61   :  { %404 = vmatprep.subr.bf16.mxu1 %v423_v40  ;;  %324 = vmatprep.mubr.bf16.mxu1 %v588_v42  ;;  %s358_s3 = sshll.u32 %s589_s4, 4  ;;  %s359_s3 = int_to_ptr.vmem [resolvable:$true] %s358_s3 }
  0x62   :  { %284 = vmatprep.subr.bf16.mxu0 %v423_v40  ;;  %314 = vmatprep.mubr.bf16.mxu0 %v588_v42  ;;  %s549_s21 = scalar_lea.vmem %s359_s3, 1280  ;;  %p554_p13 = scmp.lt.s32.totalorder %s359_s3, %s359_s3 }
  0x63   :  { %406 = vmatpush1.bf16.msra.mxu1 %v425_v41  ;;  %285 = vmatpush1.bf16.msra.mxu0 %v425_v41  ;;  %p550_p12 = scmp.ne.s32.totalorder %s359_s3, %s549_s21  ;;  %p555_p0 = scmp.lt.s32.totalorder %s549_s21, %s549_s21 }
  0x64   :  { %109 = vadd.xlane.f32.xlu0 %v108_v9  ;;  %103 = vadd.xlane.f32.xlu1 %v102_v11 }
  0x65   :  { %p556_p1 = por %p555_p0, %p554_p13 }
  0x67   :  { %p557_p2 = pnand %p556_p1, %p550_p12 }
  0x68   :  { %113 = vadd.xlane.f32.xlu0 %v112_v12 }
  0xed   :  { %v107_v13 = vpop.xlane.xlu0 %106  ;;  %v101_v14 = vpop.xlane.xlu1 %100 }
  0xee   :  { %v118_v15 = vmul.f32 0.03125, %v107_v13  ;;  %v116_v16 = vmul.f32 0.03125, %v101_v14 }
  0xf0   :  { %v694_v17 = vsub.f32 %v400_v2, %v118_v15  ;;  %v696_v18 = vsub.f32 %v396_v4, %v116_v16 }
  0xf1   :  { %v110_v19 = vpop.xlane.xlu0 %109  ;;  %v104_v20 = vpop.xlane.xlu1 %103 }
  0xf2   :  { %v119_v21 = vmul.f32 0.03125, %v110_v19  ;;  %v128_v22 = vmul.f32 %v694_v17, %v694_v17  ;;  %v117_v23 = vmul.f32 0.03125, %v104_v20  ;;  %v126_v24 = vmul.f32 %v696_v18, %v696_v18 }
  0xf4   :  { %v124_v25 = vsub.f32 %v401_v3, %v119_v21  ;;  %v137_v26 = vsel %vm98_vm0, %v128_v22, 0.0  ;;  %v703_v27 = vsub.f32 %v397_v6, %v117_v23  ;;  %v131_v31 = vsel %vm98_vm0, %v126_v24, 0.0 }
  0xf5   :  { %v114_v28 = vpop.xlane.xlu0 %113  ;;  %138 = vadd.xlane.f32.xlu1 %v137_v26  ;;  %v229_v24 = vlaneseq }
  0xf6   :  { %v120_v29 = vmul.f32 0.03125, %v114_v28  ;;  %v129_v30 = vmul.f32 %v124_v25, %v124_v25  ;;  %v127_v32 = vmul.f32 %v703_v27, %v703_v27 }
  0xf8   :  { %v708_v33 = vsub.f32 %v97_v10, %v120_v29  ;;  %v140_v34 = vsel %vm98_vm0, %v129_v30, 0.0  ;;  %v134_v36 = vsel %vm98_vm0, %v127_v32, 0.0 }
  0xf9   :  { %141 = vadd.xlane.f32.xlu0 %v140_v34  ;;  %132 = vadd.xlane.f32.xlu1 %v131_v31 }
  0xfa   :  { %v130_v35 = vmul.f32 %v708_v33, %v708_v33 }
  0xfc   :  { %v143_v37 = vsel %vm111_vm1, %v130_v35, 0.0 }
  0xfd   :  { %144 = vadd.xlane.f32.xlu1 %v143_v37  ;;  %135 = vadd.xlane.f32.xlu0 %v134_v36 }
 0x182   :  { %v139_v43 = vpop.xlane.xlu1 %138 }
 0x183   :  { %v148_v44 = vmul.f32 0.03125, %v139_v43 }
 0x185   :  { %v153_v45 = vadd.f32 1e-05, %v148_v44 }
 0x186   :  { %v142_v46 = vpop.xlane.xlu0 %141  ;;  %v133_v47 = vpop.xlane.xlu1 %132 }
 0x187   :  { %429 = vrsqrt.f32 %v153_v45  ;;  %v149_v48 = vmul.f32 0.03125, %v142_v46  ;;  %v146_v49 = vmul.f32 0.03125, %v133_v47 }
 0x189   :  { %v154_v50 = vadd.f32 1e-05, %v149_v48  ;;  %v151_v51 = vadd.f32 1e-05, %v146_v49 }
 0x18a   :  { %v136_v52 = vpop.xlane.xlu0 %135  ;;  %v145_v53 = vpop.xlane.xlu1 %144 }
 0x18b   :  { %431 = vrsqrt.f32 %v154_v50  ;;  %v147_v54 = vmul.f32 0.03125, %v136_v52  ;;  %v150_v55 = vmul.f32 0.03125, %v145_v53 }
 0x18c   :  { %433 = vrsqrt.f32 %v151_v51 }
 0x18d   :  { %v152_v56 = vadd.f32 1e-05, %v147_v54  ;;  %v155_v57 = vadd.f32 1e-05, %v150_v55 }
 0x18f   :  { %435 = vrsqrt.f32 %v152_v56 }
 0x190   :  { %437 = vrsqrt.f32 %v155_v57 }
 0x191   :  { %v430_v58 = vpop.eup %429 }
 0x192   :  { %v163_v60 = vmul.f32 %v430_v58, %v694_v17 }
 0x194   :  { %v175_v62 = vmul.f32 %v372_v59, %v163_v60 }
 0x195   :  { %v432_v63 = vpop.eup %431 }
 0x196   :  { %v434_v0 = vpop.eup %433  ;;  %v187_v1 = vadd.f32 %v373_v61, %v175_v62  ;;  %v164_v2 = vmul.f32 %v432_v63, %v124_v25  ;;  %v230_v25 = vshrl.u32 %v229_v24, 7 }
 0x197   :  { %v161_v3 = vmul.f32 %v434_v0, %v696_v18 }
 0x198   :  { %v391_v4 = vpack.c.bf16 %v187_v1, %v187_v1  ;;  %v176_v5 = vmul.f32 %v372_v59, %v164_v2  ;;  %v231_v26 = vsub.s32 0, %v230_v25  ;;  %v235_v28 = vsub.s32 1, %v230_v25 }
 0x199   :  { %v436_v6 = vpop.eup %435  ;;  %v173_v7 = vmul.f32 %v372_v59, %v161_v3 }
 0x19a   :  { %v438_v8 = vpop.eup %437  ;;  %214 = vst.msk [vmem:[#allocation2 + $0x8] sm:$0xf] %vm211_vm2, %v391_v4  ;;  %v188_v9 = vadd.f32 %v373_v61, %v176_v5  ;;  %v162_v10 = vmul.f32 %v436_v6, %v703_v27  ;;  %v227_v27 = vld [vmem:[#allocation11] sm:$0x3] }
 0x19b   :  { %v185_v11 = vadd.f32 %v373_v61, %v173_v7  ;;  %v165_v12 = vmul.f32 %v438_v8, %v708_v33  ;;  %v232_v29 = vrot.slane %v227_v27, %v231_v26  ;;  %v236_v30 = vrot.slane %v227_v27, %v235_v28 }
 0x19c   :  { %v392_v13 = vpack.c.bf16 %v188_v9, %v188_v9  ;;  %v174_v14 = vmul.f32 %v372_v59, %v162_v10 }
 0x19d   :  { %v389_v15 = vpack.c.bf16 %v185_v11, %v185_v11  ;;  %v177_v16 = vmul.f32 %v372_v59, %v165_v12 }
 0x19e   :  { %215 = vst.msk [vmem:[#allocation2 + $0xc] sm:$0xf] %vm211_vm2, %v392_v13  ;;  %v186_v17 = vadd.f32 %v373_v61, %v174_v14 }
 0x19f   :  { %212 = vst.msk [vmem:[#allocation2] sm:$0xf] %vm211_vm2, %v389_v15  ;;  %v189_v18 = vadd.f32 %v373_v61, %v177_v16 }
 0x1a0   :  { %v390_v19 = vpack.c.bf16 %v186_v17, %v186_v17 }
 0x1a1   :  { %v393_v20 = vpack.c.bf16 %v189_v18, %v189_v18 }
 0x1a2   :  { %213 = vst.msk [vmem:[#allocation2 + $0x4] sm:$0xf] %vm211_vm2, %v390_v19 }
 0x1a3   :  { %217 = vst.msk [vmem:[#allocation2 + $0x10] sm:$0x1] %vm216_vm3, %v393_v20 }
 0x1a5   :  { %v426_v21 = vld [vmem:[#allocation2 + $0x8] sm:$0xff]  }
 0x1a6   :  { %387 = vmatmul.mubr.msk.bf16.vlgmr.msra.gmra.mrb[0].mxu1 %vm98_vm0, %v426_v21 }
 0x1a7   :  { %334 = vmatprep.mubr.bf16.mxu1 %v588_v42 }
 0x1a9   :  { %v427_v22 = vld [vmem:[#allocation2] sm:$0xff]  }
 0x1aa   :  { %386 = vmatmul.mubr.msk.bf16.vlgmr.msra.gmra.mrb[0].mxu0 %vm98_vm0, %v427_v22  ;;  %v428_v23 = vld [vmem:[#allocation2 + $0x10] ss:$0 sps:$4 sm:$0x11]  }
 0x1ae   :  { %388 = vmatmul.mubr.msk.bf16.gmra.mrb[4].mxu1 %vm98_vm0, %v428_v23 }
 0x279   :  { %v326_v31 = vpop.f32.mrb[0].mxu1 }
 0x27a   :  { %v327_v32 = vadd.f32 %v326_v31, %v232_v29  ;;  %v328_v33 = vpop.f32.mrb[1].mxu1 }
 0x27b   :  { %v329_v34 = vadd.f32 %v328_v33, %v236_v30  ;;  %v330_v35 = vpop.f32.mrb[2].mxu1 }
 0x27c   :  { %347 = vst [vmem:[#allocation12 + $0x20] sm:$0xff] %v327_v32  ;;  %v331_v36 = vadd.f32 %v330_v35, %v232_v29  ;;  %v332_v37 = vpop.f32.mrb[3].mxu1 }
 0x27d   :  { %348 = vst [vmem:[#allocation12 + $0x28] sm:$0xff] %v329_v34  ;;  %v333_v38 = vadd.f32 %v332_v37, %v236_v30  ;;  %v316_v39 = vpop.f32.mrb[0].mxu0 }
 0x27e   :  { %349 = vst [vmem:[#allocation12 + $0x30] sm:$0xff] %v331_v36  ;;  %v317_v40 = vadd.f32 %v316_v39, %v232_v29  ;;  %v318_v41 = vpop.f32.mrb[1].mxu0 }
 0x27f   :  { %350 = vst [vmem:[#allocation12 + $0x38] sm:$0xff] %v333_v38  ;;  %v319_v42 = vadd.f32 %v318_v41, %v236_v30  ;;  %v320_v43 = vpop.f32.mrb[2].mxu0 }
 0x280   :  { %343 = vst [vmem:[#allocation12] sm:$0xff] %v317_v40  ;;  %v321_v44 = vadd.f32 %v320_v43, %v232_v29  ;;  %v322_v45 = vpop.f32.mrb[3].mxu0 }
 0x281   :  { %344 = vst [vmem:[#allocation12 + $0x8] sm:$0xff] %v319_v42  ;;  %v323_v46 = vadd.f32 %v322_v45, %v236_v30  ;;  %v336_v47 = vpop.f32.mrb[4].mxu1 }
 0x282   :  { %345 = vst [vmem:[#allocation12 + $0x10] sm:$0xff] %v321_v44  ;;  %v337_v48 = vadd.f32 %v336_v47, %v232_v29  ;;  %v338_v49 = vpop.f32.mrb[5].mxu1 }
 0x283   :  { %346 = vst [vmem:[#allocation12 + $0x18] sm:$0xff] %v323_v46  ;;  %v339_v50 = vadd.f32 %v338_v49, %v236_v30  ;;  %v340_v51 = vpop.f32.mrb[6].mxu1 }
 0x284   :  { %351 = vst [vmem:[#allocation12 + $0x40] sm:$0x3] %v337_v48  ;;  %v341_v52 = vpop.f32.mrb[7].mxu1 }
 0x285   :  { %352 = vst [vmem:[#allocation12 + $0x48] sm:$0x3] %v339_v50 }
 0x286   :  { %560 = shalt.err (!%p557_p2)
}
 0x287   :  { %s561_s7 = scalar_lea.hbm %s743_s5, 1280 }
 0x288   :  { %p562_p3 = scmp.ne.s32.totalorder %s743_s5, %s561_s7  ;;  %p565_p4 = scmp.lt.u32.totalorder %s561_s7, %s743_s5 }
 0x28a   :  { %p567_p5 = pnand %p565_p4, %p562_p3 }
 0x28c   :  { %570 = shalt.err (!%p567_p5)
}
 0x28d   :  { %s590_s12 = smov 256   ;;  %s591_s13 = smov 16  }
 0x28e   :  { %364 = dma.vmem_to_hbm [thread:$0]  %s359_s3, 1280, %s743_s5, [#allocation5], %s590_s12, %s590_s12, %s591_s13  }
 0x28f   :  { %577 = dma.done.wait [#allocation5], 1280  }
 0x290   :  { %578 = vsyncadd [#allocation5], 4294966016 }
 0x291   :  { %368 = vsyncpa [#allocation4], 1 }
 0x292   :  { %369 = vsyncpa [#allocation7], 1 }
 0x293   :  { %370 = vsyncpa [#allocation10], 1 }
 0x294   :  { %371 = vsyncpa [#allocation5], 1 }

// kernel: forward.37
= control target key start
LH: loop header
LB: loop body
LE: loop exit
PB: predicated region body
PF: predicated region fallthrough
CT: control target
= control target key end

     0   :  { %10 = vsyncpa [#allocation3], 0  ;;  %s449_s0 = inlined_call_operand.hbm [shape: f32[32,256], index: 0, kind: input, shape index: {}]   ;;  %s450_s1 = inlined_call_operand.hbm [shape: f32[32,256], index: 1, kind: input, shape index: {}]   ;;  %s451_s2 = inlined_call_operand.hbm [shape: f32[32,1], index: 2, kind: input, shape index: {}]   ;;  %s452_s3 = inlined_call_operand.hbm [shape: f32[1,1], index: 3, kind: output, shape index: {0}]   ;;  %s453_s4 = inlined_call_operand.hbm [shape: f32[1,1], index: 4, kind: output, shape index: {1}]  }
   0x1   :  { %11 = vsyncpa [#allocation6], 0 }
   0x2   :  { %12 = vsyncpa [#allocation4], 0 }
   0x3   :  { %13 = vsyncpa [#allocation10], 0  ;;  %s327_s15 = smov [#allocation5]   ;;  %s328_s17 = smov [#allocation2]  }
   0x4   :  { %s31_s16 = sshll.u32 %s327_s15, 4  ;;  %s19_s18 = sshll.u32 %s328_s17, 4  ;;  %s32_s16 = int_to_ptr.vmem [resolvable:$true] %s31_s16  ;;  %s362_s18 = int_to_ptr.vmem [resolvable:$true] %s19_s18 }
   0x5   :  { %s209_s21 = scalar_lea.hbm %s450_s1, 1024 }
   0x6   :  { %p210_p0 = scmp.ne.s32.totalorder %s450_s1, %s209_s21  ;;  %p213_p1 = scmp.lt.u32.totalorder %s209_s21, %s450_s1 }
   0x8   :  { %p215_p2 = pnand %p213_p1, %p210_p0 }
   0xa   :  { %218 = shalt.err (!%p215_p2)
}
   0xb   :  { %s219_s26 = scalar_lea.vmem %s32_s16, 1024  ;;  %p224_p4 = scmp.lt.s32.totalorder %s32_s16, %s32_s16 }
   0xc   :  { %p220_p3 = scmp.ne.s32.totalorder %s32_s16, %s219_s26  ;;  %p225_p5 = scmp.lt.s32.totalorder %s219_s26, %s219_s26 }
   0xe   :  { %p226_p6 = por %p225_p5, %p224_p4 }
  0x10   :  { %p227_p7 = pnand %p226_p6, %p220_p3 }
  0x12   :  { %230 = shalt.err (!%p227_p7)
}
  0x13   :  { %s329_s27 = smov 256   ;;  %s330_s28 = smov 16  }
  0x14   :  { %37 = dma.hbm_to_vmem [thread:$0]  %s450_s1, 1024, %s32_s16, [#allocation6], %s329_s27, %s329_s27, %s330_s28  }
  0x15   :  { %s231_s7 = scalar_lea.hbm %s449_s0, 1024 }
  0x16   :  { %p232_p8 = scmp.ne.s32.totalorder %s449_s0, %s231_s7  ;;  %p235_p9 = scmp.lt.u32.totalorder %s231_s7, %s449_s0 }
  0x18   :  { %p237_p10 = pnand %p235_p9, %p232_p8 }
  0x1a   :  { %240 = shalt.err (!%p237_p10)
}
  0x1b   :  { %s241_s12 = scalar_lea.vmem %s362_s18, 1024  ;;  %p246_p12 = scmp.lt.s32.totalorder %s362_s18, %s362_s18 }
  0x1c   :  { %p242_p11 = scmp.ne.s32.totalorder %s362_s18, %s241_s12  ;;  %p247_p13 = scmp.lt.s32.totalorder %s241_s12, %s241_s12 }
  0x1e   :  { %p248_p0 = por %p247_p13, %p246_p12 }
  0x20   :  { %p249_p1 = pnand %p248_p0, %p242_p11 }
  0x22   :  { %252 = shalt.err (!%p249_p1)
}
  0x23   :  { %25 = dma.hbm_to_vmem [thread:$0]  %s449_s0, 1024, %s362_s18, [#allocation3], %s329_s27, %s329_s27, %s330_s28  }
  0x24   :  { %s331_s14 = smov [#allocation7]   ;;  %s253_s19 = scalar_lea.hbm %s451_s2, 512 }
  0x25   :  { %s43_s15 = sshll.u32 %s331_s14, 4  ;;  %p254_p2 = scmp.ne.s32.totalorder %s451_s2, %s253_s19  ;;  %s44_s15 = int_to_ptr.vmem [resolvable:$true] %s43_s15 }
  0x26   :  { %p257_p3 = scmp.lt.u32.totalorder %s253_s19, %s451_s2 }
  0x28   :  { %p259_p4 = pnand %p257_p3, %p254_p2 }
  0x2a   :  { %262 = shalt.err (!%p259_p4)
}
  0x2b   :  { %s263_s24 = scalar_lea.vmem %s44_s15, 512  ;;  %p268_p6 = scmp.lt.s32.totalorder %s44_s15, %s44_s15 }
  0x2c   :  { %p264_p5 = scmp.ne.s32.totalorder %s44_s15, %s263_s24  ;;  %p269_p7 = scmp.lt.s32.totalorder %s263_s24, %s263_s24 }
  0x2e   :  { %p270_p8 = por %p269_p7, %p268_p6 }
  0x30   :  { %p271_p9 = pnand %p270_p8, %p264_p5 }
  0x32   :  { %274 = shalt.err (!%p271_p9)
}
  0x33   :  { %s332_s0 = smov 128   ;;  %s333_s18 = smov 8  }
  0x34   :  { %49 = dma.hbm_to_vmem [thread:$0]  %s451_s2, 512, %s44_s15, [#allocation6], %s332_s0, %s332_s0, %s333_s18  }
  0x35   :  { %319 = dma.done.wait [#allocation3], 1024  }
  0x36   :  { %320 = vsyncadd [#allocation3], 4294966272 }
  0x37   :  { %321 = dma.done.wait [#allocation6], 1536  }
  0x38   :  { %322 = vsyncadd [#allocation6], 4294965760  ;;  %v66_v0 = vld [vmem:[#allocation2] sm:$0xff]  ;;  %v67_v1 = vld [vmem:[#allocation2 + $0x8] sm:$0xff]  ;;  %vm124_vm0 = vcmask 7168   ;;  %vm63_vm1 = vcmask 0  }
  0x39   :  { %v74_v2 = vld [vmem:[#allocation5] sm:$0xff]  ;;  %v75_v3 = vld [vmem:[#allocation5 + $0x8] sm:$0xff]  ;;  %v68_v10 = vld [vmem:[#allocation2 + $0x10] sm:$0xff]  ;;  %s335_s2 = smov [#allocation8]   ;;  %s336_s29 = smov [#allocation9]  }
  0x3a   :  { %v82_v4 = vsub.f32 %v66_v0, %v74_v2  ;;  %v70_v5 = vld [vmem:[#allocation2 + $0x20] sm:$0xff]  ;;  %v71_v6 = vld [vmem:[#allocation2 + $0x28] sm:$0xff]  ;;  %v83_v7 = vsub.f32 %v67_v1, %v75_v3  ;;  %v69_v14 = vld [vmem:[#allocation2 + $0x18] sm:$0xff]  ;;  %v334_v2 = vmov 0.0   ;;  %s171_s27 = sshll.u32 %s335_s2, 4  ;;  %s181_s30 = sshll.u32 %s336_s29, 4  ;;  %s172_s27 = int_to_ptr.vmem [resolvable:$true] %s171_s27  ;;  %s415_s30 = int_to_ptr.vmem [resolvable:$true] %s181_s30 }
  0x3b   :  { %v78_v8 = vld [vmem:[#allocation5 + $0x20] sm:$0xff]  ;;  %v79_v9 = vld [vmem:[#allocation5 + $0x28] sm:$0xff]  ;;  %v76_v15 = vld [vmem:[#allocation5 + $0x10] sm:$0xff]  ;;  %64 = vst.msk [vmem:[#allocation8] sm:$0x1] %vm63_vm1, %v334_v2  ;;  %s275_s6 = scalar_lea.vmem %s172_s27, 16  ;;  %p280_p11 = scmp.lt.s32.totalorder %s172_s27, %s172_s27 }
  0x3c   :  { %v90_v11 = vmul.f32 %v82_v4, %v82_v4  ;;  %v86_v12 = vsub.f32 %v70_v5, %v78_v8  ;;  %v87_v13 = vsub.f32 %v71_v6, %v79_v9  ;;  %v77_v16 = vld [vmem:[#allocation5 + $0x18] sm:$0xff]  ;;  %v91_v17 = vmul.f32 %v83_v7, %v83_v7  ;;  %v72_v20 = vld [vmem:[#allocation2 + $0x30] sm:$0xff]  ;;  %v115_v36 = vld [vmem:[#allocation7] sm:$0xff]  ;;  %65 = vst.msk [vmem:[#allocation9] sm:$0x1] %vm63_vm1, %v334_v2  ;;  %p276_p10 = scmp.ne.s32.totalorder %s172_s27, %s275_s6  ;;  %s279_s7 = scalar_lea.vmem %s172_s27, 32 }
  0x3d   :  { %v84_v18 = vsub.f32 %v68_v10, %v76_v15  ;;  %v85_v19 = vsub.f32 %v69_v14, %v77_v16  ;;  %v73_v21 = vld [vmem:[#allocation2 + $0x38] sm:$0xff]  ;;  %v80_v22 = vld [vmem:[#allocation5 + $0x30] sm:$0xff]  ;;  %v146_v37 = vsel %vm124_vm0, %v115_v36, 0.0  ;;  %v116_v38 = vld [vmem:[#allocation7 + $0x8] sm:$0xff]  ;;  %p281_p12 = scmp.lt.s32.totalorder %s279_s7, %s275_s6 }
  0x3e   :  { %v94_v23 = vmul.f32 %v86_v12, %v86_v12  ;;  %v95_v24 = vmul.f32 %v87_v13, %v87_v13  ;;  %v81_v25 = vld [vmem:[#allocation5 + $0x38] sm:$0xff]  ;;  %v88_v26 = vsub.f32 %v72_v20, %v80_v22  ;;  %v98_v27 = vadd.f32 %v91_v17, %v90_v11  ;;  %v117_v40 = vld [vmem:[#allocation7 + $0x10] sm:$0xff] }
  0x3f   :  { %v92_v28 = vmul.f32 %v84_v18, %v84_v18  ;;  %v93_v29 = vmul.f32 %v85_v19, %v85_v19  ;;  %v89_v30 = vsub.f32 %v73_v21, %v81_v25  ;;  %v147_v39 = vsel %vm124_vm0, %v116_v38, 0.0  ;;  %v118_v43 = vld [vmem:[#allocation7 + $0x18] sm:$0xff]  ;;  %p282_p13 = por %p281_p12, %p280_p11 }
  0x40   :  { %v104_v31 = vadd.f32 %v95_v24, %v94_v23  ;;  %v96_v32 = vmul.f32 %v88_v26, %v88_v26  ;;  %99 = vadd.xlane.f32.xlu0 %v98_v27  ;;  %v148_v41 = vadd.f32 %v147_v39, %v146_v37  ;;  %v149_v42 = vsel %vm124_vm0, %v117_v40, 0.0 }
  0x41   :  { %v101_v33 = vadd.f32 %v93_v29, %v92_v28  ;;  %v97_v34 = vmul.f32 %v89_v30, %v89_v30  ;;  %v151_v45 = vsel %vm124_vm0, %v118_v43, 0.0  ;;  %p283_p0 = pnand %p282_p13, %p276_p10 }
  0x42   :  { %105 = vadd.xlane.f32.xlu1 %v104_v31  ;;  %v150_v44 = vadd.f32 %v149_v42, %v148_v41  ;;  %v119_v17 = vld [vmem:[#allocation8] sm:$0x1] }
  0x43   :  { %v107_v35 = vadd.f32 %v97_v34, %v96_v32  ;;  %v145_v18 = vld [vmem:[#allocation9] sm:$0x1] }
  0x44   :  { %102 = vadd.xlane.f32.xlu0 %v101_v33  ;;  %v152_v46 = vadd.f32 %v151_v45, %v150_v44 }
  0x46   :  { %108 = vadd.xlane.f32.xlu1 %v107_v35 }
  0x4a   :  { %153 = vadd.xlane.f32.xlu1 %v152_v46 }
  0xcd   :  { %v100_v47 = vpop.xlane.xlu0 %99 }
  0xce   :  { %v111_v48 = vmul.f32 0.00390625, %v100_v47 }
  0xcf   :  { %v106_v49 = vpop.xlane.xlu1 %105 }
  0xd0   :  { %v113_v50 = vmul.f32 0.00390625, %v106_v49  ;;  %v120_v52 = vmul.f32 %v115_v36, %v111_v48 }
  0xd1   :  { %v103_v51 = vpop.xlane.xlu0 %102 }
  0xd2   :  { %v112_v53 = vmul.f32 0.00390625, %v103_v51  ;;  %v122_v56 = vmul.f32 %v117_v40, %v113_v50  ;;  %v125_v59 = vsel %vm124_vm0, %v120_v52, 0.0 }
  0xd3   :  { %v109_v54 = vpop.xlane.xlu1 %108 }
  0xd4   :  { %v114_v55 = vmul.f32 0.00390625, %v109_v54  ;;  %v121_v57 = vmul.f32 %v116_v38, %v112_v53  ;;  %v128_v62 = vsel %vm124_vm0, %v122_v56, 0.0 }
  0xd6   :  { %v123_v58 = vmul.f32 %v118_v43, %v114_v55  ;;  %v126_v60 = vsel %vm124_vm0, %v121_v57, 0.0 }
  0xd7   :  { %v127_v61 = vadd.f32 %v126_v60, %v125_v59  ;;  %v154_v3 = vpop.xlane.xlu1 %153 }
  0xd8   :  { %v130_v63 = vsel %vm124_vm0, %v123_v58, 0.0  ;;  %v155_v4 = vrot.slane %v154_v3, 4 }
  0xd9   :  { %v129_v0 = vadd.f32 %v128_v62, %v127_v61 }
  0xda   :  { %v156_v5 = vadd.f32 %v155_v4, %v154_v3 }
  0xdb   :  { %v131_v1 = vadd.f32 %v130_v63, %v129_v0 }
  0xdc   :  { %v157_v6 = vrot.slane %v156_v5, 2 }
  0xdd   :  { %132 = vadd.xlane.f32.xlu0 %v131_v1 }
  0xde   :  { %v158_v10 = vadd.f32 %v157_v6, %v156_v5 }
  0xe0   :  { %v159_v13 = vrot.slane %v158_v10, 1 }
  0xe2   :  { %v160_v16 = vadd.f32 %v159_v13, %v158_v10 }
 0x16a   :  { %v133_v7 = vpop.xlane.xlu0 %132 }
 0x16b   :  { %v134_v8 = vrot.slane %v133_v7, 4 }
 0x16d   :  { %v135_v9 = vadd.f32 %v134_v8, %v133_v7 }
 0x16f   :  { %v136_v11 = vrot.slane %v135_v9, 2 }
 0x171   :  { %v137_v12 = vadd.f32 %v136_v11, %v135_v9 }
 0x173   :  { %v138_v14 = vrot.slane %v137_v12, 1 }
 0x175   :  { %v139_v15 = vadd.f32 %v138_v14, %v137_v12 }
 0x177   :  { %195 = vpush %v139_v15 }
 0x178   :  { %197 = vpush %v160_v16 }
 0x1a8   :  { %s196_s28 = spop %195 }
 0x1a9   :  { %v141_v19 = vstv %s196_s28  ;;  %s198_s5 = spop %197 }
 0x1aa   :  { %v142_v20 = vadd.f32 %v141_v19, %v119_v17  ;;  %v162_v21 = vstv %s198_s5 }
 0x1ab   :  { %v163_v22 = vadd.f32 %v162_v21, %v145_v18 }
 0x1ac   :  { %144 = vst.msk [vmem:[#allocation8] sm:$0x1] %vm63_vm1, %v142_v20 }
 0x1ad   :  { %164 = vst.msk [vmem:[#allocation9] sm:$0x1] %vm63_vm1, %v163_v22 }
 0x1ae   :  { %286 = shalt.err (!%p283_p0)
}
 0x1af   :  { %s287_s10 = scalar_lea.hbm %s452_s3, 16 }
 0x1b0   :  { %p288_p1 = scmp.ne.s32.totalorder %s452_s3, %s287_s10  ;;  %p291_p2 = scmp.lt.u32.totalorder %s287_s10, %s452_s3 }
 0x1b2   :  { %p293_p3 = pnand %p291_p2, %p288_p1 }
 0x1b4   :  { %296 = shalt.err (!%p293_p3)
}
 0x1b5   :  { %174 = dma.vmem_to_hbm [thread:$0]  %s172_s27, 16, %s452_s3, [#allocation4]  }
 0x1b6   :  { %s297_s16 = scalar_lea.vmem %s415_s30, 16  ;;  %s301_s17 = scalar_lea.vmem %s415_s30, 32 }
 0x1b7   :  { %p298_p4 = scmp.ne.s32.totalorder %s415_s30, %s297_s16  ;;  %p302_p5 = scmp.lt.s32.totalorder %s415_s30, %s415_s30 }
 0x1b8   :  { %p303_p6 = scmp.lt.s32.totalorder %s301_s17, %s297_s16 }
 0x1ba   :  { %p304_p7 = por %p303_p6, %p302_p5 }
 0x1bc   :  { %p305_p8 = pnand %p304_p7, %p298_p4 }
 0x1be   :  { %308 = shalt.err (!%p305_p8)
}
 0x1bf   :  { %s309_s21 = scalar_lea.hbm %s453_s4, 16 }
 0x1c0   :  { %p310_p9 = scmp.ne.s32.totalorder %s453_s4, %s309_s21  ;;  %p313_p10 = scmp.lt.u32.totalorder %s309_s21, %s453_s4 }
 0x1c2   :  { %p315_p11 = pnand %p313_p10, %p310_p9 }
 0x1c4   :  { %318 = shalt.err (!%p315_p11)
}
 0x1c5   :  { %184 = dma.vmem_to_hbm [thread:$0]  %s415_s30, 16, %s453_s4, [#allocation10]  }
 0x1c6   :  { %323 = dma.done.wait [#allocation4], 16  }
 0x1c7   :  { %324 = vsyncadd [#allocation4], 4294967280 }
 0x1c8   :  { %325 = dma.done.wait [#allocation10], 16  }
 0x1c9   :  { %326 = vsyncadd [#allocation10], 4294967280 }
 0x1ca   :  { %191 = vsyncpa [#allocation3], 1 }
 0x1cb   :  { %192 = vsyncpa [#allocation6], 1 }
 0x1cc   :  { %193 = vsyncpa [#allocation4], 1 }
 0x1cd   :  { %194 = vsyncpa [#allocation10], 1 }

</bundles_post_ra>
